<compile_context>
chip_gen: v6e
topology: v6e:2x2x1
jax: 0.10.0
libtpu: 0.0.40
codegen_flags: <defaults>
</compile_context>

<pallas_src>
import functools

import jax
import jax.numpy as jnp
from jax import lax
from jax.experimental import pallas as pl
from jax.experimental.pallas import tpu as pltpu

EPS = 1e-5        # nn.BatchNorm2d default eps
LANE = 128        # TPU lane width


# ---------------------------- helpers ----------------------------

def _round_up(x, m):
    return ((x + m - 1) // m) * m


def _compiler_params():
    # 32 MiB scoped VMEM is safe on v5e/v6e and leaves headroom on v7x (64 MiB
    # physical); image-sized blocks at the demo shapes use well under 1 MiB.
    return pltpu.CompilerParams(
        dimension_semantics=("parallel",),
        vmem_limit_bytes=32 * 1024 * 1024,
    )


# ---------------------------- Pallas kernels ----------------------------

def _conv1x1_pad_kernel(x_ref, w_ref, b_ref, o_ref, *, H, W, Cp):
    # x_ref: (1, H*W, Cin) f32, w_ref: (Cin, Cp) bf16, b_ref: (1, Cp) f32.
    # o_ref: (1, H+2, W+2, Cp) bf16 zero-bordered activation (next conv's input).
    y = (jnp.dot(x_ref[0].astype(jnp.bfloat16), w_ref[...],
                 preferred_element_type=jnp.float32)
         + b_ref[...])
    o_ref[...] = jnp.zeros_like(o_ref)
    o_ref[0, 1:H + 1, 1:W + 1, :] = y.reshape(H, W, Cp).astype(jnp.bfloat16)


def _conv3x3_stats_kernel(x_ref, w_ref, y_ref, st_ref, *, H, W, Cp):
    # x_ref:  (1, H+2, W+2, Cp) bf16 zero-bordered activation (one image).
    # w_ref:  (3, 3*Cp, Cp) bf16 per-dy grouped weights (rows = dx*Cp + cin).
    # y_ref:  (1, H*W, Cp) f32 raw conv output (pre-BN).
    # st_ref: (1, 2, Cp) f32: row 0 = per-channel sum, row 1 = sum of squares.
    rows = H * W
    xb = x_ref[0]                                     # (H+2, W+2, Cp) bf16
    for dy in range(3):                               # 3 grouped K = 3*Cp matmuls
        band = xb[dy:dy + H]                          # hoisted dy slice
        xs = jnp.concatenate(
            [band[:, 0:W, :], band[:, 1:W + 1, :], band[:, 2:W + 2, :]],
            axis=-1).reshape(rows, 3 * Cp)            # (rows, 3*Cp) bf16
        d = jnp.dot(xs, w_ref[dy], preferred_element_type=jnp.float32)
        if dy == 0:                                   # accumulate in VMEM (y_ref)
            y_ref[0] = d
        else:
            y_ref[0] = y_ref[0] + d
    y = y_ref[0]
    st_ref[0] = jnp.concatenate(
        [jnp.sum(y, axis=0, keepdims=True),
         jnp.sum(y * y, axis=0, keepdims=True)], axis=0)


def _apply_kernel(y_ref, sc_ref, sh_ref, *rest, H, W, Cp, pad_out):
    # Fused BatchNorm scale/shift + ReLU + residual adds.
    # y_ref: (1, H*W, Cp) f32 raw conv output; sc/sh: (1, Cp) f32.
    # rest = (*residual_refs, out_ref); residuals are (1, H+2, W+2, Cp) bf16 padded.
    # out_ref: (1, H+2, W+2, Cp) bf16 padded (pad_out) or (1, H*W, Cp) f32 (final).
    out_ref = rest[-1]
    rows = H * W
    a = jnp.maximum(y_ref[0] * sc_ref[...] + sh_ref[...], 0.0)     # f32 math
    for r_ref in rest[:-1]:
        r = r_ref[0, 1:H + 1, 1:W + 1, :].reshape(rows, Cp).astype(jnp.float32)
        a = a + r
    if pad_out:
        out_ref[...] = jnp.zeros_like(out_ref)
        out_ref[0, 1:H + 1, 1:W + 1, :] = a.reshape(H, W, Cp).astype(out_ref.dtype)
    else:
        out_ref[0] = a.astype(out_ref.dtype)


# ---------------------------- wrappers ----------------------------

def conv1x1_pad(x_flat, w, b, H, W):
    """1x1 conv (+bias), emitted directly as a zero-bordered bf16 activation."""
    N, rows, Cin = x_flat.shape
    Cp = w.shape[1]
    kern = functools.partial(_conv1x1_pad_kernel, H=H, W=W, Cp=Cp)
    return pl.pallas_call(
        kern,
        out_shape=jax.ShapeDtypeStruct((N, H + 2, W + 2, Cp), jnp.bfloat16),
        grid=(N,),
        in_specs=[pl.BlockSpec((1, rows, Cin), lambda n: (n, 0, 0)),
                  pl.BlockSpec((Cin, Cp), lambda n: (0, 0)),
                  pl.BlockSpec((1, Cp), lambda n: (0, 0))],
        out_specs=pl.BlockSpec((1, H + 2, W + 2, Cp), lambda n: (n, 0, 0, 0)),
        compiler_params=_compiler_params(),
        cost_estimate=pl.CostEstimate(
            flops=2 * N * rows * Cin * Cp, transcendentals=0,
            bytes_accessed=4 * N * rows * Cin + 2 * N * (H + 2) * (W + 2) * Cp),
    )(x_flat, w, b)


def conv_bn_relu(x_pad, p, residuals=(), final=False):
    """Conv3x3(pad=1, bias dropped) -> BN(batch stats) -> ReLU [+ residuals].

    x_pad / residuals: (N, H+2, W+2, Cp) bf16 zero-bordered activations.
    Returns the same padded bf16 layout (next conv's input) unless final=True,
    in which case it returns the flat (N, H*W, Cp) f32 block output.
    """
    N, Hp2, Wp2, Cp = x_pad.shape
    H, W = Hp2 - 2, Wp2 - 2
    rows = H * W
    M = N * rows

    # TODO(synk): for Cout >= 512 split the output-channel dim into a second grid
    # axis so the (3, 3*Cp, Cp) weight slab stays within the v7x VMEM budget.
    conv = functools.partial(_conv3x3_stats_kernel, H=H, W=W, Cp=Cp)
    y, st = pl.pallas_call(
        conv,
        out_shape=(jax.ShapeDtypeStruct((N, rows, Cp), jnp.float32),
                   jax.ShapeDtypeStruct((N, 2, Cp), jnp.float32)),
        grid=(N,),
        in_specs=[pl.BlockSpec((1, Hp2, Wp2, Cp), lambda n: (n, 0, 0, 0)),
                  pl.BlockSpec((3, 3 * Cp, Cp), lambda n: (0, 0, 0))],
        out_specs=(pl.BlockSpec((1, rows, Cp), lambda n: (n, 0, 0)),
                   pl.BlockSpec((1, 2, Cp), lambda n: (n, 0, 0))),
        compiler_params=_compiler_params(),
        cost_estimate=pl.CostEstimate(
            flops=2 * M * 9 * Cp * Cp, transcendentals=0,
            bytes_accessed=2 * x_pad.size + 2 * p['w'].size + 4 * M * Cp),
    )(x_pad, p['w'])

    # Combine streamed BN partials into per-channel scale/shift ((1, Cp) XLA glue).
    inv_m = 1.0 / M
    mean = jnp.sum(st[:, 0, :], axis=0, keepdims=True) * inv_m
    var = jnp.maximum(jnp.sum(st[:, 1, :], axis=0, keepdims=True) * inv_m
                      - mean * mean, 0.0)                          # biased variance
    scale = p['gamma'] * lax.rsqrt(var + EPS)
    shift = p['beta'] - mean * scale

    apply = functools.partial(_apply_kernel, H=H, W=W, Cp=Cp, pad_out=not final)
    if final:
        out_shape = jax.ShapeDtypeStruct((N, rows, Cp), jnp.float32)
        out_spec = pl.BlockSpec((1, rows, Cp), lambda n: (n, 0, 0))
        io_alias = {0: 0}                      # overwrite the raw conv-output buffer
    else:
        out_shape = jax.ShapeDtypeStruct((N, Hp2, Wp2, Cp), jnp.bfloat16)
        out_spec = pl.BlockSpec((1, Hp2, Wp2, Cp), lambda n: (n, 0, 0, 0))
        io_alias = {}
    out = pl.pallas_call(
        apply,
        out_shape=out_shape,
        grid=(N,),
        in_specs=([pl.BlockSpec((1, rows, Cp), lambda n: (n, 0, 0)),
                   pl.BlockSpec((1, Cp), lambda n: (0, 0)),
                   pl.BlockSpec((1, Cp), lambda n: (0, 0))]
                  + [pl.BlockSpec((1, Hp2, Wp2, Cp), lambda n: (n, 0, 0, 0))
                     for _ in residuals]),
        out_specs=out_spec,
        compiler_params=_compiler_params(),
        input_output_aliases=io_alias,
        cost_estimate=pl.CostEstimate(
            flops=M * Cp * (3 + len(residuals)), transcendentals=0,
            bytes_accessed=4 * M * Cp + 2 * M * Cp * (2 + len(residuals))),
    )(y, scale, shift, *residuals)
    return out


# ---------------------------- module composition ----------------------------

def recurrent_block(x_pad, pf, pr, t, final=False, final_extra=()):
    # r = CBR_f(x); repeat t times: x = CBR_r(x) + r.  On the last iteration of the
    # final block the extra residual (x1) and the f32 unpadded output are fused in.
    r = conv_bn_relu(x_pad, pf)
    for i in range(t):
        last = (i == t - 1)
        extra = tuple(final_extra) if (final and last) else ()
        x_pad = conv_bn_relu(x_pad, pr, residuals=(r,) + extra,
                             final=(final and last))
    return x_pad


def rrcnn_block(x_nchw, params, t, cout):
    N, Cin, H, W = x_nchw.shape
    x_flat = jnp.transpose(x_nchw, (0, 2, 3, 1)).reshape(N, H * W, Cin)  # NCHW->NHWC
    x1_pad = conv1x1_pad(x_flat, params['w1x1'], params['b1x1'], H, W)

    if t >= 1:
        x2_pad = recurrent_block(x1_pad, params['rb1_f'], params['rb1_r'], t)
        # final "x1 + x2" fused into the last CBR of the second RecurrentBlock
        out_flat = recurrent_block(x2_pad, params['rb2_f'], params['rb2_r'], t,
                                   final=True, final_extra=(x1_pad,))
        out = out_flat.reshape(N, H, W, -1)
    else:
        # t == 0: both RecurrentBlocks are identity -> out = x1 + x1 (XLA glue).
        out = 2.0 * x1_pad[:, 1:H + 1, 1:W + 1, :].astype(jnp.float32)

    return jnp.transpose(out[..., :cout], (0, 3, 1, 2))          # NHWC -> NCHW


# ---------------------------- parameter init ----------------------------

def init_conv3x3_block(key, c, cp):
    # Conv2d(c, c, 3, padding=1) + BatchNorm2d(c) + ReLU.  Conv bias omitted:
    # training-mode BN mean subtraction cancels it exactly.
    w = jax.random.normal(key, (c, c, 3, 3), jnp.float32) * 0.1      # (Cout,Cin,kH,kW)
    w_t = jnp.transpose(w, (2, 3, 1, 0))                             # (3,3,Cin,Cout)
    w_t = jnp.pad(w_t, ((0, 0), (0, 0), (0, cp - c), (0, cp - c)))   # (3,3,Cp,Cp)
    w_g = w_t.reshape(3, 3 * cp, cp).astype(jnp.bfloat16)            # per-dy grouped
    gamma = jnp.pad(jnp.ones((1, c), jnp.float32), ((0, 0), (0, cp - c)))
    beta = jnp.zeros((1, cp), jnp.float32)
    return dict(w=w_g, gamma=gamma, beta=beta)


def init_rrcnn_params(key, cin, cout):
    cp = _round_up(cout, LANE)                  # lane-dense padded channel count
    keys = jax.random.split(key, 6)
    w1 = jax.random.normal(keys[0], (cout, cin), jnp.float32) * 0.1
    b1 = jax.random.normal(keys[1], (cout,), jnp.float32) * 0.1
    return dict(
        w1x1=jnp.pad(w1.T, ((0, 0), (0, cp - cout))).astype(jnp.bfloat16),  # (Cin,Cp)
        b1x1=jnp.pad(b1, (0, cp - cout)).reshape(1, cp),
        rb1_f=init_conv3x3_block(keys[2], cout, cp),
        rb1_r=init_conv3x3_block(keys[3], cout, cp),
        rb2_f=init_conv3x3_block(keys[4], cout, cp),
        rb2_r=init_conv3x3_block(keys[5], cout, cp),
    )


if __name__ == "__main__":
    key = jax.random.PRNGKey(0)
    kx, kp = jax.random.split(key)

    N, Cin, H, W = 2, 4, 16, 16
    Cout, t = 8, 2

    x = jax.random.normal(kx, (N, Cin, H, W), jnp.float32)   # PyTorch NCHW input
    params = init_rrcnn_params(kp, Cin, Cout)

    fwd = jax.jit(functools.partial(rrcnn_block, t=t, cout=Cout))
    out = jax.block_until_ready(fwd(x, params))

    assert out.shape == (N, Cout, H, W), out.shape
    assert bool(jnp.all(jnp.isfinite(out)))
    print("KERNEL_OK")
</pallas_src>

<mosaic_0001>
module attributes {stable_mosaic.version = 11 : i64} {
  func.func @_conv1x1_pad_kernel(%arg0: i32, %arg1: memref<1x256x4xf32, #tpu.memory_space<vmem>>, %arg2: memref<4x128xbf16, #tpu.memory_space<vmem>>, %arg3: memref<1x128xf32, #tpu.memory_space<vmem>>, %arg4: memref<1x18x18x128xbf16, #tpu.memory_space<vmem>>) attributes {dimension_semantics = [#tpu.dimension_semantics<parallel>], iteration_bounds = array<i64: 2>, scalar_prefetch = 0 : i64, scratch_operands = 0 : i64, tpu.core_type = #tpu.core_type<tc>, window_params = [{transform_indices = @transform_0, window_bounds = array<i64: 1, 256, 4>}, {pipeline_mode = #tpu.pipeline_mode<synchronous>, transform_indices = @transform_1, window_bounds = array<i64: 4, 128>}, {pipeline_mode = #tpu.pipeline_mode<synchronous>, transform_indices = @transform_2, window_bounds = array<i64: 1, 128>}, {transform_indices = @transform_3, window_bounds = array<i64: 1, 18, 18, 128>}]} {
    %c0 = arith.constant 0 : index
    %c0_0 = arith.constant 0 : index
    %c0_1 = arith.constant 0 : index
    %0 = vector.load %arg1[%c0, %c0_0, %c0_1] : memref<1x256x4xf32, #tpu.memory_space<vmem>>, vector<1x256x4xf32>
    %1 = vector.shape_cast %0 : vector<1x256x4xf32> to vector<256x4xf32>
    %2 = arith.truncf %1 : vector<256x4xf32> to vector<256x4xbf16>
    %c0_2 = arith.constant 0 : index
    %c0_3 = arith.constant 0 : index
    %3 = vector.load %arg2[%c0_2, %c0_3] : memref<4x128xbf16, #tpu.memory_space<vmem>>, vector<4x128xbf16>
    %cst = arith.constant dense<0.000000e+00> : vector<256x128xf32>
    %4 = tpu.matmul %2, %3, %cst {dimension_numbers = #tpu.dot_dimension_numbers<[1], [0], [0], [1], [0, 0, 1, 1], [], []>} : vector<256x4xbf16>, vector<4x128xbf16>, vector<256x128xf32> -> vector<256x128xf32>
    %c0_4 = arith.constant 0 : index
    %c0_5 = arith.constant 0 : index
    %5 = vector.load %arg3[%c0_4, %c0_5] : memref<1x128xf32, #tpu.memory_space<vmem>>, vector<1x128xf32>
    %6 = vector.broadcast %5 : vector<1x128xf32> to vector<256x128xf32>
    %7 = arith.addf %4, %6 : vector<256x128xf32>
    %cst_6 = arith.constant 0.000000e+00 : bf16
    %8 = vector.broadcast %cst_6 : bf16 to vector<1x18x18x128xbf16>
    %c0_7 = arith.constant 0 : index
    %c0_8 = arith.constant 0 : index
    %c0_9 = arith.constant 0 : index
    %c0_10 = arith.constant 0 : index
    %9 = vector.load %arg4[%c0_7, %c0_8, %c0_9, %c0_10] : memref<1x18x18x128xbf16, #tpu.memory_space<vmem>>, vector<1x18x18x128xbf16>
    tpu.vector_store %arg4[%c0_7, %c0_8, %c0_9, %c0_10], %8 {strides = array<i32>} : memref<1x18x18x128xbf16, #tpu.memory_space<vmem>>, vector<1x18x18x128xbf16>,
    %10 = vector.shape_cast %7 : vector<256x128xf32> to vector<16x16x128xf32>
    %11 = arith.truncf %10 : vector<16x16x128xf32> to vector<16x16x128xbf16>
    %c0_11 = arith.constant 0 : index
    %c1 = arith.constant 1 : index
    %c1_12 = arith.constant 1 : index
    %c0_13 = arith.constant 0 : index
    %12 = vector.load %arg4[%c0_11, %c1, %c1_12, %c0_13] : memref<1x18x18x128xbf16, #tpu.memory_space<vmem>>, vector<1x16x16x128xbf16>
    %13 = vector.shape_cast %12 : vector<1x16x16x128xbf16> to vector<16x16x128xbf16>
    %14 = vector.shape_cast %11 : vector<16x16x128xbf16> to vector<1x16x16x128xbf16>
    tpu.vector_store %arg4[%c0_11, %c1, %c1_12, %c0_13], %14 {strides = array<i32>} : memref<1x18x18x128xbf16, #tpu.memory_space<vmem>>, vector<1x16x16x128xbf16>,
    return
  }
  func.func @transform_0(%arg0: i32) -> (i32, i32, i32) {
    %c0_i32 = arith.constant 0 : i32
    %c0_i32_0 = arith.constant 0 : i32
    %c0_i32_1 = arith.constant 0 : i32
    return %arg0, %c0_i32, %c0_i32_0 : i32, i32, i32
  }
  func.func @transform_1(%arg0: i32) -> (i32, i32) {
    %c0_i32 = arith.constant 0 : i32
    %c0_i32_0 = arith.constant 0 : i32
    %c0_i32_1 = arith.constant 0 : i32
    return %c0_i32, %c0_i32_0 : i32, i32
  }
  func.func @transform_2(%arg0: i32) -> (i32, i32) {
    %c0_i32 = arith.constant 0 : i32
    %c0_i32_0 = arith.constant 0 : i32
    %c0_i32_1 = arith.constant 0 : i32
    return %c0_i32, %c0_i32_0 : i32, i32
  }
  func.func @transform_3(%arg0: i32) -> (i32, i32, i32, i32) {
    %c0_i32 = arith.constant 0 : i32
    %c0_i32_0 = arith.constant 0 : i32
    %c0_i32_1 = arith.constant 0 : i32
    %c0_i32_2 = arith.constant 0 : i32
    return %arg0, %c0_i32, %c0_i32_0, %c0_i32_1 : i32, i32, i32, i32
  }
}

module attributes {stable_mosaic.version = 11 : i64} {
  func.func @_conv3x3_stats_kernel(%arg0: i32, %arg1: memref<1x18x18x128xbf16, #tpu.memory_space<vmem>>, %arg2: memref<3x384x128xbf16, #tpu.memory_space<vmem>>, %arg3: memref<1x256x128xf32, #tpu.memory_space<vmem>>, %arg4: memref<1x2x128xf32, #tpu.memory_space<vmem>>) attributes {dimension_semantics = [#tpu.dimension_semantics<parallel>], iteration_bounds = array<i64: 2>, scalar_prefetch = 0 : i64, scratch_operands = 0 : i64, tpu.core_type = #tpu.core_type<tc>, window_params = [{transform_indices = @transform_0, window_bounds = array<i64: 1, 18, 18, 128>}, {pipeline_mode = #tpu.pipeline_mode<synchronous>, transform_indices = @transform_1, window_bounds = array<i64: 3, 384, 128>}, {transform_indices = @transform_2, window_bounds = array<i64: 1, 256, 128>}, {transform_indices = @transform_3, window_bounds = array<i64: 1, 2, 128>}]} {
    %c0 = arith.constant 0 : index
    %c0_0 = arith.constant 0 : index
    %c0_1 = arith.constant 0 : index
    %c0_2 = arith.constant 0 : index
    %0 = vector.load %arg1[%c0, %c0_0, %c0_1, %c0_2] : memref<1x18x18x128xbf16, #tpu.memory_space<vmem>>, vector<1x18x18x128xbf16>
    %1 = vector.shape_cast %0 : vector<1x18x18x128xbf16> to vector<18x18x128xbf16>
    %2 = vector.extract_strided_slice %1 {offsets = [0, 0, 0], sizes = [16, 18, 128], strides = [1, 1, 1]} : vector<18x18x128xbf16> to vector<16x18x128xbf16>
    %3 = vector.extract_strided_slice %2 {offsets = [0, 0, 0], sizes = [16, 16, 128], strides = [1, 1, 1]} : vector<16x18x128xbf16> to vector<16x16x128xbf16>
    %4 = vector.extract_strided_slice %2 {offsets = [0, 1, 0], sizes = [16, 16, 128], strides = [1, 1, 1]} : vector<16x18x128xbf16> to vector<16x16x128xbf16>
    %5 = vector.extract_strided_slice %2 {offsets = [0, 2, 0], sizes = [16, 16, 128], strides = [1, 1, 1]} : vector<16x18x128xbf16> to vector<16x16x128xbf16>
    %6 = tpu.concatenate %3, %4, %5 in 2 : vector<16x16x128xbf16>, vector<16x16x128xbf16>, vector<16x16x128xbf16> -> vector<16x16x384xbf16>
    %7 = vector.shape_cast %6 : vector<16x16x384xbf16> to vector<256x384xbf16>
    %c0_3 = arith.constant 0 : index
    %c0_4 = arith.constant 0 : index
    %c0_5 = arith.constant 0 : index
    %8 = vector.load %arg2[%c0_3, %c0_4, %c0_5] : memref<3x384x128xbf16, #tpu.memory_space<vmem>>, vector<1x384x128xbf16>
    %9 = vector.shape_cast %8 : vector<1x384x128xbf16> to vector<384x128xbf16>
    %cst = arith.constant dense<0.000000e+00> : vector<256x128xf32>
    %10 = tpu.matmul %7, %9, %cst {dimension_numbers = #tpu.dot_dimension_numbers<[1], [0], [0], [1], [0, 0, 1, 1], [], []>} : vector<256x384xbf16>, vector<384x128xbf16>, vector<256x128xf32> -> vector<256x128xf32>
    %c0_6 = arith.constant 0 : index
    %c0_7 = arith.constant 0 : index
    %c0_8 = arith.constant 0 : index
    %11 = vector.load %arg3[%c0_6, %c0_7, %c0_8] : memref<1x256x128xf32, #tpu.memory_space<vmem>>, vector<1x256x128xf32>
    %12 = vector.shape_cast %11 : vector<1x256x128xf32> to vector<256x128xf32>
    %13 = vector.shape_cast %10 : vector<256x128xf32> to vector<1x256x128xf32>
    tpu.vector_store %arg3[%c0_6, %c0_7, %c0_8], %13 {strides = array<i32>} : memref<1x256x128xf32, #tpu.memory_space<vmem>>, vector<1x256x128xf32>,
    %14 = vector.extract_strided_slice %1 {offsets = [1, 0, 0], sizes = [16, 18, 128], strides = [1, 1, 1]} : vector<18x18x128xbf16> to vector<16x18x128xbf16>
    %15 = vector.extract_strided_slice %14 {offsets = [0, 0, 0], sizes = [16, 16, 128], strides = [1, 1, 1]} : vector<16x18x128xbf16> to vector<16x16x128xbf16>
    %16 = vector.extract_strided_slice %14 {offsets = [0, 1, 0], sizes = [16, 16, 128], strides = [1, 1, 1]} : vector<16x18x128xbf16> to vector<16x16x128xbf16>
    %17 = vector.extract_strided_slice %14 {offsets = [0, 2, 0], sizes = [16, 16, 128], strides = [1, 1, 1]} : vector<16x18x128xbf16> to vector<16x16x128xbf16>
    %18 = tpu.concatenate %15, %16, %17 in 2 : vector<16x16x128xbf16>, vector<16x16x128xbf16>, vector<16x16x128xbf16> -> vector<16x16x384xbf16>
    %19 = vector.shape_cast %18 : vector<16x16x384xbf16> to vector<256x384xbf16>
    %c1 = arith.constant 1 : index
    %c0_9 = arith.constant 0 : index
    %c0_10 = arith.constant 0 : index
    %20 = vector.load %arg2[%c1, %c0_9, %c0_10] : memref<3x384x128xbf16, #tpu.memory_space<vmem>>, vector<1x384x128xbf16>
    %21 = vector.shape_cast %20 : vector<1x384x128xbf16> to vector<384x128xbf16>
    %cst_11 = arith.constant dense<0.000000e+00> : vector<256x128xf32>
    %22 = tpu.matmul %19, %21, %cst_11 {dimension_numbers = #tpu.dot_dimension_numbers<[1], [0], [0], [1], [0, 0, 1, 1], [], []>} : vector<256x384xbf16>, vector<384x128xbf16>, vector<256x128xf32> -> vector<256x128xf32>
    %c0_12 = arith.constant 0 : index
    %c0_13 = arith.constant 0 : index
    %c0_14 = arith.constant 0 : index
    %23 = vector.load %arg3[%c0_12, %c0_13, %c0_14] : memref<1x256x128xf32, #tpu.memory_space<vmem>>, vector<1x256x128xf32>
    %24 = vector.shape_cast %23 : vector<1x256x128xf32> to vector<256x128xf32>
    %25 = arith.addf %24, %22 : vector<256x128xf32>
    %c0_15 = arith.constant 0 : index
    %c0_16 = arith.constant 0 : index
    %c0_17 = arith.constant 0 : index
    %26 = vector.load %arg3[%c0_15, %c0_16, %c0_17] : memref<1x256x128xf32, #tpu.memory_space<vmem>>, vector<1x256x128xf32>
    %27 = vector.shape_cast %26 : vector<1x256x128xf32> to vector<256x128xf32>
    %28 = vector.shape_cast %25 : vector<256x128xf32> to vector<1x256x128xf32>
    tpu.vector_store %arg3[%c0_15, %c0_16, %c0_17], %28 {strides = array<i32>} : memref<1x256x128xf32, #tpu.memory_space<vmem>>, vector<1x256x128xf32>,
    %29 = vector.extract_strided_slice %1 {offsets = [2, 0, 0], sizes = [16, 18, 128], strides = [1, 1, 1]} : vector<18x18x128xbf16> to vector<16x18x128xbf16>
    %30 = vector.extract_strided_slice %29 {offsets = [0, 0, 0], sizes = [16, 16, 128], strides = [1, 1, 1]} : vector<16x18x128xbf16> to vector<16x16x128xbf16>
    %31 = vector.extract_strided_slice %29 {offsets = [0, 1, 0], sizes = [16, 16, 128], strides = [1, 1, 1]} : vector<16x18x128xbf16> to vector<16x16x128xbf16>
    %32 = vector.extract_strided_slice %29 {offsets = [0, 2, 0], sizes = [16, 16, 128], strides = [1, 1, 1]} : vector<16x18x128xbf16> to vector<16x16x128xbf16>
    %33 = tpu.concatenate %30, %31, %32 in 2 : vector<16x16x128xbf16>, vector<16x16x128xbf16>, vector<16x16x128xbf16> -> vector<16x16x384xbf16>
    %34 = vector.shape_cast %33 : vector<16x16x384xbf16> to vector<256x384xbf16>
    %c2 = arith.constant 2 : index
    %c0_18 = arith.constant 0 : index
    %c0_19 = arith.constant 0 : index
    %35 = vector.load %arg2[%c2, %c0_18, %c0_19] : memref<3x384x128xbf16, #tpu.memory_space<vmem>>, vector<1x384x128xbf16>
    %36 = vector.shape_cast %35 : vector<1x384x128xbf16> to vector<384x128xbf16>
    %cst_20 = arith.constant dense<0.000000e+00> : vector<256x128xf32>
    %37 = tpu.matmul %34, %36, %cst_20 {dimension_numbers = #tpu.dot_dimension_numbers<[1], [0], [0], [1], [0, 0, 1, 1], [], []>} : vector<256x384xbf16>, vector<384x128xbf16>, vector<256x128xf32> -> vector<256x128xf32>
    %c0_21 = arith.constant 0 : index
    %c0_22 = arith.constant 0 : index
    %c0_23 = arith.constant 0 : index
    %38 = vector.load %arg3[%c0_21, %c0_22, %c0_23] : memref<1x256x128xf32, #tpu.memory_space<vmem>>, vector<1x256x128xf32>
    %39 = vector.shape_cast %38 : vector<1x256x128xf32> to vector<256x128xf32>
    %40 = arith.addf %39, %37 : vector<256x128xf32>
    %c0_24 = arith.constant 0 : index
    %c0_25 = arith.constant 0 : index
    %c0_26 = arith.constant 0 : index
    %41 = vector.load %arg3[%c0_24, %c0_25, %c0_26] : memref<1x256x128xf32, #tpu.memory_space<vmem>>, vector<1x256x128xf32>
    %42 = vector.shape_cast %41 : vector<1x256x128xf32> to vector<256x128xf32>
    %43 = vector.shape_cast %40 : vector<256x128xf32> to vector<1x256x128xf32>
    tpu.vector_store %arg3[%c0_24, %c0_25, %c0_26], %43 {strides = array<i32>} : memref<1x256x128xf32, #tpu.memory_space<vmem>>, vector<1x256x128xf32>,
    %c0_27 = arith.constant 0 : index
    %c0_28 = arith.constant 0 : index
    %c0_29 = arith.constant 0 : index
    %44 = vector.load %arg3[%c0_27, %c0_28, %c0_29] : memref<1x256x128xf32, #tpu.memory_space<vmem>>, vector<1x256x128xf32>
    %45 = vector.shape_cast %44 : vector<1x256x128xf32> to vector<256x128xf32>
    %cst_30 = arith.constant dense<0.000000e+00> : vector<128xf32>
    %46 = vector.multi_reduction <add>, %45, %cst_30 [0] : vector<256x128xf32> to vector<128xf32>
    %47 = vector.shape_cast %46 : vector<128xf32> to vector<1x128xf32>
    %48 = arith.mulf %45, %45 : vector<256x128xf32>
    %cst_31 = arith.constant dense<0.000000e+00> : vector<128xf32>
    %49 = vector.multi_reduction <add>, %48, %cst_31 [0] : vector<256x128xf32> to vector<128xf32>
    %50 = vector.shape_cast %49 : vector<128xf32> to vector<1x128xf32>
    %51 = tpu.concatenate %47, %50 in 0 : vector<1x128xf32>, vector<1x128xf32> -> vector<2x128xf32>
    %c0_32 = arith.constant 0 : index
    %c0_33 = arith.constant 0 : index
    %c0_34 = arith.constant 0 : index
    %52 = vector.load %arg4[%c0_32, %c0_33, %c0_34] : memref<1x2x128xf32, #tpu.memory_space<vmem>>, vector<1x2x128xf32>
    %53 = vector.shape_cast %52 : vector<1x2x128xf32> to vector<2x128xf32>
    %54 = vector.shape_cast %51 : vector<2x128xf32> to vector<1x2x128xf32>
    tpu.vector_store %arg4[%c0_32, %c0_33, %c0_34], %54 {strides = array<i32>} : memref<1x2x128xf32, #tpu.memory_space<vmem>>, vector<1x2x128xf32>,
    return
  }
  func.func @transform_0(%arg0: i32) -> (i32, i32, i32, i32) {
    %c0_i32 = arith.constant 0 : i32
    %c0_i32_0 = arith.constant 0 : i32
    %c0_i32_1 = arith.constant 0 : i32
    %c0_i32_2 = arith.constant 0 : i32
    return %arg0, %c0_i32, %c0_i32_0, %c0_i32_1 : i32, i32, i32, i32
  }
  func.func @transform_1(%arg0: i32) -> (i32, i32, i32) {
    %c0_i32 = arith.constant 0 : i32
    %c0_i32_0 = arith.constant 0 : i32
    %c0_i32_1 = arith.constant 0 : i32
    %c0_i32_2 = arith.constant 0 : i32
    return %c0_i32, %c0_i32_0, %c0_i32_1 : i32, i32, i32
  }
  func.func @transform_2(%arg0: i32) -> (i32, i32, i32) {
    %c0_i32 = arith.constant 0 : i32
    %c0_i32_0 = arith.constant 0 : i32
    %c0_i32_1 = arith.constant 0 : i32
    return %arg0, %c0_i32, %c0_i32_0 : i32, i32, i32
  }
  func.func @transform_3(%arg0: i32) -> (i32, i32, i32) {
    %c0_i32 = arith.constant 0 : i32
    %c0_i32_0 = arith.constant 0 : i32
    %c0_i32_1 = arith.constant 0 : i32
    return %arg0, %c0_i32, %c0_i32_0 : i32, i32, i32
  }
}

module attributes {stable_mosaic.version = 11 : i64} {
  func.func @_apply_kernel(%arg0: i32, %arg1: memref<1x256x128xf32, #tpu.memory_space<vmem>>, %arg2: memref<1x128xf32, #tpu.memory_space<vmem>>, %arg3: memref<1x128xf32, #tpu.memory_space<vmem>>, %arg4: memref<1x18x18x128xbf16, #tpu.memory_space<vmem>>) attributes {dimension_semantics = [#tpu.dimension_semantics<parallel>], iteration_bounds = array<i64: 2>, scalar_prefetch = 0 : i64, scratch_operands = 0 : i64, tpu.core_type = #tpu.core_type<tc>, window_params = [{transform_indices = @transform_0, window_bounds = array<i64: 1, 256, 128>}, {pipeline_mode = #tpu.pipeline_mode<synchronous>, transform_indices = @transform_1, window_bounds = array<i64: 1, 128>}, {pipeline_mode = #tpu.pipeline_mode<synchronous>, transform_indices = @transform_2, window_bounds = array<i64: 1, 128>}, {transform_indices = @transform_3, window_bounds = array<i64: 1, 18, 18, 128>}]} {
    %c0 = arith.constant 0 : index
    %c0_0 = arith.constant 0 : index
    %c0_1 = arith.constant 0 : index
    %0 = vector.load %arg1[%c0, %c0_0, %c0_1] : memref<1x256x128xf32, #tpu.memory_space<vmem>>, vector<1x256x128xf32>
    %1 = vector.shape_cast %0 : vector<1x256x128xf32> to vector<256x128xf32>
    %c0_2 = arith.constant 0 : index
    %c0_3 = arith.constant 0 : index
    %2 = vector.load %arg2[%c0_2, %c0_3] : memref<1x128xf32, #tpu.memory_space<vmem>>, vector<1x128xf32>
    %3 = vector.broadcast %2 : vector<1x128xf32> to vector<256x128xf32>
    %4 = arith.mulf %1, %3 : vector<256x128xf32>
    %c0_4 = arith.constant 0 : index
    %c0_5 = arith.constant 0 : index
    %5 = vector.load %arg3[%c0_4, %c0_5] : memref<1x128xf32, #tpu.memory_space<vmem>>, vector<1x128xf32>
    %6 = vector.broadcast %5 : vector<1x128xf32> to vector<256x128xf32>
    %7 = arith.addf %4, %6 : vector<256x128xf32>
    %cst = arith.constant 0.000000e+00 : f32
    %8 = vector.broadcast %cst : f32 to vector<256x128xf32>
    %9 = arith.maximumf %7, %8 : vector<256x128xf32>
    %cst_6 = arith.constant 0.000000e+00 : bf16
    %10 = vector.broadcast %cst_6 : bf16 to vector<1x18x18x128xbf16>
    %c0_7 = arith.constant 0 : index
    %c0_8 = arith.constant 0 : index
    %c0_9 = arith.constant 0 : index
    %c0_10 = arith.constant 0 : index
    %11 = vector.load %arg4[%c0_7, %c0_8, %c0_9, %c0_10] : memref<1x18x18x128xbf16, #tpu.memory_space<vmem>>, vector<1x18x18x128xbf16>
    tpu.vector_store %arg4[%c0_7, %c0_8, %c0_9, %c0_10], %10 {strides = array<i32>} : memref<1x18x18x128xbf16, #tpu.memory_space<vmem>>, vector<1x18x18x128xbf16>,
    %12 = vector.shape_cast %9 : vector<256x128xf32> to vector<16x16x128xf32>
    %13 = arith.truncf %12 : vector<16x16x128xf32> to vector<16x16x128xbf16>
    %c0_11 = arith.constant 0 : index
    %c1 = arith.constant 1 : index
    %c1_12 = arith.constant 1 : index
    %c0_13 = arith.constant 0 : index
    %14 = vector.load %arg4[%c0_11, %c1, %c1_12, %c0_13] : memref<1x18x18x128xbf16, #tpu.memory_space<vmem>>, vector<1x16x16x128xbf16>
    %15 = vector.shape_cast %14 : vector<1x16x16x128xbf16> to vector<16x16x128xbf16>
    %16 = vector.shape_cast %13 : vector<16x16x128xbf16> to vector<1x16x16x128xbf16>
    tpu.vector_store %arg4[%c0_11, %c1, %c1_12, %c0_13], %16 {strides = array<i32>} : memref<1x18x18x128xbf16, #tpu.memory_space<vmem>>, vector<1x16x16x128xbf16>,
    return
  }
  func.func @transform_0(%arg0: i32) -> (i32, i32, i32) {
    %c0_i32 = arith.constant 0 : i32
    %c0_i32_0 = arith.constant 0 : i32
    %c0_i32_1 = arith.constant 0 : i32
    return %arg0, %c0_i32, %c0_i32_0 : i32, i32, i32
  }
  func.func @transform_1(%arg0: i32) -> (i32, i32) {
    %c0_i32 = arith.constant 0 : i32
    %c0_i32_0 = arith.constant 0 : i32
    %c0_i32_1 = arith.constant 0 : i32
    return %c0_i32, %c0_i32_0 : i32, i32
  }
  func.func @transform_2(%arg0: i32) -> (i32, i32) {
    %c0_i32 = arith.constant 0 : i32
    %c0_i32_0 = arith.constant 0 : i32
    %c0_i32_1 = arith.constant 0 : i32
    return %c0_i32, %c0_i32_0 : i32, i32
  }
  func.func @transform_3(%arg0: i32) -> (i32, i32, i32, i32) {
    %c0_i32 = arith.constant 0 : i32
    %c0_i32_0 = arith.constant 0 : i32
    %c0_i32_1 = arith.constant 0 : i32
    %c0_i32_2 = arith.constant 0 : i32
    return %arg0, %c0_i32, %c0_i32_0, %c0_i32_1 : i32, i32, i32, i32
  }
}

module attributes {stable_mosaic.version = 11 : i64} {
  func.func @_apply_kernel(%arg0: i32, %arg1: memref<1x256x128xf32, #tpu.memory_space<vmem>>, %arg2: memref<1x128xf32, #tpu.memory_space<vmem>>, %arg3: memref<1x128xf32, #tpu.memory_space<vmem>>, %arg4: memref<1x18x18x128xbf16, #tpu.memory_space<vmem>>, %arg5: memref<1x18x18x128xbf16, #tpu.memory_space<vmem>>) attributes {dimension_semantics = [#tpu.dimension_semantics<parallel>], iteration_bounds = array<i64: 2>, scalar_prefetch = 0 : i64, scratch_operands = 0 : i64, tpu.core_type = #tpu.core_type<tc>, window_params = [{transform_indices = @transform_0, window_bounds = array<i64: 1, 256, 128>}, {pipeline_mode = #tpu.pipeline_mode<synchronous>, transform_indices = @transform_1, window_bounds = array<i64: 1, 128>}, {pipeline_mode = #tpu.pipeline_mode<synchronous>, transform_indices = @transform_2, window_bounds = array<i64: 1, 128>}, {transform_indices = @transform_3, window_bounds = array<i64: 1, 18, 18, 128>}, {transform_indices = @transform_4, window_bounds = array<i64: 1, 18, 18, 128>}]} {
    %c0 = arith.constant 0 : index
    %c0_0 = arith.constant 0 : index
    %c0_1 = arith.constant 0 : index
    %0 = vector.load %arg1[%c0, %c0_0, %c0_1] : memref<1x256x128xf32, #tpu.memory_space<vmem>>, vector<1x256x128xf32>
    %1 = vector.shape_cast %0 : vector<1x256x128xf32> to vector<256x128xf32>
    %c0_2 = arith.constant 0 : index
    %c0_3 = arith.constant 0 : index
    %2 = vector.load %arg2[%c0_2, %c0_3] : memref<1x128xf32, #tpu.memory_space<vmem>>, vector<1x128xf32>
    %3 = vector.broadcast %2 : vector<1x128xf32> to vector<256x128xf32>
    %4 = arith.mulf %1, %3 : vector<256x128xf32>
    %c0_4 = arith.constant 0 : index
    %c0_5 = arith.constant 0 : index
    %5 = vector.load %arg3[%c0_4, %c0_5] : memref<1x128xf32, #tpu.memory_space<vmem>>, vector<1x128xf32>
    %6 = vector.broadcast %5 : vector<1x128xf32> to vector<256x128xf32>
    %7 = arith.addf %4, %6 : vector<256x128xf32>
    %cst = arith.constant 0.000000e+00 : f32
    %8 = vector.broadcast %cst : f32 to vector<256x128xf32>
    %9 = arith.maximumf %7, %8 : vector<256x128xf32>
    %c0_6 = arith.constant 0 : index
    %c1 = arith.constant 1 : index
    %c1_7 = arith.constant 1 : index
    %c0_8 = arith.constant 0 : index
    %10 = vector.load %arg4[%c0_6, %c1, %c1_7, %c0_8] : memref<1x18x18x128xbf16, #tpu.memory_space<vmem>>, vector<1x16x16x128xbf16>
    %11 = vector.shape_cast %10 : vector<1x16x16x128xbf16> to vector<16x16x128xbf16>
    %12 = vector.shape_cast %11 : vector<16x16x128xbf16> to vector<256x128xbf16>
    %13 = arith.extf %12 : vector<256x128xbf16> to vector<256x128xf32>
    %14 = arith.addf %9, %13 : vector<256x128xf32>
    %cst_9 = arith.constant 0.000000e+00 : bf16
    %15 = vector.broadcast %cst_9 : bf16 to vector<1x18x18x128xbf16>
    %c0_10 = arith.constant 0 : index
    %c0_11 = arith.constant 0 : index
    %c0_12 = arith.constant 0 : index
    %c0_13 = arith.constant 0 : index
    %16 = vector.load %arg5[%c0_10, %c0_11, %c0_12, %c0_13] : memref<1x18x18x128xbf16, #tpu.memory_space<vmem>>, vector<1x18x18x128xbf16>
    tpu.vector_store %arg5[%c0_10, %c0_11, %c0_12, %c0_13], %15 {strides = array<i32>} : memref<1x18x18x128xbf16, #tpu.memory_space<vmem>>, vector<1x18x18x128xbf16>,
    %17 = vector.shape_cast %14 : vector<256x128xf32> to vector<16x16x128xf32>
    %18 = arith.truncf %17 : vector<16x16x128xf32> to vector<16x16x128xbf16>
    %c0_14 = arith.constant 0 : index
    %c1_15 = arith.constant 1 : index
    %c1_16 = arith.constant 1 : index
    %c0_17 = arith.constant 0 : index
    %19 = vector.load %arg5[%c0_14, %c1_15, %c1_16, %c0_17] : memref<1x18x18x128xbf16, #tpu.memory_space<vmem>>, vector<1x16x16x128xbf16>
    %20 = vector.shape_cast %19 : vector<1x16x16x128xbf16> to vector<16x16x128xbf16>
    %21 = vector.shape_cast %18 : vector<16x16x128xbf16> to vector<1x16x16x128xbf16>
    tpu.vector_store %arg5[%c0_14, %c1_15, %c1_16, %c0_17], %21 {strides = array<i32>} : memref<1x18x18x128xbf16, #tpu.memory_space<vmem>>, vector<1x16x16x128xbf16>,
    return
  }
  func.func @transform_0(%arg0: i32) -> (i32, i32, i32) {
    %c0_i32 = arith.constant 0 : i32
    %c0_i32_0 = arith.constant 0 : i32
    %c0_i32_1 = arith.constant 0 : i32
    return %arg0, %c0_i32, %c0_i32_0 : i32, i32, i32
  }
  func.func @transform_1(%arg0: i32) -> (i32, i32) {
    %c0_i32 = arith.constant 0 : i32
    %c0_i32_0 = arith.constant 0 : i32
    %c0_i32_1 = arith.constant 0 : i32
    return %c0_i32, %c0_i32_0 : i32, i32
  }
  func.func @transform_2(%arg0: i32) -> (i32, i32) {
    %c0_i32 = arith.constant 0 : i32
    %c0_i32_0 = arith.constant 0 : i32
    %c0_i32_1 = arith.constant 0 : i32
    return %c0_i32, %c0_i32_0 : i32, i32
  }
  func.func @transform_3(%arg0: i32) -> (i32, i32, i32, i32) {
    %c0_i32 = arith.constant 0 : i32
    %c0_i32_0 = arith.constant 0 : i32
    %c0_i32_1 = arith.constant 0 : i32
    %c0_i32_2 = arith.constant 0 : i32
    return %arg0, %c0_i32, %c0_i32_0, %c0_i32_1 : i32, i32, i32, i32
  }
  func.func @transform_4(%arg0: i32) -> (i32, i32, i32, i32) {
    %c0_i32 = arith.constant 0 : i32
    %c0_i32_0 = arith.constant 0 : i32
    %c0_i32_1 = arith.constant 0 : i32
    %c0_i32_2 = arith.constant 0 : i32
    return %arg0, %c0_i32, %c0_i32_0, %c0_i32_1 : i32, i32, i32, i32
  }
}

module attributes {stable_mosaic.version = 11 : i64} {
  func.func @_apply_kernel(%arg0: i32, %arg1: memref<1x256x128xf32, #tpu.memory_space<vmem>>, %arg2: memref<1x128xf32, #tpu.memory_space<vmem>>, %arg3: memref<1x128xf32, #tpu.memory_space<vmem>>, %arg4: memref<1x18x18x128xbf16, #tpu.memory_space<vmem>>, %arg5: memref<1x18x18x128xbf16, #tpu.memory_space<vmem>>, %arg6: memref<1x256x128xf32, #tpu.memory_space<vmem>>) attributes {dimension_semantics = [#tpu.dimension_semantics<parallel>], iteration_bounds = array<i64: 2>, scalar_prefetch = 0 : i64, scratch_operands = 0 : i64, tpu.core_type = #tpu.core_type<tc>, window_params = [{transform_indices = @transform_0, window_bounds = array<i64: 1, 256, 128>}, {pipeline_mode = #tpu.pipeline_mode<synchronous>, transform_indices = @transform_1, window_bounds = array<i64: 1, 128>}, {pipeline_mode = #tpu.pipeline_mode<synchronous>, transform_indices = @transform_2, window_bounds = array<i64: 1, 128>}, {transform_indices = @transform_3, window_bounds = array<i64: 1, 18, 18, 128>}, {transform_indices = @transform_4, window_bounds = array<i64: 1, 18, 18, 128>}, {transform_indices = @transform_5, window_bounds = array<i64: 1, 256, 128>}]} {
    %c0 = arith.constant 0 : index
    %c0_0 = arith.constant 0 : index
    %c0_1 = arith.constant 0 : index
    %0 = vector.load %arg1[%c0, %c0_0, %c0_1] : memref<1x256x128xf32, #tpu.memory_space<vmem>>, vector<1x256x128xf32>
    %1 = vector.shape_cast %0 : vector<1x256x128xf32> to vector<256x128xf32>
    %c0_2 = arith.constant 0 : index
    %c0_3 = arith.constant 0 : index
    %2 = vector.load %arg2[%c0_2, %c0_3] : memref<1x128xf32, #tpu.memory_space<vmem>>, vector<1x128xf32>
    %3 = vector.broadcast %2 : vector<1x128xf32> to vector<256x128xf32>
    %4 = arith.mulf %1, %3 : vector<256x128xf32>
    %c0_4 = arith.constant 0 : index
    %c0_5 = arith.constant 0 : index
    %5 = vector.load %arg3[%c0_4, %c0_5] : memref<1x128xf32, #tpu.memory_space<vmem>>, vector<1x128xf32>
    %6 = vector.broadcast %5 : vector<1x128xf32> to vector<256x128xf32>
    %7 = arith.addf %4, %6 : vector<256x128xf32>
    %cst = arith.constant 0.000000e+00 : f32
    %8 = vector.broadcast %cst : f32 to vector<256x128xf32>
    %9 = arith.maximumf %7, %8 : vector<256x128xf32>
    %c0_6 = arith.constant 0 : index
    %c1 = arith.constant 1 : index
    %c1_7 = arith.constant 1 : index
    %c0_8 = arith.constant 0 : index
    %10 = vector.load %arg4[%c0_6, %c1, %c1_7, %c0_8] : memref<1x18x18x128xbf16, #tpu.memory_space<vmem>>, vector<1x16x16x128xbf16>
    %11 = vector.shape_cast %10 : vector<1x16x16x128xbf16> to vector<16x16x128xbf16>
    %12 = vector.shape_cast %11 : vector<16x16x128xbf16> to vector<256x128xbf16>
    %13 = arith.extf %12 : vector<256x128xbf16> to vector<256x128xf32>
    %14 = arith.addf %9, %13 : vector<256x128xf32>
    %c0_9 = arith.constant 0 : index
    %c1_10 = arith.constant 1 : index
    %c1_11 = arith.constant 1 : index
    %c0_12 = arith.constant 0 : index
    %15 = vector.load %arg5[%c0_9, %c1_10, %c1_11, %c0_12] : memref<1x18x18x128xbf16, #tpu.memory_space<vmem>>, vector<1x16x16x128xbf16>
    %16 = vector.shape_cast %15 : vector<1x16x16x128xbf16> to vector<16x16x128xbf16>
    %17 = vector.shape_cast %16 : vector<16x16x128xbf16> to vector<256x128xbf16>
    %18 = arith.extf %17 : vector<256x128xbf16> to vector<256x128xf32>
    %19 = arith.addf %14, %18 : vector<256x128xf32>
    %c0_13 = arith.constant 0 : index
    %c0_14 = arith.constant 0 : index
    %c0_15 = arith.constant 0 : index
    %20 = vector.load %arg6[%c0_13, %c0_14, %c0_15] : memref<1x256x128xf32, #tpu.memory_space<vmem>>, vector<1x256x128xf32>
    %21 = vector.shape_cast %20 : vector<1x256x128xf32> to vector<256x128xf32>
    %22 = vector.shape_cast %19 : vector<256x128xf32> to vector<1x256x128xf32>
    tpu.vector_store %arg6[%c0_13, %c0_14, %c0_15], %22 {strides = array<i32>} : memref<1x256x128xf32, #tpu.memory_space<vmem>>, vector<1x256x128xf32>,
    return
  }
  func.func @transform_0(%arg0: i32) -> (i32, i32, i32) {
    %c0_i32 = arith.constant 0 : i32
    %c0_i32_0 = arith.constant 0 : i32
    %c0_i32_1 = arith.constant 0 : i32
    return %arg0, %c0_i32, %c0_i32_0 : i32, i32, i32
  }
  func.func @transform_1(%arg0: i32) -> (i32, i32) {
    %c0_i32 = arith.constant 0 : i32
    %c0_i32_0 = arith.constant 0 : i32
    %c0_i32_1 = arith.constant 0 : i32
    return %c0_i32, %c0_i32_0 : i32, i32
  }
  func.func @transform_2(%arg0: i32) -> (i32, i32) {
    %c0_i32 = arith.constant 0 : i32
    %c0_i32_0 = arith.constant 0 : i32
    %c0_i32_1 = arith.constant 0 : i32
    return %c0_i32, %c0_i32_0 : i32, i32
  }
  func.func @transform_3(%arg0: i32) -> (i32, i32, i32, i32) {
    %c0_i32 = arith.constant 0 : i32
    %c0_i32_0 = arith.constant 0 : i32
    %c0_i32_1 = arith.constant 0 : i32
    %c0_i32_2 = arith.constant 0 : i32
    return %arg0, %c0_i32, %c0_i32_0, %c0_i32_1 : i32, i32, i32, i32
  }
  func.func @transform_4(%arg0: i32) -> (i32, i32, i32, i32) {
    %c0_i32 = arith.constant 0 : i32
    %c0_i32_0 = arith.constant 0 : i32
    %c0_i32_1 = arith.constant 0 : i32
    %c0_i32_2 = arith.constant 0 : i32
    return %arg0, %c0_i32, %c0_i32_0, %c0_i32_1 : i32, i32, i32, i32
  }
  func.func @transform_5(%arg0: i32) -> (i32, i32, i32) {
    %c0_i32 = arith.constant 0 : i32
    %c0_i32_0 = arith.constant 0 : i32
    %c0_i32_1 = arith.constant 0 : i32
    return %arg0, %c0_i32, %c0_i32_0 : i32, i32, i32
  }
}

</mosaic_0001>

<bundles_post_ra>
// kernel: rrcnn_block.15
= control target key start
LH: loop header
LB: loop body
LE: loop exit
PB: predicated region body
PF: predicated region fallthrough
CT: control target
= control target key end

     0   :  { %s1156_s12 = smov 0   ;;  %s1537_s0 = inlined_call_operand.vmem [shape: f32[2,256,128], index: 0, kind: input, shape index: {}]   ;;  %s1538_s1 = inlined_call_operand.vmem [shape: f32[1,128], index: 1, kind: input, shape index: {}]   ;;  %s1539_s2 = inlined_call_operand.vmem [shape: f32[1,128], index: 2, kind: input, shape index: {}]   ;;  %s1540_s3 = inlined_call_operand.vmem [shape: bf16[2,18,18,128], index: 3, kind: output, shape index: {}]  }
   0x1 LB: > { %s960_s13 = sadd.s32 4294967295, %s1133_s12   ;;  %p964_p0 = scmp.ge.s32.totalorder %s1133_s12, 1  ;;  %s1133_s12 = sphi %s1156_s12, %s13_s12  }
   0x2   : > { %p137_p1 = scmp.lt.s32.totalorder %s1133_s12, 3 }
   0x4   : > { %p138_p2 = pnand %p964_p0, %p137_p1 }
   0x5   : > { %p161_p3 = scmp.lt.s32.totalorder (!%p138_p2), %s960_s13, 1 }
   0x6   : > { %141 = sbr.rel (%p138_p2) target bundleno = 115 (0x73), region = 32 }
   0xb   : > { %s1548_s13 = smov (!%p161_p3, %s960_s13), 1  ;;  %v1167_v0 = vld [vmem:[%s1538_s1] ss:$0 sm:$0xff]  ;;  %vm789_vm0 = vsmask.f32 7938  ;;  %vm788_vm1 = vcmask 1043456  }
   0xc   : > { %s1117_s14 = smul.u32 216, %s1548_s13  ;;  %s1084_s15 = sshll.u32 %s1548_s13, 8  ;;  %v1177_v1 = vld [vmem:[%s1539_s2] ss:$0 sm:$0xff]  ;;  %vm464_vm2 = vsmask.f32 256  ;;  %vm1271_vm5 = vmand %vm788_vm1, %vm789_vm0 }
   0xd   : > { %s1172_s20 = scalar_lea.vmem %s1537_s0, %s1084_s15  ;;  %v1135_v5 = vmov 0   ;;  %vm795_vm3 = vcmask 1040384   ;;  %vm465_vm4 = vsmask.f32 4368 }
   0xe   : > { %s1182_s25 = scalar_lea.vmem %s1540_s3, %s1117_s14  ;;  %v172_v2 = vld [vmem:[%s1172_s20] sm:$0xff]  ;;  %v173_v3 = vld [vmem:[%s1172_s20 + $0x8] sm:$0xff]  ;;  %v174_v4 = vld [vmem:[%s1172_s20 + $0x10] sm:$0xff] }
   0xf   : > { %317 = vst [vmem:[%s1182_s25 + $0xc] sm:$0xf] %v1135_v5  ;;  %314 = vst [vmem:[%s1182_s25] sm:$0xf] %v1135_v5  ;;  %v211_v6 = vmul.f32 %v1167_v0, %v172_v2  ;;  %v212_v7 = vmul.f32 %v1167_v0, %v173_v3  ;;  %v213_v8 = vmul.f32 %v1167_v0, %v174_v4  ;;  %v175_v9 = vld [vmem:[%s1172_s20 + $0x18] sm:$0xff]  ;;  %v176_v10 = vld [vmem:[%s1172_s20 + $0x20] sm:$0xff] }
  0x10   : > { %315 = vst [vmem:[%s1182_s25 + $0x4] sm:$0xf] %v1135_v5  ;;  %316 = vst [vmem:[%s1182_s25 + $0x8] sm:$0x1] %v1135_v5  ;;  %v177_v11 = vld [vmem:[%s1172_s20 + $0x28] sm:$0xff]  ;;  %v214_v12 = vmul.f32 %v1167_v0, %v175_v9  ;;  %v215_v13 = vmul.f32 %v1167_v0, %v176_v10  ;;  %v178_v15 = vld [vmem:[%s1172_s20 + $0x30] sm:$0xff] }
  0x11   : > { %318 = vst [vmem:[%s1182_s25 + $0x10] sm:$0xf] %v1135_v5  ;;  %319 = vst [vmem:[%s1182_s25 + $0x14] sm:$0x1] %v1135_v5  ;;  %v216_v14 = vmul.f32 %v1167_v0, %v177_v11  ;;  %v179_v16 = vld [vmem:[%s1172_s20 + $0x38] sm:$0xff]  ;;  %v250_v17 = vadd.f32 %v1177_v1, %v211_v6  ;;  %v251_v18 = vadd.f32 %v1177_v1, %v212_v7  ;;  %v180_v29 = vld [vmem:[%s1172_s20 + $0x40] sm:$0xff] }
  0x12   : > { %320 = vst [vmem:[%s1182_s25 + $0x18] sm:$0xf] %v1135_v5  ;;  %321 = vst [vmem:[%s1182_s25 + $0x1c] sm:$0xf] %v1135_v5  ;;  %v252_v19 = vadd.f32 %v1177_v1, %v213_v8  ;;  %v217_v20 = vmul.f32 %v1167_v0, %v178_v15  ;;  %v253_v21 = vadd.f32 %v1177_v1, %v214_v12  ;;  %v181_v15 = vld [vmem:[%s1172_s20 + $0x48] sm:$0xff] }
  0x13   : > { %322 = vst [vmem:[%s1182_s25 + $0x20] sm:$0x1] %v1135_v5  ;;  %323 = vst [vmem:[%s1182_s25 + $0x24] sm:$0xf] %v1135_v5  ;;  %v254_v22 = vadd.f32 %v1177_v1, %v215_v13  ;;  %v255_v23 = vadd.f32 %v1177_v1, %v216_v14  ;;  %v218_v24 = vmul.f32 %v1167_v0, %v179_v16  ;;  %v282_v25 = vmax.f32 %v250_v17, 0.0 }
  0x14   : > { %324 = vst [vmem:[%s1182_s25 + $0x28] sm:$0xf] %v1135_v5  ;;  %325 = vst [vmem:[%s1182_s25 + $0x2c] sm:$0x1] %v1135_v5  ;;  %v283_v26 = vmax.f32 %v251_v18, 0.0  ;;  %v284_v27 = vmax.f32 %v252_v19, 0.0  ;;  %v1261_v28 = vadd.f32 %v1177_v1, %v217_v20  ;;  %v219_v41 = vmul.f32 %v1167_v0, %v180_v29 }
  0x15   : > { %326 = vst [vmem:[%s1182_s25 + $0x30] sm:$0xf] %v1135_v5  ;;  %327 = vst [vmem:[%s1182_s25 + $0x34] sm:$0xf] %v1135_v5  ;;  %v285_v30 = vmax.f32 %v253_v21, 0.0  ;;  %v286_v31 = vmax.f32 %v254_v22, 0.0  ;;  %v1265_v33 = vadd.f32 %v1177_v1, %v218_v24  ;;  %v1085_v34 = vpack.c.bf16 %v282_v25, %v282_v25 }
  0x16   : > { %328 = vst [vmem:[%s1182_s25 + $0x38] sm:$0x1] %v1135_v5  ;;  %329 = vst [vmem:[%s1182_s25 + $0x3c] sm:$0xf] %v1135_v5  ;;  %v287_v32 = vmax.f32 %v255_v23, 0.0  ;;  %v1086_v35 = vpack.c.bf16 %v283_v26, %v283_v26  ;;  %v1087_v36 = vpack.c.bf16 %v284_v27, %v284_v27  ;;  %v288_v37 = vmax.f32 %v1261_v28, 0.0 }
  0x17   : > { %330 = vst [vmem:[%s1182_s25 + $0x40] sm:$0xf] %v1135_v5  ;;  %331 = vst [vmem:[%s1182_s25 + $0x44] sm:$0x1] %v1135_v5  ;;  %v1088_v38 = vpack.c.bf16 %v285_v30, %v285_v30  ;;  %v1089_v39 = vpack.c.bf16 %v286_v31, %v286_v31  ;;  %v468_v42 = vshrl.u32 %v1085_v34, 16  ;;  %v471_v43 = vshll.u32 %v1085_v34, 16 }
  0x18   : > { %332 = vst [vmem:[%s1182_s25 + $0x48] sm:$0xf] %v1135_v5  ;;  %333 = vst [vmem:[%s1182_s25 + $0x4c] sm:$0xf] %v1135_v5  ;;  %v1090_v40 = vpack.c.bf16 %v287_v32, %v287_v32  ;;  %v476_v44 = vshrl.u32 %v1086_v35, 16  ;;  %v479_v45 = vshll.u32 %v1086_v35, 16  ;;  %v1091_v24 = vpack.c.bf16 %v288_v37, %v288_v37 }
  0x19   : > { %334 = vst [vmem:[%s1182_s25 + $0x50] sm:$0x1] %v1135_v5  ;;  %335 = vst [vmem:[%s1182_s25 + $0x54] sm:$0xf] %v1135_v5  ;;  %v485_v47 = vshrl.u32 %v1087_v36, 16  ;;  %v488_v48 = vshll.u32 %v1087_v36, 16  ;;  %v258_v28 = vadd.f32 %v1177_v1, %v219_v41  ;;  %v220_v29 = vmul.f32 %v1167_v0, %v181_v15 }
  0x1a   : > { %336 = vst [vmem:[%s1182_s25 + $0x58] sm:$0xf] %v1135_v5  ;;  %337 = vst [vmem:[%s1182_s25 + $0x5c] sm:$0x1] %v1135_v5  ;;  %v493_v49 = vshrl.u32 %v1088_v38, 16  ;;  %v496_v50 = vshll.u32 %v1088_v38, 16 }
  0x1b   : > { %338 = vst [vmem:[%s1182_s25 + $0x60] sm:$0xf] %v1135_v5  ;;  %339 = vst [vmem:[%s1182_s25 + $0x64] sm:$0xf] %v1135_v5  ;;  %v470_v51 = vrot.slane %v468_v42, 7  ;;  %v478_v54 = vrot.slane %v476_v44, 7 }
  0x1c   : > { %340 = vst [vmem:[%s1182_s25 + $0x68] sm:$0x1] %v1135_v5  ;;  %341 = vst [vmem:[%s1182_s25 + $0x6c] sm:$0xf] %v1135_v5  ;;  %v1002_v52 = vld [vmem:[%s1182_s25 + $0xc] sm:$0xf] }
  0x1d   : > { %342 = vst [vmem:[%s1182_s25 + $0x70] sm:$0xf] %v1135_v5  ;;  %343 = vst [vmem:[%s1182_s25 + $0x74] sm:$0x1] %v1135_v5  ;;  %v502_v55 = vshrl.u32 %v1089_v39, 16  ;;  %v505_v56 = vshll.u32 %v1089_v39, 16  ;;  %v473_v63 = vor.u32 %v471_v43, %v470_v51  ;;  %v481_v3 = vor.u32 %v479_v45, %v478_v54 }
  0x1e   : > { %344 = vst [vmem:[%s1182_s25 + $0x78] sm:$0xf] %v1135_v5  ;;  %345 = vst [vmem:[%s1182_s25 + $0x7c] sm:$0xf] %v1135_v5  ;;  %v1005_v58 = vld [vmem:[%s1182_s25 + $0x14] sm:$0x1] }
  0x1f   : > { %346 = vst [vmem:[%s1182_s25 + $0x80] sm:$0x1] %v1135_v5  ;;  %347 = vst [vmem:[%s1182_s25 + $0x84] sm:$0xf] %v1135_v5  ;;  %v487_v59 = vrot.slane %v485_v47, 7  ;;  %v495_v60 = vrot.slane %v493_v49, 7  ;;  %v792_v11 = vsel %vm1271_vm5, %v473_v63, %v1002_v52 }
  0x20   : > { %348 = vst [vmem:[%s1182_s25 + $0x88] sm:$0xf] %v1135_v5  ;;  %349 = vst [vmem:[%s1182_s25 + $0x8c] sm:$0x1] %v1135_v5  ;;  %v510_v61 = vshrl.u32 %v1090_v40, 16  ;;  %v513_v62 = vshll.u32 %v1090_v40, 16  ;;  %v259_v40 = vadd.f32 %v1177_v1, %v220_v29 }
  0x21   : > { %350 = vst [vmem:[%s1182_s25 + $0x90] sm:$0xf] %v1135_v5  ;;  %351 = vst [vmem:[%s1182_s25 + $0x94] sm:$0xf] %v1135_v5  ;;  %v474_v2 = vrot.slane %v470_v51, 4  ;;  %v483_v4 = vrot.slane %v478_v54, 4  ;;  %v490_v7 = vor.u32 %v488_v48, %v487_v59  ;;  %v498_v9 = vor.u32 %v496_v50, %v495_v60 }
  0x22   : > { %352 = vst [vmem:[%s1182_s25 + $0x98] sm:$0x1] %v1135_v5  ;;  %353 = vst [vmem:[%s1182_s25 + $0x9c] sm:$0xf] %v1135_v5  ;;  %v1010_v6 = vld [vmem:[%s1182_s25 + $0x20] sm:$0x1] }
  0x23   : > { %354 = vst [vmem:[%s1182_s25 + $0xa0] sm:$0xf] %v1135_v5  ;;  %355 = vst [vmem:[%s1182_s25 + $0xa4] sm:$0x1] %v1135_v5  ;;  %v491_v8 = vrot.slane %v487_v59, 4  ;;  %v500_v10 = vrot.slane %v495_v60, 4 }
  0x24   : > { %356 = vst [vmem:[%s1182_s25 + $0xa8] sm:$0xf] %v1135_v5  ;;  %357 = vst [vmem:[%s1182_s25 + $0xac] sm:$0xf] %v1135_v5  ;;  %v504_v14 = vrot.slane %v502_v55, 7  ;;  %v512_v20 = vrot.slane %v510_v61, 7 }
  0x25   : > { %358 = vst [vmem:[%s1182_s25 + $0xb0] sm:$0x1] %v1135_v5  ;;  %359 = vst [vmem:[%s1182_s25 + $0xb4] sm:$0xf] %v1135_v5  ;;  %v1012_v19 = vld [vmem:[%s1182_s25 + $0x24] sm:$0xf] }
  0x26   : > { %360 = vst [vmem:[%s1182_s25 + $0xb8] sm:$0xf] %v1135_v5  ;;  %361 = vst [vmem:[%s1182_s25 + $0xbc] sm:$0x1] %v1135_v5  ;;  %v507_v21 = vor.u32 %v505_v56, %v504_v14  ;;  %v508_v22 = vrot.slane %v504_v14, 4  ;;  %v289_v25 = vmax.f32 %v1265_v33, 0.0  ;;  %v515_v26 = vor.u32 %v513_v62, %v512_v20 }
  0x27   : > { %362 = vst [vmem:[%s1182_s25 + $0xc0] sm:$0xf] %v1135_v5  ;;  %363 = vst [vmem:[%s1182_s25 + $0xc4] sm:$0xf] %v1135_v5  ;;  %v1015_v23 = vld [vmem:[%s1182_s25 + $0x2c] sm:$0x1] }
  0x28   : > { %364 = vst [vmem:[%s1182_s25 + $0xc8] sm:$0x1] %v1135_v5  ;;  %365 = vst [vmem:[%s1182_s25 + $0xcc] sm:$0xf] %v1135_v5  ;;  %v517_v27 = vrot.slane %v512_v20, 4  ;;  %v182_v30 = vld [vmem:[%s1172_s20 + $0x50] sm:$0xff]  ;;  %v808_v31 = vsel %vm1271_vm5, %v507_v21, %v1012_v19  ;;  %v1092_v35 = vpack.c.bf16 %v289_v25, %v289_v25 }
  0x29   : > { %366 = vst [vmem:[%s1182_s25 + $0xd0] sm:$0xf] %v1135_v5  ;;  %367 = vst [vmem:[%s1182_s25 + $0xd4] sm:$0x1] %v1135_v5  ;;  %v1007_v5 = vld [vmem:[%s1182_s25 + $0x18] sm:$0xf]  ;;  %v221_v44 = vmul.f32 %v1167_v0, %v182_v30 }
  0x2a   : > { %vm1278_vm6 = vmor %vm464_vm2, %vm465_vm4  ;;  %1003 = vst [vmem:[%s1182_s25 + $0xc] sm:$0xf] %v792_v11  ;;  %v801_v16 = vsel %vm1271_vm5, %v490_v7, %v1007_v5  ;;  %v519_v32 = vshrl.u32 %v1091_v24, 16  ;;  %v522_v34 = vshll.u32 %v1091_v24, 16  ;;  %v183_v36 = vld [vmem:[%s1172_s20 + $0x58] sm:$0xff]  ;;  %v184_v37 = vld [vmem:[%s1172_s20 + $0x60] sm:$0xff] }
  0x2b   : > { %vm1284_vm7 = vmand %vm795_vm3, %vm464_vm2  ;;  %v482_v12 = vsel %vm1278_vm6, %v474_v2, %v481_v3  ;;  %v499_v17 = vsel %vm1278_vm6, %v491_v8, %v498_v9  ;;  %1008 = vst [vmem:[%s1182_s25 + $0x18] sm:$0xf] %v801_v16  ;;  %v516_v33 = vsel %vm1278_vm6, %v508_v22, %v515_v26  ;;  %v290_v39 = vmax.f32 %v258_v28, 0.0  ;;  %v1017_v45 = vld [vmem:[%s1182_s25 + $0x30] sm:$0xf]  ;;  %v185_v8 = vld [vmem:[%s1172_s20 + $0x68] sm:$0xff] }
  0x2c   : > { %v798_v13 = vsel %vm1284_vm7, %v483_v4, %v1005_v58  ;;  %1004 = vst [vmem:[%s1182_s25 + $0x10] sm:$0xf] %v482_v12  ;;  %v805_v18 = vsel %vm1284_vm7, %v500_v10, %v1010_v6  ;;  %1009 = vst [vmem:[%s1182_s25 + $0x1c] sm:$0xf] %v499_v17  ;;  %v812_v38 = vsel %vm1284_vm7, %v517_v27, %v1015_v23  ;;  %v521_v41 = vrot.slane %v519_v32, 7  ;;  %v186_v23 = vld [vmem:[%s1172_s20 + $0x70] sm:$0xff] }
  0x2d   : > { %1006 = vst [vmem:[%s1182_s25 + $0x14] sm:$0x1] %v798_v13  ;;  %1011 = vst [vmem:[%s1182_s25 + $0x20] sm:$0x1] %v805_v18  ;;  %v527_v42 = vshrl.u32 %v1092_v35, 16  ;;  %v530_v43 = vshll.u32 %v1092_v35, 16  ;;  %v1093_v47 = vpack.c.bf16 %v290_v39, %v290_v39  ;;  %v222_v49 = vmul.f32 %v1167_v0, %v183_v36 }
  0x2e   : > { %1013 = vst [vmem:[%s1182_s25 + $0x24] sm:$0xf] %v808_v31  ;;  %1014 = vst [vmem:[%s1182_s25 + $0x28] sm:$0xf] %v516_v33  ;;  %v291_v48 = vmax.f32 %v259_v40, 0.0  ;;  %v223_v50 = vmul.f32 %v1167_v0, %v184_v37  ;;  %v524_v51 = vor.u32 %v522_v34, %v521_v41  ;;  %v525_v52 = vrot.slane %v521_v41, 4 }
  0x2f   : > { %1016 = vst [vmem:[%s1182_s25 + $0x2c] sm:$0x1] %v812_v38  ;;  %v529_v54 = vrot.slane %v527_v42, 7  ;;  %v260_v55 = vadd.f32 %v1177_v1, %v221_v44  ;;  %v1020_v56 = vld [vmem:[%s1182_s25 + $0x38] sm:$0x1]  ;;  %v536_v58 = vshrl.u32 %v1093_v47, 16  ;;  %v261_v61 = vadd.f32 %v1177_v1, %v222_v49 }
  0x30   : > { %v539_v59 = vshll.u32 %v1093_v47, 16  ;;  %v1094_v60 = vpack.c.bf16 %v291_v48, %v291_v48  ;;  %v815_v62 = vsel %vm1271_vm5, %v524_v51, %v1017_v45  ;;  %v1022_v11 = vld [vmem:[%s1182_s25 + $0x3c] sm:$0xf]  ;;  %v262_v13 = vadd.f32 %v1177_v1, %v223_v50  ;;  %v1025_v18 = vld [vmem:[%s1182_s25 + $0x44] sm:$0x1] }
  0x31   : > { %v532_v63 = vor.u32 %v530_v43, %v529_v54  ;;  %v534_v2 = vrot.slane %v529_v54, 4  ;;  %v292_v3 = vmax.f32 %v260_v55, 0.0  ;;  %1018 = vst [vmem:[%s1182_s25 + $0x30] sm:$0xf] %v815_v62  ;;  %v538_v4 = vrot.slane %v536_v58, 7  ;;  %v187_v33 = vld [vmem:[%s1172_s20 + $0x78] sm:$0xff] }
  0x32   : > { %v544_v5 = vshrl.u32 %v1094_v60, 16  ;;  %v547_v6 = vshll.u32 %v1094_v60, 16  ;;  %v293_v7 = vmax.f32 %v261_v61, 0.0  ;;  %v294_v21 = vmax.f32 %v262_v13, 0.0  ;;  %v1027_v35 = vld [vmem:[%s1182_s25 + $0x48] sm:$0xf] }
  0x33   : > { %v533_v9 = vsel %vm1278_vm6, %v525_v52, %v532_v63  ;;  %v819_v10 = vsel %vm1284_vm7, %v534_v2, %v1020_v56  ;;  %v1095_v12 = vpack.c.bf16 %v292_v3, %v292_v3  ;;  %v541_v14 = vor.u32 %v539_v59, %v538_v4  ;;  %v188_v38 = vld [vmem:[%s1172_s20 + $0x80] sm:$0xff]  ;;  %v1030_v41 = vld [vmem:[%s1182_s25 + $0x50] sm:$0x1]  ;;  %v189_v54 = vld [vmem:[%s1172_s20 + $0x88] sm:$0xff] }
  0x34   : > { %1019 = vst [vmem:[%s1182_s25 + $0x34] sm:$0xf] %v533_v9  ;;  %1021 = vst [vmem:[%s1182_s25 + $0x38] sm:$0x1] %v819_v10  ;;  %v542_v15 = vrot.slane %v538_v4, 4  ;;  %v546_v16 = vrot.slane %v544_v5, 7  ;;  %v1096_v17 = vpack.c.bf16 %v293_v7, %v293_v7  ;;  %v224_v22 = vmul.f32 %v1167_v0, %v185_v8 }
  0x35   : > { %v553_v19 = vshrl.u32 %v1095_v12, 16  ;;  %v556_v20 = vshll.u32 %v1095_v12, 16  ;;  %v822_v24 = vsel %vm1271_vm5, %v541_v14, %v1022_v11  ;;  %v1097_v30 = vpack.c.bf16 %v294_v21, %v294_v21  ;;  %v1032_v58 = vld [vmem:[%s1182_s25 + $0x54] sm:$0xf]  ;;  %v191_v8 = vld [vmem:[%s1172_s20 + $0x98] sm:$0xff] }
  0x36   : > { %v549_v25 = vor.u32 %v547_v6, %v546_v16  ;;  %v551_v26 = vrot.slane %v546_v16, 4  ;;  %v561_v27 = vshrl.u32 %v1096_v17, 16  ;;  %1023 = vst [vmem:[%s1182_s25 + $0x3c] sm:$0xf] %v822_v24  ;;  %v564_v29 = vshll.u32 %v1096_v17, 16  ;;  %v190_v61 = vld [vmem:[%s1172_s20 + $0x90] sm:$0xff] }
  0x37   : > { %v555_v28 = vrot.slane %v553_v19, 7  ;;  %v263_v31 = vadd.f32 %v1177_v1, %v224_v22  ;;  %v225_v37 = vmul.f32 %v1167_v0, %v186_v23  ;;  %v570_v42 = vshrl.u32 %v1097_v30, 16  ;;  %v1035_v17 = vld [vmem:[%s1182_s25 + $0x5c] sm:$0x1] }
  0x38   : > { %v550_v32 = vsel %vm1278_vm6, %v542_v15, %v549_v25  ;;  %v826_v34 = vsel %vm1284_vm7, %v551_v26, %v1025_v18  ;;  %v563_v36 = vrot.slane %v561_v27, 7  ;;  %v573_v43 = vshll.u32 %v1097_v30, 16  ;;  %v192_v26 = vld [vmem:[%s1172_s20 + $0xa0] sm:$0xff]  ;;  %v193_v27 = vld [vmem:[%s1172_s20 + $0xa8] sm:$0xff] }
  0x39   : > { %1024 = vst [vmem:[%s1182_s25 + $0x40] sm:$0xf] %v550_v32  ;;  %1026 = vst [vmem:[%s1182_s25 + $0x44] sm:$0x1] %v826_v34  ;;  %v558_v39 = vor.u32 %v556_v20, %v555_v28  ;;  %v559_v40 = vrot.slane %v555_v28, 4  ;;  %v295_v47 = vmax.f32 %v263_v31, 0.0  ;;  %v264_v48 = vadd.f32 %v1177_v1, %v225_v37 }
  0x3a   : > { %v566_v44 = vor.u32 %v564_v29, %v563_v36  ;;  %v568_v45 = vrot.slane %v563_v36, 4  ;;  %v572_v50 = vrot.slane %v570_v42, 7  ;;  %v226_v51 = vmul.f32 %v1167_v0, %v187_v33  ;;  %v1037_v28 = vld [vmem:[%s1182_s25 + $0x60] sm:$0xf]  ;;  %v1040_v42 = vld [vmem:[%s1182_s25 + $0x68] sm:$0x1] }
  0x3b   : > { %v829_v49 = vsel %vm1271_vm5, %v558_v39, %v1027_v35  ;;  %v227_v52 = vmul.f32 %v1167_v0, %v188_v38  ;;  %v1098_v59 = vpack.c.bf16 %v295_v47, %v295_v47  ;;  %v296_v60 = vmax.f32 %v264_v48, 0.0 }
  0x3c   : > { %1028 = vst [vmem:[%s1182_s25 + $0x48] sm:$0xf] %v829_v49  ;;  %v567_v55 = vsel %vm1278_vm6, %v559_v40, %v566_v44  ;;  %v833_v56 = vsel %vm1284_vm7, %v568_v45, %v1030_v41  ;;  %v575_v62 = vor.u32 %v573_v43, %v572_v50  ;;  %v576_v63 = vrot.slane %v572_v50, 4  ;;  %v1042_v43 = vld [vmem:[%s1182_s25 + $0x6c] sm:$0xf] }
  0x3d   : > { %1029 = vst [vmem:[%s1182_s25 + $0x4c] sm:$0xf] %v567_v55  ;;  %1031 = vst [vmem:[%s1182_s25 + $0x50] sm:$0x1] %v833_v56  ;;  %v265_v2 = vadd.f32 %v1177_v1, %v226_v51  ;;  %v266_v3 = vadd.f32 %v1177_v1, %v227_v52  ;;  %v578_v4 = vshrl.u32 %v1098_v59, 16  ;;  %v581_v5 = vshll.u32 %v1098_v59, 16 }
  0x3e   : > { %v1099_v6 = vpack.c.bf16 %v296_v60, %v296_v60  ;;  %v228_v7 = vmul.f32 %v1167_v0, %v189_v54  ;;  %v836_v9 = vsel %vm1271_vm5, %v575_v62, %v1032_v58  ;;  %v229_v12 = vmul.f32 %v1167_v0, %v190_v61  ;;  %v194_v58 = vld [vmem:[%s1172_s20 + $0xb0] sm:$0xff]  ;;  %v195_v59 = vld [vmem:[%s1172_s20 + $0xb8] sm:$0xff] }
  0x3f   : > { %v297_v10 = vmax.f32 %v265_v2, 0.0  ;;  %v298_v11 = vmax.f32 %v266_v3, 0.0  ;;  %1033 = vst [vmem:[%s1182_s25 + $0x54] sm:$0xf] %v836_v9  ;;  %v580_v13 = vrot.slane %v578_v4, 7  ;;  %v230_v21 = vmul.f32 %v1167_v0, %v191_v8 }
  0x40   : > { %v587_v14 = vshrl.u32 %v1099_v6, 16  ;;  %v590_v15 = vshll.u32 %v1099_v6, 16  ;;  %v267_v16 = vadd.f32 %v1177_v1, %v228_v7  ;;  %v268_v20 = vadd.f32 %v1177_v1, %v229_v12  ;;  %v1045_v6 = vld [vmem:[%s1182_s25 + $0x74] sm:$0x1] }
  0x41   : > { %v1100_v18 = vpack.c.bf16 %v297_v10, %v297_v10  ;;  %v1101_v19 = vpack.c.bf16 %v298_v11, %v298_v11  ;;  %v583_v22 = vor.u32 %v581_v5, %v580_v13  ;;  %v585_v23 = vrot.slane %v580_v13, 4 }
  0x42   : > { %v589_v24 = vrot.slane %v587_v14, 7  ;;  %v299_v25 = vmax.f32 %v267_v16, 0.0  ;;  %v300_v40 = vmax.f32 %v268_v20, 0.0  ;;  %v269_v44 = vadd.f32 %v1177_v1, %v230_v21  ;;  %v196_v20 = vld [vmem:[%s1172_s20 + $0xc0] sm:$0xff] }
  0x43   : > { %v595_v29 = vshrl.u32 %v1100_v18, 16  ;;  %v598_v30 = vshll.u32 %v1100_v18, 16  ;;  %v604_v31 = vshrl.u32 %v1101_v19, 16  ;;  %v607_v32 = vshll.u32 %v1101_v19, 16 }
  0x44   : > { %v584_v34 = vsel %vm1278_vm6, %v576_v63, %v583_v22  ;;  %v840_v35 = vsel %vm1284_vm7, %v585_v23, %v1035_v17  ;;  %v592_v36 = vor.u32 %v590_v15, %v589_v24  ;;  %v593_v37 = vrot.slane %v589_v24, 4  ;;  %v1047_v15 = vld [vmem:[%s1182_s25 + $0x78] sm:$0xf] }
  0x45   : > { %1034 = vst [vmem:[%s1182_s25 + $0x58] sm:$0xf] %v584_v34  ;;  %1036 = vst [vmem:[%s1182_s25 + $0x5c] sm:$0x1] %v840_v35  ;;  %v597_v33 = vrot.slane %v595_v29, 7  ;;  %v606_v38 = vrot.slane %v604_v31, 7  ;;  %v1102_v39 = vpack.c.bf16 %v299_v25, %v299_v25  ;;  %v231_v45 = vmul.f32 %v1167_v0, %v192_v26 }
  0x46   : > { %v843_v41 = vsel %vm1271_vm5, %v592_v36, %v1037_v28  ;;  %v232_v47 = vmul.f32 %v1167_v0, %v193_v27  ;;  %v1103_v55 = vpack.c.bf16 %v300_v40, %v300_v40  ;;  %v301_v56 = vmax.f32 %v269_v44, 0.0  ;;  %v198_v44 = vld [vmem:[%s1172_s20 + $0xd0] sm:$0xff] }
  0x47   : > { %1038 = vst [vmem:[%s1182_s25 + $0x60] sm:$0xf] %v843_v41  ;;  %v600_v48 = vor.u32 %v598_v30, %v597_v33  ;;  %v602_v49 = vrot.slane %v597_v33, 4  ;;  %v609_v50 = vor.u32 %v607_v32, %v606_v38  ;;  %v610_v51 = vrot.slane %v606_v38, 4  ;;  %v1050_v30 = vld [vmem:[%s1182_s25 + $0x80] sm:$0x1] }
  0x48   : > { %v612_v52 = vshrl.u32 %v1102_v39, 16  ;;  %v615_v54 = vshll.u32 %v1102_v39, 16  ;;  %v270_v63 = vadd.f32 %v1177_v1, %v231_v45  ;;  %v621_v3 = vshrl.u32 %v1103_v55, 16  ;;  %v1052_v38 = vld [vmem:[%s1182_s25 + $0x84] sm:$0xf] }
  0x49   : > { %v601_v60 = vsel %vm1278_vm6, %v593_v37, %v600_v48  ;;  %v847_v61 = vsel %vm1284_vm7, %v602_v49, %v1040_v42  ;;  %v850_v62 = vsel %vm1271_vm5, %v609_v50, %v1042_v43  ;;  %v624_v4 = vshll.u32 %v1103_v55, 16  ;;  %v197_v43 = vld [vmem:[%s1172_s20 + $0xc8] sm:$0xff] }
  0x4a   : > { %1039 = vst [vmem:[%s1182_s25 + $0x64] sm:$0xf] %v601_v60  ;;  %1041 = vst [vmem:[%s1182_s25 + $0x68] sm:$0x1] %v847_v61  ;;  %v614_v2 = vrot.slane %v612_v52, 7  ;;  %v1104_v5 = vpack.c.bf16 %v301_v56, %v301_v56  ;;  %v302_v7 = vmax.f32 %v270_v63, 0.0  ;;  %v271_v8 = vadd.f32 %v1177_v1, %v232_v47 }
  0x4b   : > { %1043 = vst [vmem:[%s1182_s25 + $0x6c] sm:$0xf] %v850_v62  ;;  %v233_v9 = vmul.f32 %v1167_v0, %v194_v58  ;;  %v234_v10 = vmul.f32 %v1167_v0, %v195_v59  ;;  %v623_v13 = vrot.slane %v621_v3, 7  ;;  %v235_v34 = vmul.f32 %v1167_v0, %v196_v20  ;;  %v1055_v56 = vld [vmem:[%s1182_s25 + $0x8c] sm:$0x1] }
  0x4c   : > { %v617_v11 = vor.u32 %v615_v54, %v614_v2  ;;  %v619_v12 = vrot.slane %v614_v2, 4  ;;  %v629_v14 = vshrl.u32 %v1104_v5, 16  ;;  %v632_v16 = vshll.u32 %v1104_v5, 16  ;;  %v1057_v3 = vld [vmem:[%s1182_s25 + $0x90] sm:$0xf] }
  0x4d   : > { %v1105_v17 = vpack.c.bf16 %v302_v7, %v302_v7  ;;  %v303_v18 = vmax.f32 %v271_v8, 0.0  ;;  %v272_v19 = vadd.f32 %v1177_v1, %v233_v9  ;;  %v626_v23 = vor.u32 %v624_v4, %v623_v13  ;;  %v199_v8 = vld [vmem:[%s1172_s20 + $0xd8] sm:$0xff]  ;;  %v200_v9 = vld [vmem:[%s1172_s20 + $0xe0] sm:$0xff] }
  0x4e   : > { %v618_v21 = vsel %vm1278_vm6, %v610_v51, %v617_v11  ;;  %v854_v22 = vsel %vm1284_vm7, %v619_v12, %v1045_v6  ;;  %v627_v24 = vrot.slane %v623_v13, 4  ;;  %v631_v25 = vrot.slane %v629_v14, 7  ;;  %v1060_v20 = vld [vmem:[%s1182_s25 + $0x98] sm:$0x1] }
  0x4f   : > { %1044 = vst [vmem:[%s1182_s25 + $0x70] sm:$0xf] %v618_v21  ;;  %1046 = vst [vmem:[%s1182_s25 + $0x74] sm:$0x1] %v854_v22  ;;  %v638_v26 = vshrl.u32 %v1105_v17, 16  ;;  %v641_v27 = vshll.u32 %v1105_v17, 16  ;;  %v1106_v28 = vpack.c.bf16 %v303_v18, %v303_v18  ;;  %v857_v29 = vsel %vm1271_vm5, %v626_v23, %v1047_v15 }
  0x50   : > { %v304_v31 = vmax.f32 %v272_v19, 0.0  ;;  %v273_v32 = vadd.f32 %v1177_v1, %v234_v10  ;;  %1048 = vst [vmem:[%s1182_s25 + $0x78] sm:$0xf] %v857_v29  ;;  %v634_v35 = vor.u32 %v632_v16, %v631_v25  ;;  %v636_v36 = vrot.slane %v631_v25, 4  ;;  %v201_v18 = vld [vmem:[%s1172_s20 + $0xe8] sm:$0xff] }
  0x51   : > { %v640_v37 = vrot.slane %v638_v26, 7  ;;  %v646_v33 = vshrl.u32 %v1106_v28, 16  ;;  %v649_v39 = vshll.u32 %v1106_v28, 16  ;;  %v274_v42 = vadd.f32 %v1177_v1, %v235_v34  ;;  %v1062_v28 = vld [vmem:[%s1182_s25 + $0x9c] sm:$0xf] }
  0x52   : > { %v1107_v40 = vpack.c.bf16 %v304_v31, %v304_v31  ;;  %v305_v41 = vmax.f32 %v273_v32, 0.0  ;;  %v635_v45 = vsel %vm1278_vm6, %v627_v24, %v634_v35  ;;  %v861_v47 = vsel %vm1284_vm7, %v636_v36, %v1050_v30 }
  0x53   : > { %v643_v48 = vor.u32 %v641_v27, %v640_v37  ;;  %v644_v49 = vrot.slane %v640_v37, 4  ;;  %1049 = vst [vmem:[%s1182_s25 + $0x7c] sm:$0xf] %v635_v45  ;;  %1051 = vst [vmem:[%s1182_s25 + $0x80] sm:$0x1] %v861_v47  ;;  %v648_v50 = vrot.slane %v646_v33, 7  ;;  %v236_v59 = vmul.f32 %v1167_v0, %v197_v43 }
  0x54   : > { %v655_v51 = vshrl.u32 %v1107_v40, 16  ;;  %v658_v52 = vshll.u32 %v1107_v40, 16  ;;  %v1108_v54 = vpack.c.bf16 %v305_v41, %v305_v41  ;;  %v306_v58 = vmax.f32 %v274_v42, 0.0  ;;  %v202_v37 = vld [vmem:[%s1172_s20 + $0xf0] sm:$0xff]  ;;  %v203_v41 = vld [vmem:[%s1172_s20 + $0xf8] sm:$0xff] }
  0x55   : > { %v864_v55 = vsel %vm1271_vm5, %v643_v48, %v1052_v38  ;;  %v237_v60 = vmul.f32 %v1167_v0, %v198_v44  ;;  %v651_v61 = vor.u32 %v649_v39, %v648_v50  ;;  %v653_v62 = vrot.slane %v648_v50, 4 }
  0x56   : > { %1053 = vst [vmem:[%s1182_s25 + $0x84] sm:$0xf] %v864_v55  ;;  %v657_v63 = vrot.slane %v655_v51, 7  ;;  %v663_v2 = vshrl.u32 %v1108_v54, 16  ;;  %v666_v4 = vshll.u32 %v1108_v54, 16  ;;  %v1109_v5 = vpack.c.bf16 %v306_v58, %v306_v58 }
  0x57   : > { %v275_v6 = vadd.f32 %v1177_v1, %v236_v59  ;;  %v276_v7 = vadd.f32 %v1177_v1, %v237_v60  ;;  %v652_v10 = vsel %vm1278_vm6, %v644_v49, %v651_v61  ;;  %v868_v11 = vsel %vm1284_vm7, %v653_v62, %v1055_v56  ;;  %v1065_v51 = vld [vmem:[%s1182_s25 + $0xa4] sm:$0x1] }
  0x58   : > { %v660_v12 = vor.u32 %v658_v52, %v657_v63  ;;  %v661_v13 = vrot.slane %v657_v63, 4  ;;  %1054 = vst [vmem:[%s1182_s25 + $0x88] sm:$0xf] %v652_v10  ;;  %1056 = vst [vmem:[%s1182_s25 + $0x8c] sm:$0x1] %v868_v11  ;;  %v665_v14 = vrot.slane %v663_v2, 7  ;;  %v238_v22 = vmul.f32 %v1167_v0, %v199_v8 }
  0x59   : > { %v672_v15 = vshrl.u32 %v1109_v5, 16  ;;  %v675_v16 = vshll.u32 %v1109_v5, 16  ;;  %v307_v17 = vmax.f32 %v275_v6, 0.0  ;;  %v308_v21 = vmax.f32 %v276_v7, 0.0  ;;  %v1067_v52 = vld [vmem:[%s1182_s25 + $0xa8] sm:$0xf] }
  0x5a   : > { %v871_v19 = vsel %vm1271_vm5, %v660_v12, %v1057_v3  ;;  %v239_v23 = vmul.f32 %v1167_v0, %v200_v9  ;;  %v668_v24 = vor.u32 %v666_v4, %v665_v14  ;;  %v670_v25 = vrot.slane %v665_v14, 4  ;;  %v1070_v12 = vld [vmem:[%s1182_s25 + $0xb0] sm:$0x1] }
  0x5b   : > { %1058 = vst [vmem:[%s1182_s25 + $0x90] sm:$0xf] %v871_v19  ;;  %v674_v26 = vrot.slane %v672_v15, 7  ;;  %v1110_v27 = vpack.c.bf16 %v307_v17, %v307_v17  ;;  %v1111_v29 = vpack.c.bf16 %v308_v21, %v308_v21  ;;  %v277_v30 = vadd.f32 %v1177_v1, %v238_v22 }
  0x5c   : > { %v278_v31 = vadd.f32 %v1177_v1, %v239_v23  ;;  %v240_v32 = vmul.f32 %v1167_v0, %v201_v18  ;;  %v669_v34 = vsel %vm1278_vm6, %v661_v13, %v668_v24  ;;  %v875_v35 = vsel %vm1284_vm7, %v670_v25, %v1060_v20  ;;  %v1072_v13 = vld [vmem:[%s1182_s25 + $0xb4] sm:$0xf]  ;;  %v1075_v25 = vld [vmem:[%s1182_s25 + $0xbc] sm:$0x1] }
  0x5d   : > { %v677_v36 = vor.u32 %v675_v16, %v674_v26  ;;  %1059 = vst [vmem:[%s1182_s25 + $0x94] sm:$0xf] %v669_v34  ;;  %1061 = vst [vmem:[%s1182_s25 + $0x98] sm:$0x1] %v875_v35  ;;  %v680_v33 = vshrl.u32 %v1110_v27, 16  ;;  %v683_v38 = vshll.u32 %v1110_v27, 16  ;;  %v241_v50 = vmul.f32 %v1167_v0, %v202_v37 }
  0x5e   : > { %v689_v39 = vshrl.u32 %v1111_v29, 16  ;;  %v692_v40 = vshll.u32 %v1111_v29, 16  ;;  %v309_v43 = vmax.f32 %v277_v30, 0.0  ;;  %v310_v44 = vmax.f32 %v278_v31, 0.0 }
  0x5f   : > { %v878_v42 = vsel %vm1271_vm5, %v677_v36, %v1062_v28  ;;  %v279_v45 = vadd.f32 %v1177_v1, %v240_v32  ;;  %v678_v47 = vrot.slane %v674_v26, 4  ;;  %v682_v48 = vrot.slane %v680_v33, 7  ;;  %v1077_v33 = vld [vmem:[%s1182_s25 + $0xc0] sm:$0xf] }
  0x60   : > { %1063 = vst [vmem:[%s1182_s25 + $0x9c] sm:$0xf] %v878_v42  ;;  %v691_v49 = vrot.slane %v689_v39, 7  ;;  %v1112_v54 = vpack.c.bf16 %v309_v43, %v309_v43  ;;  %v1113_v55 = vpack.c.bf16 %v310_v44, %v310_v44  ;;  %v242_v58 = vmul.f32 %v1167_v0, %v203_v41  ;;  %v1080_v41 = vld [vmem:[%s1182_s25 + $0xc8] sm:$0x1] }
  0x61   : > { %v311_v56 = vmax.f32 %v279_v45, 0.0  ;;  %v685_v59 = vor.u32 %v683_v38, %v682_v48  ;;  %v687_v60 = vrot.slane %v682_v48, 4  ;;  %v280_v10 = vadd.f32 %v1177_v1, %v241_v50 }
  0x62   : > { %v694_v61 = vor.u32 %v692_v40, %v691_v49  ;;  %v695_v62 = vrot.slane %v691_v49, 4  ;;  %v697_v63 = vshrl.u32 %v1112_v54, 16  ;;  %v700_v2 = vshll.u32 %v1112_v54, 16 }
  0x63   : > { %v706_v3 = vshrl.u32 %v1113_v55, 16  ;;  %v709_v4 = vshll.u32 %v1113_v55, 16  ;;  %v686_v5 = vsel %vm1278_vm6, %v678_v47, %v685_v59  ;;  %v882_v6 = vsel %vm1284_vm7, %v687_v60, %v1065_v51 }
  0x64   : > { %v885_v7 = vsel %vm1271_vm5, %v694_v61, %v1067_v52  ;;  %v1114_v0 = vpack.c.bf16 %v311_v56, %v311_v56  ;;  %1064 = vst [vmem:[%s1182_s25 + $0xa0] sm:$0xf] %v686_v5  ;;  %1066 = vst [vmem:[%s1182_s25 + $0xa4] sm:$0x1] %v882_v6  ;;  %v699_v8 = vrot.slane %v697_v63, 7  ;;  %v281_v11 = vadd.f32 %v1177_v1, %v242_v58 }
  0x65   : > { %1068 = vst [vmem:[%s1182_s25 + $0xa8] sm:$0xf] %v885_v7  ;;  %v708_v9 = vrot.slane %v706_v3, 7  ;;  %v312_v21 = vmax.f32 %v280_v10, 0.0 }
  0x66   : > { %v714_v14 = vshrl.u32 %v1114_v0, 16  ;;  %v717_v15 = vshll.u32 %v1114_v0, 16  ;;  %v702_v16 = vor.u32 %v700_v2, %v699_v8  ;;  %v704_v17 = vrot.slane %v699_v8, 4 }
  0x67   : > { %v711_v18 = vor.u32 %v709_v4, %v708_v9  ;;  %v712_v19 = vrot.slane %v708_v9, 4  ;;  %v313_v22 = vmax.f32 %v281_v11, 0.0  ;;  %v1115_v28 = vpack.c.bf16 %v312_v21, %v312_v21 }
  0x68   : > { %v716_v20 = vrot.slane %v714_v14, 7  ;;  %v703_v23 = vsel %vm1278_vm6, %v695_v62, %v702_v16  ;;  %v889_v1 = vsel %vm1284_vm7, %v704_v17, %v1070_v12 }
  0x69   : > { %v892_v24 = vsel %vm1271_vm5, %v711_v18, %v1072_v13  ;;  %1069 = vst [vmem:[%s1182_s25 + $0xac] sm:$0xf] %v703_v23  ;;  %1071 = vst [vmem:[%s1182_s25 + $0xb0] sm:$0x1] %v889_v1  ;;  %v1116_v29 = vpack.c.bf16 %v313_v22, %v313_v22  ;;  %v723_v32 = vshrl.u32 %v1115_v28, 16  ;;  %v726_v34 = vshll.u32 %v1115_v28, 16 }
  0x6a   : > { %1073 = vst [vmem:[%s1182_s25 + $0xb4] sm:$0xf] %v892_v24  ;;  %v719_v26 = vor.u32 %v717_v15, %v716_v20  ;;  %v721_v27 = vrot.slane %v716_v20, 4 }
  0x6b   : > { %v731_v35 = vshrl.u32 %v1116_v29, 16  ;;  %v734_v36 = vshll.u32 %v1116_v29, 16  ;;  %v725_v37 = vrot.slane %v723_v32, 7 }
  0x6c   : > { %v720_v30 = vsel %vm1278_vm6, %v712_v19, %v719_v26  ;;  %v896_v31 = vsel %vm1284_vm7, %v721_v27, %v1075_v25 }
  0x6d   : > { %1074 = vst [vmem:[%s1182_s25 + $0xb8] sm:$0xf] %v720_v30  ;;  %1076 = vst [vmem:[%s1182_s25 + $0xbc] sm:$0x1] %v896_v31  ;;  %v733_v38 = vrot.slane %v731_v35, 7  ;;  %v728_v39 = vor.u32 %v726_v34, %v725_v37  ;;  %v729_v40 = vrot.slane %v725_v37, 4 }
  0x6f   : > { %v736_v42 = vor.u32 %v734_v36, %v733_v38  ;;  %v738_v43 = vrot.slane %v733_v38, 4  ;;  %v899_v44 = vsel %vm1271_vm5, %v728_v39, %v1077_v33 }
  0x70   : > { %1078 = vst [vmem:[%s1182_s25 + $0xc0] sm:$0xf] %v899_v44 }
  0x71   : > { %v737_v45 = vsel %vm1278_vm6, %v729_v40, %v736_v42  ;;  %v903_v47 = vsel %vm1284_vm7, %v738_v43, %v1080_v41 }
  0x72   : > { %1079 = vst [vmem:[%s1182_s25 + $0xc4] sm:$0xf] %v737_v45  ;;  %1081 = vst [vmem:[%s1182_s25 + $0xc8] sm:$0x1] %v903_v47 }
  0x73 PF: > { %s13_s12 = sadd.s32 1, %s1133_s12  }
  0x74   : > { %p10_p4 = scmp.ge.s32.totalorder %s13_s12, 4  }
  0x76   :  { %12 = sbr.rel (!%p10_p4) target bundleno = 1 (0x1), region = 63 }

// kernel: rrcnn_block.13
= control target key start
LH: loop header
LB: loop body
LE: loop exit
PB: predicated region body
PF: predicated region fallthrough
CT: control target
= control target key end

     0   :  { %s1354_s12 = smov 0   ;;  %s1755_s0 = inlined_call_operand.vmem [shape: f32[2,256,4], index: 0, kind: input, shape index: {}]   ;;  %s1756_s1 = inlined_call_operand.vmem [shape: bf16[4,128], index: 1, kind: input, shape index: {}]   ;;  %s1757_s2 = inlined_call_operand.vmem [shape: f32[1,128], index: 2, kind: input, shape index: {}]   ;;  %s1758_s3 = inlined_call_operand.vmem [shape: bf16[2,18,18,128], index: 3, kind: output, shape index: {}]  }
   0x1 LB: > { %s1088_s13 = sadd.s32 4294967295, %s1331_s12   ;;  %p1092_p0 = scmp.ge.s32.totalorder %s1331_s12, 1  ;;  %s1331_s12 = sphi %s1354_s12, %s13_s12  }
   0x2   : > { %p137_p1 = scmp.lt.s32.totalorder %s1331_s12, 3 }
   0x4   : > { %p138_p2 = pnand %p1092_p0, %p137_p1 }
   0x5   : > { %p161_p3 = scmp.lt.s32.totalorder (!%p138_p2), %s1088_s13, 1 }
   0x6   : > { %141 = sbr.rel (%p138_p2) target bundleno = 286 (0x11e), region = 32 }
   0xb   : > { %v220_v0 = vld [vmem:[%s1756_s1] sm:$0x3]  ;;  %vm277_vm0 = vcmask 1041408   ;;  %s1766_s13 = smov (!%p161_p3, %s1088_s13), 1  ;;  %vm228_vm1 = vcmask 31744   ;;  %v1333_v50 = vmov 0  }
   0xc   : > { %1313 = vmatprep.subr.msk.bf16.mxu0 %vm277_vm0, %v220_v0  ;;  %1314 = vmatprep.subr.msk.bf16.mxu1 %vm277_vm0, %v220_v0  ;;  %v279_v1 = vsel %vm277_vm0, %v220_v0, 0  ;;  %s1227_s16 = sshll.u32 %s1766_s13, 8  ;;  %s1315_s20 = smul.u32 216, %s1766_s13  ;;  %v1484_v51 = vld [vmem:[%s1757_s2] ss:$0 sm:$0xff]  ;;  %vm916_vm2 = vcmask 1043456  }
   0xd   : > { %1278 = vmatpush3.bf16.msra.mxu0 %v279_v1  ;;  %1312 = vmatpush3.bf16.msra.mxu1 %v279_v1  ;;  %s1371_s19 = scalar_lea.vmem %s1755_s0, %s1227_s16  ;;  %vm917_vm3 = vsmask.f32 7938  ;;  %vm592_vm4 = vsmask.f32 256  ;;  %vm593_vm5 = vsmask.f32 4368 }
   0xe   : > { %v172_v2 = vld [vmem:[%s1371_s19] sm:$0xff]  ;;  %v173_v3 = vld [vmem:[%s1371_s19 + $0x8] sm:$0xff]  ;;  %v174_v7 = vld [vmem:[%s1371_s19 + $0x10] sm:$0xff]  ;;  %s1425_s23 = scalar_lea.vmem %s1758_s3, %s1315_s20  ;;  %vm923_vm6 = vcmask 1040384  }
   0xf   : > { %v188_v4 = vld [vmem:[%s1371_s19 + $0x80] sm:$0xff]  ;;  %v204_v5 = vpack.c.bf16 %v173_v3, %v172_v2  ;;  %v189_v6 = vld [vmem:[%s1371_s19 + $0x88] sm:$0xff]  ;;  %v175_v8 = vld [vmem:[%s1371_s19 + $0x18] sm:$0xff]  ;;  %448 = vst [vmem:[%s1425_s23 + $0x18] sm:$0xf] %v1333_v50 }
  0x10   : > { %v212_v9 = vpack.c.bf16 %v189_v6, %v188_v4  ;;  %v205_v10 = vpack.c.bf16 %v175_v8, %v174_v7  ;;  %v190_v11 = vld [vmem:[%s1371_s19 + $0x90] sm:$0xff]  ;;  %v191_v12 = vld [vmem:[%s1371_s19 + $0x98] sm:$0xff]  ;;  %v176_v13 = vld [vmem:[%s1371_s19 + $0x20] sm:$0xff]  ;;  %442 = vst [vmem:[%s1425_s23] sm:$0xf] %v1333_v50 }
  0x11   : > { %1279 = vmatprep.mubr.msk.bf16.mxu0 %vm228_vm1, %v204_v5  ;;  %v213_v14 = vpack.c.bf16 %v191_v12, %v190_v11  ;;  %v177_v15 = vld [vmem:[%s1371_s19 + $0x28] sm:$0xff]  ;;  %v192_v16 = vld [vmem:[%s1371_s19 + $0xa0] sm:$0xff]  ;;  %v178_v20 = vld [vmem:[%s1371_s19 + $0x30] sm:$0xff]  ;;  %443 = vst [vmem:[%s1425_s23 + $0x4] sm:$0xf] %v1333_v50 }
  0x12   : > { %v193_v17 = vld [vmem:[%s1371_s19 + $0xa8] sm:$0xff]  ;;  %1295 = vmatprep.mubr.msk.bf16.mxu1 %vm228_vm1, %v212_v9  ;;  %1280 = vmatmul.mubr.msk.bf16.vlgmr.msra.gmra.mxu0 %vm228_vm1, %v205_v10  ;;  %v206_v18 = vpack.c.bf16 %v177_v15, %v176_v13  ;;  %v179_v21 = vld [vmem:[%s1371_s19 + $0x38] sm:$0xff]  ;;  %v194_v22 = vld [vmem:[%s1371_s19 + $0xb0] sm:$0xff]  ;;  %444 = vst [vmem:[%s1425_s23 + $0x8] sm:$0x1] %v1333_v50 }
  0x13   : > { %v214_v19 = vpack.c.bf16 %v193_v17, %v192_v16  ;;  %1296 = vmatmul.mubr.msk.bf16.vlgmr.msra.gmra.mxu1 %vm228_vm1, %v213_v14  ;;  %v195_v23 = vld [vmem:[%s1371_s19 + $0xb8] sm:$0xff]  ;;  %v180_v24 = vld [vmem:[%s1371_s19 + $0x40] sm:$0xff]  ;;  %v181_v25 = vld [vmem:[%s1371_s19 + $0x48] sm:$0xff]  ;;  %v207_v28 = vpack.c.bf16 %v179_v21, %v178_v20  ;;  %445 = vst [vmem:[%s1425_s23 + $0xc] sm:$0xf] %v1333_v50 }
  0x14   : > { %1283 = vmatprep.mubr.msk.bf16.mxu0 %vm228_vm1, %v206_v18  ;;  %v196_v26 = vld [vmem:[%s1371_s19 + $0xc0] sm:$0xff]  ;;  %v197_v27 = vld [vmem:[%s1371_s19 + $0xc8] sm:$0xff]  ;;  %v215_v29 = vpack.c.bf16 %v195_v23, %v194_v22  ;;  %v208_v30 = vpack.c.bf16 %v181_v25, %v180_v24  ;;  %v182_v32 = vld [vmem:[%s1371_s19 + $0x50] sm:$0xff]  ;;  %446 = vst [vmem:[%s1425_s23 + $0x10] sm:$0xf] %v1333_v50 }
  0x15   : > { %1299 = vmatprep.mubr.msk.bf16.mxu1 %vm228_vm1, %v214_v19  ;;  %v216_v31 = vpack.c.bf16 %v197_v27, %v196_v26  ;;  %v183_v33 = vld [vmem:[%s1371_s19 + $0x58] sm:$0xff]  ;;  %v198_v34 = vld [vmem:[%s1371_s19 + $0xd0] sm:$0xff]  ;;  %v184_v36 = vld [vmem:[%s1371_s19 + $0x60] sm:$0xff]  ;;  %447 = vst [vmem:[%s1425_s23 + $0x14] sm:$0x1] %v1333_v50 }
  0x16   : > { %v199_v35 = vld [vmem:[%s1371_s19 + $0xd8] sm:$0xff]  ;;  %v185_v37 = vld [vmem:[%s1371_s19 + $0x68] sm:$0xff]  ;;  %v200_v38 = vld [vmem:[%s1371_s19 + $0xe0] sm:$0xff]  ;;  %v209_v40 = vpack.c.bf16 %v183_v33, %v182_v32  ;;  %449 = vst [vmem:[%s1425_s23 + $0x1c] sm:$0xf] %v1333_v50 }
  0x17   : > { %v201_v39 = vld [vmem:[%s1371_s19 + $0xe8] sm:$0xff]  ;;  %v217_v41 = vpack.c.bf16 %v199_v35, %v198_v34  ;;  %v210_v42 = vpack.c.bf16 %v185_v37, %v184_v36  ;;  %v186_v44 = vld [vmem:[%s1371_s19 + $0x70] sm:$0xff]  ;;  %v187_v45 = vld [vmem:[%s1371_s19 + $0x78] sm:$0xff]  ;;  %450 = vst [vmem:[%s1425_s23 + $0x20] sm:$0x1] %v1333_v50 }
  0x18   : > { %v218_v43 = vpack.c.bf16 %v201_v39, %v200_v38  ;;  %v202_v46 = vld [vmem:[%s1371_s19 + $0xf0] sm:$0xff]  ;;  %v203_v47 = vld [vmem:[%s1371_s19 + $0xf8] sm:$0xff]  ;;  %v211_v48 = vpack.c.bf16 %v187_v45, %v186_v44  ;;  %451 = vst [vmem:[%s1425_s23 + $0x24] sm:$0xf] %v1333_v50  ;;  %452 = vst [vmem:[%s1425_s23 + $0x28] sm:$0xf] %v1333_v50 }
  0x19   : > { %v219_v49 = vpack.c.bf16 %v203_v47, %v202_v46  ;;  %453 = vst [vmem:[%s1425_s23 + $0x2c] sm:$0x1] %v1333_v50  ;;  %454 = vst [vmem:[%s1425_s23 + $0x30] sm:$0xf] %v1333_v50  ;;  %v1150_v15 = vld [vmem:[%s1425_s23 + $0x18] sm:$0xf] }
  0x1a   : > { %1284 = vmatmul.mubr.msk.bf16.gmra.mxu0 %vm228_vm1, %v207_v28  ;;  %455 = vst [vmem:[%s1425_s23 + $0x34] sm:$0xf] %v1333_v50  ;;  %456 = vst [vmem:[%s1425_s23 + $0x38] sm:$0x1] %v1333_v50  ;;  %v1145_v28 = vld [vmem:[%s1425_s23 + $0xc] sm:$0xf] }
  0x1b   : > { %1300 = vmatmul.mubr.msk.bf16.gmra.mxu1 %vm228_vm1, %v215_v29  ;;  %1287 = vmatprep.mubr.msk.bf16.mxu0 %vm228_vm1, %v208_v30  ;;  %457 = vst [vmem:[%s1425_s23 + $0x3c] sm:$0xf] %v1333_v50  ;;  %458 = vst [vmem:[%s1425_s23 + $0x40] sm:$0xf] %v1333_v50 }
  0x1c   : > { %1303 = vmatprep.mubr.msk.bf16.mxu1 %vm228_vm1, %v216_v31  ;;  %459 = vst [vmem:[%s1425_s23 + $0x44] sm:$0x1] %v1333_v50  ;;  %460 = vst [vmem:[%s1425_s23 + $0x48] sm:$0xf] %v1333_v50 }
  0x1d   : > { %461 = vst [vmem:[%s1425_s23 + $0x4c] sm:$0xf] %v1333_v50  ;;  %462 = vst [vmem:[%s1425_s23 + $0x50] sm:$0x1] %v1333_v50 }
  0x1e   : > { %463 = vst [vmem:[%s1425_s23 + $0x54] sm:$0xf] %v1333_v50  ;;  %464 = vst [vmem:[%s1425_s23 + $0x58] sm:$0xf] %v1333_v50 }
  0x1f   : > { %465 = vst [vmem:[%s1425_s23 + $0x5c] sm:$0x1] %v1333_v50  ;;  %466 = vst [vmem:[%s1425_s23 + $0x60] sm:$0xf] %v1333_v50 }
  0x20   : > { %467 = vst [vmem:[%s1425_s23 + $0x64] sm:$0xf] %v1333_v50  ;;  %468 = vst [vmem:[%s1425_s23 + $0x68] sm:$0x1] %v1333_v50 }
  0x21   : > { %469 = vst [vmem:[%s1425_s23 + $0x6c] sm:$0xf] %v1333_v50  ;;  %470 = vst [vmem:[%s1425_s23 + $0x70] sm:$0xf] %v1333_v50 }
  0x22   : > { %1288 = vmatmul.mubr.msk.bf16.gmra.mxu0 %vm228_vm1, %v209_v40  ;;  %471 = vst [vmem:[%s1425_s23 + $0x74] sm:$0x1] %v1333_v50  ;;  %472 = vst [vmem:[%s1425_s23 + $0x78] sm:$0xf] %v1333_v50 }
  0x23   : > { %1304 = vmatmul.mubr.msk.bf16.gmra.mxu1 %vm228_vm1, %v217_v41  ;;  %1291 = vmatprep.mubr.msk.bf16.mxu0 %vm228_vm1, %v210_v42  ;;  %473 = vst [vmem:[%s1425_s23 + $0x7c] sm:$0xf] %v1333_v50  ;;  %474 = vst [vmem:[%s1425_s23 + $0x80] sm:$0x1] %v1333_v50  ;;  %v1153_v42 = vld [vmem:[%s1425_s23 + $0x20] sm:$0x1] }
  0x24   : > { %1307 = vmatprep.mubr.msk.bf16.mxu1 %vm228_vm1, %v218_v43  ;;  %475 = vst [vmem:[%s1425_s23 + $0x84] sm:$0xf] %v1333_v50  ;;  %476 = vst [vmem:[%s1425_s23 + $0x88] sm:$0xf] %v1333_v50 }
  0x25   : > { %477 = vst [vmem:[%s1425_s23 + $0x8c] sm:$0x1] %v1333_v50  ;;  %478 = vst [vmem:[%s1425_s23 + $0x90] sm:$0xf] %v1333_v50 }
  0x26   : > { %479 = vst [vmem:[%s1425_s23 + $0x94] sm:$0xf] %v1333_v50  ;;  %480 = vst [vmem:[%s1425_s23 + $0x98] sm:$0x1] %v1333_v50 }
  0x27   : > { %481 = vst [vmem:[%s1425_s23 + $0x9c] sm:$0xf] %v1333_v50  ;;  %482 = vst [vmem:[%s1425_s23 + $0xa0] sm:$0xf] %v1333_v50 }
  0x28   : > { %483 = vst [vmem:[%s1425_s23 + $0xa4] sm:$0x1] %v1333_v50  ;;  %484 = vst [vmem:[%s1425_s23 + $0xa8] sm:$0xf] %v1333_v50  ;;  %v1185_v35 = vld [vmem:[%s1425_s23 + $0x6c] sm:$0xf] }
  0x29   : > { %485 = vst [vmem:[%s1425_s23 + $0xac] sm:$0xf] %v1333_v50  ;;  %486 = vst [vmem:[%s1425_s23 + $0xb0] sm:$0x1] %v1333_v50  ;;  %v1190_v22 = vld [vmem:[%s1425_s23 + $0x78] sm:$0xf] }
  0x2a   : > { %1292 = vmatmul.mubr.msk.bf16.gmra.mxu0 %vm228_vm1, %v211_v48  ;;  %487 = vst [vmem:[%s1425_s23 + $0xb4] sm:$0xf] %v1333_v50  ;;  %488 = vst [vmem:[%s1425_s23 + $0xb8] sm:$0xf] %v1333_v50 }
  0x2b   : > { %1308 = vmatmul.mubr.msk.bf16.gmra.mxu1 %vm228_vm1, %v219_v49  ;;  %489 = vst [vmem:[%s1425_s23 + $0xbc] sm:$0x1] %v1333_v50  ;;  %490 = vst [vmem:[%s1425_s23 + $0xc0] sm:$0xf] %v1333_v50 }
  0x2c   : > { %491 = vst [vmem:[%s1425_s23 + $0xc4] sm:$0xf] %v1333_v50  ;;  %492 = vst [vmem:[%s1425_s23 + $0xc8] sm:$0x1] %v1333_v50 }
  0x2d   : > { %493 = vst [vmem:[%s1425_s23 + $0xcc] sm:$0xf] %v1333_v50  ;;  %494 = vst [vmem:[%s1425_s23 + $0xd0] sm:$0xf] %v1333_v50 }
  0x2e   : > { %495 = vst [vmem:[%s1425_s23 + $0xd4] sm:$0x1] %v1333_v50  ;;  %vm1494_vm7 = vmand %vm916_vm2, %vm917_vm3 }
  0x2f   : > { %vm1512_vm8 = vmor %vm592_vm4, %vm593_vm5 }
  0x30   : > { %vm1523_vm9 = vmand %vm923_vm6, %vm592_vm4 }
  0xd2   : > { %v1281_v52 = vpop.f32.mrf.mxu0 }
  0xd3   : > { %v324_v53 = vadd.f32 %v1281_v52, %v1484_v51  ;;  %v1297_v54 = vpop.f32.mrf.mxu1 }
  0xd4   : > { %v388_v55 = vadd.f32 %v1297_v54, %v1484_v51  ;;  %v315_v56 = vpop.f32.mrf.mxu0 }
  0xd5   : > { %v1230_v57 = vpack.c.bf16 %v324_v53, %v324_v53  ;;  %v316_v58 = vadd.f32 %v1484_v51, %v315_v56  ;;  %v379_v59 = vpop.f32.mrf.mxu1 }
  0xd6   : > { %v1246_v60 = vpack.c.bf16 %v388_v55, %v388_v55  ;;  %v380_v61 = vadd.f32 %v1484_v51, %v379_v59  ;;  %v1282_v62 = vpop.f32.mrf.mxu0 }
  0xd7   : > { %v613_v63 = vshrl.u32 %v1230_v57, 16  ;;  %v616_v0 = vshll.u32 %v1230_v57, 16  ;;  %v1228_v1 = vpack.c.bf16 %v316_v58, %v316_v58  ;;  %v327_v2 = vadd.f32 %v1282_v62, %v1484_v51  ;;  %v1298_v3 = vpop.f32.mrf.mxu1  ;;  %v1193_v57 = vld [vmem:[%s1425_s23 + $0x80] sm:$0x1] }
  0xd8   : > { %v749_v4 = vshrl.u32 %v1246_v60, 16  ;;  %v752_v5 = vshll.u32 %v1246_v60, 16  ;;  %v1244_v6 = vpack.c.bf16 %v380_v61, %v380_v61  ;;  %v391_v7 = vadd.f32 %v1298_v3, %v1484_v51  ;;  %v318_v8 = vpop.f32.mrf.mxu0 }
  0xd9   : > { %v615_v9 = vrot.slane %v613_v63, 7  ;;  %v596_v10 = vshrl.u32 %v1228_v1, 16  ;;  %v599_v11 = vshll.u32 %v1228_v1, 16  ;;  %v1231_v12 = vpack.c.bf16 %v327_v2, %v327_v2  ;;  %v382_v13 = vpop.f32.mrf.mxu1 }
  0xda   : > { %v751_v16 = vrot.slane %v749_v4, 7  ;;  %v732_v17 = vshrl.u32 %v1244_v6, 16  ;;  %v735_v18 = vshll.u32 %v1244_v6, 16  ;;  %v1247_v19 = vpack.c.bf16 %v391_v7, %v391_v7  ;;  %v1285_v25 = vpop.f32.mrf.mxu0 }
  0xdb   : > { %v618_v20 = vor.u32 %v616_v0, %v615_v9  ;;  %v619_v21 = vrot.slane %v615_v9, 4  ;;  %v1500_v23 = vrot.slane %v596_v10, 7  ;;  %v621_v24 = vshrl.u32 %v1231_v12, 16  ;;  %v1301_v31 = vpop.f32.mrf.mxu1 }
  0xdc   : > { %v754_v26 = vor.u32 %v752_v5, %v751_v16  ;;  %v755_v27 = vrot.slane %v751_v16, 4  ;;  %v1503_v29 = vrot.slane %v732_v17, 7  ;;  %v624_v30 = vshll.u32 %v1231_v12, 16  ;;  %v331_v48 = vpop.f32.mrf.mxu0 }
  0xdd   : > { %v929_v32 = vsel %vm1494_vm7, %v618_v20, %v1150_v15  ;;  %v601_v33 = vor.u32 %v599_v11, %v1500_v23  ;;  %v602_v34 = vrot.slane %v1500_v23, 4  ;;  %v623_v37 = vrot.slane %v621_v24, 7  ;;  %v395_v54 = vpop.f32.mrf.mxu1 }
  0xde   : > { %1151 = vst [vmem:[%s1425_s23 + $0x18] sm:$0xf] %v929_v32  ;;  %v985_v38 = vsel %vm1494_vm7, %v754_v26, %v1190_v22  ;;  %v737_v39 = vor.u32 %v735_v18, %v1503_v29  ;;  %v738_v40 = vrot.slane %v1503_v29, 4  ;;  %v757_v43 = vshrl.u32 %v1247_v19, 16  ;;  %v1286_v4 = vpop.f32.mrf.mxu0 }
  0xdf   : > { %1191 = vst [vmem:[%s1425_s23 + $0x78] sm:$0xf] %v985_v38  ;;  %v920_v44 = vsel %vm1494_vm7, %v601_v33, %v1145_v28  ;;  %v626_v45 = vor.u32 %v624_v30, %v623_v37  ;;  %v628_v46 = vrot.slane %v623_v37, 4  ;;  %v760_v47 = vshll.u32 %v1247_v19, 16  ;;  %v1302_v9 = vpop.f32.mrf.mxu1  ;;  %v1148_v19 = vld [vmem:[%s1425_s23 + $0x14] sm:$0x1] }
  0xe0   : > { %1146 = vst [vmem:[%s1425_s23 + $0xc] sm:$0xf] %v920_v44  ;;  %v978_v49 = vsel %vm1494_vm7, %v737_v39, %v1185_v35  ;;  %v759_v50 = vrot.slane %v757_v43, 7  ;;  %v319_v52 = vadd.f32 %v1484_v51, %v318_v8  ;;  %v383_v53 = vadd.f32 %v1484_v51, %v382_v13  ;;  %v334_v26 = vpop.f32.mrf.mxu0  ;;  %v1160_v30 = vld [vmem:[%s1425_s23 + $0x30] sm:$0xf] }
  0xe1   : > { %1186 = vst [vmem:[%s1425_s23 + $0x6c] sm:$0xf] %v978_v49  ;;  %v627_v55 = vsel %vm1512_vm8, %v619_v21, %v626_v45  ;;  %v933_v56 = vsel %vm1523_vm9, %v628_v46, %v1153_v42  ;;  %v340_v58 = vadd.f32 %v1285_v25, %v1484_v51  ;;  %v404_v59 = vadd.f32 %v1301_v31, %v1484_v51  ;;  %v1188_v21 = vld [vmem:[%s1425_s23 + $0x74] sm:$0x1]  ;;  %v398_v33 = vpop.f32.mrf.mxu1  ;;  %v1200_v42 = vld [vmem:[%s1425_s23 + $0x90] sm:$0xf] }
  0xe2   : > { %1152 = vst [vmem:[%s1425_s23 + $0x1c] sm:$0xf] %v627_v55  ;;  %1154 = vst [vmem:[%s1425_s23 + $0x20] sm:$0x1] %v933_v56  ;;  %v762_v60 = vor.u32 %v760_v47, %v759_v50  ;;  %v764_v61 = vrot.slane %v759_v50, 4  ;;  %v1229_v62 = vpack.c.bf16 %v319_v52, %v319_v52  ;;  %v1245_v63 = vpack.c.bf16 %v383_v53, %v383_v53  ;;  %v1289_v49 = vpop.f32.mrf.mxu0 }
  0xe3   : > { %v1234_v0 = vpack.c.bf16 %v340_v58, %v340_v58  ;;  %v1250_v1 = vpack.c.bf16 %v404_v59, %v404_v59  ;;  %v332_v2 = vadd.f32 %v1484_v51, %v331_v48  ;;  %v396_v3 = vadd.f32 %v1484_v51, %v395_v54  ;;  %v1155_v55 = vld [vmem:[%s1425_s23 + $0x24] sm:$0xf] }
  0xe4   : > { %v763_v5 = vsel %vm1512_vm8, %v755_v27, %v762_v60  ;;  %v989_v6 = vsel %vm1523_vm9, %v764_v61, %v1193_v57  ;;  %v604_v7 = vshrl.u32 %v1229_v62, 16  ;;  %v607_v8 = vshll.u32 %v1229_v62, 16 }
  0xe5   : > { %1192 = vst [vmem:[%s1425_s23 + $0x7c] sm:$0xf] %v763_v5  ;;  %1194 = vst [vmem:[%s1425_s23 + $0x80] sm:$0x1] %v989_v6  ;;  %v740_v10 = vshrl.u32 %v1245_v63, 16  ;;  %v743_v11 = vshll.u32 %v1245_v63, 16  ;;  %v1232_v18 = vpack.c.bf16 %v332_v2, %v332_v2  ;;  %v1248_v24 = vpack.c.bf16 %v396_v3, %v396_v3 }
  0xe6   : > { %v647_v12 = vshrl.u32 %v1234_v0, 16  ;;  %v650_v13 = vshll.u32 %v1234_v0, 16  ;;  %v606_v15 = vrot.slane %v604_v7, 7  ;;  %v783_v16 = vshrl.u32 %v1250_v1, 16  ;;  %v1195_v63 = vld [vmem:[%s1425_s23 + $0x84] sm:$0xf] }
  0xe7   : > { %v786_v17 = vshll.u32 %v1250_v1, 16  ;;  %v742_v20 = vrot.slane %v740_v10, 7  ;;  %v343_v25 = vadd.f32 %v1286_v4, %v1484_v51  ;;  %v630_v32 = vshrl.u32 %v1232_v18, 16  ;;  %v347_v4 = vpop.f32.mrf.mxu0 }
  0xe8   : > { %v1556_v22 = vrot.slane %v647_v12, 7  ;;  %v609_v27 = vor.u32 %v607_v8, %v606_v15  ;;  %v611_v28 = vrot.slane %v606_v15, 4  ;;  %v1560_v31 = vrot.slane %v783_v16, 7  ;;  %v1163_v16 = vld [vmem:[%s1425_s23 + $0x38] sm:$0x1] }
  0xe9   : > { %v745_v35 = vor.u32 %v743_v11, %v742_v20  ;;  %v747_v37 = vrot.slane %v742_v20, 4  ;;  %v1583_v48 = vrot.slane %v630_v32, 7  ;;  %v633_v50 = vshll.u32 %v1232_v18, 16 }
  0xea   : > { %v652_v38 = vor.u32 %v650_v13, %v1556_v22  ;;  %v653_v39 = vrot.slane %v1556_v22, 4  ;;  %v610_v43 = vsel %vm1512_vm8, %v602_v34, %v609_v27  ;;  %v926_v44 = vsel %vm1523_vm9, %v611_v28, %v1148_v19  ;;  %v1203_v27 = vld [vmem:[%s1425_s23 + $0x98] sm:$0x1] }
  0xeb   : > { %v788_v45 = vor.u32 %v786_v17, %v1560_v31  ;;  %v789_v46 = vrot.slane %v1560_v31, 4  ;;  %1147 = vst [vmem:[%s1425_s23 + $0x10] sm:$0xf] %v610_v43  ;;  %1149 = vst [vmem:[%s1425_s23 + $0x14] sm:$0x1] %v926_v44  ;;  %v746_v47 = vsel %vm1512_vm8, %v738_v40, %v745_v35  ;;  %v982_v23 = vsel %vm1523_vm9, %v747_v37, %v1188_v21  ;;  %v1305_v40 = vpop.f32.mrf.mxu1 }
  0xec   : > { %v943_v34 = vsel %vm1494_vm7, %v652_v38, %v1160_v30  ;;  %1187 = vst [vmem:[%s1425_s23 + $0x70] sm:$0xf] %v746_v47  ;;  %1189 = vst [vmem:[%s1425_s23 + $0x74] sm:$0x1] %v982_v23  ;;  %v766_v52 = vshrl.u32 %v1248_v24, 16  ;;  %v769_v53 = vshll.u32 %v1248_v24, 16  ;;  %v1235_v56 = vpack.c.bf16 %v343_v25, %v343_v25 }
  0xed   : > { %1161 = vst [vmem:[%s1425_s23 + $0x30] sm:$0xf] %v943_v34  ;;  %v999_v29 = vsel %vm1494_vm7, %v788_v45, %v1200_v42  ;;  %v636_v54 = vrot.slane %v1583_v48, 4  ;;  %v407_v57 = vadd.f32 %v1302_v9, %v1484_v51  ;;  %v335_v58 = vadd.f32 %v1484_v51, %v334_v26  ;;  %v411_v9 = vpop.f32.mrf.mxu1  ;;  %v1290_v26 = vpop.f32.mrf.mxu0  ;;  %v1158_v44 = vld [vmem:[%s1425_s23 + $0x2c] sm:$0x1] }
  0xee   : > { %1201 = vst [vmem:[%s1425_s23 + $0x90] sm:$0xf] %v999_v29  ;;  %v635_v59 = vor.u32 %v633_v50, %v1583_v48  ;;  %v768_v60 = vrot.slane %v766_v52, 7  ;;  %v399_v61 = vadd.f32 %v1484_v51, %v398_v33  ;;  %v356_v62 = vadd.f32 %v1289_v49, %v1484_v51  ;;  %v1198_v45 = vld [vmem:[%s1425_s23 + $0x8c] sm:$0x1] }
  0xef   : > { %v655_v0 = vshrl.u32 %v1235_v56, 16  ;;  %v658_v1 = vshll.u32 %v1235_v56, 16  ;;  %v1251_v2 = vpack.c.bf16 %v407_v57, %v407_v57  ;;  %v1233_v3 = vpack.c.bf16 %v335_v58, %v335_v58  ;;  %v1306_v35 = vpop.f32.mrf.mxu1  ;;  %v350_v50 = vpop.f32.mrf.mxu0 }
  0xf0   : > { %v936_v5 = vsel %vm1494_vm7, %v635_v59, %v1155_v55  ;;  %v771_v6 = vor.u32 %v769_v53, %v768_v60  ;;  %v772_v7 = vrot.slane %v768_v60, 4  ;;  %v1249_v8 = vpack.c.bf16 %v399_v61, %v399_v61 }
  0xf1   : > { %1156 = vst [vmem:[%s1425_s23 + $0x24] sm:$0xf] %v936_v5  ;;  %v657_v10 = vrot.slane %v655_v0, 7  ;;  %v791_v11 = vshrl.u32 %v1251_v2, 16  ;;  %v794_v12 = vshll.u32 %v1251_v2, 16  ;;  %v638_v13 = vshrl.u32 %v1233_v3, 16 }
  0xf2   : > { %v992_v15 = vsel %vm1494_vm7, %v771_v6, %v1195_v63  ;;  %v641_v17 = vshll.u32 %v1233_v3, 16  ;;  %v774_v18 = vshrl.u32 %v1249_v8, 16  ;;  %v777_v19 = vshll.u32 %v1249_v8, 16 }
  0xf3   : > { %1196 = vst [vmem:[%s1425_s23 + $0x84] sm:$0xf] %v992_v15  ;;  %v660_v20 = vor.u32 %v658_v1, %v657_v10  ;;  %v662_v21 = vrot.slane %v657_v10, 4  ;;  %v793_v24 = vrot.slane %v791_v11, 7  ;;  %v640_v25 = vrot.slane %v638_v13, 7 }
  0xf4   : > { %v776_v28 = vrot.slane %v774_v18, 7  ;;  %v1238_v30 = vpack.c.bf16 %v356_v62, %v356_v62  ;;  %v420_v32 = vadd.f32 %v1305_v40, %v1484_v51  ;;  %v348_v33 = vadd.f32 %v1484_v51, %v347_v4  ;;  %v414_v40 = vpop.f32.mrf.mxu1  ;;  %v1210_v10 = vld [vmem:[%s1425_s23 + $0xa8] sm:$0xf] }
  0xf5   : > { %v661_v37 = vsel %vm1512_vm8, %v653_v39, %v660_v20  ;;  %v947_v38 = vsel %vm1523_vm9, %v662_v21, %v1163_v16  ;;  %v796_v42 = vor.u32 %v794_v12, %v793_v24  ;;  %v798_v43 = vrot.slane %v793_v24, 4  ;;  %v1293_v16 = vpop.f32.mrf.mxu0 }
  0xf6   : > { %1162 = vst [vmem:[%s1425_s23 + $0x34] sm:$0xf] %v661_v37  ;;  %1164 = vst [vmem:[%s1425_s23 + $0x38] sm:$0x1] %v947_v38  ;;  %v643_v47 = vor.u32 %v641_v17, %v640_v25  ;;  %v645_v23 = vrot.slane %v640_v25, 4  ;;  %v779_v34 = vor.u32 %v777_v19, %v776_v28  ;;  %v781_v22 = vrot.slane %v776_v28, 4  ;;  %v1309_v24 = vpop.f32.mrf.mxu1 }
  0xf7   : > { %v797_v39 = vsel %vm1512_vm8, %v789_v46, %v796_v42  ;;  %v1003_v48 = vsel %vm1523_vm9, %v798_v43, %v1203_v27  ;;  %v681_v49 = vshrl.u32 %v1238_v30, 16  ;;  %v684_v29 = vshll.u32 %v1238_v30, 16  ;;  %v1165_v19 = vld [vmem:[%s1425_s23 + $0x3c] sm:$0xf] }
  0xf8   : > { %1202 = vst [vmem:[%s1425_s23 + $0x94] sm:$0xf] %v797_v39  ;;  %1204 = vst [vmem:[%s1425_s23 + $0x98] sm:$0x1] %v1003_v48  ;;  %v644_v52 = vsel %vm1512_vm8, %v636_v54, %v643_v47  ;;  %v940_v53 = vsel %vm1523_vm9, %v645_v23, %v1158_v44  ;;  %v780_v31 = vsel %vm1512_vm8, %v772_v7, %v779_v34  ;;  %v1170_v54 = vld [vmem:[%s1425_s23 + $0x48] sm:$0xf]  ;;  %v363_v23 = vpop.f32.mrf.mxu0 }
  0xf9   : > { %v996_v46 = vsel %vm1523_vm9, %v781_v22, %v1198_v45  ;;  %1157 = vst [vmem:[%s1425_s23 + $0x28] sm:$0xf] %v644_v52  ;;  %1159 = vst [vmem:[%s1425_s23 + $0x2c] sm:$0x1] %v940_v53  ;;  %v683_v55 = vrot.slane %v681_v49, 7  ;;  %v1254_v56 = vpack.c.bf16 %v420_v32, %v420_v32  ;;  %v1236_v57 = vpack.c.bf16 %v348_v33, %v348_v33  ;;  %v427_v49 = vpop.f32.mrf.mxu1 }
  0xfa   : > { %1197 = vst [vmem:[%s1425_s23 + $0x88] sm:$0xf] %v780_v31  ;;  %1199 = vst [vmem:[%s1425_s23 + $0x8c] sm:$0x1] %v996_v46  ;;  %v412_v58 = vadd.f32 %v1484_v51, %v411_v9  ;;  %v359_v59 = vadd.f32 %v1290_v26, %v1484_v51  ;;  %v423_v60 = vadd.f32 %v1306_v35, %v1484_v51  ;;  %v1205_v32 = vld [vmem:[%s1425_s23 + $0x9c] sm:$0xf] }
  0xfb   : > { %v351_v61 = vadd.f32 %v1484_v51, %v350_v50  ;;  %v686_v62 = vor.u32 %v684_v29, %v683_v55  ;;  %v687_v63 = vrot.slane %v683_v55, 4  ;;  %v817_v0 = vshrl.u32 %v1254_v56, 16  ;;  %v1173_v45 = vld [vmem:[%s1425_s23 + $0x50] sm:$0x1]  ;;  %v1168_v53 = vld [vmem:[%s1425_s23 + $0x44] sm:$0x1] }
  0xfc   : > { %v415_v1 = vadd.f32 %v1484_v51, %v414_v40  ;;  %v820_v2 = vshll.u32 %v1254_v56, 16  ;;  %v664_v3 = vshrl.u32 %v1236_v57, 16  ;;  %v1252_v4 = vpack.c.bf16 %v412_v58, %v412_v58  ;;  %v1213_v47 = vld [vmem:[%s1425_s23 + $0xb0] sm:$0x1] }
  0xfd   : > { %v1239_v5 = vpack.c.bf16 %v359_v59, %v359_v59  ;;  %v957_v6 = vsel %vm1494_vm7, %v686_v62, %v1170_v54  ;;  %v819_v7 = vrot.slane %v817_v0, 7  ;;  %v1255_v8 = vpack.c.bf16 %v423_v60, %v423_v60  ;;  %v1294_v60 = vpop.f32.mrf.mxu0 }
  0xfe   : > { %v1237_v9 = vpack.c.bf16 %v351_v61, %v351_v61  ;;  %1171 = vst [vmem:[%s1425_s23 + $0x48] sm:$0xf] %v957_v6  ;;  %v666_v11 = vrot.slane %v664_v3, 7  ;;  %v667_v12 = vshll.u32 %v1236_v57, 16  ;;  %v800_v13 = vshrl.u32 %v1252_v4, 16 }
  0xff   : > { %v689_v15 = vshrl.u32 %v1239_v5, 16  ;;  %v822_v17 = vor.u32 %v820_v2, %v819_v7  ;;  %v823_v18 = vrot.slane %v819_v7, 4  ;;  %v803_v20 = vshll.u32 %v1252_v4, 16  ;;  %v1208_v6 = vld [vmem:[%s1425_s23 + $0xa4] sm:$0x1] }
 0x100   : > { %v825_v21 = vshrl.u32 %v1255_v8, 16  ;;  %v669_v25 = vor.u32 %v667_v12, %v666_v11  ;;  %v1650_v26 = vrot.slane %v800_v13, 7  ;;  %v692_v28 = vshll.u32 %v1239_v5, 16 }
 0x101   : > { %v691_v27 = vrot.slane %v689_v15, 7  ;;  %v1013_v30 = vsel %vm1494_vm7, %v822_v17, %v1210_v10  ;;  %v828_v35 = vshll.u32 %v1255_v8, 16  ;;  %v672_v37 = vshrl.u32 %v1237_v9, 16 }
 0x102   : > { %v827_v33 = vrot.slane %v825_v21, 7  ;;  %1211 = vst [vmem:[%s1425_s23 + $0xa8] sm:$0xf] %v1013_v30  ;;  %v670_v38 = vrot.slane %v666_v11, 4  ;;  %v950_v42 = vsel %vm1494_vm7, %v669_v25, %v1165_v19  ;;  %v805_v43 = vor.u32 %v803_v20, %v1650_v26 }
 0x103   : > { %v694_v44 = vor.u32 %v692_v28, %v691_v27  ;;  %1166 = vst [vmem:[%s1425_s23 + $0x3c] sm:$0xf] %v950_v42  ;;  %v696_v34 = vrot.slane %v691_v27, 4  ;;  %v674_v48 = vrot.slane %v672_v37, 7  ;;  %v675_v52 = vshll.u32 %v1237_v9, 16 }
 0x104   : > { %v830_v22 = vor.u32 %v828_v35, %v827_v33  ;;  %v832_v39 = vrot.slane %v827_v33, 4  ;;  %v1006_v29 = vsel %vm1494_vm7, %v805_v43, %v1205_v32  ;;  %v1253_v31 = vpack.c.bf16 %v415_v1, %v415_v1  ;;  %v1310_v1 = vpop.f32.mrf.mxu1  ;;  %v1220_v35 = vld [vmem:[%s1425_s23 + $0xc0] sm:$0xf]  ;;  %v1175_v37 = vld [vmem:[%s1425_s23 + $0x54] sm:$0xf] }
 0x105   : > { %v695_v50 = vsel %vm1512_vm8, %v687_v63, %v694_v44  ;;  %1206 = vst [vmem:[%s1425_s23 + $0x9c] sm:$0xf] %v1006_v29  ;;  %v961_v46 = vsel %vm1523_vm9, %v696_v34, %v1173_v45  ;;  %v679_v56 = vrot.slane %v674_v48, 4  ;;  %v806_v57 = vrot.slane %v1650_v26, 4  ;;  %v1180_v26 = vld [vmem:[%s1425_s23 + $0x60] sm:$0xf] }
 0x106   : > { %1172 = vst [vmem:[%s1425_s23 + $0x4c] sm:$0xf] %v695_v50  ;;  %v831_v40 = vsel %vm1512_vm8, %v823_v18, %v830_v22  ;;  %v1017_v55 = vsel %vm1523_vm9, %v832_v39, %v1213_v47  ;;  %1174 = vst [vmem:[%s1425_s23 + $0x50] sm:$0x1] %v961_v46  ;;  %v677_v58 = vor.u32 %v675_v52, %v674_v48  ;;  %v808_v54 = vshrl.u32 %v1253_v31, 16  ;;  %v430_v48 = vpop.f32.mrf.mxu1 }
 0x107   : > { %1212 = vst [vmem:[%s1425_s23 + $0xac] sm:$0xf] %v831_v40  ;;  %1214 = vst [vmem:[%s1425_s23 + $0xb0] sm:$0x1] %v1017_v55  ;;  %v372_v59 = vadd.f32 %v1293_v16, %v1484_v51  ;;  %v954_v61 = vsel %vm1523_vm9, %v679_v56, %v1168_v53  ;;  %v436_v62 = vadd.f32 %v1309_v24, %v1484_v51  ;;  %v811_v4 = vshll.u32 %v1253_v31, 16 }
 0x108   : > { %v364_v63 = vadd.f32 %v1484_v51, %v363_v23  ;;  %v428_v0 = vadd.f32 %v1484_v51, %v427_v49  ;;  %v678_v2 = vsel %vm1512_vm8, %v670_v38, %v677_v58  ;;  %1169 = vst [vmem:[%s1425_s23 + $0x44] sm:$0x1] %v954_v61  ;;  %v810_v3 = vrot.slane %v808_v54, 7  ;;  %v1215_v47 = vld [vmem:[%s1425_s23 + $0xb4] sm:$0xf]  ;;  %v366_v23 = vpop.f32.mrf.mxu0 }
 0x109   : > { %v1242_v5 = vpack.c.bf16 %v372_v59, %v372_v59  ;;  %1167 = vst [vmem:[%s1425_s23 + $0x40] sm:$0xf] %v678_v2  ;;  %v1258_v7 = vpack.c.bf16 %v436_v62, %v436_v62  ;;  %v375_v10 = vadd.f32 %v1294_v60, %v1484_v51  ;;  %v439_v15 = vadd.f32 %v1310_v1, %v1484_v51  ;;  %v1183_v40 = vld [vmem:[%s1425_s23 + $0x68] sm:$0x1] }
 0x10a   : > { %v1240_v8 = vpack.c.bf16 %v364_v63, %v364_v63  ;;  %v1256_v9 = vpack.c.bf16 %v428_v0, %v428_v0  ;;  %v813_v11 = vor.u32 %v811_v4, %v810_v3  ;;  %v815_v12 = vrot.slane %v810_v3, 4  ;;  %v1223_v60 = vld [vmem:[%s1425_s23 + $0xc8] sm:$0x1] }
 0x10b   : > { %v715_v13 = vshrl.u32 %v1242_v5, 16  ;;  %v718_v16 = vshll.u32 %v1242_v5, 16  ;;  %v851_v17 = vshrl.u32 %v1258_v7, 16  ;;  %v854_v18 = vshll.u32 %v1258_v7, 16 }
 0x10c   : > { %v698_v19 = vshrl.u32 %v1240_v8, 16  ;;  %v814_v20 = vsel %vm1512_vm8, %v806_v57, %v813_v11  ;;  %v1010_v21 = vsel %vm1523_vm9, %v815_v12, %v1208_v6  ;;  %v834_v25 = vshrl.u32 %v1256_v9, 16 }
 0x10d   : > { %v717_v24 = vrot.slane %v715_v13, 7  ;;  %1207 = vst [vmem:[%s1425_s23 + $0xa0] sm:$0xf] %v814_v20  ;;  %1209 = vst [vmem:[%s1425_s23 + $0xa4] sm:$0x1] %v1010_v21  ;;  %v853_v27 = vrot.slane %v851_v17, 7  ;;  %v1243_v32 = vpack.c.bf16 %v375_v10, %v375_v10  ;;  %v1259_v43 = vpack.c.bf16 %v439_v15, %v439_v15 }
 0x10e   : > { %v1699_v28 = vrot.slane %v698_v19, 7  ;;  %v701_v30 = vshll.u32 %v1240_v8, 16  ;;  %v1703_v38 = vrot.slane %v834_v25, 7  ;;  %v837_v42 = vshll.u32 %v1256_v9, 16  ;;  %v1178_v8 = vld [vmem:[%s1425_s23 + $0x5c] sm:$0x1] }
 0x10f   : > { %v720_v33 = vor.u32 %v718_v16, %v717_v24  ;;  %v856_v44 = vor.u32 %v854_v18, %v853_v27  ;;  %v723_v39 = vshrl.u32 %v1243_v32, 16  ;;  %v859_v50 = vshrl.u32 %v1259_v43, 16  ;;  %v1218_v15 = vld [vmem:[%s1425_s23 + $0xbc] sm:$0x1] }
 0x110   : > { %v703_v45 = vor.u32 %v701_v30, %v1699_v28  ;;  %v839_v22 = vor.u32 %v837_v42, %v1703_v38  ;;  %v726_v31 = vshll.u32 %v1243_v32, 16  ;;  %v367_v46 = vadd.f32 %v1484_v51, %v366_v23 }
 0x111   : > { %v971_v34 = vsel %vm1494_vm7, %v720_v33, %v1180_v26  ;;  %v1027_v49 = vsel %vm1494_vm7, %v856_v44, %v1220_v35  ;;  %v725_v53 = vrot.slane %v723_v39, 7  ;;  %v861_v55 = vrot.slane %v859_v50, 7 }
 0x112   : > { %1181 = vst [vmem:[%s1425_s23 + $0x60] sm:$0xf] %v971_v34  ;;  %v964_v29 = vsel %vm1494_vm7, %v703_v45, %v1175_v37  ;;  %1221 = vst [vmem:[%s1425_s23 + $0xc0] sm:$0xf] %v1027_v49  ;;  %v1020_v52 = vsel %vm1494_vm7, %v839_v22, %v1215_v47  ;;  %v862_v56 = vshll.u32 %v1259_v43, 16  ;;  %v431_v57 = vadd.f32 %v1484_v51, %v430_v48 }
 0x113   : > { %1176 = vst [vmem:[%s1425_s23 + $0x54] sm:$0xf] %v964_v29  ;;  %1216 = vst [vmem:[%s1425_s23 + $0xb4] sm:$0xf] %v1020_v52  ;;  %v721_v58 = vrot.slane %v717_v24, 4  ;;  %v728_v54 = vor.u32 %v726_v31, %v725_v53  ;;  %v730_v59 = vrot.slane %v725_v53, 4  ;;  %v1241_v14 = vpack.c.bf16 %v367_v46, %v367_v46 }
 0x114   : > { %v857_v61 = vrot.slane %v853_v27, 4  ;;  %v864_v62 = vor.u32 %v862_v56, %v861_v55  ;;  %v866_v63 = vrot.slane %v861_v55, 4  ;;  %v1257_v0 = vpack.c.bf16 %v431_v57, %v431_v57 }
 0x115   : > { %v729_v1 = vsel %vm1512_vm8, %v721_v58, %v728_v54  ;;  %v975_v2 = vsel %vm1523_vm9, %v730_v59, %v1183_v40  ;;  %v706_v3 = vshrl.u32 %v1241_v14, 16  ;;  %v709_v7 = vshll.u32 %v1241_v14, 16 }
 0x116   : > { %1182 = vst [vmem:[%s1425_s23 + $0x64] sm:$0xf] %v729_v1  ;;  %1184 = vst [vmem:[%s1425_s23 + $0x68] sm:$0x1] %v975_v2  ;;  %v865_v51 = vsel %vm1512_vm8, %v857_v61, %v864_v62  ;;  %v1031_v4 = vsel %vm1523_vm9, %v866_v63, %v1223_v60  ;;  %v842_v5 = vshrl.u32 %v1257_v0, 16  ;;  %v845_v10 = vshll.u32 %v1257_v0, 16 }
 0x117   : > { %1222 = vst [vmem:[%s1425_s23 + $0xc4] sm:$0xf] %v865_v51  ;;  %1224 = vst [vmem:[%s1425_s23 + $0xc8] sm:$0x1] %v1031_v4  ;;  %v708_v6 = vrot.slane %v706_v3, 7  ;;  %v704_v11 = vrot.slane %v1699_v28, 4 }
 0x118   : > { %v844_v9 = vrot.slane %v842_v5, 7  ;;  %v840_v16 = vrot.slane %v1703_v38, 4 }
 0x119   : > { %v711_v12 = vor.u32 %v709_v7, %v708_v6  ;;  %v713_v13 = vrot.slane %v708_v6, 4 }
 0x11a   : > { %v847_v17 = vor.u32 %v845_v10, %v844_v9  ;;  %v849_v18 = vrot.slane %v844_v9, 4 }
 0x11b   : > { %v712_v19 = vsel %vm1512_vm8, %v704_v11, %v711_v12  ;;  %v968_v20 = vsel %vm1523_vm9, %v713_v13, %v1178_v8 }
 0x11c   : > { %1177 = vst [vmem:[%s1425_s23 + $0x58] sm:$0xf] %v712_v19  ;;  %1179 = vst [vmem:[%s1425_s23 + $0x5c] sm:$0x1] %v968_v20  ;;  %v848_v21 = vsel %vm1512_vm8, %v840_v16, %v847_v17  ;;  %v1024_v24 = vsel %vm1523_vm9, %v849_v18, %v1218_v15 }
 0x11d   : > { %1217 = vst [vmem:[%s1425_s23 + $0xb8] sm:$0xf] %v848_v21  ;;  %1219 = vst [vmem:[%s1425_s23 + $0xbc] sm:$0x1] %v1024_v24 }
 0x11e PF: > { %s13_s12 = sadd.s32 1, %s1331_s12  }
 0x11f   : > { %p10_p4 = scmp.ge.s32.totalorder %s13_s12, 4  }
 0x121   :  { %12 = sbr.rel (!%p10_p4) target bundleno = 1 (0x1), region = 63 }

// kernel: rrcnn_block.17
= control target key start
LH: loop header
LB: loop body
LE: loop exit
PB: predicated region body
PF: predicated region fallthrough
CT: control target
= control target key end

     0   :  { %s1803_s15 = smov 0   ;;  %s2331_s0 = inlined_call_operand.vmem [shape: f32[2,256,128], index: 0, kind: input, shape index: {}]   ;;  %s2332_s1 = inlined_call_operand.vmem [shape: f32[1,128], index: 1, kind: input, shape index: {}]   ;;  %s2333_s2 = inlined_call_operand.vmem [shape: f32[1,128], index: 2, kind: input, shape index: {}]   ;;  %s2334_s3 = inlined_call_operand.vmem [shape: bf16[2,18,18,128], index: 3, kind: input, shape index: {}]   ;;  %s2335_s4 = inlined_call_operand.vmem [shape: bf16[2,18,18,128], index: 4, kind: output, shape index: {}]  }
   0x1 LB: > { %s1551_s16 = sadd.s32 4294967295, %s1775_s15   ;;  %p1555_p0 = scmp.ge.s32.totalorder %s1775_s15, 1  ;;  %s1775_s15 = sphi %s1803_s15, %s14_s15  }
   0x2   : > { %p172_p1 = scmp.lt.s32.totalorder %s1775_s15, 3 }
   0x4   : > { %p173_p2 = pnand %p1555_p0, %p172_p1 }
   0x5   : > { %p203_p3 = scmp.lt.s32.totalorder (!%p173_p2), %s1551_s16, 1 }
   0x6   : > { %176 = sbr.rel (%p173_p2) target bundleno = 202 (0xca), region = 36 }
   0xb   : > { %s2345_s16 = smov (!%p203_p3, %s1551_s16), 1  ;;  %v1814_v0 = vld [vmem:[%s2332_s1] ss:$0 sm:$0xff]  ;;  %vm410_vm0 = vsmask.f32 3328  ;;  %v1777_v5 = vmov 0  }
   0xc   : > { %s1757_s17 = smul.u32 216, %s2345_s16  ;;  %s1724_s18 = sshll.u32 %s2345_s16, 8  ;;  %v1824_v1 = vld [vmem:[%s2333_s2] ss:$0 sm:$0xff]  ;;  %vm411_vm1 = vsmask.f32 7440 }
   0xd   : > { %s1819_s23 = scalar_lea.vmem %s2331_s0, %s1724_s18  ;;  %vm1913_vm2 = vmor %vm410_vm0, %vm411_vm1  ;;  %vm1367_vm3 = vcmask 1043456   ;;  %vm1368_vm4 = vsmask.f32 7938  ;;  %vm1043_vm5 = vsmask.f32 256  ;;  %vm1374_vm7 = vcmask 1040384  }
   0xe   : > { %s1829_s28 = scalar_lea.vmem %s2335_s4, %s1757_s17  ;;  %s1834_s5 = scalar_lea.vmem %s2334_s3, %s1757_s17  ;;  %v219_v2 = vld [vmem:[%s1819_s23] sm:$0xff]  ;;  %v220_v3 = vld [vmem:[%s1819_s23 + $0x8] sm:$0xff]  ;;  %v221_v4 = vld [vmem:[%s1819_s23 + $0x10] sm:$0xff]  ;;  %vm1044_vm6 = vsmask.f32 4368 }
   0xf   : > { %896 = vst [vmem:[%s1829_s28 + $0xc] sm:$0xf] %v1777_v5  ;;  %893 = vst [vmem:[%s1829_s28] sm:$0xf] %v1777_v5  ;;  %v258_v6 = vmul.f32 %v1814_v0, %v219_v2  ;;  %v1562_v7 = vld [vmem:[%s1834_s5 + $0xc] sm:$0xf]  ;;  %v259_v9 = vmul.f32 %v1814_v0, %v220_v3  ;;  %v260_v11 = vmul.f32 %v1814_v0, %v221_v4  ;;  %v222_v22 = vld [vmem:[%s1819_s23 + $0x18] sm:$0xff] }
  0x10   : > { %894 = vst [vmem:[%s1829_s28 + $0x4] sm:$0xf] %v1777_v5  ;;  %895 = vst [vmem:[%s1829_s28 + $0x8] sm:$0x1] %v1777_v5  ;;  %v1563_v8 = vld [vmem:[%s1834_s5 + $0x10] sm:$0xf]  ;;  %v261_v40 = vmul.f32 %v1814_v0, %v222_v22 }
  0x11   : > { %897 = vst [vmem:[%s1829_s28 + $0x10] sm:$0xf] %v1777_v5  ;;  %898 = vst [vmem:[%s1829_s28 + $0x14] sm:$0x1] %v1777_v5  ;;  %v1564_v10 = vld [vmem:[%s1834_s5 + $0x14] sm:$0x1]  ;;  %v297_v16 = vadd.f32 %v1824_v1, %v258_v6  ;;  %v298_v17 = vadd.f32 %v1824_v1, %v259_v9  ;;  %v1902_v19 = vadd.f32 %v1824_v1, %v260_v11 }
  0x12   : > { %899 = vst [vmem:[%s1829_s28 + $0x18] sm:$0xf] %v1777_v5  ;;  %900 = vst [vmem:[%s1829_s28 + $0x1c] sm:$0xf] %v1777_v5  ;;  %v414_v12 = vshrl.u32 %v1562_v7, 16  ;;  %v417_v13 = vshll.u32 %v1562_v7, 16  ;;  %v300_v50 = vadd.f32 %v1824_v1, %v261_v40 }
  0x13   : > { %901 = vst [vmem:[%s1829_s28 + $0x20] sm:$0x1] %v1777_v5  ;;  %902 = vst [vmem:[%s1829_s28 + $0x24] sm:$0xf] %v1777_v5  ;;  %v423_v14 = vshll.u32 %v1563_v8, 16  ;;  %v427_v15 = vshrl.u32 %v1563_v8, 16 }
  0x14   : > { %903 = vst [vmem:[%s1829_s28 + $0x28] sm:$0xf] %v1777_v5  ;;  %904 = vst [vmem:[%s1829_s28 + $0x2c] sm:$0x1] %v1777_v5  ;;  %v433_v18 = vshll.u32 %v1564_v10, 16  ;;  %v416_v23 = vrot.slane %v414_v12, 4 }
  0x15   : > { %905 = vst [vmem:[%s1829_s28 + $0x30] sm:$0xf] %v1777_v5  ;;  %906 = vst [vmem:[%s1829_s28 + $0x34] sm:$0xf] %v1777_v5  ;;  %v1565_v20 = vld [vmem:[%s1834_s5 + $0x18] sm:$0xf] }
  0x16   : > { %907 = vst [vmem:[%s1829_s28 + $0x38] sm:$0x1] %v1777_v5  ;;  %908 = vst [vmem:[%s1829_s28 + $0x3c] sm:$0xf] %v1777_v5  ;;  %v1566_v21 = vld [vmem:[%s1834_s5 + $0x1c] sm:$0xf] }
  0x17   : > { %909 = vst [vmem:[%s1829_s28 + $0x40] sm:$0xf] %v1777_v5  ;;  %910 = vst [vmem:[%s1829_s28 + $0x44] sm:$0x1] %v1777_v5  ;;  %v419_v24 = vrot.slane %v417_v13, 5  ;;  %v425_v25 = vrot.slane %v423_v14, 5 }
  0x18   : > { %911 = vst [vmem:[%s1829_s28 + $0x48] sm:$0xf] %v1777_v5  ;;  %912 = vst [vmem:[%s1829_s28 + $0x4c] sm:$0xf] %v1777_v5  ;;  %v429_v26 = vrot.slane %v427_v15, 4  ;;  %v329_v28 = vmax.f32 %v297_v16, 0.0 }
  0x19   : > { %913 = vst [vmem:[%s1829_s28 + $0x50] sm:$0x1] %v1777_v5  ;;  %914 = vst [vmem:[%s1829_s28 + $0x54] sm:$0xf] %v1777_v5  ;;  %v1567_v27 = vld [vmem:[%s1834_s5 + $0x20] sm:$0x1]  ;;  %v420_v34 = vor.u32 %v419_v24, %v416_v23 }
  0x1a   : > { %915 = vst [vmem:[%s1829_s28 + $0x58] sm:$0xf] %v1777_v5  ;;  %916 = vst [vmem:[%s1829_s28 + $0x5c] sm:$0x1] %v1777_v5  ;;  %v330_v29 = vmax.f32 %v298_v17, 0.0  ;;  %v435_v30 = vrot.slane %v433_v18, 5  ;;  %v430_v35 = vor.u32 %v429_v26, %v425_v25 }
  0x1b   : > { %917 = vst [vmem:[%s1829_s28 + $0x60] sm:$0xf] %v1777_v5  ;;  %918 = vst [vmem:[%s1829_s28 + $0x64] sm:$0xf] %v1777_v5  ;;  %v331_v31 = vmax.f32 %v1902_v19, 0.0  ;;  %v223_v32 = vld [vmem:[%s1819_s23 + $0x20] sm:$0xff] }
  0x1c   : > { %919 = vst [vmem:[%s1829_s28 + $0x68] sm:$0x1] %v1777_v5  ;;  %920 = vst [vmem:[%s1829_s28 + $0x6c] sm:$0xf] %v1777_v5  ;;  %v224_v33 = vld [vmem:[%s1819_s23 + $0x28] sm:$0xff]  ;;  %v438_v36 = vshrl.u32 %v1565_v20, 16  ;;  %v262_v45 = vmul.f32 %v1814_v0, %v223_v32 }
  0x1d   : > { %921 = vst [vmem:[%s1829_s28 + $0x70] sm:$0xf] %v1777_v5  ;;  %922 = vst [vmem:[%s1829_s28 + $0x74] sm:$0x1] %v1777_v5  ;;  %v441_v37 = vshll.u32 %v1565_v20, 16  ;;  %v447_v39 = vshll.u32 %v1566_v21, 16  ;;  %v263_v46 = vmul.f32 %v1814_v0, %v224_v33 }
  0x1e   : > { %923 = vst [vmem:[%s1829_s28 + $0x78] sm:$0xf] %v1777_v5  ;;  %924 = vst [vmem:[%s1829_s28 + $0x7c] sm:$0xf] %v1777_v5  ;;  %v451_v41 = vshrl.u32 %v1566_v21, 16  ;;  %v457_v42 = vshll.u32 %v1567_v27, 16  ;;  %v301_v62 = vadd.f32 %v1824_v1, %v262_v45 }
  0x1f   : > { %925 = vst [vmem:[%s1829_s28 + $0x80] sm:$0x1] %v1777_v5  ;;  %926 = vst [vmem:[%s1829_s28 + $0x84] sm:$0xf] %v1777_v5  ;;  %v421_v43 = vrot.slane %v420_v34, 4  ;;  %v431_v44 = vrot.slane %v430_v35, 4  ;;  %v1933_v18 = vadd.f32 %v1824_v1, %v263_v46 }
  0x20   : > { %927 = vst [vmem:[%s1829_s28 + $0x88] sm:$0xf] %v1777_v5  ;;  %928 = vst [vmem:[%s1829_s28 + $0x8c] sm:$0x1] %v1777_v5  ;;  %v440_v47 = vrot.slane %v438_v36, 4  ;;  %v443_v48 = vrot.slane %v441_v37, 5 }
  0x21   : > { %929 = vst [vmem:[%s1829_s28 + $0x90] sm:$0xf] %v1777_v5  ;;  %930 = vst [vmem:[%s1829_s28 + $0x94] sm:$0xf] %v1777_v5  ;;  %v449_v49 = vrot.slane %v447_v39, 5  ;;  %v426_v52 = vsel %vm1913_vm2, %v421_v43, %v425_v25  ;;  %v436_v53 = vsel %vm1913_vm2, %v431_v44, %v435_v30  ;;  %v453_v54 = vrot.slane %v451_v41, 4 }
  0x22   : > { %931 = vst [vmem:[%s1829_s28 + $0x98] sm:$0x1] %v1777_v5  ;;  %932 = vst [vmem:[%s1829_s28 + $0x9c] sm:$0xf] %v1777_v5  ;;  %v1568_v51 = vld [vmem:[%s1834_s5 + $0x24] sm:$0xf]  ;;  %v829_v57 = vunpack.c.l.bf16 %v426_v52  ;;  %v830_v58 = vunpack.c.l.bf16 %v436_v53  ;;  %v444_v59 = vor.u32 %v443_v48, %v440_v47 }
  0x23   : > { %933 = vst [vmem:[%s1829_s28 + $0xa0] sm:$0xf] %v1777_v5  ;;  %934 = vst [vmem:[%s1829_s28 + $0xa4] sm:$0x1] %v1777_v5  ;;  %v459_v55 = vrot.slane %v457_v42, 5  ;;  %v332_v60 = vmax.f32 %v300_v50, 0.0  ;;  %v454_v61 = vor.u32 %v453_v54, %v449_v49 }
  0x24   : > { %935 = vst [vmem:[%s1829_s28 + $0xa8] sm:$0xf] %v1777_v5  ;;  %936 = vst [vmem:[%s1829_s28 + $0xac] sm:$0xf] %v1777_v5  ;;  %v1569_v56 = vld [vmem:[%s1834_s5 + $0x28] sm:$0xf]  ;;  %v861_v3 = vadd.f32 %v829_v57, %v329_v28  ;;  %v862_v4 = vadd.f32 %v830_v58, %v330_v29 }
  0x25   : > { %937 = vst [vmem:[%s1829_s28 + $0xb0] sm:$0x1] %v1777_v5  ;;  %938 = vst [vmem:[%s1829_s28 + $0xb4] sm:$0xf] %v1777_v5  ;;  %v462_v63 = vshrl.u32 %v1568_v51, 16  ;;  %v465_v2 = vshll.u32 %v1568_v51, 16 }
  0x26   : > { %939 = vst [vmem:[%s1829_s28 + $0xb8] sm:$0xf] %v1777_v5  ;;  %940 = vst [vmem:[%s1829_s28 + $0xbc] sm:$0x1] %v1777_v5  ;;  %v471_v6 = vshll.u32 %v1569_v56, 16  ;;  %v455_v7 = vrot.slane %v454_v61, 4  ;;  %v1725_v11 = vpack.c.bf16 %v861_v3, %v861_v3  ;;  %v1726_v12 = vpack.c.bf16 %v862_v4, %v862_v4 }
  0x27   : > { %941 = vst [vmem:[%s1829_s28 + $0xc0] sm:$0xf] %v1777_v5  ;;  %942 = vst [vmem:[%s1829_s28 + $0xc4] sm:$0xf] %v1777_v5  ;;  %v333_v8 = vmax.f32 %v301_v62, 0.0  ;;  %v464_v9 = vrot.slane %v462_v63, 4 }
  0x28   : > { %943 = vst [vmem:[%s1829_s28 + $0xc8] sm:$0x1] %v1777_v5  ;;  %944 = vst [vmem:[%s1829_s28 + $0xcc] sm:$0xf] %v1777_v5  ;;  %v467_v10 = vrot.slane %v465_v2, 5  ;;  %v473_v14 = vrot.slane %v471_v6, 5  ;;  %v460_v16 = vsel %vm1913_vm2, %v455_v7, %v459_v55 }
  0x29   : > { %945 = vst [vmem:[%s1829_s28 + $0xd0] sm:$0xf] %v1777_v5  ;;  %946 = vst [vmem:[%s1829_s28 + $0xd4] sm:$0x1] %v1777_v5  ;;  %v445_v5 = vrot.slane %v444_v59, 4  ;;  %v1047_v20 = vshrl.u32 %v1725_v11, 16  ;;  %v832_v27 = vunpack.c.l.bf16 %v460_v16 }
  0x2a   : > { %v468_v17 = vor.u32 %v467_v10, %v464_v9  ;;  %v1570_v19 = vld [vmem:[%s1834_s5 + $0x2c] sm:$0x1]  ;;  %v1050_v21 = vshll.u32 %v1725_v11, 16  ;;  %v1055_v22 = vshrl.u32 %v1726_v12, 16  ;;  %v1058_v23 = vshll.u32 %v1726_v12, 16  ;;  %v225_v24 = vld [vmem:[%s1819_s23 + $0x30] sm:$0xff]  ;;  %vm1939_vm8 = vmand %vm1367_vm3, %vm1368_vm4 }
  0x2b   : > { %v450_v13 = vsel %vm1913_vm2, %v445_v5, %v449_v49  ;;  %v334_v29 = vmax.f32 %v1933_v18, 0.0  ;;  %v1049_v30 = vrot.slane %v1047_v20, 7  ;;  %vm1946_vm9 = vmor %vm1043_vm5, %vm1044_vm6  ;;  %v475_v34 = vshrl.u32 %v1569_v56, 16  ;;  %v1642_v36 = vld [vmem:[%s1829_s28 + $0xc] sm:$0xf] }
  0x2c   : > { %v831_v15 = vunpack.c.l.bf16 %v450_v13  ;;  %v469_v28 = vrot.slane %v468_v17, 4  ;;  %v1057_v33 = vrot.slane %v1055_v22, 7  ;;  %v481_v35 = vshll.u32 %v1570_v19, 16  ;;  %vm1953_vm10 = vmand %vm1374_vm7, %vm1043_vm5  ;;  %v1645_v37 = vld [vmem:[%s1829_s28 + $0x14] sm:$0x1]  ;;  %v226_v17 = vld [vmem:[%s1819_s23 + $0x38] sm:$0xff] }
  0x2d   : > { %v864_v40 = vadd.f32 %v832_v27, %v332_v60  ;;  %v264_v42 = vmul.f32 %v1814_v0, %v225_v24  ;;  %v1052_v43 = vor.u32 %v1050_v21, %v1049_v30  ;;  %v1053_v44 = vrot.slane %v1049_v30, 4  ;;  %v1571_v51 = vld [vmem:[%s1834_s5 + $0x30] sm:$0xf]  ;;  %v1647_v60 = vld [vmem:[%s1829_s28 + $0x18] sm:$0xf]  ;;  %v227_v30 = vld [vmem:[%s1819_s23 + $0x40] sm:$0xff] }
  0x2e   : > { %v863_v26 = vadd.f32 %v831_v15, %v331_v31  ;;  %v474_v41 = vsel %vm1913_vm2, %v469_v28, %v473_v14  ;;  %v1060_v45 = vor.u32 %v1058_v23, %v1057_v33  ;;  %v1062_v46 = vrot.slane %v1057_v33, 4  ;;  %v1572_v7 = vld [vmem:[%s1834_s5 + $0x34] sm:$0xf]  ;;  %v1650_v9 = vld [vmem:[%s1829_s28 + $0x20] sm:$0x1] }
  0x2f   : > { %v1728_v49 = vpack.c.bf16 %v864_v40, %v864_v40  ;;  %v833_v50 = vunpack.c.l.bf16 %v474_v41  ;;  %v1371_v52 = vsel %vm1939_vm8, %v1052_v43, %v1642_v36  ;;  %v477_v55 = vrot.slane %v475_v34, 4  ;;  %v1573_v23 = vld [vmem:[%s1834_s5 + $0x38] sm:$0x1]  ;;  %v1652_v33 = vld [vmem:[%s1829_s28 + $0x24] sm:$0xf] }
  0x30   : > { %v1727_v39 = vpack.c.bf16 %v863_v26, %v863_v26  ;;  %v1061_v53 = vsel %vm1946_vm9, %v1053_v44, %v1060_v45  ;;  %v1377_v54 = vsel %vm1953_vm10, %v1062_v46, %v1645_v37  ;;  %1643 = vst [vmem:[%s1829_s28 + $0xc] sm:$0xf] %v1371_v52  ;;  %v483_v62 = vrot.slane %v481_v35, 5 }
  0x31   : > { %1644 = vst [vmem:[%s1829_s28 + $0x10] sm:$0xf] %v1061_v53  ;;  %1646 = vst [vmem:[%s1829_s28 + $0x14] sm:$0x1] %v1377_v54  ;;  %v1072_v57 = vshrl.u32 %v1728_v49, 16  ;;  %v1075_v58 = vshll.u32 %v1728_v49, 16  ;;  %v865_v59 = vadd.f32 %v833_v50, %v333_v8  ;;  %v478_v61 = vor.u32 %v477_v55, %v473_v14 }
  0x32   : > { %v1064_v47 = vshrl.u32 %v1727_v39, 16  ;;  %v1067_v48 = vshll.u32 %v1727_v39, 16  ;;  %v1973_v63 = vadd.f32 %v1824_v1, %v264_v42  ;;  %v486_v2 = vshrl.u32 %v1571_v51, 16  ;;  %v1574_v39 = vld [vmem:[%s1834_s5 + $0x3c] sm:$0xf]  ;;  %v228_v55 = vld [vmem:[%s1819_s23 + $0x48] sm:$0xff] }
  0x33   : > { %v1074_v5 = vrot.slane %v1072_v57, 7  ;;  %v1729_v6 = vpack.c.bf16 %v865_v59, %v865_v59  ;;  %v479_v10 = vrot.slane %v478_v61, 4  ;;  %v489_v12 = vshll.u32 %v1571_v51, 16  ;;  %v1575_v51 = vld [vmem:[%s1834_s5 + $0x40] sm:$0xf] }
  0x34   : > { %v1066_v56 = vrot.slane %v1064_v47, 7  ;;  %v335_v11 = vmax.f32 %v1973_v63, 0.0  ;;  %v488_v8 = vrot.slane %v486_v2, 4  ;;  %v495_v22 = vshll.u32 %v1572_v7, 16 }
  0x35   : > { %v1077_v14 = vor.u32 %v1075_v58, %v1074_v5  ;;  %v1079_v15 = vrot.slane %v1074_v5, 4  ;;  %v1081_v16 = vshrl.u32 %v1729_v6, 16  ;;  %v1084_v19 = vshll.u32 %v1729_v6, 16 }
  0x36   : > { %v1069_v3 = vor.u32 %v1067_v48, %v1066_v56  ;;  %v1070_v4 = vrot.slane %v1066_v56, 4  ;;  %v484_v20 = vsel %vm1913_vm2, %v479_v10, %v483_v62  ;;  %v491_v21 = vrot.slane %v489_v12, 5 }
  0x37   : > { %v1384_v26 = vsel %vm1953_vm10, %v1079_v15, %v1650_v9  ;;  %v1083_v27 = vrot.slane %v1081_v16, 7  ;;  %v834_v28 = vunpack.c.l.bf16 %v484_v20  ;;  %v497_v35 = vrot.slane %v495_v22, 5  ;;  %v1577_v22 = vld [vmem:[%s1834_s5 + $0x48] sm:$0xf] }
  0x38   : > { %v1380_v13 = vsel %vm1939_vm8, %v1069_v3, %v1647_v60  ;;  %v1078_v24 = vsel %vm1946_vm9, %v1070_v4, %v1077_v14  ;;  %1651 = vst [vmem:[%s1829_s28 + $0x20] sm:$0x1] %v1384_v26  ;;  %v492_v34 = vor.u32 %v491_v21, %v488_v8  ;;  %v265_v36 = vmul.f32 %v1814_v0, %v226_v17  ;;  %v1576_v60 = vld [vmem:[%s1834_s5 + $0x44] sm:$0x1]  ;;  %v229_v21 = vld [vmem:[%s1819_s23 + $0x50] sm:$0xff] }
  0x39   : > { %1648 = vst [vmem:[%s1829_s28 + $0x18] sm:$0xf] %v1380_v13  ;;  %1649 = vst [vmem:[%s1829_s28 + $0x1c] sm:$0xf] %v1078_v24  ;;  %v499_v37 = vshrl.u32 %v1572_v7, 16  ;;  %v1086_v40 = vor.u32 %v1084_v19, %v1083_v27  ;;  %v866_v41 = vadd.f32 %v834_v28, %v334_v29  ;;  %v1087_v42 = vrot.slane %v1083_v27, 4 }
  0x3a   : > { %v505_v43 = vshll.u32 %v1573_v23, 16  ;;  %v493_v44 = vrot.slane %v492_v34, 4  ;;  %v304_v45 = vadd.f32 %v1824_v1, %v265_v36  ;;  %v266_v47 = vmul.f32 %v1814_v0, %v227_v30  ;;  %v1655_v7 = vld [vmem:[%s1829_s28 + $0x2c] sm:$0x1] }
  0x3b   : > { %v501_v46 = vrot.slane %v499_v37, 4  ;;  %v1387_v48 = vsel %vm1939_vm8, %v1086_v40, %v1652_v33  ;;  %v1730_v49 = vpack.c.bf16 %v866_v41, %v866_v41  ;;  %v510_v52 = vshrl.u32 %v1574_v39, 16  ;;  %v1578_v28 = vld [vmem:[%s1834_s5 + $0x4c] sm:$0xf]  ;;  %v1657_v41 = vld [vmem:[%s1829_s28 + $0x30] sm:$0xf] }
  0x3c   : > { %v507_v50 = vrot.slane %v505_v43, 5  ;;  %1653 = vst [vmem:[%s1829_s28 + $0x24] sm:$0xf] %v1387_v48  ;;  %v498_v18 = vsel %vm1913_vm2, %v493_v44, %v497_v35  ;;  %v336_v29 = vmax.f32 %v304_v45, 0.0  ;;  %v305_v54 = vadd.f32 %v1824_v1, %v266_v47 }
  0x3d   : > { %v502_v53 = vor.u32 %v501_v46, %v497_v35  ;;  %v1089_v56 = vshrl.u32 %v1730_v49, 16  ;;  %v1092_v57 = vshll.u32 %v1730_v49, 16  ;;  %v835_v58 = vunpack.c.l.bf16 %v498_v18 }
  0x3e   : > { %v512_v59 = vrot.slane %v510_v52, 4  ;;  %v337_v62 = vmax.f32 %v305_v54, 0.0  ;;  %v513_v63 = vshll.u32 %v1574_v39, 16  ;;  %v519_v2 = vshll.u32 %v1575_v51, 16 }
  0x3f   : > { %v503_v61 = vrot.slane %v502_v53, 4  ;;  %v1091_v3 = vrot.slane %v1089_v56, 7  ;;  %v867_v4 = vadd.f32 %v835_v58, %v335_v11  ;;  %v267_v5 = vmul.f32 %v1814_v0, %v228_v55  ;;  %v1579_v53 = vld [vmem:[%s1834_s5 + $0x50] sm:$0x1] }
  0x40   : > { %v523_v6 = vshrl.u32 %v1575_v51, 16  ;;  %v515_v10 = vrot.slane %v513_v63, 5  ;;  %v521_v8 = vrot.slane %v519_v2, 5  ;;  %v529_v12 = vshll.u32 %v1576_v60, 16  ;;  %v1660_v63 = vld [vmem:[%s1829_s28 + $0x38] sm:$0x1] }
  0x41   : > { %v508_v9 = vsel %vm1913_vm2, %v503_v61, %v507_v50  ;;  %v1094_v13 = vor.u32 %v1092_v57, %v1091_v3  ;;  %v1096_v14 = vrot.slane %v1091_v3, 4  ;;  %v1731_v15 = vpack.c.bf16 %v867_v4, %v867_v4  ;;  %v230_v50 = vld [vmem:[%s1819_s23 + $0x58] sm:$0xff] }
  0x42   : > { %v836_v16 = vunpack.c.l.bf16 %v508_v9  ;;  %v516_v11 = vor.u32 %v515_v10, %v512_v59  ;;  %v306_v17 = vadd.f32 %v1824_v1, %v267_v5  ;;  %v525_v19 = vrot.slane %v523_v6, 4 }
  0x43   : > { %v531_v20 = vrot.slane %v529_v12, 5  ;;  %v1095_v23 = vsel %vm1946_vm9, %v1087_v42, %v1094_v13  ;;  %v1391_v24 = vsel %vm1953_vm10, %v1096_v14, %v1655_v7  ;;  %v1098_v26 = vshrl.u32 %v1731_v15, 16  ;;  %v231_v14 = vld [vmem:[%s1819_s23 + $0x60] sm:$0xff] }
  0x44   : > { %v1101_v27 = vshll.u32 %v1731_v15, 16  ;;  %1654 = vst [vmem:[%s1829_s28 + $0x28] sm:$0xf] %v1095_v23  ;;  %1656 = vst [vmem:[%s1829_s28 + $0x2c] sm:$0x1] %v1391_v24  ;;  %v868_v30 = vadd.f32 %v836_v16, %v336_v29  ;;  %v517_v33 = vrot.slane %v516_v11, 4  ;;  %v526_v35 = vor.u32 %v525_v19, %v521_v8 }
  0x45   : > { %v338_v34 = vmax.f32 %v306_v17, 0.0  ;;  %v1100_v36 = vrot.slane %v1098_v26, 7  ;;  %v268_v37 = vmul.f32 %v1814_v0, %v229_v21  ;;  %v534_v39 = vshrl.u32 %v1577_v22, 16  ;;  %v1580_v15 = vld [vmem:[%s1834_s5 + $0x54] sm:$0xf] }
  0x46   : > { %v537_v40 = vshll.u32 %v1577_v22, 16  ;;  %v1732_v42 = vpack.c.bf16 %v868_v30, %v868_v30  ;;  %v522_v43 = vsel %vm1913_vm2, %v517_v33, %v521_v8  ;;  %v527_v44 = vrot.slane %v526_v35, 4  ;;  %v1662_v24 = vld [vmem:[%s1829_s28 + $0x3c] sm:$0xf] }
  0x47   : > { %v543_v45 = vshll.u32 %v1578_v28, 16  ;;  %v1103_v46 = vor.u32 %v1101_v27, %v1100_v36  ;;  %v1104_v47 = vrot.slane %v1100_v36, 4  ;;  %v837_v48 = vunpack.c.l.bf16 %v522_v43 }
  0x48   : > { %v307_v49 = vadd.f32 %v1824_v1, %v268_v37  ;;  %v1106_v51 = vshrl.u32 %v1732_v42, 16  ;;  %v1109_v52 = vshll.u32 %v1732_v42, 16  ;;  %v532_v18 = vsel %vm1913_vm2, %v527_v44, %v531_v20  ;;  %v1581_v37 = vld [vmem:[%s1834_s5 + $0x58] sm:$0xf] }
  0x49   : > { %v536_v29 = vrot.slane %v534_v39, 4  ;;  %v1394_v54 = vsel %vm1939_vm8, %v1103_v46, %v1657_v41  ;;  %v869_v55 = vadd.f32 %v837_v48, %v337_v62  ;;  %v838_v56 = vunpack.c.l.bf16 %v532_v18  ;;  %v1665_v39 = vld [vmem:[%s1829_s28 + $0x44] sm:$0x1]  ;;  %v232_v48 = vld [vmem:[%s1819_s23 + $0x68] sm:$0xff]  ;;  %v1582_v18 = vld [vmem:[%s1834_s5 + $0x5c] sm:$0x1] }
  0x4a   : > { %v339_v57 = vmax.f32 %v307_v49, 0.0  ;;  %1658 = vst [vmem:[%s1829_s28 + $0x30] sm:$0xf] %v1394_v54  ;;  %v1108_v58 = vrot.slane %v1106_v51, 7  ;;  %v539_v59 = vrot.slane %v537_v40, 5  ;;  %v545_v60 = vrot.slane %v543_v45, 5 }
  0x4b   : > { %v269_v61 = vmul.f32 %v1814_v0, %v230_v50  ;;  %v1733_v2 = vpack.c.bf16 %v869_v55, %v869_v55  ;;  %v870_v3 = vadd.f32 %v838_v56, %v338_v34  ;;  %v547_v4 = vshrl.u32 %v1578_v28, 16  ;;  %v233_v56 = vld [vmem:[%s1819_s23 + $0x70] sm:$0xff] }
  0x4c   : > { %v553_v5 = vshll.u32 %v1579_v53, 16  ;;  %v1111_v6 = vor.u32 %v1109_v52, %v1108_v58  ;;  %v1113_v7 = vrot.slane %v1108_v58, 4  ;;  %v540_v62 = vor.u32 %v539_v59, %v536_v29 }
  0x4d   : > { %v308_v9 = vadd.f32 %v1824_v1, %v269_v61  ;;  %v1115_v10 = vshrl.u32 %v1733_v2, 16  ;;  %v1118_v8 = vshll.u32 %v1733_v2, 16  ;;  %v1734_v12 = vpack.c.bf16 %v870_v3, %v870_v3  ;;  %v1583_v61 = vld [vmem:[%s1834_s5 + $0x60] sm:$0xf] }
  0x4e   : > { %v549_v13 = vrot.slane %v547_v4, 4  ;;  %v1112_v16 = vsel %vm1946_vm9, %v1104_v47, %v1111_v6  ;;  %v1398_v11 = vsel %vm1953_vm10, %v1113_v7, %v1660_v63  ;;  %v541_v17 = vrot.slane %v540_v62, 4 }
  0x4f   : > { %v340_v19 = vmax.f32 %v308_v9, 0.0  ;;  %1659 = vst [vmem:[%s1829_s28 + $0x34] sm:$0xf] %v1112_v16  ;;  %1661 = vst [vmem:[%s1829_s28 + $0x38] sm:$0x1] %v1398_v11  ;;  %v1117_v20 = vrot.slane %v1115_v10, 7  ;;  %v270_v28 = vmul.f32 %v1814_v0, %v231_v14  ;;  %v271_v59 = vmul.f32 %v1814_v0, %v232_v48 }
  0x50   : > { %v1123_v21 = vshrl.u32 %v1734_v12, 16  ;;  %v1126_v22 = vshll.u32 %v1734_v12, 16  ;;  %v550_v23 = vor.u32 %v549_v13, %v545_v60  ;;  %v546_v26 = vsel %vm1913_vm2, %v541_v17, %v545_v60  ;;  %v1667_v13 = vld [vmem:[%s1829_s28 + $0x48] sm:$0xf]  ;;  %v1584_v17 = vld [vmem:[%s1834_s5 + $0x64] sm:$0xf] }
  0x51   : > { %v555_v27 = vrot.slane %v553_v5, 5  ;;  %v558_v30 = vshrl.u32 %v1580_v15, 16  ;;  %v1120_v33 = vor.u32 %v1118_v8, %v1117_v20  ;;  %v1121_v34 = vrot.slane %v1117_v20, 4 }
  0x52   : > { %v1125_v35 = vrot.slane %v1123_v21, 7  ;;  %v839_v36 = vunpack.c.l.bf16 %v546_v26  ;;  %v551_v40 = vrot.slane %v550_v23, 4  ;;  %v309_v41 = vadd.f32 %v1824_v1, %v270_v28  ;;  %v234_v23 = vld [vmem:[%s1819_s23 + $0x78] sm:$0xff] }
  0x53   : > { %v560_v42 = vrot.slane %v558_v30, 4  ;;  %v561_v43 = vshll.u32 %v1580_v15, 16  ;;  %v1401_v44 = vsel %vm1939_vm8, %v1120_v33, %v1662_v24  ;;  %v567_v52 = vshll.u32 %v1581_v37, 16 }
  0x54   : > { %v1128_v45 = vor.u32 %v1126_v22, %v1125_v35  ;;  %v1130_v46 = vrot.slane %v1125_v35, 4  ;;  %v871_v47 = vadd.f32 %v839_v36, %v339_v57  ;;  %1663 = vst [vmem:[%s1829_s28 + $0x3c] sm:$0xf] %v1401_v44  ;;  %v556_v49 = vsel %vm1913_vm2, %v551_v40, %v555_v27  ;;  %v1670_v36 = vld [vmem:[%s1829_s28 + $0x50] sm:$0x1] }
  0x55   : > { %v341_v50 = vmax.f32 %v309_v41, 0.0  ;;  %v563_v51 = vrot.slane %v561_v43, 5  ;;  %v840_v55 = vunpack.c.l.bf16 %v556_v49  ;;  %v569_v58 = vrot.slane %v567_v52, 5  ;;  %v1585_v49 = vld [vmem:[%s1834_s5 + $0x68] sm:$0x1] }
  0x56   : > { %v1129_v29 = vsel %vm1946_vm9, %v1121_v34, %v1128_v45  ;;  %v1405_v53 = vsel %vm1953_vm10, %v1130_v46, %v1665_v39  ;;  %v1735_v54 = vpack.c.bf16 %v871_v47, %v871_v47  ;;  %v571_v60 = vshrl.u32 %v1581_v37, 16 }
  0x57   : > { %1664 = vst [vmem:[%s1829_s28 + $0x40] sm:$0xf] %v1129_v29  ;;  %1666 = vst [vmem:[%s1829_s28 + $0x44] sm:$0x1] %v1405_v53  ;;  %v564_v57 = vor.u32 %v563_v51, %v560_v42  ;;  %v872_v3 = vadd.f32 %v840_v55, %v340_v19  ;;  %v577_v4 = vshll.u32 %v1582_v18, 16  ;;  %v310_v6 = vadd.f32 %v1824_v1, %v271_v59 }
  0x58   : > { %v1132_v63 = vshrl.u32 %v1735_v54, 16  ;;  %v1135_v2 = vshll.u32 %v1735_v54, 16  ;;  %v573_v7 = vrot.slane %v571_v60, 4  ;;  %v272_v62 = vmul.f32 %v1814_v0, %v233_v56  ;;  %v1586_v54 = vld [vmem:[%s1834_s5 + $0x6c] sm:$0xf] }
  0x59   : > { %v565_v5 = vrot.slane %v564_v57, 4  ;;  %v1736_v10 = vpack.c.bf16 %v872_v3, %v872_v3  ;;  %v579_v8 = vrot.slane %v577_v4, 5  ;;  %v582_v12 = vshrl.u32 %v1583_v61, 16 }
  0x5a   : > { %v1134_v9 = vrot.slane %v1132_v63, 7  ;;  %v342_v15 = vmax.f32 %v310_v6, 0.0  ;;  %v574_v16 = vor.u32 %v573_v7, %v569_v58  ;;  %v2074_v11 = vadd.f32 %v1824_v1, %v272_v62  ;;  %v1672_v6 = vld [vmem:[%s1829_s28 + $0x54] sm:$0xf] }
  0x5b   : > { %v570_v14 = vsel %vm1913_vm2, %v565_v5, %v569_v58  ;;  %v1140_v21 = vshrl.u32 %v1736_v10, 16  ;;  %v1143_v22 = vshll.u32 %v1736_v10, 16  ;;  %v584_v28 = vrot.slane %v582_v12, 4 }
  0x5c   : > { %v1137_v19 = vor.u32 %v1135_v2, %v1134_v9  ;;  %v1138_v20 = vrot.slane %v1134_v9, 4  ;;  %v841_v24 = vunpack.c.l.bf16 %v570_v14  ;;  %v575_v26 = vrot.slane %v574_v16, 4 }
  0x5d   : > { %v343_v27 = vmax.f32 %v2074_v11, 0.0  ;;  %v1142_v33 = vrot.slane %v1140_v21, 7  ;;  %v585_v34 = vshll.u32 %v1583_v61, 16  ;;  %v591_v35 = vshll.u32 %v1584_v17, 16 }
  0x5e   : > { %v1408_v30 = vsel %vm1939_vm8, %v1137_v19, %v1667_v13  ;;  %v873_v37 = vadd.f32 %v841_v24, %v341_v50  ;;  %v580_v39 = vsel %vm1913_vm2, %v575_v26, %v579_v8  ;;  %v273_v40 = vmul.f32 %v1814_v0, %v234_v23  ;;  %v235_v50 = vld [vmem:[%s1819_s23 + $0x80] sm:$0xff] }
  0x5f   : > { %1668 = vst [vmem:[%s1829_s28 + $0x48] sm:$0xf] %v1408_v30  ;;  %v595_v41 = vshrl.u32 %v1584_v17, 16  ;;  %v1145_v42 = vor.u32 %v1143_v22, %v1142_v33  ;;  %v1147_v43 = vrot.slane %v1142_v33, 4  ;;  %v842_v44 = vunpack.c.l.bf16 %v580_v39  ;;  %v1675_v22 = vld [vmem:[%s1829_s28 + $0x5c] sm:$0x1] }
  0x60   : > { %v587_v45 = vrot.slane %v585_v34, 5  ;;  %v1737_v46 = vpack.c.bf16 %v873_v37, %v873_v37  ;;  %v593_v47 = vrot.slane %v591_v35, 5  ;;  %v312_v48 = vadd.f32 %v1824_v1, %v273_v40  ;;  %v1588_v39 = vld [vmem:[%s1834_s5 + $0x74] sm:$0x1] }
  0x61   : > { %v597_v51 = vrot.slane %v595_v41, 4  ;;  %v1146_v52 = vsel %vm1946_vm9, %v1138_v20, %v1145_v42  ;;  %v1412_v18 = vsel %vm1953_vm10, %v1147_v43, %v1670_v36  ;;  %v874_v29 = vadd.f32 %v842_v44, %v342_v15  ;;  %v1587_v15 = vld [vmem:[%s1834_s5 + $0x70] sm:$0xf]  ;;  %v236_v20 = vld [vmem:[%s1819_s23 + $0x88] sm:$0xff] }
  0x62   : > { %v588_v53 = vor.u32 %v587_v45, %v584_v28  ;;  %1669 = vst [vmem:[%s1829_s28 + $0x4c] sm:$0xf] %v1146_v52  ;;  %1671 = vst [vmem:[%s1829_s28 + $0x50] sm:$0x1] %v1412_v18  ;;  %v1149_v55 = vshrl.u32 %v1737_v46, 16  ;;  %v1152_v56 = vshll.u32 %v1737_v46, 16  ;;  %v274_v63 = vmul.f32 %v1814_v0, %v235_v50 }
  0x63   : > { %v344_v57 = vmax.f32 %v312_v48, 0.0  ;;  %v598_v58 = vor.u32 %v597_v51, %v593_v47  ;;  %v1738_v59 = vpack.c.bf16 %v874_v29, %v874_v29  ;;  %v601_v61 = vshll.u32 %v1585_v49, 16  ;;  %v237_v41 = vld [vmem:[%s1819_s23 + $0x90] sm:$0xff] }
  0x64   : > { %v589_v60 = vrot.slane %v588_v53, 4  ;;  %v1151_v2 = vrot.slane %v1149_v55, 7  ;;  %v606_v4 = vshrl.u32 %v1586_v54, 16  ;;  %v609_v5 = vshll.u32 %v1586_v54, 16  ;;  %v1589_v55 = vld [vmem:[%s1834_s5 + $0x78] sm:$0xf] }
  0x65   : > { %v599_v3 = vrot.slane %v598_v58, 4  ;;  %v1157_v7 = vshrl.u32 %v1738_v59, 16  ;;  %v1160_v62 = vshll.u32 %v1738_v59, 16  ;;  %v603_v10 = vrot.slane %v601_v61, 5 }
  0x66   : > { %v594_v9 = vsel %vm1913_vm2, %v589_v60, %v593_v47  ;;  %v1154_v8 = vor.u32 %v1152_v56, %v1151_v2  ;;  %v1155_v12 = vrot.slane %v1151_v2, 4  ;;  %v313_v14 = vadd.f32 %v1824_v1, %v274_v63  ;;  %v1677_v56 = vld [vmem:[%s1829_s28 + $0x60] sm:$0xf] }
  0x67   : > { %v843_v13 = vunpack.c.l.bf16 %v594_v9  ;;  %v1159_v16 = vrot.slane %v1157_v7, 7  ;;  %v604_v11 = vsel %vm1913_vm2, %v599_v3, %v603_v10  ;;  %v608_v17 = vrot.slane %v606_v4, 4  ;;  %v1680_v4 = vld [vmem:[%s1829_s28 + $0x68] sm:$0x1] }
  0x68   : > { %v611_v19 = vrot.slane %v609_v5, 5  ;;  %v1415_v21 = vsel %vm1939_vm8, %v1154_v8, %v1672_v6  ;;  %v844_v24 = vunpack.c.l.bf16 %v604_v11  ;;  %v345_v26 = vmax.f32 %v313_v14, 0.0  ;;  %v1591_v11 = vld [vmem:[%s1834_s5 + $0x80] sm:$0x1] }
  0x69   : > { %v875_v23 = vadd.f32 %v843_v13, %v343_v27  ;;  %1673 = vst [vmem:[%s1829_s28 + $0x54] sm:$0xf] %v1415_v21  ;;  %v1162_v28 = vor.u32 %v1160_v62, %v1159_v16  ;;  %v1164_v30 = vrot.slane %v1159_v16, 4  ;;  %v615_v34 = vshll.u32 %v1587_v15, 16 }
  0x6a   : > { %v612_v33 = vor.u32 %v611_v19, %v608_v17  ;;  %v876_v36 = vadd.f32 %v844_v24, %v344_v57  ;;  %v275_v37 = vmul.f32 %v1814_v0, %v236_v20  ;;  %v619_v40 = vshrl.u32 %v1587_v15, 16  ;;  %v239_v17 = vld [vmem:[%s1819_s23 + $0xa0] sm:$0xff] }
  0x6b   : > { %v1739_v35 = vpack.c.bf16 %v875_v23, %v875_v23  ;;  %v1163_v42 = vsel %vm1946_vm9, %v1155_v12, %v1162_v28  ;;  %v1419_v27 = vsel %vm1953_vm10, %v1164_v30, %v1675_v22  ;;  %v617_v44 = vrot.slane %v615_v34, 5  ;;  %v238_v12 = vld [vmem:[%s1819_s23 + $0x98] sm:$0xff]  ;;  %v1592_v23 = vld [vmem:[%s1834_s5 + $0x84] sm:$0xf]  ;;  %v2148_v30 = vld [vmem:[%s2332_s1] ss:$0 sm:$0xff] }
  0x6c   : > { %v613_v43 = vrot.slane %v612_v33, 4  ;;  %1674 = vst [vmem:[%s1829_s28 + $0x58] sm:$0xf] %v1163_v42  ;;  %1676 = vst [vmem:[%s1829_s28 + $0x5c] sm:$0x1] %v1419_v27  ;;  %v1740_v47 = vpack.c.bf16 %v876_v36, %v876_v36  ;;  %v314_v48 = vadd.f32 %v1824_v1, %v275_v37  ;;  %v621_v51 = vrot.slane %v619_v40, 4 }
  0x6d   : > { %v1166_v45 = vshrl.u32 %v1739_v35, 16  ;;  %v1169_v46 = vshll.u32 %v1739_v35, 16  ;;  %v625_v50 = vshll.u32 %v1588_v39, 16  ;;  %v276_v52 = vmul.f32 %v1814_v0, %v237_v41  ;;  %v1590_v0 = vld [vmem:[%s1834_s5 + $0x7c] sm:$0xf] }
  0x6e   : > { %v618_v49 = vsel %vm1913_vm2, %v613_v43, %v617_v44  ;;  %v1174_v29 = vshrl.u32 %v1740_v47, 16  ;;  %v1177_v53 = vshll.u32 %v1740_v47, 16  ;;  %v346_v57 = vmax.f32 %v314_v48, 0.0  ;;  %v1682_v39 = vld [vmem:[%s1829_s28 + $0x6c] sm:$0xf] }
  0x6f   : > { %v1168_v18 = vrot.slane %v1166_v45, 7  ;;  %v845_v54 = vunpack.c.l.bf16 %v618_v49  ;;  %v622_v58 = vor.u32 %v621_v51, %v617_v44  ;;  %v627_v59 = vrot.slane %v625_v50, 5  ;;  %v2156_v42 = vld [vmem:[%s2333_s2] ss:$0 sm:$0xff] }
  0x70   : > { %v2125_v60 = vadd.f32 %v1824_v1, %v276_v52  ;;  %v1176_v2 = vrot.slane %v1174_v29, 7  ;;  %v630_v7 = vshrl.u32 %v1589_v55, 16  ;;  %v633_v62 = vshll.u32 %v1589_v55, 16  ;;  %v1593_v52 = vld [vmem:[%s1834_s5 + $0x88] sm:$0xf] }
  0x71   : > { %v1171_v61 = vor.u32 %v1169_v46, %v1168_v18  ;;  %v1172_v63 = vrot.slane %v1168_v18, 4  ;;  %v877_v3 = vadd.f32 %v845_v54, %v345_v26  ;;  %v623_v5 = vrot.slane %v622_v58, 4  ;;  %v240_v18 = vld [vmem:[%s1819_s23 + $0xa8] sm:$0xff] }
  0x72   : > { %v347_v6 = vmax.f32 %v2125_v60, 0.0  ;;  %v1179_v1 = vor.u32 %v1177_v53, %v1176_v2  ;;  %v1181_v10 = vrot.slane %v1176_v2, 4  ;;  %v632_v14 = vrot.slane %v630_v7, 4 }
  0x73   : > { %v1422_v9 = vsel %vm1939_vm8, %v1171_v61, %v1677_v56  ;;  %v1741_v8 = vpack.c.bf16 %v877_v3, %v877_v3  ;;  %v628_v13 = vsel %vm1913_vm2, %v623_v5, %v627_v59  ;;  %v635_v15 = vrot.slane %v633_v62, 5  ;;  %v1594_v56 = vld [vmem:[%s1834_s5 + $0x8c] sm:$0x1]  ;;  %v1685_v62 = vld [vmem:[%s1829_s28 + $0x74] sm:$0x1] }
  0x74   : > { %1678 = vst [vmem:[%s1829_s28 + $0x60] sm:$0xf] %v1422_v9  ;;  %v639_v16 = vshll.u32 %v1590_v0, 16  ;;  %v1180_v19 = vsel %vm1946_vm9, %v1172_v63, %v1179_v1  ;;  %v1426_v20 = vsel %vm1953_vm10, %v1181_v10, %v1680_v4  ;;  %v846_v24 = vunpack.c.l.bf16 %v628_v13 }
  0x75   : > { %v1183_v21 = vshrl.u32 %v1741_v8, 16  ;;  %v1186_v22 = vshll.u32 %v1741_v8, 16  ;;  %1679 = vst [vmem:[%s1829_s28 + $0x64] sm:$0xf] %v1180_v19  ;;  %1681 = vst [vmem:[%s1829_s28 + $0x68] sm:$0x1] %v1426_v20  ;;  %v636_v26 = vor.u32 %v635_v15, %v632_v14  ;;  %v277_v33 = vmul.f32 %v2148_v30, %v238_v12 }
  0x76   : > { %v641_v28 = vrot.slane %v639_v16, 5  ;;  %v643_v35 = vshrl.u32 %v1590_v0, 16  ;;  %v649_v36 = vshll.u32 %v1591_v11, 16  ;;  %v278_v37 = vmul.f32 %v2148_v30, %v239_v17  ;;  %v241_v15 = vld [vmem:[%s1819_s23 + $0xb0] sm:$0xff] }
  0x77   : > { %v1185_v34 = vrot.slane %v1183_v21, 7  ;;  %v878_v40 = vadd.f32 %v846_v24, %v346_v57  ;;  %v637_v41 = vrot.slane %v636_v26, 4  ;;  %v316_v27 = vadd.f32 %v2156_v42, %v277_v33  ;;  %v1595_v20 = vld [vmem:[%s1834_s5 + $0x90] sm:$0xf] }
  0x78   : > { %v654_v43 = vshrl.u32 %v1592_v23, 16  ;;  %v645_v46 = vrot.slane %v643_v35, 4  ;;  %v651_v47 = vrot.slane %v649_v36, 5  ;;  %v2162_v50 = vadd.f32 %v2156_v42, %v278_v37  ;;  %v1687_v35 = vld [vmem:[%s1829_s28 + $0x78] sm:$0xf] }
  0x79   : > { %v1188_v44 = vor.u32 %v1186_v22, %v1185_v34  ;;  %v1189_v45 = vrot.slane %v1185_v34, 4  ;;  %v1742_v48 = vpack.c.bf16 %v878_v40, %v878_v40  ;;  %v642_v49 = vsel %vm1913_vm2, %v637_v41, %v641_v28 }
  0x7a   : > { %v348_v51 = vmax.f32 %v316_v27, 0.0  ;;  %v847_v53 = vunpack.c.l.bf16 %v642_v49  ;;  %v646_v54 = vor.u32 %v645_v46, %v641_v28  ;;  %v656_v55 = vrot.slane %v654_v43, 4 }
  0x7b   : > { %v1429_v29 = vsel %vm1939_vm8, %v1188_v44, %v1682_v39  ;;  %v1191_v57 = vshrl.u32 %v1742_v48, 16  ;;  %v1194_v58 = vshll.u32 %v1742_v48, 16  ;;  %v349_v59 = vmax.f32 %v2162_v50, 0.0 }
  0x7c   : > { %1683 = vst [vmem:[%s1829_s28 + $0x6c] sm:$0xf] %v1429_v29  ;;  %v657_v60 = vshll.u32 %v1592_v23, 16  ;;  %v879_v61 = vadd.f32 %v847_v53, %v347_v6  ;;  %v647_v63 = vrot.slane %v646_v54, 4  ;;  %v663_v2 = vshll.u32 %v1593_v52, 16 }
  0x7d   : > { %v279_v3 = vmul.f32 %v2148_v30, %v240_v18  ;;  %v1193_v0 = vrot.slane %v1191_v57, 7  ;;  %v667_v5 = vshrl.u32 %v1593_v52, 16  ;;  %v673_v7 = vshll.u32 %v1594_v56, 16  ;;  %v1690_v57 = vld [vmem:[%s1829_s28 + $0x80] sm:$0x1] }
  0x7e   : > { %v659_v4 = vrot.slane %v657_v60, 5  ;;  %v1743_v9 = vpack.c.bf16 %v879_v61, %v879_v61  ;;  %v652_v1 = vsel %vm1913_vm2, %v647_v63, %v651_v47  ;;  %v665_v10 = vrot.slane %v663_v2, 5 }
  0x7f   : > { %v318_v8 = vadd.f32 %v2156_v42, %v279_v3  ;;  %v1196_v6 = vor.u32 %v1194_v58, %v1193_v0  ;;  %v1198_v12 = vrot.slane %v1193_v0, 4  ;;  %v848_v13 = vunpack.c.l.bf16 %v652_v1 }
  0x80   : > { %v660_v14 = vor.u32 %v659_v4, %v656_v55  ;;  %v1200_v16 = vshrl.u32 %v1743_v9, 16  ;;  %v1203_v11 = vshll.u32 %v1743_v9, 16  ;;  %v669_v19 = vrot.slane %v667_v5, 4  ;;  %v1597_v4 = vld [vmem:[%s1834_s5 + $0x98] sm:$0x1] }
  0x81   : > { %v350_v17 = vmax.f32 %v318_v8, 0.0  ;;  %v1197_v21 = vsel %vm1946_vm9, %v1189_v45, %v1196_v6  ;;  %v1433_v22 = vsel %vm1953_vm10, %v1198_v12, %v1685_v62  ;;  %v880_v23 = vadd.f32 %v848_v13, %v348_v51  ;;  %v1596_v45 = vld [vmem:[%s1834_s5 + $0x94] sm:$0xf]  ;;  %v242_v51 = vld [vmem:[%s1819_s23 + $0xb8] sm:$0xff]  ;;  %v243_v12 = vld [vmem:[%s1819_s23 + $0xc0] sm:$0xff] }
  0x82   : > { %v661_v24 = vrot.slane %v660_v14, 4  ;;  %1684 = vst [vmem:[%s1829_s28 + $0x70] sm:$0xf] %v1197_v21  ;;  %1686 = vst [vmem:[%s1829_s28 + $0x74] sm:$0x1] %v1433_v22  ;;  %v1202_v26 = vrot.slane %v1200_v16, 7  ;;  %v670_v28 = vor.u32 %v669_v19, %v665_v10  ;;  %v280_v34 = vmul.f32 %v2148_v30, %v241_v15 }
  0x83   : > { %v675_v33 = vrot.slane %v673_v7, 5  ;;  %v1744_v36 = vpack.c.bf16 %v880_v23, %v880_v23  ;;  %v678_v39 = vshrl.u32 %v1595_v20, 16  ;;  %v681_v40 = vshll.u32 %v1595_v20, 16  ;;  %v1599_v23 = vld [vmem:[%s1834_s5 + $0xa0] sm:$0xf] }
  0x84   : > { %v666_v37 = vsel %vm1913_vm2, %v661_v24, %v665_v10  ;;  %v1205_v41 = vor.u32 %v1203_v11, %v1202_v26  ;;  %v1206_v27 = vrot.slane %v1202_v26, 4  ;;  %v671_v44 = vrot.slane %v670_v28, 4  ;;  %v1598_v11 = vld [vmem:[%s1834_s5 + $0x9c] sm:$0xf] }
  0x85   : > { %v849_v43 = vunpack.c.l.bf16 %v666_v37  ;;  %v1208_v46 = vshrl.u32 %v1744_v36, 16  ;;  %v1211_v47 = vshll.u32 %v1744_v36, 16  ;;  %v319_v48 = vadd.f32 %v2156_v42, %v280_v34 }
  0x86   : > { %v680_v49 = vrot.slane %v678_v39, 4  ;;  %v1436_v50 = vsel %vm1939_vm8, %v1205_v41, %v1687_v35  ;;  %v676_v18 = vsel %vm1913_vm2, %v671_v44, %v675_v33  ;;  %v683_v29 = vrot.slane %v681_v40, 5  ;;  %v1695_v40 = vld [vmem:[%s1829_s28 + $0x8c] sm:$0x1] }
  0x87   : > { %v881_v52 = vadd.f32 %v849_v43, %v349_v59  ;;  %1688 = vst [vmem:[%s1829_s28 + $0x78] sm:$0xf] %v1436_v50  ;;  %v1210_v53 = vrot.slane %v1208_v46, 7  ;;  %v850_v54 = vunpack.c.l.bf16 %v676_v18  ;;  %v351_v55 = vmax.f32 %v319_v48, 0.0  ;;  %v244_v48 = vld [vmem:[%s1819_s23 + $0xc8] sm:$0xff] }
  0x88   : > { %v687_v56 = vshll.u32 %v1596_v45, 16  ;;  %v684_v60 = vor.u32 %v683_v29, %v680_v49  ;;  %v281_v61 = vmul.f32 %v2148_v30, %v242_v51  ;;  %v691_v63 = vshrl.u32 %v1596_v45, 16 }
  0x89   : > { %v1745_v58 = vpack.c.bf16 %v881_v52, %v881_v52  ;;  %v1213_v59 = vor.u32 %v1211_v47, %v1210_v53  ;;  %v1215_v2 = vrot.slane %v1210_v53, 4  ;;  %v882_v3 = vadd.f32 %v850_v54, %v350_v17  ;;  %v1692_v17 = vld [vmem:[%s1829_s28 + $0x84] sm:$0xf] }
  0x8a   : > { %v689_v0 = vrot.slane %v687_v56, 5  ;;  %v685_v62 = vrot.slane %v684_v60, 4  ;;  %v320_v9 = vadd.f32 %v2156_v42, %v281_v61  ;;  %v693_v6 = vrot.slane %v691_v63, 4  ;;  %v1600_v52 = vld [vmem:[%s1834_s5 + $0xa4] sm:$0x1]  ;;  %v245_v61 = vld [vmem:[%s1819_s23 + $0xd0] sm:$0xff] }
  0x8b   : > { %v1217_v5 = vshrl.u32 %v1745_v58, 16  ;;  %v1220_v7 = vshll.u32 %v1745_v58, 16  ;;  %v1214_v1 = vsel %vm1946_vm9, %v1206_v27, %v1213_v59  ;;  %v1440_v10 = vsel %vm1953_vm10, %v1215_v2, %v1690_v57 }
  0x8c   : > { %v1746_v8 = vpack.c.bf16 %v882_v3, %v882_v3  ;;  %1689 = vst [vmem:[%s1829_s28 + $0x7c] sm:$0xf] %v1214_v1  ;;  %1691 = vst [vmem:[%s1829_s28 + $0x80] sm:$0x1] %v1440_v10  ;;  %v690_v14 = vsel %vm1913_vm2, %v685_v62, %v689_v0  ;;  %v352_v15 = vmax.f32 %v320_v9, 0.0  ;;  %v697_v16 = vshll.u32 %v1597_v4, 16 }
  0x8d   : > { %v1219_v13 = vrot.slane %v1217_v5, 7  ;;  %v851_v21 = vunpack.c.l.bf16 %v690_v14  ;;  %v694_v22 = vor.u32 %v693_v6, %v689_v0  ;;  %v282_v33 = vmul.f32 %v2148_v30, %v243_v12  ;;  %v1697_v0 = vld [vmem:[%s1829_s28 + $0x90] sm:$0xf]  ;;  %v1602_v6 = vld [vmem:[%s1834_s5 + $0xac] sm:$0xf] }
  0x8e   : > { %v1225_v19 = vshrl.u32 %v1746_v8, 16  ;;  %v1228_v20 = vshll.u32 %v1746_v8, 16  ;;  %v699_v28 = vrot.slane %v697_v16, 5  ;;  %v702_v37 = vshrl.u32 %v1598_v11, 16  ;;  %v246_v16 = vld [vmem:[%s1819_s23 + $0xd8] sm:$0xff] }
  0x8f   : > { %v1222_v24 = vor.u32 %v1220_v7, %v1219_v13  ;;  %v1223_v26 = vrot.slane %v1219_v13, 4  ;;  %v883_v35 = vadd.f32 %v851_v21, %v351_v55  ;;  %v695_v36 = vrot.slane %v694_v22, 4  ;;  %v1601_v55 = vld [vmem:[%s1834_s5 + $0xa8] sm:$0xf] }
  0x90   : > { %v1227_v34 = vrot.slane %v1225_v19, 7  ;;  %v321_v41 = vadd.f32 %v2156_v42, %v282_v33  ;;  %v705_v27 = vshll.u32 %v1598_v11, 16  ;;  %v711_v43 = vshll.u32 %v1599_v23, 16 }
  0x91   : > { %v1443_v39 = vsel %vm1939_vm8, %v1222_v24, %v1692_v17  ;;  %v1747_v46 = vpack.c.bf16 %v883_v35, %v883_v35  ;;  %v700_v47 = vsel %vm1913_vm2, %v695_v36, %v699_v28  ;;  %v704_v51 = vrot.slane %v702_v37, 4 }
  0x92   : > { %1693 = vst [vmem:[%s1829_s28 + $0x84] sm:$0xf] %v1443_v39  ;;  %v1230_v44 = vor.u32 %v1228_v20, %v1227_v34  ;;  %v1232_v45 = vrot.slane %v1227_v34, 4  ;;  %v852_v49 = vunpack.c.l.bf16 %v700_v47  ;;  %v707_v50 = vrot.slane %v705_v27, 5 }
  0x93   : > { %v1234_v53 = vshrl.u32 %v1747_v46, 16  ;;  %v1237_v54 = vshll.u32 %v1747_v46, 16  ;;  %v353_v57 = vmax.f32 %v321_v41, 0.0  ;;  %v283_v60 = vmul.f32 %v2148_v30, %v244_v48  ;;  %v247_v46 = vld [vmem:[%s1819_s23 + $0xe0] sm:$0xff] }
  0x94   : > { %v1231_v18 = vsel %vm1946_vm9, %v1223_v26, %v1230_v44  ;;  %v1447_v29 = vsel %vm1953_vm10, %v1232_v45, %v1695_v40  ;;  %v884_v56 = vadd.f32 %v852_v49, %v352_v15  ;;  %v708_v58 = vor.u32 %v707_v50, %v704_v51  ;;  %v1700_v26 = vld [vmem:[%s1829_s28 + $0x98] sm:$0x1]  ;;  %v1603_v44 = vld [vmem:[%s1834_s5 + $0xb0] sm:$0x1]  ;;  %v1604_v50 = vld [vmem:[%s1834_s5 + $0xb4] sm:$0xf] }
  0x95   : > { %1694 = vst [vmem:[%s1829_s28 + $0x88] sm:$0xf] %v1231_v18  ;;  %1696 = vst [vmem:[%s1829_s28 + $0x8c] sm:$0x1] %v1447_v29  ;;  %v1236_v63 = vrot.slane %v1234_v53, 7  ;;  %v713_v59 = vrot.slane %v711_v43, 5  ;;  %v322_v7 = vadd.f32 %v2156_v42, %v283_v60  ;;  %v284_v8 = vmul.f32 %v2148_v30, %v245_v61 }
  0x96   : > { %v715_v2 = vshrl.u32 %v1599_v23, 16  ;;  %v721_v3 = vshll.u32 %v1600_v52, 16  ;;  %v1748_v4 = vpack.c.bf16 %v884_v56, %v884_v56  ;;  %v709_v5 = vrot.slane %v708_v58, 4 }
  0x97   : > { %v726_v62 = vshrl.u32 %v1601_v55, 16  ;;  %v1239_v9 = vor.u32 %v1237_v54, %v1236_v63  ;;  %v1240_v1 = vrot.slane %v1236_v63, 4  ;;  %v354_v19 = vmax.f32 %v322_v7, 0.0 }
  0x98   : > { %v717_v10 = vrot.slane %v715_v2, 4  ;;  %v1242_v12 = vshrl.u32 %v1748_v4, 16  ;;  %v1245_v13 = vshll.u32 %v1748_v4, 16  ;;  %v714_v14 = vsel %vm1913_vm2, %v709_v5, %v713_v59 }
  0x99   : > { %v723_v15 = vrot.slane %v721_v3, 5  ;;  %v1450_v11 = vsel %vm1939_vm8, %v1239_v9, %v1697_v0  ;;  %v853_v17 = vunpack.c.l.bf16 %v714_v14  ;;  %v728_v22 = vrot.slane %v726_v62, 4  ;;  %v1606_v14 = vld [vmem:[%s1834_s5 + $0xbc] sm:$0x1] }
  0x9a   : > { %v718_v20 = vor.u32 %v717_v10, %v713_v59  ;;  %1698 = vst [vmem:[%s1829_s28 + $0x90] sm:$0xf] %v1450_v11  ;;  %v1244_v21 = vrot.slane %v1242_v12, 7  ;;  %v729_v23 = vshll.u32 %v1601_v55, 16  ;;  %v735_v24 = vshll.u32 %v1602_v6, 16  ;;  %v248_v10 = vld [vmem:[%s1819_s23 + $0xe8] sm:$0xff] }
  0x9b   : > { %v885_v28 = vadd.f32 %v853_v17, %v353_v57  ;;  %v323_v34 = vadd.f32 %v2156_v42, %v284_v8  ;;  %v285_v35 = vmul.f32 %v2148_v30, %v246_v16  ;;  %v739_v45 = vshrl.u32 %v1602_v6, 16  ;;  %v1702_v59 = vld [vmem:[%s1829_s28 + $0x9c] sm:$0xf] }
  0x9c   : > { %v719_v33 = vrot.slane %v718_v20, 4  ;;  %v1247_v36 = vor.u32 %v1245_v13, %v1244_v21  ;;  %v1249_v37 = vrot.slane %v1244_v21, 4  ;;  %v731_v39 = vrot.slane %v729_v23, 5  ;;  %v1705_v23 = vld [vmem:[%s1829_s28 + $0xa4] sm:$0x1] }
  0x9d   : > { %v737_v40 = vrot.slane %v735_v24, 5  ;;  %v1749_v41 = vpack.c.bf16 %v885_v28, %v885_v28  ;;  %v324_v43 = vadd.f32 %v2156_v42, %v285_v35  ;;  %v355_v29 = vmax.f32 %v323_v34, 0.0 }
  0x9e   : > { %v724_v27 = vsel %vm1913_vm2, %v719_v33, %v723_v15  ;;  %v1248_v47 = vsel %vm1946_vm9, %v1240_v1, %v1247_v36  ;;  %v1454_v48 = vsel %vm1953_vm10, %v1249_v37, %v1700_v26  ;;  %v732_v51 = vor.u32 %v731_v39, %v728_v22  ;;  %v1605_v1 = vld [vmem:[%s1834_s5 + $0xb8] sm:$0xf] }
  0x9f   : > { %v854_v49 = vunpack.c.l.bf16 %v724_v27  ;;  %1699 = vst [vmem:[%s1829_s28 + $0x94] sm:$0xf] %v1248_v47  ;;  %1701 = vst [vmem:[%s1829_s28 + $0x98] sm:$0x1] %v1454_v48  ;;  %v1251_v52 = vshrl.u32 %v1749_v41, 16  ;;  %v1254_v18 = vshll.u32 %v1749_v41, 16  ;;  %v286_v57 = vmul.f32 %v2148_v30, %v247_v46 }
  0xa0   : > { %v741_v53 = vrot.slane %v739_v45, 4  ;;  %v733_v55 = vrot.slane %v732_v51, 4  ;;  %v745_v56 = vshll.u32 %v1603_v44, 16  ;;  %v750_v61 = vshrl.u32 %v1604_v50, 16  ;;  %v249_v47 = vld [vmem:[%s1819_s23 + $0xf0] sm:$0xff] }
  0xa1   : > { %v886_v54 = vadd.f32 %v854_v49, %v354_v19  ;;  %v1253_v58 = vrot.slane %v1251_v52, 7  ;;  %v753_v63 = vshll.u32 %v1604_v50, 16  ;;  %v356_v0 = vmax.f32 %v324_v43, 0.0  ;;  %v1607_v48 = vld [vmem:[%s1834_s5 + $0xc0] sm:$0xf] }
  0xa2   : > { %v742_v60 = vor.u32 %v741_v53, %v737_v40  ;;  %v738_v3 = vsel %vm1913_vm2, %v733_v55, %v737_v40  ;;  %v747_v4 = vrot.slane %v745_v56, 5  ;;  %v325_v9 = vadd.f32 %v2156_v42, %v286_v57  ;;  %v1608_v56 = vld [vmem:[%s1834_s5 + $0xc4] sm:$0xf] }
  0xa3   : > { %v1750_v2 = vpack.c.bf16 %v886_v54, %v886_v54  ;;  %v1256_v5 = vor.u32 %v1254_v18, %v1253_v58  ;;  %v855_v7 = vunpack.c.l.bf16 %v738_v3  ;;  %v1257_v8 = vrot.slane %v1253_v58, 4  ;;  %v1707_v18 = vld [vmem:[%s1829_s28 + $0xa8] sm:$0xf] }
  0xa4   : > { %v743_v62 = vrot.slane %v742_v60, 4  ;;  %v752_v13 = vrot.slane %v750_v61, 4  ;;  %v755_v17 = vrot.slane %v753_v63, 5  ;;  %v759_v21 = vshll.u32 %v1605_v1, 16 }
  0xa5   : > { %v1259_v6 = vshrl.u32 %v1750_v2, 16  ;;  %v1262_v12 = vshll.u32 %v1750_v2, 16  ;;  %v1457_v15 = vsel %vm1939_vm8, %v1256_v5, %v1702_v59  ;;  %v887_v16 = vadd.f32 %v855_v7, %v355_v29 }
  0xa6   : > { %v748_v11 = vsel %vm1913_vm2, %v743_v62, %v747_v4  ;;  %1703 = vst [vmem:[%s1829_s28 + $0x9c] sm:$0xf] %v1457_v15  ;;  %v287_v22 = vmul.f32 %v2148_v30, %v248_v10  ;;  %v756_v26 = vor.u32 %v755_v17, %v752_v13  ;;  %v763_v28 = vshrl.u32 %v1605_v1, 16  ;;  %v1710_v4 = vld [vmem:[%s1829_s28 + $0xb0] sm:$0x1] }
  0xa7   : > { %v1261_v19 = vrot.slane %v1259_v6, 7  ;;  %v856_v20 = vunpack.c.l.bf16 %v748_v11  ;;  %v1751_v24 = vpack.c.bf16 %v887_v16, %v887_v16  ;;  %v769_v33 = vshll.u32 %v1606_v14, 16  ;;  %v250_v6 = vld [vmem:[%s1819_s23 + $0xf8] sm:$0xff]  ;;  %v1609_v15 = vld [vmem:[%s1834_s5 + $0xc8] sm:$0x1] }
  0xa8   : > { %v761_v37 = vrot.slane %v759_v21, 5  ;;  %v357_v41 = vmax.f32 %v325_v9, 0.0  ;;  %v757_v27 = vrot.slane %v756_v26, 4  ;;  %v765_v46 = vrot.slane %v763_v28, 4 }
  0xa9   : > { %v1264_v34 = vor.u32 %v1262_v12, %v1261_v19  ;;  %v1266_v35 = vrot.slane %v1261_v19, 4  ;;  %v888_v36 = vadd.f32 %v856_v20, %v356_v0  ;;  %v1268_v39 = vshrl.u32 %v1751_v24, 16 }
  0xaa   : > { %v1271_v40 = vshll.u32 %v1751_v24, 16  ;;  %v762_v51 = vsel %vm1913_vm2, %v757_v27, %v761_v37  ;;  %v326_v50 = vadd.f32 %v2156_v42, %v287_v22  ;;  %v771_v52 = vrot.slane %v769_v33, 5  ;;  %v1712_v33 = vld [vmem:[%s1829_s28 + $0xb4] sm:$0xf] }
  0xab   : > { %v1265_v43 = vsel %vm1946_vm9, %v1257_v8, %v1264_v34  ;;  %v1461_v44 = vsel %vm1953_vm10, %v1266_v35, %v1705_v23  ;;  %v1752_v45 = vpack.c.bf16 %v888_v36, %v888_v36  ;;  %v1270_v49 = vrot.slane %v1268_v39, 7 }
  0xac   : > { %1704 = vst [vmem:[%s1829_s28 + $0xa0] sm:$0xf] %v1265_v43  ;;  %1706 = vst [vmem:[%s1829_s28 + $0xa4] sm:$0x1] %v1461_v44  ;;  %v857_v54 = vunpack.c.l.bf16 %v762_v51  ;;  %v766_v55 = vor.u32 %v765_v46, %v761_v37  ;;  %v288_v60 = vmul.f32 %v2148_v30, %v249_v47  ;;  %v774_v61 = vshrl.u32 %v1607_v48, 16 }
  0xad   : > { %v1276_v29 = vshrl.u32 %v1752_v45, 16  ;;  %v1279_v53 = vshll.u32 %v1752_v45, 16  ;;  %v1273_v57 = vor.u32 %v1271_v40, %v1270_v49  ;;  %v1274_v58 = vrot.slane %v1270_v49, 4  ;;  %v1715_v49 = vld [vmem:[%s1829_s28 + $0xbc] sm:$0x1] }
  0xae   : > { %v889_v59 = vadd.f32 %v857_v54, %v357_v41  ;;  %v767_v2 = vrot.slane %v766_v55, 4  ;;  %v777_v3 = vshll.u32 %v1607_v48, 16  ;;  %v358_v5 = vmax.f32 %v326_v50, 0.0 }
  0xaf   : > { %v1278_v63 = vrot.slane %v1276_v29, 7  ;;  %v1464_v0 = vsel %vm1939_vm8, %v1273_v57, %v1707_v18  ;;  %v776_v7 = vrot.slane %v774_v61, 4  ;;  %v783_v62 = vshll.u32 %v1608_v56, 16 }
  0xb0   : > { %1708 = vst [vmem:[%s1829_s28 + $0xa8] sm:$0xf] %v1464_v0  ;;  %v1753_v10 = vpack.c.bf16 %v889_v59, %v889_v59  ;;  %v772_v8 = vsel %vm1913_vm2, %v767_v2, %v771_v52  ;;  %v327_v13 = vadd.f32 %v2156_v42, %v288_v60  ;;  %v779_v14 = vrot.slane %v777_v3, 5 }
  0xb1   : > { %v1281_v9 = vor.u32 %v1279_v53, %v1278_v63  ;;  %v1283_v1 = vrot.slane %v1278_v63, 4  ;;  %v858_v12 = vunpack.c.l.bf16 %v772_v8  ;;  %v289_v22 = vmul.f32 %v2148_v30, %v250_v6  ;;  %v1717_v63 = vld [vmem:[%s1829_s28 + $0xc0] sm:$0xf] }
  0xb2   : > { %v1285_v17 = vshrl.u32 %v1753_v10, 16  ;;  %v1288_v19 = vshll.u32 %v1753_v10, 16  ;;  %v780_v21 = vor.u32 %v779_v14, %v776_v7  ;;  %v787_v23 = vshrl.u32 %v1608_v56, 16  ;;  %v1720_v7 = vld [vmem:[%s1829_s28 + $0xc8] sm:$0x1] }
  0xb3   : > { %v1282_v16 = vsel %vm1946_vm9, %v1274_v58, %v1281_v9  ;;  %v1468_v11 = vsel %vm1953_vm10, %v1283_v1, %v1710_v4  ;;  %v890_v20 = vadd.f32 %v858_v12, %v358_v5  ;;  %v785_v26 = vrot.slane %v783_v62, 5 }
  0xb4   : > { %1709 = vst [vmem:[%s1829_s28 + $0xac] sm:$0xf] %v1282_v16  ;;  %1711 = vst [vmem:[%s1829_s28 + $0xb0] sm:$0x1] %v1468_v11  ;;  %v1287_v24 = vrot.slane %v1285_v17, 7  ;;  %v793_v28 = vshll.u32 %v1609_v15, 16  ;;  %v328_v43 = vadd.f32 %v2156_v42, %v289_v22 }
  0xb5   : > { %v1754_v34 = vpack.c.bf16 %v890_v20, %v890_v20  ;;  %v781_v35 = vrot.slane %v780_v21, 4  ;;  %v789_v36 = vrot.slane %v787_v23, 4  ;;  %v359_v39 = vmax.f32 %v327_v13, 0.0 }
  0xb6   : > { %v1290_v37 = vor.u32 %v1288_v19, %v1287_v24  ;;  %v795_v46 = vrot.slane %v793_v28, 5  ;;  %v1291_v47 = vrot.slane %v1287_v24, 4  ;;  %v360_v29 = vmax.f32 %v328_v43, 0.0 }
  0xb7   : > { %v1293_v40 = vshrl.u32 %v1754_v34, 16  ;;  %v1296_v41 = vshll.u32 %v1754_v34, 16  ;;  %v786_v27 = vsel %vm1913_vm2, %v781_v35, %v785_v26  ;;  %v790_v45 = vor.u32 %v789_v36, %v785_v26 }
  0xb8   : > { %v1471_v30 = vsel %vm1939_vm8, %v1290_v37, %v1712_v33  ;;  %v859_v44 = vunpack.c.l.bf16 %v786_v27 }
  0xb9   : > { %1713 = vst [vmem:[%s1829_s28 + $0xb4] sm:$0xf] %v1471_v30  ;;  %v1295_v48 = vrot.slane %v1293_v40, 7  ;;  %v791_v50 = vrot.slane %v790_v45, 4 }
  0xba   : > { %v891_v51 = vadd.f32 %v859_v44, %v359_v39 }
  0xbb   : > { %v1298_v52 = vor.u32 %v1296_v41, %v1295_v48  ;;  %v1300_v18 = vrot.slane %v1295_v48, 4  ;;  %v796_v42 = vsel %vm1913_vm2, %v791_v50, %v795_v46 }
  0xbc   : > { %v1755_v53 = vpack.c.bf16 %v891_v51, %v891_v51  ;;  %v860_v56 = vunpack.c.l.bf16 %v796_v42 }
  0xbd   : > { %v1299_v54 = vsel %vm1946_vm9, %v1291_v47, %v1298_v52  ;;  %v1475_v55 = vsel %vm1953_vm10, %v1300_v18, %v1715_v49 }
  0xbe   : > { %1714 = vst [vmem:[%s1829_s28 + $0xb8] sm:$0xf] %v1299_v54  ;;  %1716 = vst [vmem:[%s1829_s28 + $0xbc] sm:$0x1] %v1475_v55  ;;  %v1302_v57 = vshrl.u32 %v1755_v53, 16  ;;  %v1305_v58 = vshll.u32 %v1755_v53, 16  ;;  %v892_v60 = vadd.f32 %v860_v56, %v360_v29 }
  0xc0   : > { %v1304_v61 = vrot.slane %v1302_v57, 7  ;;  %v1756_v38 = vpack.c.bf16 %v892_v60, %v892_v60 }
  0xc2   : > { %v1307_v59 = vor.u32 %v1305_v58, %v1304_v61  ;;  %v1310_v2 = vshrl.u32 %v1756_v38, 16  ;;  %v1313_v3 = vshll.u32 %v1756_v38, 16  ;;  %v1308_v4 = vrot.slane %v1304_v61, 4 }
  0xc4   : > { %v1478_v0 = vsel %vm1939_vm8, %v1307_v59, %v1717_v63  ;;  %v1312_v5 = vrot.slane %v1310_v2, 7 }
  0xc5   : > { %1718 = vst [vmem:[%s1829_s28 + $0xc0] sm:$0xf] %v1478_v0 }
  0xc6   : > { %v1315_v62 = vor.u32 %v1313_v3, %v1312_v5  ;;  %v1317_v9 = vrot.slane %v1312_v5, 4 }
  0xc8   : > { %v1316_v1 = vsel %vm1946_vm9, %v1308_v4, %v1315_v62  ;;  %v1482_v10 = vsel %vm1953_vm10, %v1317_v9, %v1720_v7 }
  0xc9   : > { %1719 = vst [vmem:[%s1829_s28 + $0xc4] sm:$0xf] %v1316_v1  ;;  %1721 = vst [vmem:[%s1829_s28 + $0xc8] sm:$0x1] %v1482_v10 }
  0xca PF: > { %s14_s15 = sadd.s32 1, %s1775_s15  }
  0xcb   : > { %p11_p4 = scmp.ge.s32.totalorder %s14_s15, 4  }
  0xcd   :  { %13 = sbr.rel (!%p11_p4) target bundleno = 1 (0x1), region = 71 }

// kernel: rrcnn_block.14
= control target key start
LH: loop header
LB: loop body
LE: loop exit
PB: predicated region body
PF: predicated region fallthrough
CT: control target
= control target key end

     0   :  { %s3636_s12 = smov 0   ;;  %s4759_s0 = inlined_call_operand.vmem [shape: bf16[2,18,18,128], index: 0, kind: input, shape index: {}]   ;;  %s4760_s1 = inlined_call_operand.vmem [shape: bf16[3,384,128], index: 1, kind: input, shape index: {}]   ;;  %s4761_s2 = inlined_call_operand.vmem [shape: f32[2,256,128], index: 2, kind: output, shape index: {0}]   ;;  %s4762_s3 = inlined_call_operand.vmem [shape: f32[2,2,128], index: 3, kind: output, shape index: {1}]  }
   0x1 LB: > { %s2702_s13 = sadd.s32 4294967295, %s3614_s12   ;;  %p2706_p0 = scmp.ge.s32.totalorder %s3614_s12, 1  ;;  %s3614_s12 = sphi %s3636_s12, %s14_s12  }
   0x2   : > { %p140_p1 = scmp.lt.s32.totalorder %s3614_s12, 3 }
   0x4   : > { %p141_p2 = pnand %p2706_p0, %p140_p1 }
   0x6   : > { %144 = sbr.rel (%p141_p2) target bundleno = 550 (0x226), region = 28 }
   0xb   : > { %v3495_v0 = vld [vmem:[%s4760_s1 + $0x78] sm:$0xff]   ;;  %v3497_v2 = vld [vmem:[%s4760_s1 + $0x70] sm:$0xff]   ;;  %p168_p3 = scmp.lt.s32.totalorder %s2702_s13, 1  ;;  %v3499_v4 = vld [vmem:[%s4760_s1 + $0x68] sm:$0xff]   ;;  %vm381_vm0 = vsmask.f32 7424 }
   0xc   : > { %v3496_v1 = vld [vmem:[%s4760_s1 + $0x38] sm:$0xff]   ;;  %2918 = vmatprep.subr.bf16.mxu0 %v3495_v0  ;;  %3470 = vmatprep.subr.bf16.mxu1 %v3495_v0  ;;  %v3498_v3 = vld [vmem:[%s4760_s1 + $0x30] sm:$0xff]   ;;  %v3500_v5 = vld [vmem:[%s4760_s1 + $0x28] sm:$0xff]   ;;  %vm590_vm1 = vcmask 1046528   ;;  %vm2613_vm2 = vcmask 1040384  }
   0xd   : > { %2919 = vmatpush3.bf16.msra.mxu0 %v3496_v1  ;;  %3478 = vmatpush3.bf16.msra.mxu1 %v3496_v1  ;;  %s4792_s13 = smov (!%p168_p3, %s2702_s13), 1  ;;  %v3501_v6 = vld [vmem:[%s4760_s1 + $0x60] sm:$0xff]   ;;  %v3503_v8 = vld [vmem:[%s4760_s1 + $0x58] sm:$0xff]   ;;  %v3505_v10 = vld [vmem:[%s4760_s1 + $0x50] sm:$0xff]  }
   0xe   : > { %2920 = vmatprep.subr.bf16.mxu0 %v3497_v2  ;;  %3471 = vmatprep.subr.bf16.mxu1 %v3497_v2  ;;  %s3486_s28 = smul.u32 216, %s4792_s13  ;;  %v3502_v7 = vld [vmem:[%s4760_s1 + $0x20] sm:$0xff]   ;;  %v3504_v9 = vld [vmem:[%s4760_s1 + $0x18] sm:$0xff]   ;;  %v3506_v11 = vld [vmem:[%s4760_s1 + $0x10] sm:$0xff]   ;;  %s2710_s20 = sshll.u32 %s4792_s13, 1 }
   0xf   : > { %v3507_v18 = vld [vmem:[%s4760_s1 + $0x48] sm:$0xff]   ;;  %v3509_v26 = vld [vmem:[%s4760_s1 + $0x40] sm:$0xff]   ;;  %v3515_v36 = vld [vmem:[%s4760_s1 + $0xb8] sm:$0xff]   ;;  %s181_s23 = scalar_lea.vmem %s4762_s3, %s2710_s20 }
  0x10   : > { %s3680_s10 = scalar_lea.vmem %s4759_s0, %s3486_s28  ;;  %v3508_v24 = vld [vmem:[%s4760_s1 + $0x8] sm:$0xff]   ;;  %v3510_v31 = vld [vmem:[%s4760_s1] sm:$0xff]   ;;  %v3516_v44 = vld [vmem:[%s4760_s1 + $0x178] sm:$0xff]  }
  0x11   : > { %2921 = vmatpush3.bf16.msra.mxu0 %v3498_v3  ;;  %3479 = vmatpush3.bf16.msra.mxu1 %v3498_v3  ;;  %v3689_v12 = vld [vmem:[%s3680_s10] sm:$0xff]   ;;  %v3692_v13 = vld [vmem:[%s3680_s10 + $0x8] ss:$0 sps:$4 sm:$0x11]   ;;  %v3698_v17 = vld [vmem:[%s3680_s10 + $0x90] sm:$0xff]  }
  0x12   : > { %2922 = vmatprep.subr.bf16.mxu0 %v3499_v4  ;;  %3472 = vmatprep.subr.bf16.mxu1 %v3499_v4  ;;  %v383_v14 = vshrl.u32 %v3689_v12, 16  ;;  %v385_v15 = vshll.u32 %v3689_v12, 16  ;;  %v390_v16 = vshll.u32 %v3692_v13, 16  ;;  %v3704_v19 = vld [vmem:[%s3680_s10 + $0x98] ss:$0 sps:$4 sm:$0x11]  }
  0x13   : > { %v527_v22 = vshrl.u32 %v3698_v17, 16  ;;  %v529_v23 = vshll.u32 %v3698_v17, 16  ;;  %v534_v25 = vshll.u32 %v3704_v19, 16  ;;  %v3716_v30 = vld [vmem:[%s3680_s10 + $0xc] sm:$0xff]   ;;  %v3726_v35 = vld [vmem:[%s3680_s10 + $0x9c] sm:$0xff]  }
  0x14   : > { %v387_v20 = vrot.slane %v385_v15, 1  ;;  %v392_v21 = vrot.slane %v390_v16, 1  ;;  %v3723_v34 = vld [vmem:[%s3680_s10 + $0x14] ss:$0 sps:$4 sm:$0x11]   ;;  %v395_v37 = vshrl.u32 %v3716_v30, 16 }
  0x15   : > { %2923 = vmatpush3.bf16.msra.mxu0 %v3500_v5  ;;  %3480 = vmatpush3.bf16.msra.mxu1 %v3500_v5  ;;  %v531_v28 = vrot.slane %v529_v23, 1  ;;  %v536_v29 = vrot.slane %v534_v25, 1  ;;  %v397_v38 = vshll.u32 %v3716_v30, 16  ;;  %v402_v40 = vshll.u32 %v3723_v34, 16  ;;  %v3517_v49 = vld [vmem:[%s4760_s1 + $0xb0] sm:$0xff]   ;;  %v3754_v54 = vld [vmem:[%s3680_s10 + $0x18] sm:$0xff]  }
  0x16   : > { %2924 = vmatprep.subr.bf16.mxu0 %v3501_v6  ;;  %3473 = vmatprep.subr.bf16.mxu1 %v3501_v6  ;;  %v388_v27 = vor.u32 %v387_v20, %v383_v14  ;;  %v3738_v41 = vld [vmem:[%s3680_s10 + $0xa4] ss:$0 sps:$4 sm:$0x11]   ;;  %v539_v42 = vshrl.u32 %v3726_v35, 16  ;;  %v541_v43 = vshll.u32 %v3726_v35, 16  ;;  %v3524_v53 = vld [vmem:[%s4760_s1 + $0x170] sm:$0xff]  }
  0x17   : > { %v532_v33 = vor.u32 %v531_v28, %v527_v22  ;;  %v399_v45 = vrot.slane %v397_v38, 1  ;;  %v404_v46 = vrot.slane %v402_v40, 1  ;;  %v546_v48 = vshll.u32 %v3738_v41, 16  ;;  %v3757_v55 = vld [vmem:[%s3680_s10 + $0x20] ss:$0 sps:$4 sm:$0x11]  }
  0x18   : > { %v393_v32 = vsel %vm381_vm0, %v388_v27, %v392_v21  ;;  %v543_v47 = vrot.slane %v541_v43, 1  ;;  %v407_v58 = vshrl.u32 %v3754_v54, 16  ;;  %v409_v59 = vshll.u32 %v3754_v54, 16  ;;  %v3771_v61 = vld [vmem:[%s3680_s10 + $0xa8] sm:$0xff]   ;;  %v3523_v5 = vld [vmem:[%s4760_s1 + $0xa0] sm:$0xff]   ;;  %v3800_v20 = vld [vmem:[%s3680_s10 + $0xb4] sm:$0xff]  }
  0x19   : > { %2925 = vmatpush3.bf16.msra.mxu0 %v3502_v7  ;;  %3481 = vmatpush3.bf16.msra.mxu1 %v3502_v7  ;;  %v3734_v39 = vsel %vm381_vm0, %v532_v33, %v536_v29  ;;  %v400_v50 = vor.u32 %v399_v45, %v395_v37  ;;  %v548_v52 = vrot.slane %v546_v48, 1  ;;  %v414_v60 = vshll.u32 %v3757_v55, 16  ;;  %v3522_v62 = vld [vmem:[%s4760_s1 + $0xa8] sm:$0xff]   ;;  %v3777_v63 = vld [vmem:[%s3680_s10 + $0xb0] ss:$0 sps:$4 sm:$0x11]  }
  0x1a   : > { %2926 = vmatprep.subr.bf16.mxu0 %v3503_v8  ;;  %3474 = vmatprep.subr.bf16.mxu1 %v3503_v8  ;;  %v544_v51 = vor.u32 %v543_v47, %v539_v42  ;;  %v411_v0 = vrot.slane %v409_v59, 1  ;;  %v551_v2 = vshrl.u32 %v3771_v61, 16  ;;  %v553_v3 = vshll.u32 %v3771_v61, 16  ;;  %v3788_v8 = vld [vmem:[%s3680_s10 + $0x24] sm:$0xff]   ;;  %v3529_v23 = vld [vmem:[%s4760_s1 + $0x98] sm:$0xff]   ;;  %v3530_v42 = vld [vmem:[%s4760_s1 + $0x90] sm:$0xff]  }
  0x1b   : > { %879 = vmatprep.mubr.bf16.mxu0 %v393_v32  ;;  %975 = vmatprep.mubr.bf16.mxu1 %v3734_v39  ;;  %v3760_v56 = vsel %vm381_vm0, %v400_v50, %v404_v46  ;;  %v416_v1 = vrot.slane %v414_v60, 1  ;;  %v558_v4 = vshll.u32 %v3777_v63, 16  ;;  %v419_v15 = vshrl.u32 %v3788_v8, 16  ;;  %v3803_v21 = vld [vmem:[%s3680_s10 + $0xbc] ss:$0 sps:$4 sm:$0x11]  }
  0x1c   : > { %v3765_v57 = vsel %vm381_vm0, %v544_v51, %v548_v52  ;;  %v412_v6 = vor.u32 %v411_v0, %v407_v58  ;;  %v555_v7 = vrot.slane %v553_v3, 1  ;;  %v421_v16 = vshll.u32 %v3788_v8, 16  ;;  %v3536_v25 = vld [vmem:[%s4760_s1 + $0x168] sm:$0xff]   ;;  %v3825_v38 = vld [vmem:[%s3680_s10 + $0x38] ss:$0 sps:$4 sm:$0x11]  }
  0x1d   : > { %2927 = vmatpush3.bf16.msra.mxu0 %v3504_v9  ;;  %3482 = vmatpush3.bf16.msra.mxu1 %v3504_v9  ;;  %v560_v9 = vrot.slane %v558_v4, 1  ;;  %v563_v27 = vshrl.u32 %v3800_v20, 16  ;;  %v565_v28 = vshll.u32 %v3800_v20, 16  ;;  %v570_v29 = vshll.u32 %v3803_v21, 16  ;;  %v3535_v48 = vld [vmem:[%s4760_s1 + $0x88] sm:$0xff]   ;;  %v3542_v50 = vld [vmem:[%s4760_s1 + $0x160] sm:$0xff]  }
  0x1e   : > { %2928 = vmatprep.subr.bf16.mxu0 %v3505_v10  ;;  %3475 = vmatprep.subr.bf16.mxu1 %v3505_v10  ;;  %v3791_v10 = vld [vmem:[%s3680_s10 + $0x2c] ss:$0 sps:$4 sm:$0x11]   ;;  %v556_v14 = vor.u32 %v555_v7, %v551_v2  ;;  %v438_v47 = vshll.u32 %v3825_v38, 16  ;;  %v3850_v52 = vld [vmem:[%s3680_s10 + $0x3c] sm:$0xff]   ;;  %v591_v58 = vrot.slane %v3689_v12, 1 }
  0x1f   : > { %v567_v32 = vrot.slane %v565_v28, 1  ;;  %v572_v33 = vrot.slane %v570_v29, 1  ;;  %v592_v59 = vrot.slane %v3692_v13, 1  ;;  %v3537_v60 = vld [vmem:[%s4760_s1 + $0x80] sm:$0xff]   ;;  %v445_v0 = vshll.u32 %v3850_v52, 16  ;;  %v3868_v3 = vld [vmem:[%s3680_s10 + $0x48] sm:$0xff]  }
  0x20   : > { %v3808_v22 = vsel %vm381_vm0, %v556_v14, %v560_v9  ;;  %v594_v4 = vrot.slane %v3716_v30, 1  ;;  %v3879_v7 = vld [vmem:[%s3680_s10 + $0x50] ss:$0 sps:$4 sm:$0x11]  }
  0x21   : > { %2929 = vmatpush3.bf16.msra.mxu0 %v3506_v11  ;;  %3483 = vmatpush3.bf16.msra.mxu1 %v3506_v11  ;;  %v3794_v11 = vsel %vm381_vm0, %v412_v6, %v416_v1  ;;  %v568_v37 = vor.u32 %v567_v32, %v563_v27  ;;  %v593_v2 = vsel %vm590_vm1, %v591_v58, %v592_v59  ;;  %v3540_v6 = vld [vmem:[%s4760_s1 + $0x138] sm:$0xff]   ;;  %v455_v27 = vshrl.u32 %v3868_v3, 16  ;;  %v3550_v58 = vld [vmem:[%s4760_s1 + $0xe8] sm:$0xff]  }
  0x22   : > { %2930 = vmatprep.subr.bf16.mxu0 %v3507_v18  ;;  %3476 = vmatprep.subr.bf16.mxu1 %v3507_v18  ;;  %v426_v18 = vshll.u32 %v3791_v10, 16  ;;  %v462_v28 = vshll.u32 %v3879_v7, 16  ;;  %v3904_v32 = vld [vmem:[%s3680_s10 + $0x54] sm:$0xff]  }
  0x23   : > { %v3836_v45 = vsel %vm381_vm0, %v568_v37, %v572_v33  ;;  %v3546_v33 = vld [vmem:[%s4760_s1 + $0xf0] sm:$0xff]  }
  0x25   : > { %2931 = vmatpush3.bf16.msra.mxu0 %v3508_v24  ;;  %3484 = vmatpush3.bf16.msra.mxu1 %v3508_v24  ;;  %v423_v24 = vrot.slane %v421_v16, 1  ;;  %v597_v16 = vrot.slane %v3754_v54, 1 }
  0x26   : > { %2932 = vmatprep.subr.bf16.mxu0 %v3509_v26  ;;  %3477 = vmatprep.subr.bf16.mxu1 %v3509_v26  ;;  %v428_v26 = vrot.slane %v426_v18, 1  ;;  %v3551_v18 = vld [vmem:[%s4760_s1 + $0x158] sm:$0xff]  }
  0x29   : > { %2933 = vmatpush3.bf16.msra.mxu0 %v3510_v31  ;;  %3485 = vmatpush3.bf16.msra.mxu1 %v3510_v31  ;;  %v424_v31 = vor.u32 %v423_v24, %v419_v15  ;;  %v457_v15 = vshll.u32 %v3868_v3, 16  ;;  %v3541_v24 = vld [vmem:[%s4760_s1 + $0xf8] sm:$0xff]  }
  0x2a   : > { %3326 = vmatprep.subr.bf16.mxu1 %v3515_v36  ;;  %3374 = vmatprep.subr.bf16.mxu0 %v3516_v44 }
  0x2b   : > { %v3832_v43 = vsel %vm381_vm0, %v424_v31, %v428_v26  ;;  %v601_v26 = vrot.slane %v3791_v10, 1  ;;  %v459_v31 = vrot.slane %v457_v15, 1 }
  0x2c   : > { %880 = vmatmul.mubr.bf16.vlgmr.msra.gmra.mxu0 %v3689_v12  ;;  %976 = vmatmul.mubr.bf16.vlgmr.msra.gmra.mxu1 %v3698_v17  ;;  %v447_v12 = vrot.slane %v445_v0, 1 }
  0x2d   : > { %3327 = vmatpush3.bf16.msra.mxu1 %v3515_v36  ;;  %3375 = vmatpush3.bf16.msra.mxu0 %v3516_v44  ;;  %v3822_v36 = vld [vmem:[%s3680_s10 + $0x30] sm:$0xff]  }
  0x2e   : > { %3328 = vmatprep.subr.bf16.mxu1 %v3517_v49  ;;  %887 = vmatprep.mubr.bf16.mxu0 %v3760_v56  ;;  %v433_v40 = vshll.u32 %v3822_v36, 16  ;;  %v431_v44 = vshrl.u32 %v3822_v36, 16  ;;  %v603_v37 = vrot.slane %v3822_v36, 1 }
  0x2f   : > { %983 = vmatprep.mubr.bf16.mxu1 %v3765_v57  ;;  %3376 = vmatprep.subr.bf16.mxu0 %v3524_v53 }
  0x30   : > { %v435_v46 = vrot.slane %v433_v40, 1  ;;  %v604_v40 = vrot.slane %v3825_v38, 1  ;;  %v469_v38 = vshll.u32 %v3904_v32, 16 }
  0x31   : > { %3329 = vmatpush3.bf16.msra.mxu1 %v3517_v49  ;;  %3377 = vmatpush3.bf16.msra.mxu0 %v3524_v53  ;;  %v440_v49 = vrot.slane %v438_v47, 1  ;;  %v3853_v53 = vld [vmem:[%s3680_s10 + $0x44] ss:$0 sps:$4 sm:$0x11]   ;;  %v460_v47 = vor.u32 %v459_v31, %v455_v27  ;;  %v3562_v27 = vld [vmem:[%s4760_s1 + $0xd8] sm:$0xff]   ;;  %v3982_v31 = vld [vmem:[%s3680_s10 + $0x6c] sm:$0xff]  }
  0x32   : > { %3330 = vmatprep.subr.bf16.mxu1 %v3522_v62  ;;  %3378 = vmatprep.subr.bf16.mxu0 %v3536_v25  ;;  %v436_v51 = vor.u32 %v435_v46, %v431_v44  ;;  %v450_v13 = vshll.u32 %v3853_v53, 16  ;;  %v464_v44 = vrot.slane %v462_v28, 1  ;;  %v3556_v46 = vld [vmem:[%s4760_s1 + $0x150] sm:$0xff]   ;;  %v612_v28 = vrot.slane %v3904_v32, 1 }
  0x34   : > { %888 = vmatmul.mubr.bf16.gmra.mxu0 %v3716_v30  ;;  %984 = vmatmul.mubr.bf16.gmra.mxu1 %v3726_v35  ;;  %v3863_v1 = vsel %vm381_vm0, %v436_v51, %v440_v49  ;;  %v452_v14 = vrot.slane %v450_v13, 1  ;;  %v606_v51 = vrot.slane %v3850_v52, 1  ;;  %v3939_v59 = vsel %vm381_vm0, %v460_v47, %v464_v44 }
  0x35   : > { %3331 = vmatpush3.bf16.msra.mxu1 %v3522_v62  ;;  %895 = vmatprep.mubr.bf16.mxu0 %v3794_v11  ;;  %v443_v62 = vshrl.u32 %v3850_v52, 16  ;;  %v607_v13 = vrot.slane %v3853_v53, 1  ;;  %v3555_v53 = vld [vmem:[%s4760_s1 + $0xe0] sm:$0xff]   ;;  %v493_v47 = vshll.u32 %v3982_v31, 16 }
  0x36   : > { %3332 = vmatprep.subr.bf16.mxu1 %v3523_v5  ;;  %991 = vmatprep.mubr.bf16.mxu1 %v3808_v22 }
  0x37   : > { %3379 = vmatpush3.bf16.msra.mxu0 %v3536_v25  ;;  %v448_v9 = vor.u32 %v447_v12, %v443_v62  ;;  %v600_v25 = vrot.slane %v3788_v8, 1  ;;  %v471_v62 = vrot.slane %v469_v38, 1  ;;  %v3944_v12 = vld [vmem:[%s3680_s10 + $0x60] sm:$0xff]   ;;  %v3568_v38 = vld [vmem:[%s4760_s1 + $0xd0] sm:$0xff]  }
  0x38   : > { %3380 = vmatprep.subr.bf16.mxu0 %v3542_v50  ;;  %v481_v15 = vshll.u32 %v3944_v12, 16 }
  0x39   : > { %3333 = vmatpush3.bf16.msra.mxu1 %v3523_v5  ;;  %v595_v5 = vrot.slane %v3723_v34, 1  ;;  %v598_v34 = vrot.slane %v3757_v55, 1  ;;  %v3545_v55 = vld [vmem:[%s4760_s1 + $0x130] sm:$0xff]   ;;  %v3901_v29 = vsel %vm381_vm0, %v448_v9, %v452_v14  ;;  %v3929_v49 = vsel %vm590_vm1, %v600_v25, %v601_v26 }
  0x3a   : > { %3334 = vmatprep.subr.bf16.mxu1 %v3529_v23 }
  0x3b   : > { %3381 = vmatpush3.bf16.msra.mxu0 %v3542_v50  ;;  %v3907_v10 = vsel %vm590_vm1, %v597_v16, %v598_v34  ;;  %v3932_v50 = vsel %vm590_vm1, %v603_v37, %v604_v40  ;;  %v479_v16 = vshrl.u32 %v3944_v12, 16  ;;  %v3966_v34 = vsel %vm590_vm1, %v606_v51, %v607_v13 }
  0x3c   : > { %896 = vmatmul.mubr.bf16.gmra.mxu0 %v3754_v54  ;;  %992 = vmatmul.mubr.bf16.gmra.mxu1 %v3771_v61  ;;  %v615_v40 = vrot.slane %v3944_v12, 1 }
  0x3d   : > { %3335 = vmatpush3.bf16.msra.mxu1 %v3529_v23  ;;  %903 = vmatprep.mubr.bf16.mxu0 %v3832_v43  ;;  %v3888_v23 = vsel %vm590_vm1, %v594_v4, %v595_v5  ;;  %v609_v4 = vrot.slane %v3868_v3, 1  ;;  %v610_v5 = vrot.slane %v3879_v7, 1  ;;  %v3561_v7 = vld [vmem:[%s4760_s1 + $0x118] sm:$0xff]  }
  0x3e   : > { %3336 = vmatprep.subr.bf16.mxu1 %v3530_v42  ;;  %999 = vmatprep.mubr.bf16.mxu1 %v3836_v45 }
  0x3f   : > { %3382 = vmatprep.subr.bf16.mxu0 %v3551_v18  ;;  %v3975_v26 = vsel %vm590_vm1, %v609_v4, %v610_v5  ;;  %v495_v4 = vrot.slane %v493_v47, 1  ;;  %v4011_v5 = vld [vmem:[%s3680_s10 + $0x78] sm:$0xff]  }
  0x40   : > { %3383 = vmatpush3.bf16.msra.mxu0 %v3551_v18 }
  0x41   : > { %3337 = vmatpush3.bf16.msra.mxu1 %v3530_v42  ;;  %v3549_v42 = vld [vmem:[%s4760_s1 + $0x128] sm:$0xff]   ;;  %3384 = vmatprep.subr.bf16.mxu0 %v3556_v46 }
  0x42   : > { %3338 = vmatprep.subr.bf16.mxu1 %v3535_v48 }
  0x44   : > { %904 = vmatmul.mubr.bf16.gmra.mxu0 %v3788_v8  ;;  %1000 = vmatmul.mubr.bf16.gmra.mxu1 %v3800_v20 }
  0x45   : > { %3339 = vmatpush3.bf16.msra.mxu1 %v3535_v48  ;;  %911 = vmatprep.mubr.bf16.mxu0 %v3863_v1  ;;  %v3925_v48 = vld [vmem:[%s3680_s10 + $0x5c] ss:$0 sps:$4 sm:$0x11]  }
  0x46   : > { %3340 = vmatprep.subr.bf16.mxu1 %v3537_v60  ;;  %3342 = vmatprep.mubr.bf16.mxu1 %v593_v2  ;;  %v474_v0 = vshll.u32 %v3925_v48, 16  ;;  %v3554_v2 = vld [vmem:[%s4760_s1 + $0x120] sm:$0xff]   ;;  %v613_v37 = vrot.slane %v3925_v48, 1  ;;  %v618_v48 = vrot.slane %v3982_v31, 1 }
  0x47   : > { %3385 = vmatpush3.bf16.msra.mxu0 %v3556_v46 }
  0x48   : > { %v476_v14 = vrot.slane %v474_v0, 1  ;;  %v3564_v0 = vld [vmem:[%s3680_s10 + $0x80] ss:$0 sps:$4 sm:$0x11]   ;;  %v4007_v13 = vsel %vm590_vm1, %v612_v28, %v613_v37  ;;  %v505_v28 = vshll.u32 %v4011_v5, 16  ;;  %v3575_v37 = vld [vmem:[%s4760_s1 + $0x238] sm:$0xff]  }
  0x49   : > { %3341 = vmatpush3.bf16.msra.mxu1 %v3537_v60  ;;  %v467_v60 = vshrl.u32 %v3904_v32, 16 }
  0x4a   : > { %3054 = vmatprep.subr.bf16.mxu1 %v3540_v6  ;;  %v3558_v6 = vld [vmem:[%s3680_s10 + $0x68] ss:$0 sps:$4 sm:$0x11]  }
  0x4b   : > { %v472_v9 = vor.u32 %v471_v62, %v467_v60  ;;  %v486_v18 = vshll.u32 %v3558_v6, 16  ;;  %v616_v46 = vrot.slane %v3558_v6, 1  ;;  %v3572_v60 = vld [vmem:[%s4760_s1 + $0x140] sm:$0xff]  }
  0x4c   : > { %912 = vmatmul.mubr.bf16.gmra.mxu0 %v3822_v36  ;;  %3343 = vmatmul.mubr.bf16.vlgmr.msra.gmra.mxu1 %v3888_v23 }
  0x4d   : > { %3055 = vmatpush3.bf16.msra.mxu1 %v3541_v24  ;;  %919 = vmatprep.mubr.bf16.mxu0 %v3901_v29  ;;  %v3569_v24 = vld [vmem:[%s4760_s1 + $0x148] sm:$0xff]   ;;  %v3972_v25 = vsel %vm381_vm0, %v472_v9, %v476_v14  ;;  %v488_v44 = vrot.slane %v486_v18, 1  ;;  %v4020_v9 = vsel %vm590_vm1, %v615_v40, %v616_v46  ;;  %v621_v18 = vrot.slane %v4011_v5, 1 }
  0x4e   : > { %3346 = vmatprep.mubr.bf16.mxu1 %v3907_v10  ;;  %3056 = vmatprep.subr.bf16.mxu1 %v3545_v55  ;;  %v483_v55 = vrot.slane %v481_v15, 1  ;;  %v3573_v15 = vld [vmem:[%s4760_s1 + $0x100] sm:$0xff]  }
  0x4f   : > { %3386 = vmatprep.subr.bf16.mxu0 %v3569_v24  ;;  %v4042_v40 = vld [vmem:[%s3680_s10 + $0x84] sm:$0xff]  }
  0x50   : > { %v484_v51 = vor.u32 %v483_v55, %v479_v16  ;;  %3387 = vmatpush3.bf16.msra.mxu0 %v3569_v24  ;;  %v3576_v16 = vld [vmem:[%s4760_s1 + $0x1f8] sm:$0xff]   ;;  %v622_v24 = vrot.slane %v3564_v0, 1 }
  0x51   : > { %3057 = vmatpush3.bf16.msra.mxu1 %v3546_v33  ;;  %v3567_v33 = vld [vmem:[%s4760_s1 + $0x110] sm:$0xff]   ;;  %3388 = vmatprep.subr.bf16.mxu0 %v3572_v60 }
  0x52   : > { %3058 = vmatprep.subr.bf16.mxu1 %v3549_v42  ;;  %v3560_v42 = vld [vmem:[%s3680_s10 + $0x74] ss:$0 sps:$4 sm:$0x11]   ;;  %v4017_v6 = vsel %vm381_vm0, %v484_v51, %v488_v44  ;;  %v503_v44 = vshrl.u32 %v4011_v5, 16  ;;  %v4052_v47 = vsel %vm590_vm1, %v621_v18, %v622_v24  ;;  %v510_v51 = vshll.u32 %v3564_v0, 16 }
  0x53   : > { %v498_v62 = vshll.u32 %v3560_v42, 16  ;;  %v619_v14 = vrot.slane %v3560_v42, 1  ;;  %v517_v0 = vshll.u32 %v4042_v40, 16  ;;  %v633_v24 = vrot.slane %v3771_v61, 1 }
  0x54   : > { %920 = vmatmul.mubr.bf16.gmra.mxu0 %v3850_v52  ;;  %3347 = vmatmul.mubr.bf16.gmra.mxu1 %v3929_v49 }
  0x55   : > { %927 = vmatprep.mubr.bf16.mxu0 %v3939_v59  ;;  %3350 = vmatprep.mubr.bf16.mxu1 %v3932_v50  ;;  %v4045_v42 = vsel %vm590_vm1, %v618_v48, %v619_v14  ;;  %v515_v14 = vshrl.u32 %v4042_v40, 16 }
  0x56   : > { %3059 = vmatpush3.bf16.msra.mxu1 %v3550_v58  ;;  %v3570_v58 = vld [vmem:[%s4760_s1 + $0x108] sm:$0xff]   ;;  %3389 = vmatpush3.bf16.msra.mxu0 %v3572_v60  ;;  %v627_v60 = vrot.slane %v3698_v17, 1  ;;  %v630_v17 = vrot.slane %v3726_v35, 1  ;;  %v636_v35 = vrot.slane %v3800_v20, 1  ;;  %v3578_v20 = vld [vmem:[%s4760_s1 + $0x1f0] sm:$0xff]  }
  0x57   : > { %3060 = vmatprep.subr.bf16.mxu1 %v3554_v2  ;;  %v491_v2 = vshrl.u32 %v3982_v31, 16  ;;  %3190 = vmatprep.subr.bf16.mxu0 %v3576_v16  ;;  %v519_v16 = vrot.slane %v517_v0, 1  ;;  %v3589_v0 = vld [vmem:[%s4760_s1 + $0x190] sm:$0xff]  }
  0x59   : > { %v496_v55 = vor.u32 %v495_v4, %v491_v2  ;;  %v512_v4 = vrot.slane %v510_v51, 1  ;;  %v3583_v51 = vld [vmem:[%s4760_s1 + $0x1e0] sm:$0xff]  }
  0x5a   : > { %3061 = vmatpush3.bf16.msra.mxu1 %v3555_v53  ;;  %v3571_v53 = vld [vmem:[%s4760_s1 + $0xc8] sm:$0xff]  }
  0x5b   : > { %3062 = vmatprep.subr.bf16.mxu1 %v3561_v7  ;;  %v500_v7 = vrot.slane %v498_v62, 1  ;;  %v628_v62 = vrot.slane %v3704_v19, 1  ;;  %v631_v19 = vrot.slane %v3738_v41, 1  ;;  %v637_v41 = vrot.slane %v3803_v21, 1  ;;  %v3580_v21 = vld [vmem:[%s4760_s1 + $0x230] sm:$0xff]  }
  0x5c   : > { %928 = vmatmul.mubr.bf16.gmra.mxu0 %v3868_v3  ;;  %3351 = vmatmul.mubr.bf16.gmra.mxu1 %v3966_v34 }
  0x5d   : > { %935 = vmatprep.mubr.bf16.mxu0 %v3972_v25  ;;  %3354 = vmatprep.mubr.bf16.mxu1 %v3975_v26  ;;  %v4049_v46 = vsel %vm381_vm0, %v496_v55, %v500_v7  ;;  %v4070_v7 = vsel %vm590_vm1, %v627_v60, %v628_v62  ;;  %v520_v55 = vor.u32 %v519_v16, %v515_v14  ;;  %v3586_v60 = vld [vmem:[%s4760_s1 + $0x1d8] sm:$0xff]   ;;  %v3591_v14 = vld [vmem:[%s4760_s1 + $0x1c8] sm:$0xff]  }
  0x5e   : > { %3063 = vmatpush3.bf16.msra.mxu1 %v3562_v27  ;;  %v3566_v27 = vld [vmem:[%s3680_s10 + $0x8c] ss:$0 sps:$4 sm:$0x11]   ;;  %v4096_v61 = vsel %vm590_vm1, %v636_v35, %v637_v41  ;;  %v3587_v62 = vld [vmem:[%s4760_s1 + $0x198] sm:$0xff]  }
  0x5f   : > { %3064 = vmatprep.subr.bf16.mxu1 %v3567_v33  ;;  %v3574_v33 = vld [vmem:[%s4760_s1 + $0xc0] sm:$0xff]   ;;  %v625_v48 = vrot.slane %v3566_v27, 1  ;;  %v522_v18 = vshll.u32 %v3566_v27, 16  ;;  %v4081_v27 = vsel %vm590_vm1, %v630_v17, %v631_v19  ;;  %v3599_v16 = vld [vmem:[%s4760_s1 + $0x208] sm:$0xff]  }
  0x60   : > { %v3595_v17 = vld [vmem:[%s4760_s1 + $0x1c0] sm:$0xff]  }
  0x61   : > { %v3600_v19 = vld [vmem:[%s4760_s1 + $0x200] sm:$0xff]  }
  0x62   : > { %3065 = vmatpush3.bf16.msra.mxu1 %v3568_v38  ;;  %v507_v38 = vrot.slane %v505_v28, 1  ;;  %v524_v28 = vrot.slane %v522_v18, 1  ;;  %v3592_v18 = vld [vmem:[%s4760_s1 + $0x188] sm:$0xff]  }
  0x63   : > { %3066 = vmatprep.subr.bf16.mxu1 %v3570_v58  ;;  %v624_v58 = vrot.slane %v4042_v40, 1 }
  0x64   : > { %936 = vmatmul.mubr.bf16.gmra.mxu0 %v3904_v32  ;;  %3355 = vmatmul.mubr.bf16.gmra.mxu1 %v4007_v13  ;;  %v508_v2 = vor.u32 %v507_v38, %v503_v44  ;;  %v4084_v44 = vsel %vm381_vm0, %v520_v55, %v524_v28  ;;  %v4193_v55 = vld [vmem:[%s3680_s10 + $0xc0] sm:$0xff]   ;;  %v3594_v28 = vld [vmem:[%s3680_s10 + $0xc8] ss:$0 sps:$4 sm:$0x11]  }
  0x65   : > { %943 = vmatprep.mubr.bf16.mxu0 %v4017_v6  ;;  %3358 = vmatprep.mubr.bf16.mxu1 %v4020_v9  ;;  %v1224_v35 = vrot.slane %v3594_v28, 1 }
  0x66   : > { %3067 = vmatpush3.bf16.msra.mxu1 %v3571_v53  ;;  %v4063_v53 = vsel %vm590_vm1, %v624_v58, %v625_v48  ;;  %v3590_v58 = vld [vmem:[%s4760_s1 + $0x220] sm:$0xff]  }
  0x67   : > { %3068 = vmatprep.subr.bf16.mxu1 %v3573_v15  ;;  %v4067_v15 = vsel %vm381_vm0, %v508_v2, %v512_v4  ;;  %v3584_v48 = vld [vmem:[%s4760_s1 + $0x1a0] sm:$0xff]   ;;  %v3588_v2 = vld [vmem:[%s4760_s1 + $0x1d0] sm:$0xff]  }
  0x68   : > { %v3598_v4 = vld [vmem:[%s4760_s1 + $0x210] sm:$0xff]  }
  0x6a   : > { %3069 = vmatpush3.bf16.msra.mxu1 %v3574_v33  ;;  %v634_v33 = vrot.slane %v3777_v63, 1  ;;  %v3577_v63 = vld [vmem:[%s4760_s1 + $0x1b8] sm:$0xff]  }
  0x6b   : > { %3422 = vmatprep.subr.bf16.mxu1 %v3575_v37 }
  0x6c   : > { %944 = vmatmul.mubr.bf16.gmra.mxu0 %v3944_v12  ;;  %3359 = vmatmul.mubr.bf16.gmra.mxu1 %v4045_v42  ;;  %v4087_v38 = vsel %vm590_vm1, %v633_v24, %v634_v33  ;;  %v3596_v24 = vld [vmem:[%s4760_s1 + $0x180] sm:$0xff]   ;;  %v1223_v33 = vrot.slane %v4193_v55, 1 }
  0x6d   : > { %951 = vmatprep.mubr.bf16.mxu0 %v4049_v46  ;;  %3362 = vmatprep.mubr.bf16.mxu1 %v4052_v47 }
  0x6e   : > { %v4202_v41 = vsel %vm590_vm1, %v1223_v33, %v1224_v35 }
  0x74   : > { %952 = vmatmul.mubr.bf16.gmra.mxu0 %v3982_v31  ;;  %3363 = vmatmul.mubr.bf16.gmra.mxu1 %v4063_v53 }
  0x75   : > { %959 = vmatprep.mubr.bf16.mxu0 %v4067_v15  ;;  %3366 = vmatprep.mubr.bf16.mxu1 %v4070_v7 }
  0x7c   : > { %960 = vmatmul.mubr.bf16.gmra.mxu0 %v4011_v5  ;;  %3367 = vmatmul.mubr.bf16.gmra.mxu1 %v4081_v27 }
  0x7d   : > { %967 = vmatprep.mubr.bf16.mxu0 %v4084_v44  ;;  %3370 = vmatprep.mubr.bf16.mxu1 %v4087_v38 }
  0x84   : > { %968 = vmatmul.mubr.bf16.gmra.mxu0 %v4042_v40  ;;  %3371 = vmatmul.mubr.bf16.gmra.mxu1 %v4096_v61 }
  0x85   : > { %1452 = vmatprep.mubr.bf16.mxu1 %v3760_v56  ;;  %3390 = vmatprep.mubr.bf16.mxu0 %v3888_v23  ;;  %v3579_v56 = vld [vmem:[%s4760_s1 + $0x1b0] sm:$0xff]   ;;  %v3581_v23 = vld [vmem:[%s4760_s1 + $0x1e8] sm:$0xff]  }
  0x8c   : > { %1453 = vmatmul.mubr.bf16.vlgmr.msra.gmra.mxu1 %v3716_v30  ;;  %3391 = vmatmul.mubr.bf16.vlgmr.msra.gmra.mxu0 %v3907_v10  ;;  %v3585_v30 = vld [vmem:[%s4760_s1 + $0x228] sm:$0xff]  }
  0x8d   : > { %3423 = vmatpush3.bf16.msra.mxu1 %v3575_v37  ;;  %3191 = vmatpush3.bf16.msra.mxu0 %v3577_v63  ;;  %v3582_v37 = vld [vmem:[%s4760_s1 + $0x1a8] sm:$0xff]   ;;  %v3603_v63 = vld [vmem:[%s3680_s10 + $0x18] sm:$0xff]  }
  0x8e   : > { %1460 = vmatprep.mubr.bf16.mxu1 %v3794_v11  ;;  %3394 = vmatprep.mubr.bf16.mxu0 %v3929_v49 }
  0x8f   : > { %3192 = vmatprep.subr.bf16.mxu0 %v3578_v20  ;;  %3424 = vmatprep.subr.bf16.mxu1 %v3580_v21 }
  0x91   : > { %3193 = vmatpush3.bf16.msra.mxu0 %v3579_v56  ;;  %3425 = vmatpush3.bf16.msra.mxu1 %v3580_v21 }
  0x92   : > { %3194 = vmatprep.subr.bf16.mxu0 %v3581_v23  ;;  %3426 = vmatprep.subr.bf16.mxu1 %v3585_v30 }
  0x94   : > { %1461 = vmatmul.mubr.bf16.gmra.mxu1 %v3754_v54  ;;  %3395 = vmatmul.mubr.bf16.gmra.mxu0 %v3932_v50  ;;  %v3597_v54 = vld [vmem:[%s4760_s1 + $0x218] sm:$0xff]  }
  0x95   : > { %1468 = vmatprep.mubr.bf16.mxu1 %v3832_v43  ;;  %3398 = vmatprep.mubr.bf16.mxu0 %v3966_v34 }
  0x96   : > { %3195 = vmatpush3.bf16.msra.mxu0 %v3582_v37  ;;  %3427 = vmatpush3.bf16.msra.mxu1 %v3585_v30  ;;  %v1211_v37 = vshrl.u32 %v4193_v55, 16 }
  0x97   : > { %3196 = vmatprep.subr.bf16.mxu0 %v3583_v51  ;;  %3428 = vmatprep.subr.bf16.mxu1 %v3590_v58  ;;  %v1218_v51 = vshll.u32 %v3594_v28, 16 }
  0x9a   : > { %3197 = vmatpush3.bf16.msra.mxu0 %v3584_v48  ;;  %3429 = vmatpush3.bf16.msra.mxu1 %v3590_v58 }
  0x9b   : > { %3198 = vmatprep.subr.bf16.mxu0 %v3586_v60  ;;  %3430 = vmatprep.subr.bf16.mxu1 %v3597_v54 }
  0x9c   : > { %1469 = vmatmul.mubr.bf16.gmra.mxu1 %v3788_v8  ;;  %3399 = vmatmul.mubr.bf16.gmra.mxu0 %v3975_v26 }
  0x9d   : > { %1476 = vmatprep.mubr.bf16.mxu1 %v3863_v1  ;;  %3402 = vmatprep.mubr.bf16.mxu0 %v4007_v13 }
  0x9e   : > { %3199 = vmatpush3.bf16.msra.mxu0 %v3587_v62  ;;  %3431 = vmatpush3.bf16.msra.mxu1 %v3597_v54  ;;  %v4245_v54 = vld [vmem:[%s3680_s10 + $0xa8] sm:$0xff]  }
  0x9f   : > { %3200 = vmatprep.subr.bf16.mxu0 %v3588_v2  ;;  %3432 = vmatprep.subr.bf16.mxu1 %v3598_v4 }
  0xa2   : > { %3201 = vmatpush3.bf16.msra.mxu0 %v3589_v0  ;;  %3433 = vmatpush3.bf16.msra.mxu1 %v3598_v4  ;;  %v1220_v0 = vrot.slane %v1218_v51, 1 }
  0xa3   : > { %3202 = vmatprep.subr.bf16.mxu0 %v3591_v14  ;;  %3434 = vmatprep.subr.bf16.mxu1 %v3599_v16 }
  0xa4   : > { %1477 = vmatmul.mubr.bf16.gmra.mxu1 %v3822_v36  ;;  %3403 = vmatmul.mubr.bf16.gmra.mxu0 %v4020_v9 }
  0xa5   : > { %1484 = vmatprep.mubr.bf16.mxu1 %v3901_v29  ;;  %3406 = vmatprep.mubr.bf16.mxu0 %v4045_v42 }
  0xa6   : > { %3203 = vmatpush3.bf16.msra.mxu0 %v3592_v18  ;;  %3435 = vmatpush3.bf16.msra.mxu1 %v3599_v16 }
  0xa7   : > { %3204 = vmatprep.subr.bf16.mxu0 %v3595_v17  ;;  %3436 = vmatprep.subr.bf16.mxu1 %v3600_v19 }
  0xaa   : > { %3205 = vmatpush3.bf16.msra.mxu0 %v3596_v24  ;;  %3437 = vmatpush3.bf16.msra.mxu1 %v3600_v19 }
  0xac   : > { %1485 = vmatmul.mubr.bf16.gmra.mxu1 %v3850_v52  ;;  %3407 = vmatmul.mubr.bf16.gmra.mxu0 %v4052_v47 }
  0xad   : > { %1492 = vmatprep.mubr.bf16.mxu1 %v3939_v59  ;;  %3410 = vmatprep.mubr.bf16.mxu0 %v4063_v53 }
  0xb4   : > { %1493 = vmatmul.mubr.bf16.gmra.mxu1 %v3868_v3  ;;  %3411 = vmatmul.mubr.bf16.gmra.mxu0 %v4070_v7 }
  0xb5   : > { %1500 = vmatprep.mubr.bf16.mxu1 %v3972_v25  ;;  %3414 = vmatprep.mubr.bf16.mxu0 %v4081_v27 }
  0xbc   : > { %1501 = vmatmul.mubr.bf16.gmra.mxu1 %v3904_v32  ;;  %3415 = vmatmul.mubr.bf16.gmra.mxu0 %v4087_v38 }
  0xbd   : > { %1508 = vmatprep.mubr.bf16.mxu1 %v4017_v6  ;;  %3418 = vmatprep.mubr.bf16.mxu0 %v4096_v61 }
  0xc4   : > { %1509 = vmatmul.mubr.bf16.gmra.mxu1 %v3944_v12  ;;  %3419 = vmatmul.mubr.bf16.gmra.mxu0 %v4202_v41 }
  0xc5   : > { %1516 = vmatprep.mubr.bf16.mxu1 %v4049_v46  ;;  %2089 = vmatprep.mubr.bf16.mxu0 %v3794_v11  ;;  %v4221_v11 = vld [vmem:[%s3680_s10 + $0x90] sm:$0xff]  }
  0xcc   : > { %1517 = vmatmul.mubr.bf16.gmra.mxu1 %v3982_v31  ;;  %2090 = vmatmul.mubr.bf16.vlgmr.msra.gmra.mxu0 %v3603_v63  ;;  %v4259_v63 = vld [vmem:[%s3680_s10 + $0xb4] sm:$0xff]  }
  0xcd   : > { %1524 = vmatprep.mubr.bf16.mxu1 %v4067_v15  ;;  %2097 = vmatprep.mubr.bf16.mxu0 %v3832_v43 }
  0xd4   : > { %1525 = vmatmul.mubr.bf16.gmra.mxu1 %v4011_v5  ;;  %2098 = vmatmul.mubr.bf16.gmra.mxu0 %v3788_v8 }
  0xd5   : > { %1532 = vmatprep.mubr.bf16.mxu1 %v4084_v44  ;;  %2105 = vmatprep.mubr.bf16.mxu0 %v3863_v1  ;;  %v4228_v1 = vld [vmem:[%s3680_s10 + $0x9c] sm:$0xff]  }
  0xdc   : > { %1533 = vmatmul.mubr.bf16.gmra.mxu1 %v4042_v40  ;;  %2106 = vmatmul.mubr.bf16.gmra.mxu0 %v3822_v36 }
  0xdd   : > { %1540 = vmatprep.mubr.bf16.mxu1 %v3734_v39  ;;  %2113 = vmatprep.mubr.bf16.mxu0 %v3901_v29 }
  0xe4   : > { %1541 = vmatmul.mubr.bf16.gmra.mxu1 %v4221_v11  ;;  %2114 = vmatmul.mubr.bf16.gmra.mxu0 %v3850_v52  ;;  %v1213_v52 = vshll.u32 %v4193_v55, 16 }
  0xe5   : > { %1548 = vmatprep.mubr.bf16.mxu1 %v3765_v57  ;;  %2121 = vmatprep.mubr.bf16.mxu0 %v3939_v59 }
  0xec   : > { %v2934_v8 = vpop.f32.mrf.mxu0  ;;  %v3006_v43 = vpop.f32.mrf.mxu1  ;;  %1549 = vmatmul.mubr.bf16.gmra.mxu1 %v4228_v1  ;;  %2122 = vmatmul.mubr.bf16.gmra.mxu0 %v3868_v3  ;;  %v1215_v3 = vrot.slane %v1213_v52, 1 }
  0xed   : > { %1556 = vmatprep.mubr.bf16.mxu1 %v3808_v22  ;;  %2129 = vmatprep.mubr.bf16.mxu0 %v3972_v25 }
  0xee   : > { %v2935_v36 = vpop.f32.mrf.mxu0  ;;  %v3007_v29 = vpop.f32.mrf.mxu1  ;;  %v1216_v4 = vor.u32 %v1215_v3, %v1211_v37 }
  0xef   : > { %v4235_v20 = vadd.f32 %v2935_v36, %v2934_v8  ;;  %v4237_v59 = vadd.f32 %v3007_v29, %v3006_v43 }
  0xf0   : > { %v2937_v21 = vpop.f32.mrf.mxu0  ;;  %v3009_v56 = vpop.f32.mrf.mxu1  ;;  %v4254_v28 = vsel %vm381_vm0, %v1216_v4, %v1220_v0 }
  0xf2   : > { %v2938_v23 = vpop.f32.mrf.mxu0  ;;  %v3010_v30 = vpop.f32.mrf.mxu1 }
  0xf3   : > { %v4240_v58 = vadd.f32 %v2938_v23, %v2937_v21  ;;  %v4242_v25 = vadd.f32 %v3010_v30, %v3009_v56 }
  0xf4   : > { %v2940_v48 = vpop.f32.mrf.mxu0  ;;  %v3012_v60 = vpop.f32.mrf.mxu1  ;;  %1557 = vmatmul.mubr.bf16.gmra.mxu1 %v4245_v54  ;;  %2130 = vmatmul.mubr.bf16.gmra.mxu0 %v3904_v32 }
  0xf5   : > { %1564 = vmatprep.mubr.bf16.mxu1 %v3836_v45  ;;  %2137 = vmatprep.mubr.bf16.mxu0 %v4017_v6 }
  0xf6   : > { %v2941_v62 = vpop.f32.mrf.mxu0  ;;  %v3013_v2 = vpop.f32.mrf.mxu1 }
  0xf7   : > { %v2942_v14 = vadd.f32 %v2941_v62, %v2940_v48  ;;  %v4251_v16 = vadd.f32 %v3013_v2, %v3012_v60 }
  0xf8   : > { %v2943_v18 = vpop.f32.mrf.mxu0  ;;  %v3015_v17 = vpop.f32.mrf.mxu1 }
  0xfa   : > { %v2944_v19 = vpop.f32.mrf.mxu0  ;;  %v3016_v24 = vpop.f32.mrf.mxu1 }
  0xfb   : > { %v2945_v32 = vadd.f32 %v2944_v19, %v2943_v18  ;;  %v4256_v33 = vadd.f32 %v3016_v24, %v3015_v17 }
  0xfc   : > { %v2946_v35 = vpop.f32.mrf.mxu0  ;;  %v3018_v6 = vpop.f32.mrf.mxu1  ;;  %1565 = vmatmul.mubr.bf16.gmra.mxu1 %v4259_v63  ;;  %2138 = vmatmul.mubr.bf16.gmra.mxu0 %v3944_v12 }
  0xfd   : > { %1572 = vmatprep.mubr.bf16.mxu1 %v4254_v28  ;;  %2145 = vmatprep.mubr.bf16.mxu0 %v4049_v46 }
  0xfe   : > { %v2947_v8 = vpop.f32.mrf.mxu0  ;;  %v3019_v43 = vpop.f32.mrf.mxu1 }
  0xff   : > { %v2948_v36 = vadd.f32 %v2947_v8, %v2946_v35  ;;  %v4265_v29 = vadd.f32 %v3019_v43, %v3018_v6 }
 0x100   : > { %v2949_v52 = vpop.f32.mrf.mxu0  ;;  %v3021_v21 = vpop.f32.mrf.mxu1 }
 0x102   : > { %v2950_v56 = vpop.f32.mrf.mxu0  ;;  %v3022_v23 = vpop.f32.mrf.mxu1 }
 0x103   : > { %v2951_v30 = vadd.f32 %v2950_v56, %v2949_v52  ;;  %v4267_v37 = vadd.f32 %v3022_v23, %v3021_v21 }
 0x104   : > { %v2952_v3 = vpop.f32.mrf.mxu0  ;;  %v3024_v51 = vpop.f32.mrf.mxu1  ;;  %1573 = vmatmul.mubr.bf16.gmra.mxu1 %v4193_v55  ;;  %2146 = vmatmul.mubr.bf16.gmra.mxu0 %v3982_v31 }
 0x105   : > { %2153 = vmatprep.mubr.bf16.mxu0 %v4067_v15  ;;  %3438 = vmatprep.mubr.bf16.mxu1 %v3907_v10 }
 0x106   : > { %v2953_v12 = vpop.f32.mrf.mxu0  ;;  %v3025_v46 = vpop.f32.mrf.mxu1 }
 0x107   : > { %v2954_v48 = vadd.f32 %v2953_v12, %v2952_v3  ;;  %v4273_v60 = vadd.f32 %v3025_v46, %v3024_v51 }
 0x108   : > { %v2955_v62 = vpop.f32.mrf.mxu0  ;;  %v3027_v2 = vpop.f32.mrf.mxu1 }
 0x10a   : > { %v2956_v4 = vpop.f32.mrf.mxu0  ;;  %v3028_v0 = vpop.f32.mrf.mxu1 }
 0x10b   : > { %v2957_v18 = vadd.f32 %v2956_v4, %v2955_v62  ;;  %v4275_v17 = vadd.f32 %v3028_v0, %v3027_v2 }
 0x10c   : > { %v2958_v19 = vpop.f32.mrf.mxu0  ;;  %v3344_v24 = vpop.f32.mrf.mxu1  ;;  %2154 = vmatmul.mubr.bf16.gmra.mxu0 %v4011_v5  ;;  %3439 = vmatmul.mubr.bf16.vlgmr.msra.gmra.mxu1 %v3929_v49 }
 0x10d   : > { %v4279_v31 = vadd.f32 %v3344_v24, %v2942_v14  ;;  %2161 = vmatprep.mubr.bf16.mxu0 %v4084_v44  ;;  %3442 = vmatprep.mubr.bf16.mxu1 %v3932_v50 }
 0x10e   : > { %v2959_v10 = vpop.f32.mrf.mxu0  ;;  %v1042_v15 = vpop.f32.mrf.mxu1 }
 0x10f   : > { %v2960_v35 = vadd.f32 %v2959_v10, %v2958_v19  ;;  %v4284_v6 = vadd.f32 %v4235_v20, %v1042_v15 }
 0x110   : > { %v2961_v8 = vpop.f32.mrf.mxu0  ;;  %v3345_v43 = vpop.f32.mrf.mxu1 }
 0x111   : > { %v4286_v52 = vadd.f32 %v3345_v43, %v2945_v32 }
 0x112   : > { %v2962_v21 = vpop.f32.mrf.mxu0  ;;  %v1045_v5 = vpop.f32.mrf.mxu1 }
 0x113   : > { %v2963_v56 = vadd.f32 %v2962_v21, %v2961_v8  ;;  %v4289_v49 = vadd.f32 %v4240_v58, %v1045_v5 }
 0x114   : > { %v2964_v14 = vpop.f32.mrf.mxu0  ;;  %v3348_v44 = vpop.f32.mrf.mxu1  ;;  %2162 = vmatmul.mubr.bf16.gmra.mxu0 %v4042_v40  ;;  %3443 = vmatmul.mubr.bf16.gmra.mxu1 %v3966_v34 }
 0x115   : > { %v4293_v50 = vadd.f32 %v3348_v44, %v2954_v48  ;;  %2169 = vmatprep.mubr.bf16.mxu0 %v3734_v39  ;;  %3446 = vmatprep.mubr.bf16.mxu1 %v3975_v26 }
 0x116   : > { %v2965_v20 = vpop.f32.mrf.mxu0  ;;  %v1058_v32 = vpop.f32.mrf.mxu1 }
 0x117   : > { %v2966_v23 = vadd.f32 %v2965_v20, %v2964_v14  ;;  %v4297_v3 = vadd.f32 %v2948_v36, %v1058_v32  ;;  %v4324_v20 = vld [vmem:[%s3680_s10 + $0xcc] sm:$0xff]  }
 0x118   : > { %v2967_v51 = vpop.f32.mrf.mxu0  ;;  %v3349_v58 = vpop.f32.mrf.mxu1 }
 0x119   : > { %v4299_v12 = vadd.f32 %v3349_v58, %v2957_v18  ;;  %v3602_v58 = vld [vmem:[%s3680_s10 + $0xd4] ss:$0 sps:$4 sm:$0x11]   ;;  %s2917_s10 = sshll.u32 %s4792_s13, 8 }
 0x11a   : > { %v2968_v46 = vpop.f32.mrf.mxu0  ;;  %v1061_v62 = vpop.f32.mrf.mxu1  ;;  %s4603_s19 = scalar_lea.vmem %s4761_s2, %s2917_s10 }
 0x11b   : > { %v2969_v40 = vadd.f32 %v2968_v46, %v2967_v51  ;;  %v4301_v2 = vadd.f32 %v2951_v30, %v1061_v62  ;;  %v1850_v46 = vshll.u32 %v4324_v20, 16 }
 0x11c   : > { %v2970_v34 = vpop.f32.mrf.mxu0  ;;  %v3352_v48 = vpop.f32.mrf.mxu1  ;;  %2170 = vmatmul.mubr.bf16.gmra.mxu0 %v4221_v11  ;;  %3447 = vmatmul.mubr.bf16.gmra.mxu1 %v4007_v13 }
 0x11d   : > { %v4305_v39 = vadd.f32 %v3352_v48, %v2966_v23  ;;  %2177 = vmatprep.mubr.bf16.mxu0 %v3765_v57  ;;  %3450 = vmatprep.mubr.bf16.mxu1 %v4020_v9 }
 0x11e   : > { %v2971_v26 = vpop.f32.mrf.mxu0  ;;  %v1074_v36 = vpop.f32.mrf.mxu1 }
 0x11f   : > { %v2972_v4 = vadd.f32 %v2971_v26, %v2970_v34  ;;  %v4309_v0 = vadd.f32 %v2960_v35, %v1074_v36  ;;  %v1852_v36 = vrot.slane %v1850_v46, 1 }
 0x120   : > { %v2973_v18 = vpop.f32.mrf.mxu0  ;;  %v3353_v30 = vpop.f32.mrf.mxu1 }
 0x121   : > { %v4311_v19 = vadd.f32 %v3353_v30, %v2969_v40 }
 0x122   : > { %v2974_v24 = vpop.f32.mrf.mxu0  ;;  %v1077_v10 = vpop.f32.mrf.mxu1 }
 0x123   : > { %v2975_v11 = vadd.f32 %v2974_v24, %v2973_v18  ;;  %v4313_v15 = vadd.f32 %v2963_v56, %v1077_v10 }
 0x124   : > { %v2976_v13 = vpop.f32.mrf.mxu0  ;;  %v3356_v8 = vpop.f32.mrf.mxu1  ;;  %2178 = vmatmul.mubr.bf16.gmra.mxu0 %v4228_v1  ;;  %3451 = vmatmul.mubr.bf16.gmra.mxu1 %v4045_v42 }
 0x125   : > { %2185 = vmatprep.mubr.bf16.mxu0 %v3808_v22  ;;  %3454 = vmatprep.mubr.bf16.mxu1 %v4052_v47 }
 0x126   : > { %v2977_v57 = vpop.f32.mrf.mxu0  ;;  %v1090_v9 = vpop.f32.mrf.mxu1 }
 0x127   : > { %v2978_v35 = vadd.f32 %v2977_v57, %v2976_v13  ;;  %v4319_v43 = vadd.f32 %v2972_v4, %v1090_v9  ;;  %v1855_v4 = vshll.u32 %v3602_v58, 16 }
 0x128   : > { %v2979_v21 = vpop.f32.mrf.mxu0  ;;  %v3357_v5 = vpop.f32.mrf.mxu1 }
 0x129   : > { %v4321_v56 = vadd.f32 %v3356_v8, %v2978_v35  ;;  %v1857_v13 = vrot.slane %v1855_v4, 1 }
 0x12a   : > { %v2980_v14 = vpop.f32.mrf.mxu0  ;;  %v1093_v44 = vpop.f32.mrf.mxu1 }
 0x12b   : > { %v2981_v1 = vadd.f32 %v2980_v14, %v2979_v21  ;;  %v4326_v42 = vadd.f32 %v2975_v11, %v1093_v44 }
 0x12c   : > { %v2982_v22 = vpop.f32.mrf.mxu0  ;;  %v3360_v32 = vpop.f32.mrf.mxu1  ;;  %2186 = vmatmul.mubr.bf16.gmra.mxu0 %v4245_v54  ;;  %3455 = vmatmul.mubr.bf16.gmra.mxu1 %v4063_v53  ;;  %v1848_v53 = vshrl.u32 %v4324_v20, 16 }
 0x12d   : > { %v4330_v47 = vadd.f32 %v3357_v5, %v2981_v1  ;;  %2193 = vmatprep.mubr.bf16.mxu0 %v3836_v45  ;;  %3458 = vmatprep.mubr.bf16.mxu1 %v4070_v7  ;;  %v1860_v1 = vrot.slane %v4324_v20, 1 }
 0x12e   : > { %v2983_v23 = vpop.f32.mrf.mxu0  ;;  %v1106_v51 = vpop.f32.mrf.mxu1  ;;  %v1853_v11 = vor.u32 %v1852_v36, %v1848_v53 }
 0x12f   : > { %v2984_v62 = vadd.f32 %v2983_v23, %v2982_v22  ;;  %v1861_v22 = vrot.slane %v3602_v58, 1 }
 0x130   : > { %v2985_v40 = vpop.f32.mrf.mxu0  ;;  %v3361_v34 = vpop.f32.mrf.mxu1 }
 0x131   : > { %v4336_v48 = vadd.f32 %v2984_v62, %v1106_v51 }
 0x132   : > { %v2986_v26 = vpop.f32.mrf.mxu0  ;;  %v1109_v54 = vpop.f32.mrf.mxu1 }
 0x133   : > { %v2987_v18 = vadd.f32 %v2986_v26, %v2985_v40 }
 0x134   : > { %v2988_v45 = vpop.f32.mrf.mxu0  ;;  %v3364_v30 = vpop.f32.mrf.mxu1  ;;  %2194 = vmatmul.mubr.bf16.gmra.mxu0 %v4259_v63  ;;  %3459 = vmatmul.mubr.bf16.gmra.mxu1 %v4081_v27  ;;  %v1858_v63 = vsel %vm381_vm0, %v1853_v11, %v1857_v13 }
 0x135   : > { %v4341_v7 = vadd.f32 %v2987_v18, %v1109_v54  ;;  %2201 = vmatprep.mubr.bf16.mxu0 %v4254_v28  ;;  %3462 = vmatprep.mubr.bf16.mxu1 %v4087_v38 }
 0x136   : > { %v2989_v24 = vpop.f32.mrf.mxu0  ;;  %v1122_v10 = vpop.f32.mrf.mxu1 }
 0x137   : > { %v2990_v8 = vadd.f32 %v2989_v24, %v2988_v45 }
 0x138   : > { %v2991_v57 = vpop.f32.mrf.mxu0  ;;  %v3365_v9 = vpop.f32.mrf.mxu1 }
 0x139   : > { %v4345_v35 = vadd.f32 %v3360_v32, %v2990_v8 }
 0x13a   : > { %v2992_v21 = vpop.f32.mrf.mxu0  ;;  %v1125_v5 = vpop.f32.mrf.mxu1 }
 0x13b   : > { %v2993_v27 = vadd.f32 %v2992_v21, %v2991_v57 }
 0x13c   : > { %v2994_v14 = vpop.f32.mrf.mxu0  ;;  %v3368_v44 = vpop.f32.mrf.mxu1  ;;  %2202 = vmatmul.mubr.bf16.gmra.mxu0 %v4193_v55  ;;  %3463 = vmatmul.mubr.bf16.gmra.mxu1 %v4096_v61 }
 0x13d   : > { %v4350_v38 = vadd.f32 %v3361_v34, %v2993_v27  ;;  %v4353_v28 = vadd.f32 %v3368_v44, %v4251_v16  ;;  %2209 = vmatprep.mubr.bf16.mxu0 %v1858_v63  ;;  %3466 = vmatprep.mubr.bf16.mxu1 %v4202_v41  ;;  %v1862_v16 = vsel %vm590_vm1, %v1860_v1, %v1861_v22 }
 0x13e   : > { %v2995_v32 = vpop.f32.mrf.mxu0  ;;  %v1138_v23 = vpop.f32.mrf.mxu1 }
 0x13f   : > { %v2996_v51 = vadd.f32 %v2995_v32, %v2994_v14  ;;  %v4358_v46 = vadd.f32 %v4237_v59, %v1138_v23 }
 0x140   : > { %v2997_v55 = vpop.f32.mrf.mxu0  ;;  %v3369_v62 = vpop.f32.mrf.mxu1 }
 0x141   : > { %v4360_v61 = vadd.f32 %v2996_v51, %v1122_v10  ;;  %v4363_v40 = vadd.f32 %v3369_v62, %v4256_v33 }
 0x142   : > { %v2998_v34 = vpop.f32.mrf.mxu0  ;;  %v1141_v41 = vpop.f32.mrf.mxu1 }
 0x143   : > { %v2999_v26 = vadd.f32 %v2998_v34, %v2997_v55  ;;  %v4367_v58 = vadd.f32 %v4242_v25, %v1141_v41 }
 0x144   : > { %v3000_v54 = vpop.f32.mrf.mxu0  ;;  %v3372_v53 = vpop.f32.mrf.mxu1  ;;  %2210 = vmatmul.mubr.bf16.gmra.mxu0 %v4324_v20  ;;  %3467 = vmatmul.mubr.bf16.gmra.mxu1 %v1862_v16 }
 0x145   : > { %v4370_v59 = vadd.f32 %v2999_v26, %v1125_v5  ;;  %v4373_v36 = vadd.f32 %v3372_v53, %v4273_v60 }
 0x146   : > { %v3001_v33 = vpop.f32.mrf.mxu0  ;;  %v1154_v4 = vpop.f32.mrf.mxu1 }
 0x147   : > { %v3002_v18 = vadd.f32 %v3001_v33, %v3000_v54  ;;  %v4376_v45 = vadd.f32 %v4265_v29, %v1154_v4 }
 0x148   : > { %v3003_v24 = vpop.f32.mrf.mxu0  ;;  %v3373_v10 = vpop.f32.mrf.mxu1 }
 0x149   : > { %v4378_v25 = vadd.f32 %v3364_v30, %v3002_v18  ;;  %v4381_v11 = vadd.f32 %v3373_v10, %v4275_v17 }
 0x14a   : > { %v3004_v20 = vpop.f32.mrf.mxu0  ;;  %v1157_v13 = vpop.f32.mrf.mxu1 }
 0x14b   : > { %v3005_v8 = vadd.f32 %v3004_v20, %v3003_v24  ;;  %v4384_v57 = vadd.f32 %v4267_v37, %v1157_v13 }
 0x14c   : > { %v3070_v60 = vpop.f32.mrf.mxu1  ;;  %v3392_v21 = vpop.f32.mrf.mxu0 }
 0x14d   : > { %v4386_v5 = vadd.f32 %v3365_v9, %v3005_v8 }
 0x14e   : > { %v3071_v63 = vpop.f32.mrf.mxu1  ;;  %v1615_v29 = vpop.f32.mrf.mxu0 }
 0x14f   : > { %v3072_v27 = vadd.f32 %v3071_v63, %v3070_v60 }
 0x150   : > { %v3073_v14 = vpop.f32.mrf.mxu1  ;;  %v3393_v44 = vpop.f32.mrf.mxu0 }
 0x151   : > { %v1616_v30 = vadd.f32 %v3072_v27, %v1615_v29 }
 0x152   : > { %v3074_v1 = vpop.f32.mrf.mxu1  ;;  %v1618_v22 = vpop.f32.mrf.mxu0 }
 0x153   : > { %v4389_v17 = vadd.f32 %v1616_v30, %v4284_v6  ;;  %v3075_v32 = vadd.f32 %v3074_v1, %v3073_v14 }
 0x154   : > { %v3076_v23 = vpop.f32.mrf.mxu1  ;;  %v3396_v51 = vpop.f32.mrf.mxu0 }
 0x155   : > { %v1619_v37 = vadd.f32 %v3075_v32, %v1618_v22 }
 0x156   : > { %v3077_v55 = vpop.f32.mrf.mxu1  ;;  %v1631_v62 = vpop.f32.mrf.mxu0 }
 0x157   : > { %v4392_v9 = vadd.f32 %v1619_v37, %v4289_v49  ;;  %v3078_v16 = vadd.f32 %v3077_v55, %v3076_v23 }
 0x158   : > { %v3079_v34 = vpop.f32.mrf.mxu1  ;;  %v3397_v41 = vpop.f32.mrf.mxu0 }
 0x159   : > { %v1624_v26 = vadd.f32 %v3392_v21, %v3078_v16 }
 0x15a   : > { %v3080_v54 = vpop.f32.mrf.mxu1  ;;  %v1634_v53 = vpop.f32.mrf.mxu0 }
 0x15b   : > { %v4395_v33 = vadd.f32 %v1624_v26, %v4279_v31  ;;  %v3081_v6 = vadd.f32 %v3080_v54, %v3079_v34 }
 0x15c   : > { %v3082_v4 = vpop.f32.mrf.mxu1  ;;  %v3400_v18 = vpop.f32.mrf.mxu0 }
 0x15d   : > { %v1627_v24 = vadd.f32 %v3393_v44, %v3081_v6 }
 0x15e   : > { %v3083_v10 = vpop.f32.mrf.mxu1  ;;  %v1647_v20 = vpop.f32.mrf.mxu0 }
 0x15f   : > { %v4398_v13 = vadd.f32 %v1627_v24, %v4286_v52  ;;  %v3084_v49 = vadd.f32 %v3083_v10, %v3082_v4 }
 0x160   : > { %v3085_v8 = vpop.f32.mrf.mxu1  ;;  %v3401_v60 = vpop.f32.mrf.mxu0 }
 0x161   : > { %v1632_v63 = vadd.f32 %v3084_v49, %v1631_v62 }
 0x162   : > { %v3086_v29 = vpop.f32.mrf.mxu1  ;;  %v1650_v21 = vpop.f32.mrf.mxu0 }
 0x163   : > { %v4401_v27 = vadd.f32 %v1632_v63, %v4297_v3  ;;  %v3087_v31 = vadd.f32 %v3086_v29, %v3085_v8 }
 0x164   : > { %v3088_v14 = vpop.f32.mrf.mxu1  ;;  %v4403_v30 = vpop.f32.mrf.mxu0 }
 0x165   : > { %v1635_v1 = vadd.f32 %v3087_v31, %v1634_v53 }
 0x166   : > { %v3089_v44 = vpop.f32.mrf.mxu1  ;;  %v1663_v22 = vpop.f32.mrf.mxu0 }
 0x167   : > { %v4406_v32 = vadd.f32 %v1635_v1, %v4301_v2  ;;  %v3090_v52 = vadd.f32 %v3089_v44, %v3088_v14 }
 0x168   : > { %v3091_v23 = vpop.f32.mrf.mxu1  ;;  %v4408_v37 = vpop.f32.mrf.mxu0 }
 0x169   : > { %v1640_v55 = vadd.f32 %v3396_v51, %v3090_v52 }
 0x16a   : > { %v3092_v62 = vpop.f32.mrf.mxu1  ;;  %v1666_v16 = vpop.f32.mrf.mxu0 }
 0x16b   : > { %v4411_v3 = vadd.f32 %v1640_v55, %v4293_v50  ;;  %v3093_v34 = vadd.f32 %v3092_v62, %v3091_v23 }
 0x16c   : > { %v3094_v26 = vpop.f32.mrf.mxu1  ;;  %v4413_v54 = vpop.f32.mrf.mxu0 }
 0x16d   : > { %v1643_v53 = vadd.f32 %v3397_v41, %v3093_v34 }
 0x16e   : > { %v3095_v6 = vpop.f32.mrf.mxu1  ;;  %v1679_v4 = vpop.f32.mrf.mxu0 }
 0x16f   : > { %v4416_v2 = vadd.f32 %v1643_v53, %v4299_v12  ;;  %v3096_v24 = vadd.f32 %v3095_v6, %v3094_v26 }
 0x170   : > { %v3097_v10 = vpop.f32.mrf.mxu1  ;;  %v4418_v49 = vpop.f32.mrf.mxu0 }
 0x171   : > { %v1648_v51 = vadd.f32 %v3096_v24, %v1647_v20 }
 0x172   : > { %v3098_v8 = vpop.f32.mrf.mxu1  ;;  %v1682_v63 = vpop.f32.mrf.mxu0 }
 0x173   : > { %v4421_v50 = vadd.f32 %v1648_v51, %v4309_v0  ;;  %v3099_v29 = vadd.f32 %v3098_v8, %v3097_v10 }
 0x174   : > { %v3100_v31 = vpop.f32.mrf.mxu1  ;;  %v4423_v14 = vpop.f32.mrf.mxu0 }
 0x175   : > { %v1651_v41 = vadd.f32 %v3099_v29, %v1650_v21 }
 0x176   : > { %v3101_v1 = vpop.f32.mrf.mxu1  ;;  %v4425_v44 = vpop.f32.mrf.mxu0 }
 0x177   : > { %v4428_v12 = vadd.f32 %v1651_v41, %v4313_v15  ;;  %v3102_v52 = vadd.f32 %v3101_v1, %v3100_v31 }
 0x178   : > { %v3103_v23 = vpop.f32.mrf.mxu1  ;;  %v4430_v55 = vpop.f32.mrf.mxu0 }
 0x179   : > { %v1656_v20 = vadd.f32 %v3400_v18, %v3102_v52 }
 0x17a   : > { %v3104_v62 = vpop.f32.mrf.mxu1  ;;  %v4432_v34 = vpop.f32.mrf.mxu0 }
 0x17b   : > { %v4435_v0 = vadd.f32 %v1656_v20, %v4305_v39  ;;  %v3105_v26 = vadd.f32 %v3104_v62, %v3103_v23 }
 0x17c   : > { %v3106_v53 = vpop.f32.mrf.mxu1  ;;  %v4437_v21 = vpop.f32.mrf.mxu0 }
 0x17d   : > { %v1659_v6 = vadd.f32 %v3401_v60, %v3105_v26 }
 0x17e   : > { %v3107_v24 = vpop.f32.mrf.mxu1  ;;  %v4439_v10 = vpop.f32.mrf.mxu0 }
 0x17f   : > { %v4442_v15 = vadd.f32 %v1659_v6, %v4311_v19  ;;  %v3108_v51 = vadd.f32 %v3107_v24, %v3106_v53 }
 0x180   : > { %v3109_v8 = vpop.f32.mrf.mxu1  ;;  %v4444_v18 = vpop.f32.mrf.mxu0 }
 0x181   : > { %v1664_v29 = vadd.f32 %v3108_v51, %v1663_v22 }
 0x182   : > { %v3110_v31 = vpop.f32.mrf.mxu1  ;;  %v4446_v41 = vpop.f32.mrf.mxu0 }
 0x183   : > { %v4449_v39 = vadd.f32 %v1664_v29, %v4319_v43  ;;  %v3111_v1 = vadd.f32 %v3110_v31, %v3109_v8 }
 0x184   : > { %v3112_v52 = vpop.f32.mrf.mxu1  ;;  %v4451_v60 = vpop.f32.mrf.mxu0 }
 0x185   : > { %4763 = vst [vmem:[#allocation2_spill] sm:$0xff] %v4449_v39  ;;  %v1667_v23 = vadd.f32 %v3111_v1, %v1666_v16 }
 0x186   : > { %v3113_v20 = vpop.f32.mrf.mxu1  ;;  %v4453_v62 = vpop.f32.mrf.mxu0 }
 0x187   : > { %v4456_v19 = vadd.f32 %v1667_v23, %v4326_v42  ;;  %v3114_v26 = vadd.f32 %v3113_v20, %v3112_v52 }
 0x188   : > { %v3115_v53 = vpop.f32.mrf.mxu1  ;;  %v4458_v22 = vpop.f32.mrf.mxu0 }
 0x189   : > { %4764 = vst [vmem:[#allocation3_spill] sm:$0xff] %v4456_v19  ;;  %v1672_v6 = vadd.f32 %v4403_v30, %v3114_v26 }
 0x18a   : > { %v3116_v24 = vpop.f32.mrf.mxu1  ;;  %v4461_v43 = vpop.f32.mrf.mxu0 }
 0x18b   : > { %v4464_v51 = vadd.f32 %v1672_v6, %v4321_v56  ;;  %v3117_v8 = vadd.f32 %v3116_v24, %v3115_v53 }
 0x18c   : > { %v3118_v16 = vpop.f32.mrf.mxu1  ;;  %v4466_v29 = vpop.f32.mrf.mxu0 }
 0x18d   : > { %4765 = vst [vmem:[#allocation4_spill] sm:$0xff] %v4464_v51  ;;  %v1675_v31 = vadd.f32 %v4408_v37, %v3117_v8 }
 0x18e   : > { %v3119_v42 = vpop.f32.mrf.mxu1  ;;  %v4469_v1 = vpop.f32.mrf.mxu0 }
 0x18f   : > { %v4472_v52 = vadd.f32 %v1675_v31, %v4330_v47  ;;  %v3120_v23 = vadd.f32 %v3119_v42, %v3118_v16 }
 0x190   : > { %v3121_v30 = vpop.f32.mrf.mxu1  ;;  %v4474_v20 = vpop.f32.mrf.mxu0 }
 0x191   : > { %v1680_v26 = vadd.f32 %v3120_v23, %v1679_v4 }
 0x192   : > { %v3122_v19 = vpop.f32.mrf.mxu1  ;;  %v4476_v56 = vpop.f32.mrf.mxu0 }
 0x193   : > { %v4479_v53 = vadd.f32 %v1680_v26, %v4336_v48  ;;  %v3123_v6 = vadd.f32 %v3122_v19, %v3121_v30 }
 0x194   : > { %v3124_v24 = vpop.f32.mrf.mxu1  ;;  %v4481_v37 = vpop.f32.mrf.mxu0 }
 0x195   : > { %4766 = vst [vmem:[#allocation5_spill] sm:$0xff] %v4479_v53  ;;  %v1683_v8 = vadd.f32 %v3123_v6, %v1682_v63 }
 0x196   : > { %v3125_v39 = vpop.f32.mrf.mxu1  ;;  %v4483_v51 = vpop.f32.mrf.mxu0 }
 0x197   : > { %v4486_v47 = vadd.f32 %v1683_v8, %v4341_v7  ;;  %v3126_v16 = vadd.f32 %v3125_v39, %v3124_v24 }
 0x198   : > { %v3127_v31 = vpop.f32.mrf.mxu1  ;;  %v4488_v4 = vpop.f32.mrf.mxu0 }
 0x199   : > { %4767 = vst [vmem:[#allocation6_spill] sm:$0xff] %v4486_v47  ;;  %v1688_v42 = vadd.f32 %v4413_v54, %v3126_v16 }
 0x19a   : > { %v3128_v23 = vpop.f32.mrf.mxu1  ;;  %v4491_v48 = vpop.f32.mrf.mxu0 }
 0x19b   : > { %v4494_v19 = vadd.f32 %v1688_v42, %v4345_v35  ;;  %v3129_v30 = vadd.f32 %v3128_v23, %v3127_v31 }
 0x19c   : > { %v3130_v63 = vpop.f32.mrf.mxu1  ;;  %v4496_v26 = vpop.f32.mrf.mxu0 }
 0x19d   : > { %v1691_v6 = vadd.f32 %v4418_v49, %v3129_v30 }
 0x19e   : > { %v3131_v7 = vpop.f32.mrf.mxu1  ;;  %v4499_v8 = vpop.f32.mrf.mxu0 }
 0x19f   : > { %v4502_v39 = vadd.f32 %v1691_v6, %v4350_v38  ;;  %v3132_v24 = vadd.f32 %v3131_v7, %v3130_v63 }
 0x1a0   : > { %v3133_v54 = vpop.f32.mrf.mxu1  ;;  %v4504_v16 = vpop.f32.mrf.mxu0 }
 0x1a1   : > { %4768 = vst [vmem:[#allocation7_spill] sm:$0xff] %v4502_v39  ;;  %v1696_v47 = vadd.f32 %v3132_v24, %v4425_v44 }
 0x1a2   : > { %v3134_v35 = vpop.f32.mrf.mxu1  ;;  %v4507_v42 = vpop.f32.mrf.mxu0 }
 0x1a3   : > { %v4510_v31 = vadd.f32 %v1696_v47, %v4360_v61  ;;  %v3135_v23 = vadd.f32 %v3134_v35, %v3133_v54 }
 0x1a4   : > { %v3136_v49 = vpop.f32.mrf.mxu1  ;;  %v4512_v30 = vpop.f32.mrf.mxu0 }
 0x1a5   : > { %4769 = vst [vmem:[#allocation8_spill] sm:$0xff] %v4510_v31  ;;  %v1699_v53 = vadd.f32 %v3135_v23, %v4432_v34 }
 0x1a6   : > { %v3137_v38 = vpop.f32.mrf.mxu1  ;;  %v4515_v6 = vpop.f32.mrf.mxu0 }
 0x1a7   : > { %v4518_v63 = vadd.f32 %v1699_v53, %v4370_v59  ;;  %v3138_v7 = vadd.f32 %v3137_v38, %v3136_v49 }
 0x1a8   : > { %v3139_v44 = vpop.f32.mrf.mxu1  ;;  %v4520_v24 = vpop.f32.mrf.mxu0 }
 0x1a9   : > { %4770 = vst [vmem:[#allocation9_spill] sm:$0xff] %v4518_v63  ;;  %v1704_v39 = vadd.f32 %v4423_v14, %v3138_v7 }
 0x1aa   : > { %v3140_v61 = vpop.f32.mrf.mxu1  ;;  %v4523_v47 = vpop.f32.mrf.mxu0 }
 0x1ab   : > { %v4526_v54 = vadd.f32 %v1704_v39, %v4378_v25  ;;  %v3141_v35 = vadd.f32 %v3140_v61, %v3139_v44 }
 0x1ac   : > { %v3142_v34 = vpop.f32.mrf.mxu1  ;;  %v4528_v23 = vpop.f32.mrf.mxu0 }
 0x1ad   : > { %4771 = vst [vmem:[#allocation10_spill] sm:$0xff] %v4526_v54  ;;  %v1707_v31 = vadd.f32 %v4430_v55, %v3141_v35 }
 0x1ae   : > { %v3143_v59 = vpop.f32.mrf.mxu1  ;;  %v4531_v53 = vpop.f32.mrf.mxu0 }
 0x1af   : > { %v4534_v49 = vadd.f32 %v1707_v31, %v4386_v5  ;;  %v3144_v38 = vadd.f32 %v3143_v59, %v3142_v34 }
 0x1b0   : > { %v3145_v14 = vpop.f32.mrf.mxu1  ;;  %v4536_v7 = vpop.f32.mrf.mxu0 }
 0x1b1   : > { %4772 = vst [vmem:[#allocation11_spill] sm:$0xff] %v4534_v49  ;;  %v1712_v63 = vadd.f32 %v3144_v38, %v4439_v10 }
 0x1b2   : > { %v3146_v25 = vpop.f32.mrf.mxu1  ;;  %v4539_v39 = vpop.f32.mrf.mxu0 }
 0x1b3   : > { %v4542_v44 = vadd.f32 %v1712_v63, %v4358_v46  ;;  %v3147_v61 = vadd.f32 %v3146_v25, %v3145_v14 }
 0x1b4   : > { %v3148_v55 = vpop.f32.mrf.mxu1  ;;  %v4544_v35 = vpop.f32.mrf.mxu0 }
 0x1b5   : > { %4773 = vst [vmem:[#allocation12_spill] sm:$0xff] %v4542_v44  ;;  %v1715_v54 = vadd.f32 %v3147_v61, %v4446_v41 }
 0x1b6   : > { %v3149_v5 = vpop.f32.mrf.mxu1  ;;  %v4547_v31 = vpop.f32.mrf.mxu0 }
 0x1b7   : > { %v4550_v34 = vadd.f32 %v1715_v54, %v4367_v58  ;;  %v3150_v59 = vadd.f32 %v3149_v5, %v3148_v55 }
 0x1b8   : > { %v3151_v10 = vpop.f32.mrf.mxu1  ;;  %v4552_v38 = vpop.f32.mrf.mxu0 }
 0x1b9   : > { %4774 = vst [vmem:[#allocation13_spill] sm:$0xff] %v4550_v34  ;;  %v1720_v49 = vadd.f32 %v4437_v21, %v3150_v59 }
 0x1ba   : > { %v3152_v46 = vpop.f32.mrf.mxu1  ;;  %v4555_v63 = vpop.f32.mrf.mxu0 }
 0x1bb   : > { %v4558_v14 = vadd.f32 %v1720_v49, %v4353_v28  ;;  %v3153_v25 = vadd.f32 %v3152_v46, %v3151_v10 }
 0x1bc   : > { %v3154_v41 = vpop.f32.mrf.mxu1  ;;  %v4560_v61 = vpop.f32.mrf.mxu0 }
 0x1bd   : > { %4775 = vst [vmem:[#allocation14_spill] sm:$0xff] %v4558_v14  ;;  %v1723_v44 = vadd.f32 %v4444_v18, %v3153_v25 }
 0x1be   : > { %v3155_v58 = vpop.f32.mrf.mxu1  ;;  %v4563_v54 = vpop.f32.mrf.mxu0 }
 0x1bf   : > { %v4566_v55 = vadd.f32 %v1723_v44, %v4363_v40  ;;  %v3156_v5 = vadd.f32 %v3155_v58, %v3154_v41 }
 0x1c0   : > { %v3157_v21 = vpop.f32.mrf.mxu1  ;;  %v4568_v59 = vpop.f32.mrf.mxu0 }
 0x1c1   : > { %4776 = vst [vmem:[#allocation15_spill] sm:$0xff] %v4566_v55  ;;  %v1728_v34 = vadd.f32 %v3156_v5, %v4453_v62 }
 0x1c2   : > { %v3158_v28 = vpop.f32.mrf.mxu1  ;;  %v4571_v49 = vpop.f32.mrf.mxu0 }
 0x1c3   : > { %v4574_v10 = vadd.f32 %v1728_v34, %v4376_v45  ;;  %v3159_v18 = vadd.f32 %v3158_v28, %v3157_v21  ;;  %v3214_v21 = vadd.f32 %v4483_v51, %v4481_v37  ;;  %v3217_v37 = vadd.f32 %v4491_v48, %v4488_v4 }
 0x1c4   : > { %v3160_v46 = vpop.f32.mrf.mxu1  ;;  %v4576_v25 = vpop.f32.mrf.mxu0 }
 0x1c5   : > { %v1731_v40 = vadd.f32 %v3159_v18, %v4461_v43 }
 0x1c6   : > { %v3161_v44 = vpop.f32.mrf.mxu1  ;;  %v4579_v41 = vpop.f32.mrf.mxu0 }
 0x1c7   : > { %v4582_v58 = vadd.f32 %v1731_v40, %v4384_v57  ;;  %v3162_v62 = vadd.f32 %v3161_v44, %v3160_v46  ;;  %v3208_v46 = vadd.f32 %v4469_v1, %v4466_v29 }
 0x1c8   : > { %v3163_v5 = vpop.f32.mrf.mxu1  ;;  %v4584_v55 = vpop.f32.mrf.mxu0 }
 0x1c9   : > { %v1736_v14 = vadd.f32 %v4451_v60, %v3162_v62  ;;  %v3211_v62 = vadd.f32 %v4476_v56, %v4474_v20 }
 0x1ca   : > { %v3164_v45 = vpop.f32.mrf.mxu1  ;;  %v4587_v34 = vpop.f32.mrf.mxu0 }
 0x1cb   : > { %v4593_v43 = vadd.f32 %v1736_v14, %v4373_v36  ;;  %v3165_v28 = vadd.f32 %v3164_v45, %v3163_v5 }
 0x1cc   : > { %v4595_v18 = vpop.f32.mrf.mxu0  ;;  %v3440_v57 = vpop.f32.mrf.mxu1 }
 0x1cd   : > { %v1739_v40 = vadd.f32 %v4458_v22, %v3165_v28  ;;  %v2261_v60 = vadd.f32 %v3440_v57, %v3214_v21 }
 0x1ce   : > { %v4605_v51 = vpop.f32.mrf.mxu0  ;;  %v2252_v36 = vpop.f32.mrf.mxu1 }
 0x1cf   : > { %v4610_v14 = vadd.f32 %v1739_v40, %v4381_v11  ;;  %v2413_v29 = vadd.f32 %v2261_v60, %v4395_v33  ;;  %v2253_v22 = vadd.f32 %v3208_v46, %v2252_v36  ;;  %v3226_v11 = vadd.f32 %v4515_v6, %v4512_v30 }
 0x1d0   : > { %v4613_v1 = vpop.f32.mrf.mxu0  ;;  %v3441_v44 = vpop.f32.mrf.mxu1  ;;  %v3229_v46 = vadd.f32 %v4523_v47, %v4520_v24  ;;  %v3223_v24 = vadd.f32 %v4507_v42, %v4504_v16  ;;  %v3238_v47 = vadd.f32 %v4547_v31, %v4544_v35 }
 0x1d1   : > { %2445 = vst [vmem:[%s4603_s19 + $0x10] sm:$0xff] %v2413_v29  ;;  %v2411_v5 = vadd.f32 %v2253_v22, %v4389_v17  ;;  %v2264_v45 = vadd.f32 %v3441_v44, %v3217_v37  ;;  %v3220_v17 = vadd.f32 %v4499_v8, %v4496_v26  ;;  %v2546_v44 = vmul.f32 %v2413_v29, %v2413_v29 }
 0x1d2   : > { %v4619_v21 = vpop.f32.mrf.mxu0  ;;  %v2255_v4 = vpop.f32.mrf.mxu1 }
 0x1d3   : > { %2443 = vst [vmem:[%s4603_s19] sm:$0xff] %v2411_v5  ;;  %v2414_v33 = vadd.f32 %v2264_v45, %v4398_v13  ;;  %v2256_v48 = vadd.f32 %v3211_v62, %v2255_v4  ;;  %v2544_v6 = vmul.f32 %v2411_v5, %v2411_v5 }
 0x1d4   : > { %v4625_v28 = vpop.f32.mrf.mxu0  ;;  %v3444_v57 = vpop.f32.mrf.mxu1 }
 0x1d5   : > { %2446 = vst [vmem:[%s4603_s19 + $0x18] sm:$0xff] %v2414_v33  ;;  %v2412_v20 = vadd.f32 %v2256_v48, %v4392_v9  ;;  %v2277_v56 = vadd.f32 %v3444_v57, %v3226_v11  ;;  %v2547_v4 = vmul.f32 %v2414_v33, %v2414_v33  ;;  %v3232_v57 = vadd.f32 %v4531_v53, %v4528_v23 }
 0x1d6   : > { %v4633_v40 = vpop.f32.mrf.mxu0  ;;  %v2268_v30 = vpop.f32.mrf.mxu1  ;;  %v3241_v23 = vadd.f32 %v4555_v63, %v4552_v38 }
 0x1d7   : > { %2444 = vst [vmem:[%s4603_s19 + $0x8] sm:$0xff] %v2412_v20  ;;  %v2507_v13 = vadd.f32 %v2412_v20, %v2411_v5  ;;  %v2545_v60 = vmul.f32 %v2412_v20, %v2412_v20  ;;  %v2417_v36 = vadd.f32 %v2277_v56, %v4411_v3  ;;  %v2269_v37 = vadd.f32 %v3220_v17, %v2268_v30 }
 0x1d8   : > { %v4637_v22 = vpop.f32.mrf.mxu0  ;;  %v3445_v9 = vpop.f32.mrf.mxu1 }
 0x1d9   : > { %v2508_v62 = vadd.f32 %v2507_v13, %v2413_v29  ;;  %v2576_v26 = vadd.f32 %v2545_v60, %v2544_v6  ;;  %2449 = vst [vmem:[%s4603_s19 + $0x30] sm:$0xff] %v2417_v36  ;;  %v2280_v8 = vadd.f32 %v3445_v9, %v3229_v46  ;;  %v2415_v5 = vadd.f32 %v2269_v37, %v4401_v27 }
 0x1da   : > { %v4645_v3 = vpop.f32.mrf.mxu0  ;;  %v2271_v45 = vpop.f32.mrf.mxu1  ;;  %v2550_v38 = vmul.f32 %v2417_v36, %v2417_v36 }
 0x1db   : > { %v2577_v11 = vadd.f32 %v2576_v26, %v2546_v44  ;;  %v2509_v48 = vadd.f32 %v2508_v62, %v2414_v33  ;;  %v2418_v29 = vadd.f32 %v2280_v8, %v4416_v2  ;;  %2447 = vst [vmem:[%s4603_s19 + $0x20] sm:$0xff] %v2415_v5  ;;  %v2272_v16 = vadd.f32 %v3223_v24, %v2271_v45 }
 0x1dc   : > { %v4651_v42 = vpop.f32.mrf.mxu0  ;;  %v3448_v35 = vpop.f32.mrf.mxu1  ;;  %v2548_v20 = vmul.f32 %v2415_v5, %v2415_v5  ;;  %v3250_v8 = vadd.f32 %v4579_v41, %v4576_v25 }
 0x1dd   : > { %v2510_v31 = vadd.f32 %v2509_v48, %v2415_v5  ;;  %v2578_v27 = vadd.f32 %v2577_v11, %v2547_v4  ;;  %2450 = vst [vmem:[%s4603_s19 + $0x38] sm:$0xff] %v2418_v29  ;;  %v2293_v56 = vadd.f32 %v3448_v35, %v3238_v47  ;;  %v2416_v17 = vadd.f32 %v2272_v16, %v4406_v32  ;;  %v4777_v35 = vld [vmem:[#allocation4_spill] sm:$0xff] }
 0x1de   : > { %v4655_v33 = vpop.f32.mrf.mxu0  ;;  %v2284_v2 = vpop.f32.mrf.mxu1  ;;  %v3235_v32 = vadd.f32 %v4539_v39, %v4536_v7  ;;  %v2551_v7 = vmul.f32 %v2418_v29, %v2418_v29  ;;  %v3253_v16 = vadd.f32 %v4587_v34, %v4584_v55 }
 0x1df   : > { %v2579_v53 = vadd.f32 %v2578_v27, %v2548_v20  ;;  %v2421_v46 = vadd.f32 %v2293_v56, %v4435_v0  ;;  %v2285_v30 = vadd.f32 %v3232_v57, %v2284_v2  ;;  %2448 = vst [vmem:[%s4603_s19 + $0x28] sm:$0xff] %v2416_v17  ;;  %v2511_v6 = vadd.f32 %v2510_v31, %v2416_v17 }
 0x1e0   : > { %v2549_v13 = vmul.f32 %v2416_v17, %v2416_v17  ;;  %v4661_v60 = vpop.f32.mrf.mxu0  ;;  %v3449_v37 = vpop.f32.mrf.mxu1  ;;  %v3247_v56 = vadd.f32 %v4571_v49, %v4568_v59  ;;  %v4778_v17 = vld [vmem:[#allocation2_spill] sm:$0xff] }
 0x1e1   : > { %2453 = vst [vmem:[%s4603_s19 + $0x50] sm:$0xff] %v2421_v46  ;;  %v2419_v9 = vadd.f32 %v2285_v30, %v4421_v50  ;;  %v2296_v44 = vadd.f32 %v3449_v37, %v3241_v23  ;;  %v2512_v63 = vadd.f32 %v2511_v6, %v2417_v36  ;;  %v3244_v36 = vadd.f32 %v4563_v54, %v4560_v61 }
 0x1e2   : > { %v2580_v62 = vadd.f32 %v2579_v53, %v2549_v13  ;;  %v4667_v0 = vpop.f32.mrf.mxu0  ;;  %v2287_v26 = vpop.f32.mrf.mxu1  ;;  %v2554_v55 = vmul.f32 %v2421_v46, %v2421_v46  ;;  %v3262_v13 = vadd.f32 %v4633_v40, %v4625_v28 }
 0x1e3   : > { %2451 = vst [vmem:[%s4603_s19 + $0x40] sm:$0xff] %v2419_v9  ;;  %v2422_v24 = vadd.f32 %v2296_v44, %v4442_v15  ;;  %v2288_v47 = vadd.f32 %v3235_v32, %v2287_v26  ;;  %v2513_v5 = vadd.f32 %v2512_v63, %v2418_v29  ;;  %v2552_v41 = vmul.f32 %v2419_v9, %v2419_v9  ;;  %v4779_v63 = vld [vmem:[#allocation3_spill] sm:$0xff] }
 0x1e4   : > { %v2581_v39 = vadd.f32 %v2580_v62, %v2550_v38  ;;  %v4673_v50 = vpop.f32.mrf.mxu0  ;;  %v3452_v45 = vpop.f32.mrf.mxu1 }
 0x1e5   : > { %2454 = vst [vmem:[%s4603_s19 + $0x58] sm:$0xff] %v2422_v24  ;;  %v2420_v4 = vadd.f32 %v2288_v47, %v4428_v12  ;;  %v2309_v11 = vadd.f32 %v3452_v45, %v3250_v8  ;;  %v2514_v25 = vadd.f32 %v2513_v5, %v2419_v9  ;;  %v2555_v9 = vmul.f32 %v2422_v24, %v2422_v24 }
 0x1e6   : > { %v2582_v48 = vadd.f32 %v2581_v39, %v2551_v7  ;;  %v3273_v15 = vpop.f32.mrf.mxu0  ;;  %v2300_v57 = vpop.f32.mrf.mxu1 }
 0x1e7   : > { %2452 = vst [vmem:[%s4603_s19 + $0x48] sm:$0xff] %v2420_v4  ;;  %v2553_v29 = vmul.f32 %v2420_v4, %v2420_v4  ;;  %v2425_v31 = vadd.f32 %v2309_v11, %v4777_v35  ;;  %v2301_v20 = vadd.f32 %v3244_v36, %v2300_v57  ;;  %v2515_v54 = vadd.f32 %v2514_v25, %v2420_v4  ;;  %v4780_v11 = vld [vmem:[#allocation5_spill] sm:$0xff] }
 0x1e8   : > { %v2583_v61 = vadd.f32 %v2582_v48, %v2552_v41  ;;  %v4683_v27 = vpop.f32.mrf.mxu0  ;;  %v3453_v12 = vpop.f32.mrf.mxu1  ;;  %v3259_v4 = vadd.f32 %v4619_v21, %v4613_v1 }
 0x1e9   : > { %2457 = vst [vmem:[%s4603_s19 + $0x70] sm:$0xff] %v2425_v31  ;;  %v2423_v2 = vadd.f32 %v2301_v20, %v4778_v17  ;;  %v2312_v23 = vadd.f32 %v3453_v12, %v3253_v16  ;;  %v2516_v34 = vadd.f32 %v2515_v54, %v2421_v46  ;;  %v3256_v46 = vadd.f32 %v4605_v51, %v4595_v18 }
 0x1ea   : > { %v2584_v53 = vadd.f32 %v2583_v61, %v2553_v29  ;;  %v3276_v30 = vpop.f32.mrf.mxu0  ;;  %v2303_v6 = vpop.f32.mrf.mxu1  ;;  %v3274_v16 = vadd.f32 %v3273_v15, %v4673_v50  ;;  %v4781_v29 = vld [vmem:[#allocation7_spill] sm:$0xff] }
 0x1eb   : > { %2455 = vst [vmem:[%s4603_s19 + $0x60] sm:$0xff] %v2423_v2  ;;  %v2426_v37 = vadd.f32 %v2312_v23, %v4472_v52  ;;  %v2304_v32 = vadd.f32 %v3247_v56, %v2303_v6  ;;  %v2517_v49 = vadd.f32 %v2516_v34, %v2422_v24  ;;  %v2556_v40 = vmul.f32 %v2423_v2, %v2423_v2 }
 0x1ec   : > { %v2585_v59 = vadd.f32 %v2584_v53, %v2554_v55  ;;  %v4693_v44 = vpop.f32.mrf.mxu0  ;;  %v3456_v38 = vpop.f32.mrf.mxu1  ;;  %v3265_v24 = vadd.f32 %v4645_v3, %v4637_v22  ;;  %v2558_v22 = vmul.f32 %v2425_v31, %v2425_v31  ;;  %v3268_v56 = vadd.f32 %v4655_v33, %v4651_v42 }
 0x1ed   : > { %2458 = vst [vmem:[%s4603_s19 + $0x78] sm:$0xff] %v2426_v37  ;;  %v2424_v62 = vadd.f32 %v2304_v32, %v4779_v63  ;;  %v2325_v26 = vadd.f32 %v3456_v38, %v3262_v13  ;;  %v2518_v28 = vadd.f32 %v2517_v49, %v2423_v2  ;;  %v2559_v61 = vmul.f32 %v2426_v37, %v2426_v37  ;;  %v4783_v13 = vld [vmem:[#allocation10_spill] sm:$0xff]  ;;  %v4784_v38 = vld [vmem:[#allocation8_spill] sm:$0xff] }
 0x1ee   : > { %v2586_v8 = vadd.f32 %v2585_v59, %v2555_v9  ;;  %v4699_v52 = vpop.f32.mrf.mxu0  ;;  %v2316_v47 = vpop.f32.mrf.mxu1  ;;  %v3277_v53 = vadd.f32 %v3276_v30, %v4683_v27  ;;  %v3271_v49 = vadd.f32 %v4667_v0, %v4661_v60 }
 0x1ef   : > { %2456 = vst [vmem:[%s4603_s19 + $0x68] sm:$0xff] %v2424_v62  ;;  %v2557_v7 = vmul.f32 %v2424_v62, %v2424_v62  ;;  %v2429_v39 = vadd.f32 %v2325_v26, %v4494_v19  ;;  %v2317_v18 = vadd.f32 %v3256_v46, %v2316_v47  ;;  %v2519_v5 = vadd.f32 %v2518_v28, %v2424_v62 }
 0x1f0   : > { %v2587_v51 = vadd.f32 %v2586_v8, %v2556_v40  ;;  %v4705_v45 = vpop.f32.mrf.mxu0  ;;  %v3457_v36 = vpop.f32.mrf.mxu1  ;;  %v4785_v8 = vld [vmem:[#allocation11_spill] sm:$0xff] }
 0x1f1   : > { %2461 = vst [vmem:[%s4603_s19 + $0x90] sm:$0xff] %v2429_v39  ;;  %v2427_v25 = vadd.f32 %v2317_v18, %v4780_v11  ;;  %v2328_v41 = vadd.f32 %v3457_v36, %v3265_v24  ;;  %v2520_v3 = vadd.f32 %v2519_v5, %v2425_v31  ;;  %v4782_v31 = vld [vmem:[#allocation6_spill] sm:$0xff]  ;;  %v2562_v62 = vmul.f32 %v2429_v39, %v2429_v39  ;;  %v4786_v36 = vld [vmem:[#allocation9_spill] sm:$0xff] }
 0x1f2   : > { %v2588_v48 = vadd.f32 %v2587_v51, %v2557_v7  ;;  %v4711_v57 = vpop.f32.mrf.mxu0  ;;  %v2319_v19 = vpop.f32.mrf.mxu1  ;;  %v3280_v5 = vadd.f32 %v4699_v52, %v4693_v44 }
 0x1f3   : > { %2459 = vst [vmem:[%s4603_s19 + $0x80] sm:$0xff] %v2427_v25  ;;  %v2430_v35 = vadd.f32 %v2328_v41, %v4781_v29  ;;  %v2320_v20 = vadd.f32 %v3259_v4, %v2319_v19  ;;  %v2521_v21 = vadd.f32 %v2520_v3, %v2426_v37  ;;  %v2560_v50 = vmul.f32 %v2427_v25, %v2427_v25 }
 0x1f4   : > { %v2589_v1 = vadd.f32 %v2588_v48, %v2558_v22  ;;  %v3284_v54 = vpop.f32.mrf.mxu0  ;;  %v3460_v12 = vpop.f32.mrf.mxu1 }
 0x1f5   : > { %2462 = vst [vmem:[%s4603_s19 + $0x98] sm:$0xff] %v2430_v35  ;;  %v2428_v17 = vadd.f32 %v2320_v20, %v4782_v31  ;;  %v2341_v2 = vadd.f32 %v3460_v12, %v3274_v16  ;;  %v2522_v23 = vadd.f32 %v2521_v21, %v2427_v25  ;;  %v2563_v7 = vmul.f32 %v2430_v35, %v2430_v35  ;;  %v4787_v16 = vld [vmem:[#allocation14_spill] sm:$0xff]  ;;  %v4788_v21 = vld [vmem:[#allocation12_spill] sm:$0xff] }
 0x1f6   : > { %v2590_v15 = vadd.f32 %v2589_v1, %v2559_v61  ;;  %v3285_v55 = vpop.f32.mrf.mxu0  ;;  %v2332_v34 = vpop.f32.mrf.mxu1  ;;  %v3283_v1 = vadd.f32 %v4711_v57, %v4705_v45 }
 0x1f7   : > { %2460 = vst [vmem:[%s4603_s19 + $0x88] sm:$0xff] %v2428_v17  ;;  %v2561_v6 = vmul.f32 %v2428_v17, %v2428_v17  ;;  %v2433_v37 = vadd.f32 %v2341_v2, %v4783_v13  ;;  %v2333_v32 = vadd.f32 %v3268_v56, %v2332_v34  ;;  %v2523_v42 = vadd.f32 %v2522_v23, %v2428_v17 }
 0x1f8   : > { %v2591_v9 = vadd.f32 %v2590_v15, %v2560_v50  ;;  %v3287_v33 = vpop.f32.mrf.mxu0  ;;  %v3461_v59 = vpop.f32.mrf.mxu1  ;;  %v3286_v40 = vadd.f32 %v3285_v55, %v3284_v54  ;;  %v4789_v50 = vld [vmem:[#allocation15_spill] sm:$0xff] }
 0x1f9   : > { %2465 = vst [vmem:[%s4603_s19 + $0xb0] sm:$0xff] %v2433_v37  ;;  %v2431_v46 = vadd.f32 %v2333_v32, %v4784_v38  ;;  %v2344_v63 = vadd.f32 %v3461_v59, %v3277_v53  ;;  %v2524_v27 = vadd.f32 %v2523_v42, %v2429_v39  ;;  %v2566_v56 = vmul.f32 %v2433_v37, %v2433_v37  ;;  %v4790_v32 = vld [vmem:[#allocation13_spill] sm:$0xff] }
 0x1fa   : > { %v2592_v30 = vadd.f32 %v2591_v9, %v2561_v6  ;;  %v3288_v26 = vpop.f32.mrf.mxu0  ;;  %v2335_v28 = vpop.f32.mrf.mxu1 }
 0x1fb   : > { %2463 = vst [vmem:[%s4603_s19 + $0xa0] sm:$0xff] %v2431_v46  ;;  %v2434_v47 = vadd.f32 %v2344_v63, %v4785_v8  ;;  %v2336_v24 = vadd.f32 %v3271_v49, %v2335_v28  ;;  %v2525_v51 = vadd.f32 %v2524_v27, %v2430_v35  ;;  %v2564_v25 = vmul.f32 %v2431_v46, %v2431_v46 }
 0x1fc   : > { %v2593_v18 = vadd.f32 %v2592_v30, %v2562_v62  ;;  %v3290_v60 = vpop.f32.mrf.mxu0  ;;  %v3464_v0 = vpop.f32.mrf.mxu1  ;;  %v3289_v48 = vadd.f32 %v3288_v26, %v3287_v33 }
 0x1fd   : > { %2466 = vst [vmem:[%s4603_s19 + $0xb8] sm:$0xff] %v2434_v47  ;;  %v2432_v39 = vadd.f32 %v2336_v24, %v4786_v36  ;;  %v2357_v4 = vadd.f32 %v3464_v0, %v3286_v40  ;;  %v2526_v11 = vadd.f32 %v2525_v51, %v2431_v46  ;;  %v2567_v34 = vmul.f32 %v2434_v47, %v2434_v47 }
 0x1fe   : > { %v2594_v41 = vadd.f32 %v2593_v18, %v2563_v7  ;;  %v3291_v22 = vpop.f32.mrf.mxu0  ;;  %v2348_v3 = vpop.f32.mrf.mxu1 }
 0x1ff   : > { %2464 = vst [vmem:[%s4603_s19 + $0xa8] sm:$0xff] %v2432_v39  ;;  %v2565_v19 = vmul.f32 %v2432_v39, %v2432_v39  ;;  %v2437_v29 = vadd.f32 %v2357_v4, %v4787_v16  ;;  %v2349_v35 = vadd.f32 %v3280_v5, %v2348_v3  ;;  %v2527_v61 = vadd.f32 %v2526_v11, %v2432_v39 }
 0x200   : > { %v2595_v20 = vadd.f32 %v2594_v41, %v2564_v25  ;;  %v3293_v44 = vpop.f32.mrf.mxu0  ;;  %v3465_v52 = vpop.f32.mrf.mxu1  ;;  %v3292_v57 = vadd.f32 %v3291_v22, %v3290_v60 }
 0x201   : > { %2469 = vst [vmem:[%s4603_s19 + $0xd0] sm:$0xff] %v2437_v29  ;;  %v2435_v54 = vadd.f32 %v2349_v35, %v4788_v21  ;;  %v2360_v12 = vadd.f32 %v3465_v52, %v3289_v48  ;;  %v2528_v31 = vadd.f32 %v2527_v61, %v2433_v37 }
 0x202   : > { %v2596_v17 = vadd.f32 %v2595_v20, %v2565_v19  ;;  %v3294_v2 = vpop.f32.mrf.mxu0  ;;  %v2351_v23 = vpop.f32.mrf.mxu1 }
 0x203   : > { %2467 = vst [vmem:[%s4603_s19 + $0xc0] sm:$0xff] %v2435_v54  ;;  %v2438_v15 = vadd.f32 %v2360_v12, %v4789_v50  ;;  %v2352_v55 = vadd.f32 %v3283_v1, %v2351_v23  ;;  %v2529_v6 = vadd.f32 %v2528_v31, %v2434_v47  ;;  %v2568_v33 = vmul.f32 %v2435_v54, %v2435_v54 }
 0x204   : > { %v2597_v53 = vadd.f32 %v2596_v17, %v2566_v56  ;;  %v3296_v13 = vpop.f32.mrf.mxu0  ;;  %v3468_v45 = vpop.f32.mrf.mxu1  ;;  %v3295_v28 = vadd.f32 %v3294_v2, %v3293_v44  ;;  %v2570_v47 = vmul.f32 %v2437_v29, %v2437_v29 }
 0x205   : > { %2470 = vst [vmem:[%s4603_s19 + $0xd8] sm:$0xff] %v2438_v15  ;;  %v2436_v9 = vadd.f32 %v2352_v55, %v4790_v32  ;;  %v2530_v42 = vadd.f32 %v2529_v6, %v2435_v54  ;;  %v2571_v36 = vmul.f32 %v2438_v15, %v2438_v15 }
 0x206   : > { %v2598_v37 = vadd.f32 %v2597_v53, %v2567_v34  ;;  %v3297_v59 = vpop.f32.mrf.mxu0  ;;  %v2364_v49 = vpop.f32.mrf.mxu1 }
 0x207   : > { %2468 = vst [vmem:[%s4603_s19 + $0xc8] sm:$0xff] %v2436_v9  ;;  %v2569_v38 = vmul.f32 %v2436_v9, %v2436_v9  ;;  %v3298_v46 = vadd.f32 %v3297_v59, %v3296_v13  ;;  %v2365_v63 = vadd.f32 %v3292_v57, %v2364_v49  ;;  %v2531_v27 = vadd.f32 %v2530_v42, %v2436_v9 }
 0x208   : > { %v2599_v62 = vadd.f32 %v2598_v37, %v2568_v33  ;;  %v3299_v30 = vpop.f32.mrf.mxu0  ;;  %v3469_v26 = vpop.f32.mrf.mxu1 }
 0x209   : > { %v2373_v40 = vadd.f32 %v3468_v45, %v3298_v46  ;;  %v2439_v8 = vadd.f32 %v2365_v63, %v4574_v10  ;;  %v2532_v24 = vadd.f32 %v2531_v27, %v2437_v29 }
 0x20a   : > { %v2600_v7 = vadd.f32 %v2599_v62, %v2569_v38  ;;  %v3300_v18 = vpop.f32.mrf.mxu0  ;;  %v2367_v51 = vpop.f32.mrf.mxu1 }
 0x20b   : > { %v2441_v60 = vadd.f32 %v2373_v40, %v4593_v43  ;;  %2471 = vst [vmem:[%s4603_s19 + $0xe0] sm:$0xff] %v2439_v8  ;;  %v3301_v0 = vadd.f32 %v3300_v18, %v3299_v30  ;;  %v2368_v5 = vadd.f32 %v3295_v28, %v2367_v51  ;;  %v2533_v4 = vadd.f32 %v2532_v24, %v2438_v15 }
 0x20c   : > { %v2601_v39 = vadd.f32 %v2600_v7, %v2570_v47  ;;  %v2572_v41 = vmul.f32 %v2439_v8, %v2439_v8 }
 0x20d   : > { %2473 = vst [vmem:[%s4603_s19 + $0xf0] sm:$0xff] %v2441_v60  ;;  %v2376_v11 = vadd.f32 %v3469_v26, %v3301_v0  ;;  %v2440_v25 = vadd.f32 %v2368_v5, %v4582_v58  ;;  %v2534_v10 = vadd.f32 %v2533_v4, %v2439_v8  ;;  %v2574_v16 = vmul.f32 %v2441_v60, %v2441_v60 }
 0x20e   : > { %v2602_v22 = vadd.f32 %v2601_v39, %v2571_v36 }
 0x20f   : > { %v2442_v3 = vadd.f32 %v2376_v11, %v4610_v14  ;;  %2472 = vst [vmem:[%s4603_s19 + $0xe8] sm:$0xff] %v2440_v25  ;;  %v2573_v48 = vmul.f32 %v2440_v25, %v2440_v25  ;;  %v2535_v43 = vadd.f32 %v2534_v10, %v2440_v25 }
 0x210   : > { %v2603_v19 = vadd.f32 %v2602_v22, %v2572_v41 }
 0x211   : > { %2474 = vst [vmem:[%s4603_s19 + $0xf8] sm:$0xff] %v2442_v3  ;;  %v2536_v29 = vadd.f32 %v2535_v43, %v2441_v60  ;;  %v2575_v20 = vmul.f32 %v2442_v3, %v2442_v3 }
 0x212   : > { %v2604_v35 = vadd.f32 %v2603_v19, %v2573_v48 }
 0x213   : > { %v2537_v61 = vadd.f32 %v2536_v29, %v2442_v3 }
 0x214   : > { %v2605_v44 = vadd.f32 %v2604_v35, %v2574_v16 }
 0x215   : > { %v2538_v52 = vrot.slane %v2537_v61, 4 }
 0x216   : > { %v2606_v1 = vadd.f32 %v2605_v44, %v2575_v20 }
 0x217   : > { %v2539_v58 = vadd.f32 %v2538_v52, %v2537_v61 }
 0x218   : > { %v2607_v21 = vrot.slane %v2606_v1, 4 }
 0x219   : > { %v2540_v54 = vrot.slane %v2539_v58, 2 }
 0x21a   : > { %v2608_v12 = vadd.f32 %v2607_v21, %v2606_v1 }
 0x21b   : > { %v2541_v56 = vadd.f32 %v2540_v54, %v2539_v58 }
 0x21c   : > { %v2609_v14 = vrot.slane %v2608_v12, 2 }
 0x21d   : > { %v2542_v31 = vrot.slane %v2541_v56, 1 }
 0x21e   : > { %v2610_v17 = vadd.f32 %v2609_v14, %v2608_v12 }
 0x21f   : > { %v2543_v23 = vadd.f32 %v2542_v31, %v2541_v56 }
 0x220   : > { %v2611_v2 = vrot.slane %v2610_v17, 1 }
 0x222   : > { %v2612_v50 = vadd.f32 %v2611_v2, %v2610_v17 }
 0x224   : > { %v2614_v15 = vsel %vm2613_vm2, %v2543_v23, %v2612_v50 }
 0x225   : > { %2615 = vst [vmem:[%s181_s23] sm:$0x3] %v2614_v15 }
 0x226 PF: > { %s14_s12 = sadd.s32 1, %s3614_s12  }
 0x227   : > { %p11_p4 = scmp.ge.s32.totalorder %s14_s12, 4  }
 0x229   :  { %13 = sbr.rel (!%p11_p4) target bundleno = 1 (0x1), region = 72 }

// kernel: rrcnn_block.25
= control target key start
LH: loop header
LB: loop body
LE: loop exit
PB: predicated region body
PF: predicated region fallthrough
CT: control target
= control target key end

     0   :  { %s1741_s18 = smov 0   ;;  %s2274_s0 = inlined_call_operand.vmem [shape: f32[2,256,128], index: 0, kind: input, shape index: {}, may-alias: {0,5}]   ;;  %s2275_s1 = inlined_call_operand.vmem [shape: f32[1,128], index: 1, kind: input, shape index: {}]   ;;  %s2276_s2 = inlined_call_operand.vmem [shape: f32[1,128], index: 2, kind: input, shape index: {}]   ;;  %s2277_s3 = inlined_call_operand.vmem [shape: bf16[2,18,18,128], index: 3, kind: input, shape index: {}]   ;;  %s2278_s4 = inlined_call_operand.vmem [shape: bf16[2,18,18,128], index: 4, kind: input, shape index: {}]   ;;  %s2279_s5 = inlined_call_operand.vmem [shape: f32[2,256,128], index: 5, kind: output, shape index: {}, may-alias: {0,5}]  }
   0x1 LB: > { %s1579_s19 = sadd.s32 4294967295, %s1709_s18   ;;  %p1583_p0 = scmp.ge.s32.totalorder %s1709_s18, 1  ;;  %s1709_s18 = sphi %s1741_s18, %s15_s18  }
   0x2   : > { %p207_p1 = scmp.lt.s32.totalorder %s1709_s18, 3 }
   0x4   : > { %p208_p2 = pnand %p1583_p0, %p207_p1 }
   0x5   : > { %p245_p3 = scmp.lt.s32.totalorder (!%p208_p2), %s1579_s19, 1 }
   0x6   : > { %211 = sbr.rel (%p208_p2) target bundleno = 206 (0xce), region = 40 }
   0xb   : > { %s2285_s19 = smov (!%p245_p3, %s1579_s19), 1  ;;  %v1755_v0 = vld [vmem:[%s2275_s1] ss:$0 sm:$0xff]  ;;  %vm456_vm0 = vsmask.f32 3328 }
   0xc   : > { %s1690_s20 = sshll.u32 %s2285_s19, 8  ;;  %v1767_v1 = vld [vmem:[%s2276_s2] ss:$0 sm:$0xff]  ;;  %s1692_s28 = smul.u32 216, %s2285_s19  ;;  %vm457_vm1 = vsmask.f32 7440 }
   0xd   : > { %s1762_s25 = scalar_lea.vmem %s2274_s0, %s1690_s20  ;;  %vm1884_vm2 = vmor %vm456_vm0, %vm457_vm1  ;;  %s1907_s12 = scalar_lea.vmem %s2279_s5, %s1690_s20 }
   0xe   : > { %v265_v2 = vld [vmem:[%s1762_s25] sm:$0xff]  ;;  %v266_v3 = vld [vmem:[%s1762_s25 + $0x8] sm:$0xff]  ;;  %v267_v4 = vld [vmem:[%s1762_s25 + $0x10] sm:$0xff]  ;;  %s1828_s6 = scalar_lea.vmem %s2277_s3, %s1692_s28  ;;  %s1840_s9 = scalar_lea.vmem %s2278_s4, %s1692_s28 }
   0xf   : > { %v268_v5 = vld [vmem:[%s1762_s25 + $0x18] sm:$0xff]  ;;  %v269_v6 = vld [vmem:[%s1762_s25 + $0x20] sm:$0xff]  ;;  %v270_v7 = vld [vmem:[%s1762_s25 + $0x28] sm:$0xff]  ;;  %v304_v8 = vmul.f32 %v1755_v0, %v265_v2  ;;  %v305_v9 = vmul.f32 %v1755_v0, %v266_v3  ;;  %v306_v10 = vmul.f32 %v1755_v0, %v267_v4 }
  0x10   : > { %v271_v11 = vld [vmem:[%s1762_s25 + $0x30] sm:$0xff]  ;;  %v272_v12 = vld [vmem:[%s1762_s25 + $0x38] sm:$0xff]  ;;  %v307_v13 = vmul.f32 %v1755_v0, %v268_v5  ;;  %v308_v14 = vmul.f32 %v1755_v0, %v269_v6  ;;  %v309_v15 = vmul.f32 %v1755_v0, %v270_v7  ;;  %v273_v20 = vld [vmem:[%s1762_s25 + $0x40] sm:$0xff] }
  0x11   : > { %v1785_v16 = vadd.f32 %v1767_v1, %v304_v8  ;;  %v1788_v17 = vadd.f32 %v1767_v1, %v305_v9  ;;  %v1791_v18 = vadd.f32 %v1767_v1, %v306_v10  ;;  %v310_v19 = vmul.f32 %v1755_v0, %v271_v11  ;;  %v274_v21 = vld [vmem:[%s1762_s25 + $0x48] sm:$0xff]  ;;  %v275_v22 = vld [vmem:[%s1762_s25 + $0x50] sm:$0xff]  ;;  %v276_v27 = vld [vmem:[%s1762_s25 + $0x58] sm:$0xff] }
  0x12   : > { %v1798_v23 = vadd.f32 %v1767_v1, %v307_v13  ;;  %v1801_v24 = vadd.f32 %v1767_v1, %v308_v14  ;;  %v1804_v25 = vadd.f32 %v1767_v1, %v309_v15  ;;  %v311_v26 = vmul.f32 %v1755_v0, %v272_v12  ;;  %v277_v28 = vld [vmem:[%s1762_s25 + $0x60] sm:$0xff]  ;;  %v278_v29 = vld [vmem:[%s1762_s25 + $0x68] sm:$0xff]  ;;  %v279_v34 = vld [vmem:[%s1762_s25 + $0x70] sm:$0xff] }
  0x13   : > { %v375_v30 = vmax.f32 %v1785_v16, 0.0  ;;  %v376_v31 = vmax.f32 %v1788_v17, 0.0  ;;  %v377_v32 = vmax.f32 %v1791_v18, 0.0  ;;  %v1814_v33 = vadd.f32 %v1767_v1, %v310_v19  ;;  %v280_v39 = vld [vmem:[%s1762_s25 + $0x78] sm:$0xff]  ;;  %v281_v44 = vld [vmem:[%s1762_s25 + $0x80] sm:$0xff] }
  0x14   : > { %v378_v35 = vmax.f32 %v1798_v23, 0.0  ;;  %v379_v36 = vmax.f32 %v1801_v24, 0.0  ;;  %v380_v37 = vmax.f32 %v1804_v25, 0.0  ;;  %v1821_v38 = vadd.f32 %v1767_v1, %v311_v26  ;;  %v1592_v53 = vld [vmem:[%s1828_s6 + $0xc] sm:$0xf]  ;;  %v1916_v16 = vld [vmem:[%s1762_s25 + $0x98] sm:$0xff] }
  0x15   : > { %v312_v41 = vmul.f32 %v1755_v0, %v273_v20  ;;  %v313_v42 = vmul.f32 %v1755_v0, %v274_v21  ;;  %v314_v43 = vmul.f32 %v1755_v0, %v275_v22  ;;  %v315_v46 = vmul.f32 %v1755_v0, %v276_v27  ;;  %v1593_v58 = vld [vmem:[%s1828_s6 + $0x10] sm:$0xf]  ;;  %v1640_v61 = vld [vmem:[%s1840_s9 + $0xc] sm:$0xf]  ;;  %v1594_v11 = vld [vmem:[%s1828_s6 + $0x14] sm:$0x1] }
  0x16   : > { %v316_v47 = vmul.f32 %v1755_v0, %v277_v28  ;;  %v317_v48 = vmul.f32 %v1755_v0, %v278_v29  ;;  %v318_v52 = vmul.f32 %v1755_v0, %v279_v34  ;;  %v1868_v57 = vmul.f32 %v1755_v0, %v280_v39  ;;  %v1641_v4 = vld [vmem:[%s1840_s9 + $0x10] sm:$0xf]  ;;  %v1642_v19 = vld [vmem:[%s1840_s9 + $0x14] sm:$0x1]  ;;  %v1595_v27 = vld [vmem:[%s1828_s6 + $0x18] sm:$0xf] }
  0x17   : > { %v1848_v49 = vadd.f32 %v1767_v1, %v312_v41  ;;  %v1851_v50 = vadd.f32 %v1767_v1, %v313_v42  ;;  %v1854_v51 = vadd.f32 %v1767_v1, %v314_v43  ;;  %v1859_v54 = vadd.f32 %v1767_v1, %v315_v46  ;;  %v1596_v41 = vld [vmem:[%s1828_s6 + $0x1c] sm:$0xf] }
  0x18   : > { %v1862_v55 = vadd.f32 %v1767_v1, %v316_v47  ;;  %v1865_v56 = vadd.f32 %v1767_v1, %v317_v48  ;;  %v460_v59 = vshrl.u32 %v1592_v53, 16  ;;  %v463_v60 = vshll.u32 %v1592_v53, 16  ;;  %v1956_v17 = vld [vmem:[%s1762_s25 + $0xf8] sm:$0xff] }
  0x19   : > { %v1873_v62 = vadd.f32 %v1767_v1, %v318_v52  ;;  %v1876_v63 = vmul.f32 %v1755_v0, %v281_v44  ;;  %v469_v2 = vshll.u32 %v1593_v58, 16  ;;  %v473_v3 = vshrl.u32 %v1593_v58, 16 }
  0x1a   : > { %v989_v5 = vshrl.u32 %v1640_v61, 16  ;;  %v992_v6 = vshll.u32 %v1640_v61, 16  ;;  %v462_v7 = vrot.slane %v460_v59, 4  ;;  %v465_v8 = vrot.slane %v463_v60, 5 }
  0x1b   : > { %v998_v9 = vshll.u32 %v1641_v4, 16  ;;  %v1002_v10 = vshrl.u32 %v1641_v4, 16  ;;  %v471_v12 = vrot.slane %v469_v2, 5  ;;  %v475_v15 = vrot.slane %v473_v3, 4  ;;  %v1643_v3 = vld [vmem:[%s1840_s9 + $0x18] sm:$0xf] }
  0x1c   : > { %v991_v13 = vrot.slane %v989_v5, 4  ;;  %v994_v14 = vrot.slane %v992_v6, 5  ;;  %v466_v20 = vor.u32 %v465_v8, %v462_v7  ;;  %v479_v22 = vshll.u32 %v1594_v11, 16  ;;  %v1644_v8 = vld [vmem:[%s1840_s9 + $0x1c] sm:$0xf] }
  0x1d   : > { %v1000_v21 = vrot.slane %v998_v9, 5  ;;  %v1004_v26 = vrot.slane %v1002_v10, 4  ;;  %v476_v34 = vor.u32 %v475_v15, %v471_v12  ;;  %v1008_v39 = vshll.u32 %v1642_v19, 16 }
  0x1e   : > { %v995_v29 = vor.u32 %v994_v14, %v991_v13  ;;  %v484_v42 = vshrl.u32 %v1595_v27, 16  ;;  %v467_v43 = vrot.slane %v466_v20, 4  ;;  %v481_v44 = vrot.slane %v479_v22, 5  ;;  %v1597_v20 = vld [vmem:[%s1828_s6 + $0x20] sm:$0x1]  ;;  %v1913_v22 = vld [vmem:[%s1762_s25 + $0x90] sm:$0xff] }
  0x1f   : > { %v1005_v46 = vor.u32 %v1004_v26, %v1000_v21  ;;  %v487_v47 = vshll.u32 %v1595_v27, 16  ;;  %v477_v52 = vrot.slane %v476_v34, 4  ;;  %v1010_v53 = vrot.slane %v1008_v39, 5  ;;  %v1922_v26 = vld [vmem:[%s1762_s25 + $0xa8] sm:$0xff]  ;;  %v1925_v27 = vld [vmem:[%s1762_s25 + $0xb0] sm:$0xff]  ;;  %v1931_v34 = vld [vmem:[%s1762_s25 + $0xc0] sm:$0xff] }
  0x20   : > { %v996_v48 = vrot.slane %v995_v29, 4  ;;  %v486_v58 = vrot.slane %v484_v42, 4  ;;  %v472_v59 = vsel %vm1884_vm2, %v467_v43, %v471_v12  ;;  %v493_v2 = vshll.u32 %v1596_v41, 16  ;;  %v1928_v29 = vld [vmem:[%s1762_s25 + $0xb8] sm:$0xff]  ;;  %v1934_v39 = vld [vmem:[%s1762_s25 + $0xc8] sm:$0xff] }
  0x21   : > { %v1006_v60 = vrot.slane %v1005_v46, 4  ;;  %v489_v61 = vrot.slane %v487_v47, 5  ;;  %v875_v4 = vunpack.c.l.bf16 %v472_v59  ;;  %v482_v6 = vsel %vm1884_vm2, %v477_v52, %v481_v44  ;;  %v1940_v42 = vld [vmem:[%s1762_s25 + $0xd8] sm:$0xff]  ;;  %v1946_v52 = vld [vmem:[%s1762_s25 + $0xe0] sm:$0xff] }
  0x22   : > { %v1001_v5 = vsel %vm1884_vm2, %v996_v48, %v1000_v21  ;;  %v497_v7 = vshrl.u32 %v1596_v41, 16  ;;  %v876_v10 = vunpack.c.l.bf16 %v482_v6  ;;  %v495_v15 = vrot.slane %v493_v2, 5  ;;  %v1910_v21 = vld [vmem:[%s1762_s25 + $0x88] sm:$0xff]  ;;  %v1937_v41 = vld [vmem:[%s1762_s25 + $0xd0] sm:$0xff]  ;;  %v1645_v48 = vld [vmem:[%s1840_s9 + $0x20] sm:$0x1] }
  0x23   : > { %v1404_v9 = vunpack.c.l.bf16 %v1001_v5  ;;  %v1011_v11 = vsel %vm1884_vm2, %v1006_v60, %v1010_v53  ;;  %v490_v12 = vor.u32 %v489_v61, %v486_v58  ;;  %v907_v13 = vadd.f32 %v875_v4, %v375_v30  ;;  %v1919_v30 = vld [vmem:[%s1762_s25 + $0xa0] sm:$0xff]  ;;  %v1950_v2 = vld [vmem:[%s1762_s25 + $0xe8] sm:$0xff]  ;;  %v1953_v4 = vld [vmem:[%s1762_s25 + $0xf0] sm:$0xff] }
  0x24   : > { %v1405_v14 = vunpack.c.l.bf16 %v1011_v11  ;;  %v1013_v19 = vshrl.u32 %v1643_v3, 16  ;;  %v908_v43 = vadd.f32 %v876_v10, %v376_v31  ;;  %v1016_v46 = vshll.u32 %v1643_v3, 16  ;;  %v1598_v61 = vld [vmem:[%s1828_s6 + $0x24] sm:$0xf] }
  0x25   : > { %v491_v44 = vrot.slane %v490_v12, 4  ;;  %v1022_v47 = vshll.u32 %v1644_v8, 16  ;;  %v1436_v53 = vadd.f32 %v1404_v9, %v907_v13  ;;  %v1026_v59 = vshrl.u32 %v1644_v8, 16  ;;  %v1599_v13 = vld [vmem:[%s1828_s6 + $0x28] sm:$0xf] }
  0x26   : > { %v1015_v58 = vrot.slane %v1013_v19, 4  ;;  %v499_v60 = vrot.slane %v497_v7, 4  ;;  %v1437_v31 = vadd.f32 %v1405_v14, %v908_v43  ;;  %v1018_v5 = vrot.slane %v1016_v46, 5 }
  0x27   : > { %v496_v3 = vsel %vm1884_vm2, %v491_v44, %v495_v15  ;;  %v1024_v6 = vrot.slane %v1022_v47, 5  ;;  %1468 = vst [vmem:[%s1907_s12] sm:$0xff] %v1436_v53  ;;  %v503_v8 = vshll.u32 %v1597_v20, 16  ;;  %v1028_v7 = vrot.slane %v1026_v59, 4  ;;  %v1646_v47 = vld [vmem:[%s1840_s9 + $0x24] sm:$0xf] }
  0x28   : > { %v877_v9 = vunpack.c.l.bf16 %v496_v3  ;;  %v500_v10 = vor.u32 %v499_v60, %v495_v15  ;;  %1469 = vst [vmem:[%s1907_s12 + $0x8] sm:$0xff] %v1437_v31  ;;  %v1019_v11 = vor.u32 %v1018_v5, %v1015_v58  ;;  %v1032_v12 = vshll.u32 %v1645_v48, 16  ;;  %v1647_v31 = vld [vmem:[%s1840_s9 + $0x28] sm:$0xf] }
  0x29   : > { %v508_v19 = vshrl.u32 %v1598_v61, 16  ;;  %v511_v45 = vshll.u32 %v1598_v61, 16  ;;  %v505_v44 = vrot.slane %v503_v8, 5  ;;  %v1029_v46 = vor.u32 %v1028_v7, %v1024_v6  ;;  %v1600_v8 = vld [vmem:[%s1828_s6 + $0x2c] sm:$0x1] }
  0x2a   : > { %v909_v14 = vadd.f32 %v877_v9, %v377_v32  ;;  %v501_v43 = vrot.slane %v500_v10, 4  ;;  %v1020_v40 = vrot.slane %v1019_v11, 4  ;;  %v1034_v53 = vrot.slane %v1032_v12, 5 }
  0x2b   : > { %v510_v15 = vrot.slane %v508_v19, 4  ;;  %v513_v20 = vrot.slane %v511_v45, 5  ;;  %v1030_v48 = vrot.slane %v1029_v46, 4  ;;  %v517_v59 = vshll.u32 %v1599_v13, 16  ;;  %v1601_v46 = vld [vmem:[%s1828_s6 + $0x30] sm:$0xf] }
  0x2c   : > { %v506_v58 = vsel %vm1884_vm2, %v501_v43, %v505_v44  ;;  %v521_v60 = vshrl.u32 %v1599_v13, 16  ;;  %v1025_v18 = vsel %vm1884_vm2, %v1020_v40, %v1024_v6  ;;  %v1037_v3 = vshrl.u32 %v1646_v47, 16  ;;  %v1648_v40 = vld [vmem:[%s1840_s9 + $0x2c] sm:$0x1] }
  0x2d   : > { %v878_v32 = vunpack.c.l.bf16 %v506_v58  ;;  %v514_v61 = vor.u32 %v513_v20, %v510_v15  ;;  %v1406_v5 = vunpack.c.l.bf16 %v1025_v18  ;;  %v1035_v9 = vsel %vm1884_vm2, %v1030_v48, %v1034_v53 }
  0x2e   : > { %v519_v45 = vrot.slane %v517_v59, 5  ;;  %v1040_v10 = vshll.u32 %v1646_v47, 16  ;;  %v1407_v11 = vunpack.c.l.bf16 %v1035_v9  ;;  %v1039_v13 = vrot.slane %v1037_v3, 4  ;;  %v1602_v59 = vld [vmem:[%s1828_s6 + $0x34] sm:$0xf] }
  0x2f   : > { %v910_v7 = vadd.f32 %v878_v32, %v378_v35  ;;  %v515_v12 = vrot.slane %v514_v61, 4  ;;  %v1438_v6 = vadd.f32 %v1406_v5, %v909_v14  ;;  %v1046_v43 = vshll.u32 %v1647_v31, 16  ;;  %v1649_v9 = vld [vmem:[%s1840_s9 + $0x30] sm:$0xf] }
  0x30   : > { %v1042_v19 = vrot.slane %v1040_v10, 5  ;;  %v1050_v44 = vshrl.u32 %v1647_v31, 16  ;;  %v523_v53 = vrot.slane %v521_v60, 4  ;;  %v527_v20 = vshll.u32 %v1600_v8, 16 }
  0x31   : > { %v1439_v15 = vadd.f32 %v1407_v11, %v910_v7  ;;  %v520_v47 = vsel %vm1884_vm2, %v515_v12, %v519_v45  ;;  %1470 = vst [vmem:[%s1907_s12 + $0x10] sm:$0xff] %v1438_v6  ;;  %v1048_v58 = vrot.slane %v1046_v43, 5  ;;  %v1056_v32 = vshll.u32 %v1648_v40, 16  ;;  %v1650_v6 = vld [vmem:[%s1840_s9 + $0x34] sm:$0xf] }
  0x32   : > { %v879_v23 = vunpack.c.l.bf16 %v520_v47  ;;  %v1043_v35 = vor.u32 %v1042_v19, %v1039_v13  ;;  %v1052_v48 = vrot.slane %v1050_v44, 4  ;;  %v524_v18 = vor.u32 %v523_v53, %v519_v45  ;;  %v1603_v53 = vld [vmem:[%s1828_s6 + $0x38] sm:$0x1] }
  0x33   : > { %1471 = vst [vmem:[%s1907_s12 + $0x18] sm:$0xff] %v1439_v15  ;;  %v529_v14 = vrot.slane %v527_v20, 5  ;;  %v532_v61 = vshrl.u32 %v1601_v46, 16  ;;  %v535_v60 = vshll.u32 %v1601_v46, 16  ;;  %v1058_v8 = vrot.slane %v1056_v32, 5 }
  0x34   : > { %v911_v31 = vadd.f32 %v879_v23, %v379_v36  ;;  %v1044_v3 = vrot.slane %v1043_v35, 4  ;;  %v1053_v5 = vor.u32 %v1052_v48, %v1048_v58  ;;  %v525_v10 = vrot.slane %v524_v18, 4  ;;  %v1651_v20 = vld [vmem:[%s1840_s9 + $0x38] sm:$0x1] }
  0x35   : > { %v534_v7 = vrot.slane %v532_v61, 4  ;;  %v541_v11 = vshll.u32 %v1602_v59, 16  ;;  %v537_v13 = vrot.slane %v535_v60, 5  ;;  %v545_v40 = vshrl.u32 %v1602_v59, 16 }
  0x36   : > { %v1049_v45 = vsel %vm1884_vm2, %v1044_v3, %v1048_v58  ;;  %v1054_v12 = vrot.slane %v1053_v5, 4  ;;  %v530_v24 = vsel %vm1884_vm2, %v525_v10, %v529_v14  ;;  %v1061_v43 = vshrl.u32 %v1649_v9, 16 }
  0x37   : > { %v1408_v19 = vunpack.c.l.bf16 %v1049_v45  ;;  %v543_v36 = vrot.slane %v541_v11, 5  ;;  %v880_v44 = vunpack.c.l.bf16 %v530_v24  ;;  %v538_v15 = vor.u32 %v537_v13, %v534_v7  ;;  %v1605_v11 = vld [vmem:[%s1828_s6 + $0x40] sm:$0xf] }
  0x38   : > { %v1059_v46 = vsel %vm1884_vm2, %v1054_v12, %v1058_v8  ;;  %v1064_v47 = vshll.u32 %v1649_v9, 16  ;;  %v1063_v58 = vrot.slane %v1061_v43, 4  ;;  %v1070_v48 = vshll.u32 %v1650_v6, 16  ;;  %v1604_v9 = vld [vmem:[%s1828_s6 + $0x3c] sm:$0xf] }
  0x39   : > { %v1440_v23 = vadd.f32 %v1408_v19, %v911_v31  ;;  %v1409_v35 = vunpack.c.l.bf16 %v1059_v46  ;;  %v912_v59 = vadd.f32 %v880_v44, %v380_v37  ;;  %v539_v18 = vrot.slane %v538_v15, 4 }
  0x3a   : > { %v1066_v14 = vrot.slane %v1064_v47, 5  ;;  %v1074_v32 = vshrl.u32 %v1650_v6, 16  ;;  %v1072_v61 = vrot.slane %v1070_v48, 5  ;;  %v547_v3 = vrot.slane %v545_v40, 4  ;;  %v1652_v47 = vld [vmem:[%s1840_s9 + $0x3c] sm:$0xf] }
  0x3b   : > { %1472 = vst [vmem:[%s1907_s12 + $0x20] sm:$0xff] %v1440_v23  ;;  %v551_v5 = vshll.u32 %v1603_v53, 16  ;;  %v1080_v60 = vshll.u32 %v1651_v20, 16  ;;  %v1441_v10 = vadd.f32 %v1409_v35, %v912_v59  ;;  %v544_v31 = vsel %vm1884_vm2, %v539_v18, %v543_v36  ;;  %v1653_v35 = vld [vmem:[%s1840_s9 + $0x40] sm:$0xf] }
  0x3c   : > { %v1067_v8 = vor.u32 %v1066_v14, %v1063_v58  ;;  %v1076_v7 = vrot.slane %v1074_v32, 4  ;;  %v881_v25 = vunpack.c.l.bf16 %v544_v31  ;;  %v548_v37 = vor.u32 %v547_v3, %v543_v36 }
  0x3d   : > { %v553_v45 = vrot.slane %v551_v5, 5  ;;  %v1082_v12 = vrot.slane %v1080_v60, 5  ;;  %1473 = vst [vmem:[%s1907_s12 + $0x28] sm:$0xff] %v1441_v10  ;;  %v383_v40 = vmax.f32 %v1848_v49, 0.0  ;;  %v556_v19 = vshrl.u32 %v1604_v9, 16 }
  0x3e   : > { %v1068_v13 = vrot.slane %v1067_v8, 4  ;;  %v1077_v6 = vor.u32 %v1076_v7, %v1072_v61  ;;  %v2282_v24 = vmax.f32 %v1814_v33, 0.0  ;;  %v549_v44 = vrot.slane %v548_v37, 4 }
  0x3f   : > { %v559_v46 = vshll.u32 %v1604_v9, 16  ;;  %v565_v15 = vshll.u32 %v1605_v11, 16  ;;  %v558_v20 = vrot.slane %v556_v19, 4  ;;  %v569_v23 = vshrl.u32 %v1605_v11, 16  ;;  %v1606_v9 = vld [vmem:[%s1828_s6 + $0x44] sm:$0x1] }
  0x40   : > { %v913_v43 = vadd.f32 %v881_v25, %v2282_v24  ;;  %v1073_v53 = vsel %vm1884_vm2, %v1068_v13, %v1072_v61  ;;  %v1078_v36 = vrot.slane %v1077_v6, 4  ;;  %v554_v49 = vsel %vm1884_vm2, %v549_v44, %v553_v45  ;;  %v1654_v25 = vld [vmem:[%s1840_s9 + $0x44] sm:$0x1]  ;;  %v1607_v44 = vld [vmem:[%s1828_s6 + $0x48] sm:$0xf] }
  0x41   : > { %v1410_v58 = vunpack.c.l.bf16 %v1073_v53  ;;  %v561_v48 = vrot.slane %v559_v46, 5  ;;  %v567_v33 = vrot.slane %v565_v15, 5  ;;  %v882_v59 = vunpack.c.l.bf16 %v554_v49  ;;  %v1608_v53 = vld [vmem:[%s1828_s6 + $0x4c] sm:$0xf] }
  0x42   : > { %v1083_v18 = vsel %vm1884_vm2, %v1078_v36, %v1082_v12  ;;  %v1085_v14 = vshrl.u32 %v1652_v47, 16  ;;  %v1088_v32 = vshll.u32 %v1652_v47, 16  ;;  %v1094_v60 = vshll.u32 %v1653_v35, 16 }
  0x43   : > { %v1442_v61 = vadd.f32 %v1410_v58, %v913_v43  ;;  %v1411_v3 = vunpack.c.l.bf16 %v1083_v18  ;;  %v562_v5 = vor.u32 %v561_v48, %v558_v20  ;;  %v2283_v10 = vmax.f32 %v1821_v38, 0.0 }
  0x44   : > { %v1087_v8 = vrot.slane %v1085_v14, 4  ;;  %v1090_v7 = vrot.slane %v1088_v32, 5  ;;  %v1098_v11 = vshrl.u32 %v1653_v35, 16  ;;  %v1096_v45 = vrot.slane %v1094_v60, 5  ;;  %v1655_v32 = vld [vmem:[%s1840_s9 + $0x48] sm:$0xf] }
  0x45   : > { %v914_v31 = vadd.f32 %v882_v59, %v2283_v10  ;;  %1474 = vst [vmem:[%s1907_s12 + $0x30] sm:$0xff] %v1442_v61  ;;  %v563_v37 = vrot.slane %v562_v5, 4  ;;  %v384_v12 = vmax.f32 %v1851_v50, 0.0  ;;  %v571_v13 = vrot.slane %v569_v23, 4  ;;  %v1656_v60 = vld [vmem:[%s1840_s9 + $0x4c] sm:$0xf] }
  0x46   : > { %v1091_v19 = vor.u32 %v1090_v7, %v1087_v8  ;;  %v575_v24 = vshll.u32 %v1606_v9, 16  ;;  %v1100_v43 = vrot.slane %v1098_v11, 4  ;;  %v1104_v15 = vshll.u32 %v1654_v25, 16 }
  0x47   : > { %v1443_v6 = vadd.f32 %v1411_v3, %v914_v31  ;;  %v568_v38 = vsel %vm1884_vm2, %v563_v37, %v567_v33  ;;  %v572_v46 = vor.u32 %v571_v13, %v567_v33  ;;  %v385_v47 = vmax.f32 %v1854_v51, 0.0  ;;  %v1609_v37 = vld [vmem:[%s1828_s6 + $0x50] sm:$0x1] }
  0x48   : > { %v883_v36 = vunpack.c.l.bf16 %v568_v38  ;;  %v1092_v20 = vrot.slane %v1091_v19, 4  ;;  %v577_v50 = vrot.slane %v575_v24, 5  ;;  %v1101_v23 = vor.u32 %v1100_v43, %v1096_v45  ;;  %v1657_v24 = vld [vmem:[%s1840_s9 + $0x50] sm:$0x1] }
  0x49   : > { %1475 = vst [vmem:[%s1907_s12 + $0x38] sm:$0xff] %v1443_v6  ;;  %v573_v35 = vrot.slane %v572_v46, 4  ;;  %v1106_v58 = vrot.slane %v1104_v15, 5  ;;  %v580_v49 = vshrl.u32 %v1607_v44, 16  ;;  %v583_v48 = vshll.u32 %v1607_v44, 16 }
  0x4a   : > { %v915_v59 = vadd.f32 %v883_v36, %v383_v40  ;;  %v1097_v18 = vsel %vm1884_vm2, %v1092_v20, %v1096_v45  ;;  %v1102_v33 = vrot.slane %v1101_v23, 4  ;;  %v589_v14 = vshll.u32 %v1608_v53, 16 }
  0x4b   : > { %v1412_v51 = vunpack.c.l.bf16 %v1097_v18  ;;  %v578_v61 = vsel %vm1884_vm2, %v573_v35, %v577_v50  ;;  %v582_v3 = vrot.slane %v580_v49, 4  ;;  %v585_v5 = vrot.slane %v583_v48, 5  ;;  %v1610_v50 = vld [vmem:[%s1828_s6 + $0x54] sm:$0xf]  ;;  %v1611_v49 = vld [vmem:[%s1828_s6 + $0x58] sm:$0xf] }
  0x4c   : > { %v884_v9 = vunpack.c.l.bf16 %v578_v61  ;;  %v1107_v40 = vsel %vm1884_vm2, %v1102_v33, %v1106_v58  ;;  %v591_v10 = vrot.slane %v589_v14, 5  ;;  %v593_v31 = vshrl.u32 %v1608_v53, 16 }
  0x4d   : > { %v1444_v8 = vadd.f32 %v1412_v51, %v915_v59  ;;  %v1413_v7 = vunpack.c.l.bf16 %v1107_v40  ;;  %v586_v11 = vor.u32 %v585_v5, %v582_v3  ;;  %v1109_v25 = vshrl.u32 %v1655_v32, 16 }
  0x4e   : > { %v916_v45 = vadd.f32 %v884_v9, %v384_v12  ;;  %v1112_v13 = vshll.u32 %v1655_v32, 16  ;;  %v1118_v6 = vshll.u32 %v1656_v60, 16  ;;  %v1122_v19 = vshrl.u32 %v1656_v60, 16  ;;  %v1658_v9 = vld [vmem:[%s1840_s9 + $0x54] sm:$0xf] }
  0x4f   : > { %1476 = vst [vmem:[%s1907_s12 + $0x40] sm:$0xff] %v1444_v8  ;;  %v587_v43 = vrot.slane %v586_v11, 4  ;;  %v1111_v44 = vrot.slane %v1109_v25, 4  ;;  %v386_v38 = vmax.f32 %v1859_v54, 0.0  ;;  %v595_v46 = vrot.slane %v593_v31, 4 }
  0x50   : > { %v1445_v15 = vadd.f32 %v1413_v7, %v916_v45  ;;  %v1114_v53 = vrot.slane %v1112_v13, 5  ;;  %v1120_v36 = vrot.slane %v1118_v6, 5  ;;  %v599_v20 = vshll.u32 %v1609_v37, 16  ;;  %v1659_v7 = vld [vmem:[%s1840_s9 + $0x58] sm:$0xf] }
  0x51   : > { %v592_v12 = vsel %vm1884_vm2, %v587_v43, %v591_v10  ;;  %v596_v23 = vor.u32 %v595_v46, %v591_v10  ;;  %v1124_v35 = vrot.slane %v1122_v19, 4  ;;  %v1128_v58 = vshll.u32 %v1657_v24, 16  ;;  %v1612_v46 = vld [vmem:[%s1828_s6 + $0x5c] sm:$0x1] }
  0x52   : > { %1477 = vst [vmem:[%s1907_s12 + $0x48] sm:$0xff] %v1445_v15  ;;  %v885_v48 = vunpack.c.l.bf16 %v592_v12  ;;  %v1115_v59 = vor.u32 %v1114_v53, %v1111_v44  ;;  %v601_v18 = vrot.slane %v599_v20, 5  ;;  %v387_v54 = vmax.f32 %v1862_v55, 0.0  ;;  %v1660_v15 = vld [vmem:[%s1840_s9 + $0x5c] sm:$0x1] }
  0x53   : > { %v597_v33 = vrot.slane %v596_v23, 4  ;;  %v1125_v14 = vor.u32 %v1124_v35, %v1120_v36  ;;  %v1130_v32 = vrot.slane %v1128_v58, 5  ;;  %v604_v51 = vshrl.u32 %v1610_v50, 16  ;;  %v1613_v12 = vld [vmem:[%s1828_s6 + $0x60] sm:$0xf] }
  0x54   : > { %v917_v61 = vadd.f32 %v885_v48, %v385_v47  ;;  %v1116_v3 = vrot.slane %v1115_v59, 4  ;;  %v607_v5 = vshll.u32 %v1610_v50, 16  ;;  %v613_v60 = vshll.u32 %v1611_v49, 16 }
  0x55   : > { %v602_v40 = vsel %vm1884_vm2, %v597_v33, %v601_v18  ;;  %v1126_v10 = vrot.slane %v1125_v14, 4  ;;  %v606_v31 = vrot.slane %v604_v51, 4  ;;  %v617_v8 = vshrl.u32 %v1611_v49, 16  ;;  %v1614_v51 = vld [vmem:[%s1828_s6 + $0x64] sm:$0xf] }
  0x56   : > { %v1121_v55 = vsel %vm1884_vm2, %v1116_v3, %v1120_v36  ;;  %v886_v11 = vunpack.c.l.bf16 %v602_v40  ;;  %v609_v25 = vrot.slane %v607_v5, 5  ;;  %v615_v47 = vrot.slane %v613_v60, 5 }
  0x57   : > { %v1414_v37 = vunpack.c.l.bf16 %v1121_v55  ;;  %v1131_v45 = vsel %vm1884_vm2, %v1126_v10, %v1130_v32  ;;  %v1133_v13 = vshrl.u32 %v1658_v9, 16  ;;  %v1136_v6 = vshll.u32 %v1658_v9, 16 }
  0x58   : > { %v918_v19 = vadd.f32 %v886_v11, %v386_v38  ;;  %v1415_v24 = vunpack.c.l.bf16 %v1131_v45  ;;  %v610_v43 = vor.u32 %v609_v25, %v606_v31  ;;  %v1142_v44 = vshll.u32 %v1659_v7, 16 }
  0x59   : > { %v1446_v53 = vadd.f32 %v1414_v37, %v917_v61  ;;  %v1135_v36 = vrot.slane %v1133_v13, 4  ;;  %v1138_v20 = vrot.slane %v1136_v6, 5  ;;  %v1146_v50 = vshrl.u32 %v1659_v7, 16  ;;  %v1662_v6 = vld [vmem:[%s1840_s9 + $0x64] sm:$0xf] }
  0x5a   : > { %v1447_v23 = vadd.f32 %v1415_v24, %v918_v19  ;;  %v611_v35 = vrot.slane %v610_v43, 4  ;;  %v1144_v58 = vrot.slane %v1142_v44, 5  ;;  %v388_v49 = vmax.f32 %v1865_v56, 0.0 }
  0x5b   : > { %1478 = vst [vmem:[%s1907_s12 + $0x50] sm:$0xff] %v1446_v53  ;;  %v1139_v48 = vor.u32 %v1138_v20, %v1135_v36  ;;  %v619_v38 = vrot.slane %v617_v8, 4  ;;  %v623_v59 = vshll.u32 %v1612_v46, 16  ;;  %v1148_v18 = vrot.slane %v1146_v50, 4  ;;  %v1661_v8 = vld [vmem:[%s1840_s9 + $0x60] sm:$0xf] }
  0x5c   : > { %1479 = vst [vmem:[%s1907_s12 + $0x58] sm:$0xff] %v1447_v23  ;;  %v616_v33 = vsel %vm1884_vm2, %v611_v35, %v615_v47  ;;  %v1152_v14 = vshll.u32 %v1660_v15, 16  ;;  %v389_v32 = vmax.f32 %v1873_v62, 0.0  ;;  %v628_v61 = vshrl.u32 %v1613_v12, 16  ;;  %v1615_v53 = vld [vmem:[%s1828_s6 + $0x68] sm:$0x1] }
  0x5d   : > { %v887_v3 = vunpack.c.l.bf16 %v616_v33  ;;  %v1140_v5 = vrot.slane %v1139_v48, 4  ;;  %v620_v60 = vor.u32 %v619_v38, %v615_v47  ;;  %v625_v56 = vrot.slane %v623_v59, 5  ;;  %v1663_v38 = vld [vmem:[%s1840_s9 + $0x68] sm:$0x1] }
  0x5e   : > { %v1149_v9 = vor.u32 %v1148_v18, %v1144_v58  ;;  %v1154_v40 = vrot.slane %v1152_v14, 5  ;;  %v630_v10 = vrot.slane %v628_v61, 4  ;;  %v631_v31 = vshll.u32 %v1613_v12, 16 }
  0x5f   : > { %v919_v7 = vadd.f32 %v887_v3, %v387_v54  ;;  %v1145_v55 = vsel %vm1884_vm2, %v1140_v5, %v1144_v58  ;;  %v621_v11 = vrot.slane %v620_v60, 4  ;;  %v637_v25 = vshll.u32 %v1614_v51, 16 }
  0x60   : > { %v1416_v62 = vunpack.c.l.bf16 %v1145_v55  ;;  %v1150_v37 = vrot.slane %v1149_v9, 4  ;;  %v633_v45 = vrot.slane %v631_v31, 5  ;;  %v641_v13 = vshrl.u32 %v1614_v51, 16  ;;  %v1616_v51 = vld [vmem:[%s1828_s6 + $0x6c] sm:$0xf] }
  0x61   : > { %v626_v47 = vsel %vm1884_vm2, %v621_v11, %v625_v56  ;;  %v639_v19 = vrot.slane %v637_v25, 5  ;;  %v1157_v24 = vshrl.u32 %v1661_v8, 16  ;;  %v1160_v43 = vshll.u32 %v1661_v8, 16  ;;  %v1617_v8 = vld [vmem:[%s1828_s6 + $0x70] sm:$0xf] }
  0x62   : > { %v1448_v54 = vadd.f32 %v1416_v62, %v919_v7  ;;  %v888_v44 = vunpack.c.l.bf16 %v626_v47  ;;  %v1155_v46 = vsel %vm1884_vm2, %v1150_v37, %v1154_v40  ;;  %v634_v15 = vor.u32 %v633_v45, %v630_v10  ;;  %v1664_v47 = vld [vmem:[%s1840_s9 + $0x6c] sm:$0xf] }
  0x63   : > { %v1417_v36 = vunpack.c.l.bf16 %v1155_v46  ;;  %v1159_v20 = vrot.slane %v1157_v24, 4  ;;  %v1162_v50 = vrot.slane %v1160_v43, 5  ;;  %v1166_v12 = vshll.u32 %v1662_v6, 16 }
  0x64   : > { %1480 = vst [vmem:[%s1907_s12 + $0x60] sm:$0xff] %v1448_v54  ;;  %v920_v23 = vadd.f32 %v888_v44, %v388_v49  ;;  %v635_v35 = vrot.slane %v634_v15, 4  ;;  %v1170_v58 = vshrl.u32 %v1662_v6, 16  ;;  %v358_v48 = vadd.f32 %v1767_v1, %v1868_v57  ;;  %v1665_v54 = vld [vmem:[%s1840_s9 + $0x70] sm:$0xf] }
  0x65   : > { %v1163_v59 = vor.u32 %v1162_v50, %v1159_v20  ;;  %v1168_v18 = vrot.slane %v1166_v12, 5  ;;  %v643_v33 = vrot.slane %v641_v13, 4  ;;  %v647_v14 = vshll.u32 %v1615_v53, 16  ;;  %v1618_v12 = vld [vmem:[%s1828_s6 + $0x74] sm:$0x1] }
  0x66   : > { %v1449_v61 = vadd.f32 %v1417_v36, %v920_v23  ;;  %v640_v3 = vsel %vm1884_vm2, %v635_v35, %v639_v19  ;;  %v390_v5 = vmax.f32 %v358_v48, 0.0  ;;  %v1172_v60 = vrot.slane %v1170_v58, 4 }
  0x67   : > { %v889_v49 = vunpack.c.l.bf16 %v640_v3  ;;  %v1164_v56 = vrot.slane %v1163_v59, 4  ;;  %v644_v9 = vor.u32 %v643_v33, %v639_v19  ;;  %v649_v40 = vrot.slane %v647_v14, 5  ;;  %v1666_v14 = vld [vmem:[%s1840_s9 + $0x74] sm:$0x1] }
  0x68   : > { %1481 = vst [vmem:[%s1907_s12 + $0x68] sm:$0xff] %v1449_v61  ;;  %v1173_v57 = vor.u32 %v1172_v60, %v1168_v18  ;;  %v1176_v10 = vshll.u32 %v1663_v38, 16  ;;  %v359_v31 = vadd.f32 %v1767_v1, %v1876_v63  ;;  %v652_v7 = vshrl.u32 %v1616_v51, 16 }
  0x69   : > { %v921_v55 = vadd.f32 %v889_v49, %v389_v32  ;;  %v1169_v11 = vsel %vm1884_vm2, %v1164_v56, %v1168_v18  ;;  %v645_v25 = vrot.slane %v644_v9, 4  ;;  %v655_v62 = vshll.u32 %v1616_v51, 16 }
  0x6a   : > { %v1418_v37 = vunpack.c.l.bf16 %v1169_v11  ;;  %v1174_v45 = vrot.slane %v1173_v57, 4  ;;  %v1178_v13 = vrot.slane %v1176_v10, 5  ;;  %v391_v6 = vmax.f32 %v359_v31, 0.0  ;;  %v1620_v11 = vld [vmem:[%s1828_s6 + $0x7c] sm:$0xf] }
  0x6b   : > { %v650_v19 = vsel %vm1884_vm2, %v645_v25, %v649_v40  ;;  %v654_v63 = vrot.slane %v652_v7, 4  ;;  %v657_v24 = vrot.slane %v655_v62, 5  ;;  %v661_v43 = vshll.u32 %v1617_v8, 16  ;;  %v1619_v40 = vld [vmem:[%s1828_s6 + $0x78] sm:$0xf] }
  0x6c   : > { %v1450_v32 = vadd.f32 %v1418_v37, %v921_v55  ;;  %v890_v44 = vunpack.c.l.bf16 %v650_v19  ;;  %v1179_v46 = vsel %vm1884_vm2, %v1174_v45, %v1178_v13  ;;  %v665_v15 = vshrl.u32 %v1617_v8, 16  ;;  %v2103_v55 = vld [vmem:[%s2275_s1] ss:$0 sm:$0xff] }
  0x6d   : > { %v1419_v53 = vunpack.c.l.bf16 %v1179_v46  ;;  %v658_v36 = vor.u32 %v657_v24, %v654_v63  ;;  %v663_v20 = vrot.slane %v661_v43, 5  ;;  %v1181_v50 = vshrl.u32 %v1664_v47, 16  ;;  %v2113_v19 = vld [vmem:[%s2276_s2] ss:$0 sm:$0xff] }
  0x6e   : > { %1482 = vst [vmem:[%s1907_s12 + $0x70] sm:$0xff] %v1450_v32  ;;  %v922_v23 = vadd.f32 %v890_v44, %v390_v5  ;;  %v1184_v35 = vshll.u32 %v1664_v47, 16  ;;  %v1190_v58 = vshll.u32 %v1665_v54, 16  ;;  %v1194_v48 = vshrl.u32 %v1665_v54, 16  ;;  %v1667_v32 = vld [vmem:[%s1840_s9 + $0x78] sm:$0xf] }
  0x6f   : > { %v659_v38 = vrot.slane %v658_v36, 4  ;;  %v1183_v59 = vrot.slane %v1181_v50, 4  ;;  %v321_v18 = vmul.f32 %v1755_v0, %v1910_v21  ;;  %v667_v33 = vrot.slane %v665_v15, 4  ;;  %v1668_v36 = vld [vmem:[%s1840_s9 + $0x7c] sm:$0xf] }
  0x70   : > { %v1451_v51 = vadd.f32 %v1419_v53, %v922_v23  ;;  %v1186_v61 = vrot.slane %v1184_v35, 5  ;;  %v1192_v3 = vrot.slane %v1190_v58, 5  ;;  %v671_v60 = vshll.u32 %v1618_v12, 16 }
  0x71   : > { %v664_v5 = vsel %vm1884_vm2, %v659_v38, %v663_v20  ;;  %v360_v49 = vadd.f32 %v1767_v1, %v321_v18  ;;  %v668_v56 = vor.u32 %v667_v33, %v663_v20  ;;  %v1196_v9 = vrot.slane %v1194_v48, 4 }
  0x72   : > { %1483 = vst [vmem:[%s1907_s12 + $0x78] sm:$0xff] %v1451_v51  ;;  %v891_v57 = vunpack.c.l.bf16 %v664_v5  ;;  %v1187_v10 = vor.u32 %v1186_v61, %v1183_v59  ;;  %v673_v31 = vrot.slane %v671_v60, 5  ;;  %v1200_v0 = vshll.u32 %v1666_v14, 16  ;;  %v1621_v59 = vld [vmem:[%s1828_s6 + $0x80] sm:$0x1] }
  0x73   : > { %v392_v21 = vmax.f32 %v360_v49, 0.0  ;;  %v669_v8 = vrot.slane %v668_v56, 4  ;;  %v1197_v7 = vor.u32 %v1196_v9, %v1192_v3  ;;  %v322_v1 = vmul.f32 %v2103_v55, %v1913_v22  ;;  %v1669_v61 = vld [vmem:[%s1840_s9 + $0x80] sm:$0x1] }
  0x74   : > { %v923_v25 = vadd.f32 %v891_v57, %v391_v6  ;;  %v1188_v62 = vrot.slane %v1187_v10, 4  ;;  %v1202_v37 = vrot.slane %v1200_v0, 5  ;;  %v676_v45 = vshrl.u32 %v1619_v40, 16 }
  0x75   : > { %v674_v13 = vsel %vm1884_vm2, %v669_v8, %v673_v31  ;;  %v1198_v47 = vrot.slane %v1197_v7, 4  ;;  %v361_v63 = vadd.f32 %v2113_v19, %v322_v1  ;;  %v679_v24 = vshll.u32 %v1619_v40, 16 }
  0x76   : > { %v1193_v22 = vsel %vm1884_vm2, %v1188_v62, %v1192_v3  ;;  %v892_v6 = vunpack.c.l.bf16 %v674_v13  ;;  %v678_v43 = vrot.slane %v676_v45, 4  ;;  %v685_v54 = vshll.u32 %v1620_v11, 16 }
  0x77   : > { %v1420_v44 = vunpack.c.l.bf16 %v1193_v22  ;;  %v1203_v46 = vsel %vm1884_vm2, %v1198_v47, %v1202_v37  ;;  %v393_v15 = vmax.f32 %v361_v63, 0.0  ;;  %v681_v53 = vrot.slane %v679_v24, 5 }
  0x78   : > { %v924_v20 = vadd.f32 %v892_v6, %v392_v21  ;;  %v1421_v50 = vunpack.c.l.bf16 %v1203_v46  ;;  %v687_v12 = vrot.slane %v685_v54, 5  ;;  %v689_v23 = vshrl.u32 %v1620_v11, 16  ;;  %v1622_v21 = vld [vmem:[%s1828_s6 + $0x84] sm:$0xf] }
  0x79   : > { %v1452_v35 = vadd.f32 %v1420_v44, %v923_v25  ;;  %v682_v58 = vor.u32 %v681_v53, %v678_v43  ;;  %v1205_v48 = vshrl.u32 %v1667_v32, 16  ;;  %v1208_v38 = vshll.u32 %v1667_v32, 16  ;;  %v1623_v25 = vld [vmem:[%s1828_s6 + $0x88] sm:$0xf]  ;;  %v1670_v44 = vld [vmem:[%s1840_s9 + $0x84] sm:$0xf] }
  0x7a   : > { %v1453_v18 = vadd.f32 %v1421_v50, %v924_v20  ;;  %v1214_v33 = vshll.u32 %v1668_v36, 16  ;;  %v1218_v14 = vshrl.u32 %v1668_v36, 16  ;;  %v323_v51 = vmul.f32 %v2103_v55, %v1916_v16  ;;  %v1671_v36 = vld [vmem:[%s1840_s9 + $0x88] sm:$0xf] }
  0x7b   : > { %1484 = vst [vmem:[%s1907_s12 + $0x80] sm:$0xff] %v1452_v35  ;;  %v683_v3 = vrot.slane %v682_v58, 4  ;;  %v1207_v60 = vrot.slane %v1205_v48, 4  ;;  %v1210_v5 = vrot.slane %v1208_v38, 5  ;;  %v691_v49 = vrot.slane %v689_v23, 4 }
  0x7c   : > { %1485 = vst [vmem:[%s1907_s12 + $0x88] sm:$0xff] %v1453_v18  ;;  %v1216_v56 = vrot.slane %v1214_v33, 5  ;;  %v362_v9 = vadd.f32 %v2113_v19, %v323_v51  ;;  %v695_v40 = vshll.u32 %v1621_v59, 16  ;;  %v1220_v57 = vrot.slane %v1218_v14, 4  ;;  %v1624_v59 = vld [vmem:[%s1828_s6 + $0x8c] sm:$0x1] }
  0x7d   : > { %v688_v10 = vsel %vm1884_vm2, %v683_v3, %v687_v12  ;;  %v1211_v31 = vor.u32 %v1210_v5, %v1207_v60  ;;  %v692_v0 = vor.u32 %v691_v49, %v687_v12  ;;  %v1224_v16 = vshll.u32 %v1669_v61, 16  ;;  %v1672_v61 = vld [vmem:[%s1840_s9 + $0x8c] sm:$0x1] }
  0x7e   : > { %v893_v8 = vunpack.c.l.bf16 %v688_v10  ;;  %v394_v7 = vmax.f32 %v362_v9, 0.0  ;;  %v697_v1 = vrot.slane %v695_v40, 5  ;;  %v1221_v11 = vor.u32 %v1220_v57, %v1216_v56 }
  0x7f   : > { %v1212_v62 = vrot.slane %v1211_v31, 4  ;;  %v693_v37 = vrot.slane %v692_v0, 4  ;;  %v1226_v45 = vrot.slane %v1224_v16, 5  ;;  %v324_v13 = vmul.f32 %v2103_v55, %v1919_v30 }
  0x80   : > { %v925_v47 = vadd.f32 %v893_v8, %v393_v15  ;;  %v1222_v63 = vrot.slane %v1221_v11, 4  ;;  %v700_v24 = vshrl.u32 %v1622_v21, 16  ;;  %v703_v22 = vshll.u32 %v1622_v21, 16  ;;  %v1625_v21 = vld [vmem:[%s1828_s6 + $0x90] sm:$0xf] }
  0x81   : > { %v1217_v6 = vsel %vm1884_vm2, %v1212_v62, %v1216_v56  ;;  %v698_v43 = vsel %vm1884_vm2, %v693_v37, %v697_v1  ;;  %v363_v54 = vadd.f32 %v2113_v19, %v324_v13  ;;  %v709_v32 = vshll.u32 %v1623_v25, 16 }
  0x82   : > { %v1422_v46 = vunpack.c.l.bf16 %v1217_v6  ;;  %v894_v53 = vunpack.c.l.bf16 %v698_v43  ;;  %v1227_v30 = vsel %vm1884_vm2, %v1222_v63, %v1226_v45  ;;  %v702_v15 = vrot.slane %v700_v24, 4  ;;  %v1626_v63 = vld [vmem:[%s1828_s6 + $0x94] sm:$0xf] }
  0x83   : > { %v1423_v20 = vunpack.c.l.bf16 %v1227_v30  ;;  %v395_v50 = vmax.f32 %v363_v54, 0.0  ;;  %v705_v12 = vrot.slane %v703_v22, 5  ;;  %v711_v23 = vrot.slane %v709_v32, 5  ;;  %v1673_v32 = vld [vmem:[%s1840_s9 + $0x90] sm:$0xf] }
  0x84   : > { %v1454_v35 = vadd.f32 %v1422_v46, %v925_v47  ;;  %v926_v58 = vadd.f32 %v894_v53, %v394_v7  ;;  %v713_v48 = vshrl.u32 %v1623_v25, 16  ;;  %v1229_v38 = vshrl.u32 %v1670_v44, 16 }
  0x85   : > { %v706_v18 = vor.u32 %v705_v12, %v702_v15  ;;  %v1232_v33 = vshll.u32 %v1670_v44, 16  ;;  %v1238_v14 = vshll.u32 %v1671_v36, 16  ;;  %v1242_v51 = vshrl.u32 %v1671_v36, 16 }
  0x86   : > { %1486 = vst [vmem:[%s1907_s12 + $0x90] sm:$0xff] %v1454_v35  ;;  %v1455_v3 = vadd.f32 %v1423_v20, %v926_v58  ;;  %v1231_v60 = vrot.slane %v1229_v38, 4  ;;  %v325_v5 = vmul.f32 %v2103_v55, %v1922_v26  ;;  %v715_v49 = vrot.slane %v713_v48, 4 }
  0x87   : > { %v707_v56 = vrot.slane %v706_v18, 4  ;;  %v1234_v9 = vrot.slane %v1232_v33, 5  ;;  %v1240_v40 = vrot.slane %v1238_v14, 5  ;;  %v719_v57 = vshll.u32 %v1624_v59, 16  ;;  %v1627_v33 = vld [vmem:[%s1828_s6 + $0x98] sm:$0x1] }
  0x88   : > { %1487 = vst [vmem:[%s1907_s12 + $0x98] sm:$0xff] %v1455_v3  ;;  %v364_v10 = vadd.f32 %v2113_v19, %v325_v5  ;;  %v716_v31 = vor.u32 %v715_v49, %v711_v23  ;;  %v1244_v0 = vrot.slane %v1242_v51, 4  ;;  %v1248_v16 = vshll.u32 %v1672_v61, 16  ;;  %v1675_v14 = vld [vmem:[%s1840_s9 + $0x98] sm:$0x1] }
  0x89   : > { %v712_v8 = vsel %vm1884_vm2, %v707_v56, %v711_v23  ;;  %v1235_v7 = vor.u32 %v1234_v9, %v1231_v60  ;;  %v721_v1 = vrot.slane %v719_v57, 5  ;;  %v326_v26 = vmul.f32 %v2103_v55, %v1925_v27 }
  0x8a   : > { %v895_v11 = vunpack.c.l.bf16 %v712_v8  ;;  %v396_v25 = vmax.f32 %v364_v10, 0.0  ;;  %v717_v62 = vrot.slane %v716_v31, 4  ;;  %v1245_v37 = vor.u32 %v1244_v0, %v1240_v40 }
  0x8b   : > { %v1236_v45 = vrot.slane %v1235_v7, 4  ;;  %v1250_v13 = vrot.slane %v1248_v16, 5  ;;  %v365_v47 = vadd.f32 %v2113_v19, %v326_v26  ;;  %v724_v24 = vshrl.u32 %v1625_v21, 16  ;;  %v1628_v7 = vld [vmem:[%s1828_s6 + $0x9c] sm:$0xf] }
  0x8c   : > { %v927_v22 = vadd.f32 %v895_v11, %v395_v50  ;;  %v722_v6 = vsel %vm1884_vm2, %v717_v62, %v721_v1  ;;  %v1246_v43 = vrot.slane %v1245_v37, 4  ;;  %v727_v54 = vshll.u32 %v1625_v21, 16  ;;  %v1674_v50 = vld [vmem:[%s1840_s9 + $0x94] sm:$0xf] }
  0x8d   : > { %v1241_v27 = vsel %vm1884_vm2, %v1236_v45, %v1240_v40  ;;  %v896_v44 = vunpack.c.l.bf16 %v722_v6  ;;  %v397_v46 = vmax.f32 %v365_v47, 0.0  ;;  %v726_v53 = vrot.slane %v724_v24, 4 }
  0x8e   : > { %v1424_v30 = vunpack.c.l.bf16 %v1241_v27  ;;  %v1251_v15 = vsel %vm1884_vm2, %v1246_v43, %v1250_v13  ;;  %v729_v36 = vrot.slane %v727_v54, 5  ;;  %v733_v20 = vshll.u32 %v1626_v63, 16  ;;  %v1676_v27 = vld [vmem:[%s1840_s9 + $0x9c] sm:$0xf] }
  0x8f   : > { %v928_v12 = vadd.f32 %v896_v44, %v396_v25  ;;  %v1425_v23 = vunpack.c.l.bf16 %v1251_v15  ;;  %v737_v35 = vshrl.u32 %v1626_v63, 16  ;;  %v1253_v58 = vshrl.u32 %v1673_v32, 16  ;;  %v1629_v25 = vld [vmem:[%s1828_s6 + $0xa0] sm:$0xf] }
  0x90   : > { %v1456_v48 = vadd.f32 %v1424_v30, %v927_v22  ;;  %v730_v38 = vor.u32 %v729_v36, %v726_v53  ;;  %v735_v59 = vrot.slane %v733_v20, 5  ;;  %v1256_v18 = vshll.u32 %v1673_v32, 16  ;;  %v1677_v30 = vld [vmem:[%s1840_s9 + $0xa0] sm:$0xf] }
  0x91   : > { %v1457_v51 = vadd.f32 %v1425_v23, %v928_v12  ;;  %v1255_v61 = vrot.slane %v1253_v58, 4  ;;  %v1262_v3 = vshll.u32 %v1674_v50, 16  ;;  %v1266_v60 = vshrl.u32 %v1674_v50, 16 }
  0x92   : > { %1488 = vst [vmem:[%s1907_s12 + $0xa0] sm:$0xff] %v1456_v48  ;;  %v731_v5 = vrot.slane %v730_v38, 4  ;;  %v1258_v49 = vrot.slane %v1256_v18, 5  ;;  %v327_v56 = vmul.f32 %v2103_v55, %v1928_v29  ;;  %v739_v9 = vrot.slane %v737_v35, 4  ;;  %v1630_v48 = vld [vmem:[%s1828_s6 + $0xa4] sm:$0x1] }
  0x93   : > { %1489 = vst [vmem:[%s1907_s12 + $0xa8] sm:$0xff] %v1457_v51  ;;  %v1264_v40 = vrot.slane %v1262_v3, 5  ;;  %v743_v57 = vshll.u32 %v1627_v33, 16  ;;  %v1268_v10 = vrot.slane %v1266_v60, 4  ;;  %v1272_v31 = vshll.u32 %v1675_v14, 16 }
  0x94   : > { %v736_v0 = vsel %vm1884_vm2, %v731_v5, %v735_v59  ;;  %v1259_v16 = vor.u32 %v1258_v49, %v1255_v61  ;;  %v366_v21 = vadd.f32 %v2113_v19, %v327_v56  ;;  %v740_v8 = vor.u32 %v739_v9, %v735_v59  ;;  %v1678_v14 = vld [vmem:[%s1840_s9 + $0xa4] sm:$0x1] }
  0x95   : > { %v897_v1 = vunpack.c.l.bf16 %v736_v0  ;;  %v745_v26 = vrot.slane %v743_v57, 5  ;;  %v1269_v11 = vor.u32 %v1268_v10, %v1264_v40  ;;  %v1274_v29 = vrot.slane %v1272_v31, 5  ;;  %v1631_v0 = vld [vmem:[%s1828_s6 + $0xa8] sm:$0xf] }
  0x96   : > { %v1260_v62 = vrot.slane %v1259_v16, 4  ;;  %v398_v37 = vmax.f32 %v366_v21, 0.0  ;;  %v741_v45 = vrot.slane %v740_v8, 4  ;;  %v328_v13 = vmul.f32 %v2103_v55, %v1931_v34 }
  0x97   : > { %v929_v47 = vadd.f32 %v897_v1, %v397_v46  ;;  %v1270_v63 = vrot.slane %v1269_v11, 4  ;;  %v748_v24 = vshrl.u32 %v1628_v7, 16  ;;  %v751_v22 = vshll.u32 %v1628_v7, 16 }
  0x98   : > { %v1265_v6 = vsel %vm1884_vm2, %v1260_v62, %v1264_v40  ;;  %v746_v43 = vsel %vm1884_vm2, %v741_v45, %v745_v26  ;;  %v367_v54 = vadd.f32 %v2113_v19, %v328_v13  ;;  %v757_v32 = vshll.u32 %v1629_v25, 16 }
  0x99   : > { %v1426_v44 = vunpack.c.l.bf16 %v1265_v6  ;;  %v898_v53 = vunpack.c.l.bf16 %v746_v43  ;;  %v1275_v34 = vsel %vm1884_vm2, %v1270_v63, %v1274_v29  ;;  %v750_v46 = vrot.slane %v748_v24, 4 }
  0x9a   : > { %v1427_v15 = vunpack.c.l.bf16 %v1275_v34  ;;  %v399_v36 = vmax.f32 %v367_v54, 0.0  ;;  %v753_v20 = vrot.slane %v751_v22, 5  ;;  %v759_v50 = vrot.slane %v757_v32, 5  ;;  %v1679_v22 = vld [vmem:[%s1840_s9 + $0xa8] sm:$0xf] }
  0x9b   : > { %v1458_v12 = vadd.f32 %v1426_v44, %v929_v47  ;;  %v930_v23 = vadd.f32 %v898_v53, %v398_v37  ;;  %v761_v35 = vshrl.u32 %v1629_v25, 16  ;;  %v1277_v58 = vshrl.u32 %v1676_v27, 16  ;;  %v1632_v37 = vld [vmem:[%s1828_s6 + $0xac] sm:$0xf] }
  0x9c   : > { %v754_v38 = vor.u32 %v753_v20, %v750_v46  ;;  %v1280_v59 = vshll.u32 %v1676_v27, 16  ;;  %v1286_v18 = vshll.u32 %v1677_v30, 16  ;;  %v1290_v33 = vshrl.u32 %v1677_v30, 16  ;;  %v1680_v34 = vld [vmem:[%s1840_s9 + $0xac] sm:$0xf] }
  0x9d   : > { %1490 = vst [vmem:[%s1907_s12 + $0xb0] sm:$0xff] %v1458_v12  ;;  %v1459_v51 = vadd.f32 %v1427_v15, %v930_v23  ;;  %v1279_v61 = vrot.slane %v1277_v58, 4  ;;  %v329_v3 = vmul.f32 %v2103_v55, %v1934_v39  ;;  %v763_v60 = vrot.slane %v761_v35, 4  ;;  %v1633_v35 = vld [vmem:[%s1828_s6 + $0xb0] sm:$0x1] }
  0x9e   : > { %v755_v5 = vrot.slane %v754_v38, 4  ;;  %v1282_v49 = vrot.slane %v1280_v59, 5  ;;  %v1288_v56 = vrot.slane %v1286_v18, 5  ;;  %v767_v9 = vshll.u32 %v1630_v48, 16  ;;  %v1681_v58 = vld [vmem:[%s1840_s9 + $0xb0] sm:$0x1] }
  0x9f   : > { %1491 = vst [vmem:[%s1907_s12 + $0xb8] sm:$0xff] %v1459_v51  ;;  %v368_v40 = vadd.f32 %v2113_v19, %v329_v3  ;;  %v764_v57 = vor.u32 %v763_v60, %v759_v50  ;;  %v1292_v10 = vrot.slane %v1290_v33, 4  ;;  %v1296_v31 = vshll.u32 %v1678_v14, 16 }
  0xa0   : > { %v760_v16 = vsel %vm1884_vm2, %v755_v5, %v759_v50  ;;  %v1283_v21 = vor.u32 %v1282_v49, %v1279_v61  ;;  %v769_v8 = vrot.slane %v767_v9, 5  ;;  %v330_v39 = vmul.f32 %v2103_v55, %v1937_v41 }
  0xa1   : > { %v899_v7 = vunpack.c.l.bf16 %v760_v16  ;;  %v400_v1 = vmax.f32 %v368_v40, 0.0  ;;  %v765_v26 = vrot.slane %v764_v57, 4  ;;  %v1293_v11 = vor.u32 %v1292_v10, %v1288_v56  ;;  %v1634_v10 = vld [vmem:[%s1828_s6 + $0xb4] sm:$0xf] }
  0xa2   : > { %v1284_v29 = vrot.slane %v1283_v21, 4  ;;  %v1298_v25 = vrot.slane %v1296_v31, 5  ;;  %v369_v62 = vadd.f32 %v2113_v19, %v330_v39  ;;  %v772_v45 = vshrl.u32 %v1631_v0, 16  ;;  %v1635_v21 = vld [vmem:[%s1828_s6 + $0xb8] sm:$0xf] }
  0xa3   : > { %v931_v13 = vadd.f32 %v899_v7, %v399_v36  ;;  %v770_v47 = vsel %vm1884_vm2, %v765_v26, %v769_v8  ;;  %v1294_v63 = vrot.slane %v1293_v11, 4  ;;  %v775_v24 = vshll.u32 %v1631_v0, 16 }
  0xa4   : > { %v1289_v41 = vsel %vm1884_vm2, %v1284_v29, %v1288_v56  ;;  %v900_v6 = vunpack.c.l.bf16 %v770_v47  ;;  %v401_v43 = vmax.f32 %v369_v62, 0.0  ;;  %v774_v54 = vrot.slane %v772_v45, 4  ;;  %v1682_v47 = vld [vmem:[%s1840_s9 + $0xb4] sm:$0xf] }
  0xa5   : > { %v1428_v32 = vunpack.c.l.bf16 %v1289_v41  ;;  %v1299_v27 = vsel %vm1884_vm2, %v1294_v63, %v1298_v25  ;;  %v777_v44 = vrot.slane %v775_v24, 5  ;;  %v781_v53 = vshll.u32 %v1632_v37, 16  ;;  %v1683_v41 = vld [vmem:[%s1840_s9 + $0xb8] sm:$0xf] }
  0xa6   : > { %v932_v46 = vadd.f32 %v900_v6, %v400_v1  ;;  %v1429_v30 = vunpack.c.l.bf16 %v1299_v27  ;;  %v785_v15 = vshrl.u32 %v1632_v37, 16  ;;  %v1301_v36 = vshrl.u32 %v1679_v22, 16 }
  0xa7   : > { %v1460_v20 = vadd.f32 %v1428_v32, %v931_v13  ;;  %v778_v50 = vor.u32 %v777_v44, %v774_v54  ;;  %v783_v12 = vrot.slane %v781_v53, 5  ;;  %v1304_v23 = vshll.u32 %v1679_v22, 16 }
  0xa8   : > { %v1461_v48 = vadd.f32 %v1429_v30, %v932_v46  ;;  %v1303_v38 = vrot.slane %v1301_v36, 4  ;;  %v1310_v59 = vshll.u32 %v1680_v34, 16  ;;  %v1314_v18 = vshrl.u32 %v1680_v34, 16  ;;  %v1636_v46 = vld [vmem:[%s1828_s6 + $0xbc] sm:$0x1] }
  0xa9   : > { %1492 = vst [vmem:[%s1907_s12 + $0xc0] sm:$0xff] %v1460_v20  ;;  %v779_v33 = vrot.slane %v778_v50, 4  ;;  %v1306_v14 = vrot.slane %v1304_v23, 5  ;;  %v331_v51 = vmul.f32 %v2103_v55, %v1940_v42  ;;  %v787_v61 = vrot.slane %v785_v15, 4  ;;  %v1684_v50 = vld [vmem:[%s1840_s9 + $0xbc] sm:$0x1] }
  0xaa   : > { %1493 = vst [vmem:[%s1907_s12 + $0xc8] sm:$0xff] %v1461_v48  ;;  %v1312_v3 = vrot.slane %v1310_v59, 5  ;;  %v791_v60 = vshll.u32 %v1633_v35, 16  ;;  %v1316_v5 = vrot.slane %v1314_v18, 4  ;;  %v1320_v49 = vshll.u32 %v1681_v58, 16 }
  0xab   : > { %v784_v56 = vsel %vm1884_vm2, %v779_v33, %v783_v12  ;;  %v1307_v9 = vor.u32 %v1306_v14, %v1303_v38  ;;  %v370_v40 = vadd.f32 %v2113_v19, %v331_v51  ;;  %v788_v57 = vor.u32 %v787_v61, %v783_v12 }
  0xac   : > { %v901_v31 = vunpack.c.l.bf16 %v784_v56  ;;  %v793_v0 = vrot.slane %v791_v60, 5  ;;  %v1317_v16 = vor.u32 %v1316_v5, %v1312_v3  ;;  %v1322_v42 = vrot.slane %v1320_v49, 5 }
  0xad   : > { %v1308_v8 = vrot.slane %v1307_v9, 4  ;;  %v402_v39 = vmax.f32 %v370_v40, 0.0  ;;  %v789_v7 = vrot.slane %v788_v57, 4  ;;  %v332_v1 = vmul.f32 %v2103_v55, %v1946_v52 }
  0xae   : > { %v933_v26 = vadd.f32 %v901_v31, %v401_v43  ;;  %v1318_v11 = vrot.slane %v1317_v16, 4  ;;  %v796_v29 = vshrl.u32 %v1634_v10, 16  ;;  %v799_v25 = vshll.u32 %v1634_v10, 16  ;;  %v1638_v16 = vld [vmem:[%s1828_s6 + $0xc4] sm:$0xf] }
  0xaf   : > { %v1313_v62 = vsel %vm1884_vm2, %v1308_v8, %v1312_v3  ;;  %v794_v37 = vsel %vm1884_vm2, %v789_v7, %v793_v0  ;;  %v371_v45 = vadd.f32 %v2113_v19, %v332_v1  ;;  %v805_v13 = vshll.u32 %v1635_v21, 16  ;;  %v1637_v3 = vld [vmem:[%s1828_s6 + $0xc0] sm:$0xf] }
  0xb0   : > { %v1430_v63 = vunpack.c.l.bf16 %v1313_v62  ;;  %v902_v24 = vunpack.c.l.bf16 %v794_v37  ;;  %v1323_v52 = vsel %vm1884_vm2, %v1318_v11, %v1322_v42  ;;  %v798_v22 = vrot.slane %v796_v29, 4  ;;  %v1685_v1 = vld [vmem:[%s1840_s9 + $0xc0] sm:$0xf] }
  0xb1   : > { %v1431_v6 = vunpack.c.l.bf16 %v1323_v52  ;;  %v403_v43 = vmax.f32 %v371_v45, 0.0  ;;  %v801_v54 = vrot.slane %v799_v25, 5  ;;  %v807_v32 = vrot.slane %v805_v13, 5  ;;  %v1686_v13 = vld [vmem:[%s1840_s9 + $0xc4] sm:$0xf] }
  0xb2   : > { %v1462_v27 = vadd.f32 %v1430_v63, %v933_v26  ;;  %v934_v44 = vadd.f32 %v902_v24, %v402_v39  ;;  %v809_v53 = vshrl.u32 %v1635_v21, 16  ;;  %v1325_v34 = vshrl.u32 %v1682_v47, 16 }
  0xb3   : > { %v802_v30 = vor.u32 %v801_v54, %v798_v22  ;;  %v1328_v15 = vshll.u32 %v1682_v47, 16  ;;  %v1334_v36 = vshll.u32 %v1683_v41, 16  ;;  %v1338_v20 = vshrl.u32 %v1683_v41, 16  ;;  %v1639_v54 = vld [vmem:[%s1828_s6 + $0xc8] sm:$0x1] }
  0xb4   : > { %1494 = vst [vmem:[%s1907_s12 + $0xd0] sm:$0xff] %v1462_v27  ;;  %v1463_v12 = vadd.f32 %v1431_v6, %v934_v44  ;;  %v1327_v23 = vrot.slane %v1325_v34, 4  ;;  %v333_v35 = vmul.f32 %v2103_v55, %v1950_v2  ;;  %v811_v58 = vrot.slane %v809_v53, 4 }
  0xb5   : > { %v803_v48 = vrot.slane %v802_v30, 4  ;;  %v1330_v38 = vrot.slane %v1328_v15, 5  ;;  %v1336_v59 = vrot.slane %v1334_v36, 5  ;;  %v815_v18 = vshll.u32 %v1636_v46, 16 }
  0xb6   : > { %1495 = vst [vmem:[%s1907_s12 + $0xd8] sm:$0xff] %v1463_v12  ;;  %v372_v33 = vadd.f32 %v2113_v19, %v333_v35  ;;  %v812_v14 = vor.u32 %v811_v58, %v807_v32  ;;  %v1340_v51 = vrot.slane %v1338_v20, 4  ;;  %v1344_v61 = vshll.u32 %v1684_v50, 16 }
  0xb7   : > { %v808_v60 = vsel %vm1884_vm2, %v803_v48, %v807_v32  ;;  %v1331_v5 = vor.u32 %v1330_v38, %v1327_v23  ;;  %v817_v49 = vrot.slane %v815_v18, 5  ;;  %v334_v2 = vmul.f32 %v2103_v55, %v1953_v4  ;;  %v1687_v32 = vld [vmem:[%s1840_s9 + $0xc8] sm:$0x1] }
  0xb8   : > { %v903_v56 = vunpack.c.l.bf16 %v808_v60  ;;  %v404_v9 = vmax.f32 %v372_v33, 0.0  ;;  %v813_v40 = vrot.slane %v812_v14, 4  ;;  %v1341_v57 = vor.u32 %v1340_v51, %v1336_v59 }
  0xb9   : > { %v1332_v10 = vrot.slane %v1331_v5, 4  ;;  %v1346_v31 = vrot.slane %v1344_v61, 5  ;;  %v373_v0 = vadd.f32 %v2113_v19, %v334_v2  ;;  %v820_v42 = vshrl.u32 %v1637_v3, 16 }
  0xba   : > { %v935_v21 = vadd.f32 %v903_v56, %v403_v43  ;;  %v818_v8 = vsel %vm1884_vm2, %v813_v40, %v817_v49  ;;  %v1342_v39 = vrot.slane %v1341_v57, 4  ;;  %v823_v7 = vshll.u32 %v1637_v3, 16 }
  0xbb   : > { %v1337_v4 = vsel %vm1884_vm2, %v1332_v10, %v1336_v59  ;;  %v904_v26 = vunpack.c.l.bf16 %v818_v8  ;;  %v405_v11 = vmax.f32 %v373_v0, 0.0  ;;  %v822_v29 = vrot.slane %v820_v42, 4 }
  0xbc   : > { %v1432_v25 = vunpack.c.l.bf16 %v1337_v4  ;;  %v1347_v62 = vsel %vm1884_vm2, %v1342_v39, %v1346_v31  ;;  %v825_v37 = vrot.slane %v823_v7, 5  ;;  %v829_v45 = vshll.u32 %v1638_v16, 16 }
  0xbd   : > { %v936_v47 = vadd.f32 %v904_v26, %v404_v9  ;;  %v1433_v63 = vunpack.c.l.bf16 %v1347_v62  ;;  %v833_v24 = vshrl.u32 %v1638_v16, 16  ;;  %v1349_v52 = vshrl.u32 %v1685_v1, 16 }
  0xbe   : > { %v1464_v22 = vadd.f32 %v1432_v25, %v935_v21  ;;  %v826_v41 = vor.u32 %v825_v37, %v822_v29  ;;  %v831_v6 = vrot.slane %v829_v45, 5  ;;  %v1352_v43 = vshll.u32 %v1685_v1, 16 }
  0xbf   : > { %v1465_v27 = vadd.f32 %v1433_v63, %v936_v47  ;;  %v1351_v44 = vrot.slane %v1349_v52, 4  ;;  %v1358_v53 = vshll.u32 %v1686_v13, 16  ;;  %v1362_v34 = vshrl.u32 %v1686_v13, 16 }
  0xc0   : > { %1496 = vst [vmem:[%s1907_s12 + $0xe0] sm:$0xff] %v1464_v22  ;;  %v827_v46 = vrot.slane %v826_v41, 4  ;;  %v1354_v30 = vrot.slane %v1352_v43, 5  ;;  %v335_v15 = vmul.f32 %v2103_v55, %v1956_v17  ;;  %v835_v36 = vrot.slane %v833_v24, 4 }
  0xc1   : > { %1497 = vst [vmem:[%s1907_s12 + $0xe8] sm:$0xff] %v1465_v27  ;;  %v1360_v20 = vrot.slane %v1358_v53, 5  ;;  %v839_v50 = vshll.u32 %v1639_v54, 16  ;;  %v1364_v12 = vrot.slane %v1362_v34, 4  ;;  %v1368_v23 = vshll.u32 %v1687_v32, 16 }
  0xc2   : > { %v832_v35 = vsel %vm1884_vm2, %v827_v46, %v831_v6  ;;  %v1355_v58 = vor.u32 %v1354_v30, %v1351_v44  ;;  %v374_v48 = vadd.f32 %v2113_v19, %v335_v15  ;;  %v836_v38 = vor.u32 %v835_v36, %v831_v6 }
  0xc3   : > { %v905_v59 = vunpack.c.l.bf16 %v832_v35  ;;  %v841_v18 = vrot.slane %v839_v50, 5  ;;  %v1365_v33 = vor.u32 %v1364_v12, %v1360_v20  ;;  %v1370_v14 = vrot.slane %v1368_v23, 5 }
  0xc4   : > { %v1356_v17 = vrot.slane %v1355_v58, 4  ;;  %v837_v55 = vrot.slane %v836_v38, 4  ;;  %v406_v61 = vmax.f32 %v374_v48, 0.0 }
  0xc5   : > { %v937_v51 = vadd.f32 %v905_v59, %v405_v11  ;;  %v1366_v3 = vrot.slane %v1365_v33, 4 }
  0xc6   : > { %v1361_v60 = vsel %vm1884_vm2, %v1356_v17, %v1360_v20  ;;  %v842_v5 = vsel %vm1884_vm2, %v837_v55, %v841_v18 }
  0xc7   : > { %v1434_v49 = vunpack.c.l.bf16 %v1361_v60  ;;  %v906_v19 = vunpack.c.l.bf16 %v842_v5  ;;  %v1371_v2 = vsel %vm1884_vm2, %v1366_v3, %v1370_v14 }
  0xc8   : > { %v1435_v56 = vunpack.c.l.bf16 %v1371_v2 }
  0xc9   : > { %v1466_v9 = vadd.f32 %v1434_v49, %v937_v51  ;;  %v938_v40 = vadd.f32 %v906_v19, %v406_v61 }
  0xcb   : > { %1498 = vst [vmem:[%s1907_s12 + $0xf0] sm:$0xff] %v1466_v9  ;;  %v1467_v57 = vadd.f32 %v1435_v56, %v938_v40 }
  0xcd   : > { %1499 = vst [vmem:[%s1907_s12 + $0xf8] sm:$0xff] %v1467_v57 }
  0xce PF: > { %s15_s18 = sadd.s32 1, %s1709_s18  }
  0xcf   : > { %p12_p4 = scmp.ge.s32.totalorder %s15_s18, 4  }
  0xd1   :  { %14 = sbr.rel (!%p12_p4) target bundleno = 1 (0x1), region = 78 }

</bundles_post_ra>
